<compile_context>
chip_gen: v7x
topology: tpu7x:2x2x1
jax: 0.10.0
libtpu: 0.0.40
codegen_flags: <defaults>
</compile_context>

<pallas_src>
import math

import jax
import jax.numpy as jnp
from jax.experimental import pallas as pl
from jax.experimental.pallas import tpu as pltpu


def _round_up(n, m):
    return ((n + m - 1) // m) * m


def _vmem_limit_bytes():
    """Generation-aware scoped-VMEM budget: half of physical, capped at 64 MiB."""
    try:
        cap = int(getattr(pltpu.get_tpu_info(), "vmem_capacity_bytes", 0) or 0)
    except Exception:
        cap = 0
    if cap <= 0:
        return 32 * 1024 * 1024          # safe default on any generation
    return int(min(cap // 2, 64 * 1024 * 1024))


def value_net_kernel(xp_ref, w1b_ref, b1t_ref, w2b_ref, b2_ref, o_ref):
    # xp_ref : (TBp, pack*S)   lane-packed batch tile (pack rows per vector row)
    # w1b_ref: (pack*S, pack*H) block-diagonal fc1 weight (VMEM-resident)
    # b1t_ref: (1, pack*H)      fc1 bias tiled per packed group
    # w2b_ref: (pack*H, pack)   block-diagonal fc2 weight (VMEM-resident)
    # b2_ref : (1, 1)           fc2 bias scalar in SMEM
    # o_ref  : (TBp, pack)      one value per original batch row
    xp = xp_ref[...]
    h = jnp.dot(xp, w1b_ref[...],
                preferred_element_type=jnp.float32,
                precision=jax.lax.Precision.HIGHEST)      # MXU, K = pack*S (dense)
    h = jnp.maximum(h + b1t_ref[...], 0.0)                # bias + ReLU (VPU)
    y = jnp.dot(h, w2b_ref[...],
                preferred_element_type=jnp.float32,
                precision=jax.lax.Precision.HIGHEST)      # MXU, K = pack*H
    o_ref[...] = (y + b2_ref[0, 0]).astype(o_ref.dtype)


def value_net_forward(x, w1, b1, w2, b2, *, block_b=16384):
    """x: (B, S).  w1: (S, H), b1: (H,), w2: (H, 1), b2: (1,).

    Returns (B, 1) f32, matching relu(x @ w1 + b1) @ w2 + b2.
    """
    B, S = x.shape
    H = w1.shape[1]

    # Lane-packing factor: how many batch rows share one 128-lane vector row.
    pack = max(1, 128 // S)
    # Keep the block-diagonal weights comfortably VMEM-resident (cap ~4 MiB).
    while pack > 1 and pack * pack * (S + 1) * H * 4 > (4 << 20):
        pack //= 2

    # Batch tile: multiple of 8*pack (8 sublanes of packed rows), big enough to
    # amortize the per-grid-step overhead, capped so there are always >= 2
    # tiles (v7x megacore).  Padded rows compute relu(b1)@w2+b2 garbage that is
    # sliced off below (do not fuse reductions over the output without masking).
    unit = 8 * pack
    tb = max(unit, min(_round_up(block_b, unit), _round_up(pl.cdiv(B, 2), unit)))
    num_tiles = max(pl.cdiv(B, tb), 2)
    bp = num_tiles * tb
    if bp != B:
        x = jnp.pad(x, ((0, bp - B), (0, 0)))

    # Zero-copy row-major packing: packed row r holds original rows
    # [r*pack, (r+1)*pack), each occupying S consecutive lanes.
    xp = x.reshape(bp // pack, pack * S)
    tb_p = tb // pack

    # Block-diagonal weights / tiled bias, built once outside the kernel.
    eye = jnp.eye(pack, dtype=w1.dtype)
    w1b = jnp.kron(eye, w1)                        # (pack*S, pack*H)
    w2b = jnp.kron(eye.astype(w2.dtype), w2)       # (pack*H, pack)
    b1t = jnp.tile(b1, pack).reshape(1, pack * H)  # (1, pack*H)
    b2s = b2.reshape(1, 1)                         # SMEM scalar

    vmem = pltpu.MemorySpace.VMEM
    smem = pltpu.MemorySpace.SMEM
    out = pl.pallas_call(
        value_net_kernel,
        out_shape=jax.ShapeDtypeStruct((num_tiles * tb_p, pack), jnp.float32),
        grid_spec=pl.GridSpec(
            grid=(num_tiles,),
            in_specs=[
                # Streamed per batch tile (double-buffered by Pallas).
                pl.BlockSpec((tb_p, pack * S), lambda i: (i, 0), memory_space=vmem),
                # Weights / bias: constant block index -> DMA'd once, resident.
                pl.BlockSpec((pack * S, pack * H), lambda i: (0, 0), memory_space=vmem),
                pl.BlockSpec((1, pack * H), lambda i: (0, 0), memory_space=vmem),
                pl.BlockSpec((pack * H, pack), lambda i: (0, 0), memory_space=vmem),
                # b2: scalar kept in SMEM (avoids a padded VMEM tile + DMA).
                pl.BlockSpec(memory_space=smem),
            ],
            out_specs=pl.BlockSpec((tb_p, pack), lambda i: (i, 0), memory_space=vmem),
        ),
        compiler_params=pltpu.CompilerParams(
            dimension_semantics=("parallel",),      # v7x: batch tiles split across 2 TCs
            vmem_limit_bytes=_vmem_limit_bytes(),   # 32 MiB v7x / 64 MiB v5e,v6e
        ),
    )(xp, w1b, b1t, w2b, b2s)

    # (num_tiles*tb_p, pack) flattens row-major back to the original row order.
    return out.reshape(-1)[:B].reshape(B, 1)


def init_params(key, state_dim, hidden_dim):
    """Deterministic init mirroring torch.nn.Linear default (uniform +/- 1/sqrt(fan_in))."""
    k1, k2, k3, k4 = jax.random.split(key, 4)
    bound1 = 1.0 / math.sqrt(state_dim)
    bound2 = 1.0 / math.sqrt(hidden_dim)
    # Stored as (in_features, out_features) so the kernel computes x @ W + b.
    w1 = jax.random.uniform(k1, (state_dim, hidden_dim), jnp.float32, -bound1, bound1)
    b1 = jax.random.uniform(k2, (hidden_dim,), jnp.float32, -bound1, bound1)
    w2 = jax.random.uniform(k3, (hidden_dim, 1), jnp.float32, -bound2, bound2)
    b2 = jax.random.uniform(k4, (1,), jnp.float32, -bound2, bound2)
    return w1, b1, w2, b2


if __name__ == "__main__":
    batch = 8
    state_dim = 4
    hidden_dim = 32

    key = jax.random.PRNGKey(0)
    kx, kp = jax.random.split(key)
    x = jax.random.normal(kx, (batch, state_dim), jnp.float32)
    w1, b1, w2, b2 = init_params(kp, state_dim, hidden_dim)

    out = jax.block_until_ready(value_net_forward(x, w1, b1, w2, b2))

    # Pure-JAX reference (full f32 precision to match the kernel's HIGHEST dots).
    hi = jax.lax.Precision.HIGHEST
    h_ref = jnp.maximum(jnp.dot(x, w1, precision=hi) + b1, 0.0)
    ref = jnp.dot(h_ref, w2, precision=hi) + b2

    assert out.shape == (batch, 1)
    assert jnp.allclose(out, ref, atol=1e-4, rtol=1e-4)

    print("KERNEL_OK")
</pallas_src>

<mosaic_0001>
module attributes {stable_mosaic.version = 11 : i64} {
  func.func @value_net_kernel(%arg0: i32, %arg1: memref<8x128xf32, #tpu.memory_space<vmem>>, %arg2: memref<128x1024xf32, #tpu.memory_space<vmem>>, %arg3: memref<1x1024xf32, #tpu.memory_space<vmem>>, %arg4: memref<1024x32xf32, #tpu.memory_space<vmem>>, %arg5: memref<1x1xf32, #tpu.memory_space<smem>>, %arg6: memref<8x32xf32, #tpu.memory_space<vmem>>) attributes {dimension_semantics = [#tpu.dimension_semantics<parallel>], iteration_bounds = array<i64: 2>, scalar_prefetch = 0 : i64, scratch_operands = 0 : i64, tpu.core_type = #tpu.core_type<tc>, window_params = [{transform_indices = @transform_0, window_bounds = array<i64: 8, 128>}, {pipeline_mode = #tpu.pipeline_mode<synchronous>, transform_indices = @transform_1, window_bounds = array<i64: 128, 1024>}, {pipeline_mode = #tpu.pipeline_mode<synchronous>, transform_indices = @transform_2, window_bounds = array<i64: 1, 1024>}, {pipeline_mode = #tpu.pipeline_mode<synchronous>, transform_indices = @transform_3, window_bounds = array<i64: 1024, 32>}, {transform_indices = @transform_4, window_bounds = array<i64: 1, 1>}, {transform_indices = @transform_5, window_bounds = array<i64: 8, 32>}]} {
    %c0 = arith.constant 0 : index
    %c0_0 = arith.constant 0 : index
    %0 = vector.load %arg1[%c0, %c0_0] : memref<8x128xf32, #tpu.memory_space<vmem>>, vector<8x128xf32>
    %c0_1 = arith.constant 0 : index
    %c0_2 = arith.constant 0 : index
    %1 = vector.load %arg2[%c0_1, %c0_2] : memref<128x1024xf32, #tpu.memory_space<vmem>>, vector<128x1024xf32>
    %cst = arith.constant dense<0.000000e+00> : vector<8x1024xf32>
    %2 = tpu.matmul %0, %1, %cst {dimension_numbers = #tpu.dot_dimension_numbers<[1], [0], [0], [1], [0, 0, 1, 1], [], []>, precision = #tpu.contract_precision<fp32>} : vector<8x128xf32>, vector<128x1024xf32>, vector<8x1024xf32> -> vector<8x1024xf32>
    %c0_3 = arith.constant 0 : index
    %c0_4 = arith.constant 0 : index
    %3 = vector.load %arg3[%c0_3, %c0_4] : memref<1x1024xf32, #tpu.memory_space<vmem>>, vector<1x1024xf32>
    %4 = vector.broadcast %3 : vector<1x1024xf32> to vector<8x1024xf32>
    %5 = arith.addf %2, %4 : vector<8x1024xf32>
    %cst_5 = arith.constant 0.000000e+00 : f32
    %6 = vector.broadcast %cst_5 : f32 to vector<8x1024xf32>
    %7 = arith.maximumf %5, %6 : vector<8x1024xf32>
    %c0_6 = arith.constant 0 : index
    %c0_7 = arith.constant 0 : index
    %8 = vector.load %arg4[%c0_6, %c0_7] : memref<1024x32xf32, #tpu.memory_space<vmem>>, vector<1024x32xf32>
    %cst_8 = arith.constant dense<0.000000e+00> : vector<8x32xf32>
    %9 = tpu.matmul %7, %8, %cst_8 {dimension_numbers = #tpu.dot_dimension_numbers<[1], [0], [0], [1], [0, 0, 1, 1], [], []>, precision = #tpu.contract_precision<fp32>} : vector<8x1024xf32>, vector<1024x32xf32>, vector<8x32xf32> -> vector<8x32xf32>
    %c0_9 = arith.constant 0 : index
    %c0_10 = arith.constant 0 : index
    %10 = memref.load %arg5[%c0_9, %c0_10] : memref<1x1xf32, #tpu.memory_space<smem>>
    %11 = vector.broadcast %10 : f32 to vector<8x32xf32>
    %12 = arith.addf %9, %11 : vector<8x32xf32>
    %c0_11 = arith.constant 0 : index
    %c0_12 = arith.constant 0 : index
    %13 = vector.load %arg6[%c0_11, %c0_12] : memref<8x32xf32, #tpu.memory_space<vmem>>, vector<8x32xf32>
    tpu.vector_store %arg6[%c0_11, %c0_12], %12 {strides = array<i32>} : memref<8x32xf32, #tpu.memory_space<vmem>>, vector<8x32xf32>,
    return
  }
  func.func @transform_0(%arg0: i32) -> (i32, i32) {
    %c0_i32 = arith.constant 0 : i32
    %c0_i32_0 = arith.constant 0 : i32
    return %arg0, %c0_i32 : i32, i32
  }
  func.func @transform_1(%arg0: i32) -> (i32, i32) {
    %c0_i32 = arith.constant 0 : i32
    %c0_i32_0 = arith.constant 0 : i32
    %c0_i32_1 = arith.constant 0 : i32
    return %c0_i32, %c0_i32_0 : i32, i32
  }
  func.func @transform_2(%arg0: i32) -> (i32, i32) {
    %c0_i32 = arith.constant 0 : i32
    %c0_i32_0 = arith.constant 0 : i32
    %c0_i32_1 = arith.constant 0 : i32
    return %c0_i32, %c0_i32_0 : i32, i32
  }
  func.func @transform_3(%arg0: i32) -> (i32, i32) {
    %c0_i32 = arith.constant 0 : i32
    %c0_i32_0 = arith.constant 0 : i32
    %c0_i32_1 = arith.constant 0 : i32
    return %c0_i32, %c0_i32_0 : i32, i32
  }
  func.func @transform_4(%arg0: i32) -> (i32, i32) {
    %c0_i32 = arith.constant 0 : i32
    %c0_i32_0 = arith.constant 0 : i32
    %c0_i32_1 = arith.constant 0 : i32
    return %c0_i32, %c0_i32_0 : i32, i32
  }
  func.func @transform_5(%arg0: i32) -> (i32, i32) {
    %c0_i32 = arith.constant 0 : i32
    %c0_i32_0 = arith.constant 0 : i32
    return %arg0, %c0_i32 : i32, i32
  }
}

</mosaic_0001>

<bundles_post_ra>
// kernel: tpu_custom_call.1
= control target key start
LH: loop header
LB: loop body
LE: loop exit
PB: predicated region body
PF: predicated region fallthrough
CT: control target
= control target key end

     0   :  { %s15437_s0 = inlined_call_operand.vmem [shape: f32[16,128], index: 0, kind: input, shape index: {}]   ;;  %s15438_s1 = inlined_call_operand.vmem [shape: f32[128,1024], index: 1, kind: input, shape index: {}]   ;;  %s15439_s2 = inlined_call_operand.vmem [shape: f32[1,1024], index: 2, kind: input, shape index: {}]   ;;  %s15440_s3 = inlined_call_operand.vmem [shape: f32[1024,32], index: 3, kind: input, shape index: {}]   ;;  %s15441_s4 = inlined_call_operand.<no memory space> [shape: f32[1,1], index: 4, kind: input, shape index: {}]   ;;  %s15442_s5 = inlined_call_operand.hbm [shape: f32[16,32], index: 5, kind: output, shape index: {}]  }
   0x1   :  { %10 = sst [smem:[#allocation2]] %s15441_s4 }
   0x2   :  { %11 = vsyncpa [#allocation4], 0 }
   0x3   :  { %13 = vsyncpa [#allocation4 + $0x1], 0  ;;  %s10047_s20 = smov 0   ;;  %s10049_s21 = smov 0  }
   0x4   :  { %s10051_s22 = smov 0   ;;  %s10053_s23 = smov 0  }
   0x5 LB: > { %s10068_s4 = sadd.s32 4294967295, %s10010_s23   ;;  %s7473_s24 = sadd.s32 4294967294, %s10010_s23   ;;  %s10010_s23 = sphi %s10053_s23, %s17447_s23   ;;  %s10006_s22 = sphi %s10051_s22, %s17446_s22   ;;  %s10002_s21 = sphi %s10049_s21, %s17445_s21   ;;  %s9998_s20 = sphi %s10047_s20, %s17444_s20  }
   0x6   : > { %s10072_s25 = sadd.s32 1, %s10010_s23   ;;  %s136_s26 = sadd.s32 1, %s10006_s22 }
   0x7   : > { %s133_s27 = ssub.s32 %s10010_s23, %s10072_s25  ;;  %p146_p0 = scmp.ne.s32.totalorder %s10006_s22, %s10002_s21 }
   0x8   : > { %p134_p1 = scmp.eq.s32.totalorder %s133_s27, 0  ;;  %p147_p2 = scmp.eq.s32.totalorder %s10068_s4, 1 }
   0x9   : > { %p152_p3 = scmp.ne.s32.totalorder %s10002_s21, %s9998_s20  ;;  %p153_p4 = scmp.eq.s32.totalorder %s7473_s24, 1 }
   0xa   : > { %s10083_s28 = scalar_select %p134_p1, %s10006_s22, %s136_s26  }
   0xb   : > { %p10085_p5 = por %p147_p2, %p146_p0  ;;  %p10089_p6 = por %p153_p4, %p152_p3 }
   0xc   : > { %p7476_p7 = scmp.ge.s32.totalorder %s10010_s23, 1  ;;  %p190_p8 = scmp.lt.s32.totalorder %s10010_s23, 3 }
   0xe   : > { %p191_p9 = pnand %p7476_p7, %p190_p8 }
  0x10   : > { %194 = sbr.rel (%p191_p9) target bundleno = 1100 (0x44c), region = 40 }
  0x17   : > { %v223_v0 = vld [vmem:[%s15438_s1 + $0x8] sm:$0xff]  ;;  %v225_v2 = vld [vmem:[%s15438_s1 + $0x18] sm:$0xff]  ;;  %v222_v7 = vld [vmem:[%s15438_s1] sm:$0xff]  ;;  %v15443_v9 = vmov 0.0   ;;  %p217_p10 = scmp.lt.s32.totalorder %s10068_s4, 1  ;;  %s214_s18 = sand.u32 1, %s10002_s21  }
  0x18   : > { %v231_v1 = vld [vmem:[%s15438_s1 + $0x48] sm:$0xff]  ;;  %v392_v3 = vand.u32 4294901760, %v223_v0  ;;  %v233_v5 = vld [vmem:[%s15438_s1 + $0x58] sm:$0xff]  ;;  %v1247_v6 = vand.u32 4294901760, %v225_v2  ;;  %v230_v8 = vld [vmem:[%s15438_s1 + $0x40] sm:$0xff]  ;;  %488 = vmatprep.mubr.f32.mxu0 %v15443_v9  ;;  %1343 = vmatprep.mubr.f32.mxu1 %v15443_v9  ;;  %v394_v11 = vand.u32 4294901760, %v222_v7 }
  0x19   : > { %v396_v4 = vand.u32 4294901760, %v231_v1  ;;  %v1251_v10 = vand.u32 4294901760, %v233_v5  ;;  %v398_v12 = vand.u32 4294901760, %v230_v8  ;;  %v224_v13 = vld [vmem:[%s15438_s1 + $0x10] sm:$0xff]  ;;  %v239_v15 = vld [vmem:[%s15438_s1 + $0x88] sm:$0xff]  ;;  %v241_v21 = vld [vmem:[%s15438_s1 + $0x98] sm:$0xff] }
  0x1a   : > { %v232_v14 = vld [vmem:[%s15438_s1 + $0x50] sm:$0xff]  ;;  %v10126_v17 = vsub.f32 %v223_v0, %v392_v3  ;;  %v10130_v19 = vsub.f32 %v225_v2, %v1247_v6  ;;  %v247_v20 = vld [vmem:[%s15438_s1 + $0xc8] sm:$0xff]  ;;  %v249_v22 = vld [vmem:[%s15438_s1 + $0xd8] sm:$0xff]  ;;  %v10147_v26 = vsub.f32 %v222_v7, %v394_v11  ;;  %v1249_v29 = vand.u32 4294901760, %v224_v13  ;;  %s10423_s14 = scalar_select %p217_p10, %s10068_s4, 1 }
  0x1b   : > { %v10124_v16 = vpack.c.bf16 %v396_v4, %v392_v3  ;;  %v10128_v18 = vsub.f32 %v231_v1, %v396_v4  ;;  %v10141_v23 = vpack.c.bf16 %v1251_v10, %v1247_v6  ;;  %v10143_v24 = vsub.f32 %v233_v5, %v1251_v10  ;;  %v238_v27 = vld [vmem:[%s15438_s1 + $0x80] sm:$0xff]  ;;  %v240_v37 = vld [vmem:[%s15438_s1 + $0x90] sm:$0xff]  ;;  %v255_v43 = vld [vmem:[%s15438_s1 + $0x108] sm:$0xff]  ;;  %s7480_s24 = sshll.u32 %s10068_s4, 7  ;;  %s7401_s9 = scalar_lea.sflag [#allocation4], %s214_s18 }
  0x1c   : > { %16053 = vst [vmem:[#allocation7_spill] sm:$0xff] %v10126_v17  ;;  %16055 = vst [vmem:[#allocation9_spill] sm:$0xff] %v10130_v19  ;;  %v10145_v25 = vpack.c.bf16 %v398_v12, %v394_v11  ;;  %v10153_v28 = vsub.f32 %v230_v8, %v398_v12  ;;  %v1253_v30 = vand.u32 4294901760, %v232_v14  ;;  %v400_v31 = vand.u32 4294901760, %v239_v15  ;;  %v246_v32 = vld [vmem:[%s15438_s1 + $0xc0] sm:$0xff]  ;;  %v248_v38 = vld [vmem:[%s15438_s1 + $0xd0] sm:$0xff] }
  0x1d   : > { %16052 = vst [vmem:[#allocation6_spill] sm:$0xff] %v10124_v16  ;;  %16054 = vst [vmem:[#allocation8_spill] sm:$0xff] %v10128_v18  ;;  %8324 = vmatprep.subr.bf16.mxu0 %v10124_v16  ;;  %8516 = vmatprep.subr.bf16.mxu1 %v10141_v23  ;;  %v404_v33 = vand.u32 4294901760, %v247_v20  ;;  %v1255_v34 = vand.u32 4294901760, %v241_v21  ;;  %v1259_v35 = vand.u32 4294901760, %v249_v22  ;;  %v402_v36 = vand.u32 4294901760, %v238_v27 }
  0x1e   : > { %16056 = vst [vmem:[#allocation10_spill] sm:$0xff] %v10141_v23  ;;  %16057 = vst [vmem:[#allocation11_spill] sm:$0xff] %v10143_v24  ;;  %8326 = vmatpush1.bf16.msra.mxu0 %v10145_v25  ;;  %v10166_v39 = vpack.c.bf16 %v1253_v30, %v1249_v29  ;;  %v10168_v40 = vsub.f32 %v224_v13, %v1249_v29  ;;  %v10170_v41 = vsub.f32 %v232_v14, %v1253_v30  ;;  %v263_v44 = vld [vmem:[%s15438_s1 + $0x148] sm:$0xff]  ;;  %v257_v45 = vld [vmem:[%s15438_s1 + $0x118] sm:$0xff]  ;;  %s7478_s8 = sshll.u32 %s10423_s14, 3  ;;  %s14617_s14 = sld [smem:[#allocation2]] }
  0x1f   : > { %16058 = vst [vmem:[#allocation12_spill] sm:$0xff] %v10145_v25  ;;  %16059 = vst [vmem:[#allocation13_spill] sm:$0xff] %v10153_v28  ;;  %v10172_v42 = vsub.f32 %v239_v15, %v400_v31  ;;  %v10183_v46 = vpack.c.bf16 %v404_v33, %v400_v31  ;;  %v10185_v47 = vsub.f32 %v247_v20, %v404_v33  ;;  %v265_v50 = vld [vmem:[%s15438_s1 + $0x158] sm:$0xff]  ;;  %v406_v52 = vand.u32 4294901760, %v246_v32  ;;  %v254_v59 = vld [vmem:[%s15438_s1 + $0x100] sm:$0xff]  ;;  %s220_s19 = scalar_lea.vmem %s15437_s0, %s7478_s8  ;;  %s15395_s8 = scalar_lea.hbm %s15442_s5, %s7480_s24 }
  0x20   : > { %16060 = vst [vmem:[#allocation14_spill] sm:$0xff] %v10166_v39  ;;  %v10187_v48 = vpack.c.bf16 %v1259_v35, %v1255_v34  ;;  %v10189_v49 = vsub.f32 %v241_v21, %v1255_v34  ;;  %8518 = vmatpush1.bf16.msra.mxu1 %v10166_v39  ;;  %v10195_v51 = vsub.f32 %v249_v22, %v1259_v35  ;;  %v1257_v54 = vand.u32 4294901760, %v240_v37  ;;  %v262_v60 = vld [vmem:[%s15438_s1 + $0x140] sm:$0xff]  ;;  %v256_v1 = vld [vmem:[%s15438_s1 + $0x110] sm:$0xff]  ;;  %v271_v3 = vld [vmem:[%s15438_s1 + $0x188] sm:$0xff]  ;;  %s10013_s4 = smov [#allocation3]  }
  0x21   : > { %16061 = vst [vmem:[#allocation15_spill] sm:$0xff] %v10183_v46  ;;  %v10197_v53 = vsub.f32 %v238_v27, %v402_v36  ;;  %8328 = vmatprep.subr.bf16.mxu0 %v10183_v46  ;;  %v1261_v55 = vand.u32 4294901760, %v248_v38  ;;  %v408_v56 = vand.u32 4294901760, %v255_v43  ;;  %v412_v57 = vand.u32 4294901760, %v263_v44  ;;  %v264_v2 = vld [vmem:[%s15438_s1 + $0x150] sm:$0xff]  ;;  %v279_v8 = vld [vmem:[%s15438_s1 + $0x1c8] sm:$0xff] }
  0x22   : > { %16062 = vst [vmem:[#allocation16_spill] sm:$0xff] %v10187_v48  ;;  %8520 = vmatprep.subr.bf16.mxu1 %v10187_v48  ;;  %v1263_v58 = vand.u32 4294901760, %v257_v45  ;;  %v10207_v61 = vpack.c.bf16 %v406_v52, %v402_v36  ;;  %v10209_v62 = vsub.f32 %v246_v32, %v406_v52  ;;  %v10211_v63 = vsub.f32 %v240_v37, %v1257_v54  ;;  %v273_v10 = vld [vmem:[%s15438_s1 + $0x198] sm:$0xff]  ;;  %v270_v33 = vld [vmem:[%s15438_s1 + $0x180] sm:$0xff]  ;;  %v304_v48 = vld [vmem:[%s15438_s1 + $0x290] sm:$0xff]  ;;  %s9952_s11 = sshll.u32 %s10013_s4, 4  ;;  %s9953_s11 = int_to_ptr.vmem [resolvable:$false] %s9952_s11 }
  0x23   : > { %v1267_v0 = vand.u32 4294901760, %v265_v50  ;;  %v10222_v4 = vpack.c.bf16 %v1261_v55, %v1257_v54  ;;  %v10224_v5 = vsub.f32 %v248_v38, %v1261_v55  ;;  %v10226_v6 = vpack.c.bf16 %v412_v57, %v408_v56  ;;  %v281_v11 = vld [vmem:[%s15438_s1 + $0x1d8] sm:$0xff]  ;;  %v278_v38 = vld [vmem:[%s15438_s1 + $0x1c0] sm:$0xff]  ;;  %v287_v55 = vld [vmem:[%s15438_s1 + $0x208] sm:$0xff]  ;;  %s9954_s12 = scalar_lea.vmem %s9953_s11, 256 }
  0x24   : > { %16063 = vst [vmem:[#allocation17_spill] sm:$0xff] %v10207_v61  ;;  %v10228_v7 = vsub.f32 %v255_v43, %v408_v56  ;;  %8330 = vmatpush1.bf16.msra.mxu0 %v10207_v61  ;;  %v10240_v12 = vsub.f32 %v263_v44, %v412_v57  ;;  %v10244_v14 = vsub.f32 %v257_v45, %v1263_v58  ;;  %v410_v20 = vand.u32 4294901760, %v254_v59  ;;  %v272_v43 = vld [vmem:[%s15438_s1 + $0x190] sm:$0xff]  ;;  %v295_v56 = vld [vmem:[%s15438_s1 + $0x248] sm:$0xff]  ;;  %v289_v57 = vld [vmem:[%s15438_s1 + $0x218] sm:$0xff] }
  0x25   : > { %16064 = vst [vmem:[#allocation18_spill] sm:$0xff] %v10222_v4  ;;  %16065 = vst [vmem:[#allocation19_spill] sm:$0xff] %v10226_v6  ;;  %v10242_v13 = vpack.c.bf16 %v1267_v0, %v1263_v58  ;;  %v10246_v15 = vsub.f32 %v265_v50, %v1267_v0  ;;  %8522 = vmatpush1.bf16.msra.mxu1 %v10222_v4  ;;  %8332 = vmatprep.subr.bf16.mxu0 %v10226_v6  ;;  %v414_v21 = vand.u32 4294901760, %v262_v60  ;;  %v280_v44 = vld [vmem:[%s15438_s1 + $0x1d0] sm:$0xff]  ;;  %v319_v39 = vld [vmem:[%s15438_s1 + $0x308] sm:$0xff]  ;;  %vm7398_vm0 = vcmask 261120  }
  0x26   : > { %v1265_v22 = vand.u32 4294901760, %v256_v1  ;;  %v1269_v27 = vand.u32 4294901760, %v264_v2  ;;  %v416_v29 = vand.u32 4294901760, %v271_v3  ;;  %v420_v30 = vand.u32 4294901760, %v279_v8  ;;  %v327_v46 = vld [vmem:[%s15438_s1 + $0x348] sm:$0xff] }
  0x27   : > { %16066 = vst [vmem:[#allocation20_spill] sm:$0xff] %v10242_v13  ;;  %8524 = vmatprep.subr.bf16.mxu1 %v10242_v13  ;;  %v1271_v31 = vand.u32 4294901760, %v273_v10  ;;  %v1275_v32 = vand.u32 4294901760, %v281_v11  ;;  %v10254_v34 = vpack.c.bf16 %v414_v21, %v410_v20  ;;  %v10256_v35 = vsub.f32 %v254_v59, %v410_v20 }
  0x28   : > { %v10258_v36 = vsub.f32 %v262_v60, %v414_v21  ;;  %v10260_v37 = vpack.c.bf16 %v1269_v27, %v1265_v22  ;;  %v10271_v45 = vsub.f32 %v256_v1, %v1265_v22  ;;  %v10273_v50 = vsub.f32 %v264_v2, %v1269_v27  ;;  %v297_v21 = vld [vmem:[%s15438_s1 + $0x258] sm:$0xff] }
  0x29   : > { %16067 = vst [vmem:[#allocation21_spill] sm:$0xff] %v10254_v34  ;;  %v10275_v52 = vpack.c.bf16 %v420_v30, %v416_v29  ;;  %v10277_v54 = vsub.f32 %v271_v3, %v416_v29  ;;  %8334 = vmatpush1.bf16.msra.mxu0 %v10254_v34  ;;  %v10290_v58 = vsub.f32 %v279_v8, %v420_v30  ;;  %v418_v0 = vand.u32 4294901760, %v270_v33  ;;  %v286_v29 = vld [vmem:[%s15438_s1 + $0x200] sm:$0xff]  ;;  %v288_v30 = vld [vmem:[%s15438_s1 + $0x210] sm:$0xff] }
  0x2a   : > { %16068 = vst [vmem:[#allocation22_spill] sm:$0xff] %v10260_v37  ;;  %8526 = vmatpush1.bf16.msra.mxu1 %v10260_v37  ;;  %v10292_v59 = vpack.c.bf16 %v1275_v32, %v1271_v31  ;;  %v10294_v60 = vsub.f32 %v273_v10, %v1271_v31  ;;  %v10297_v1 = vsub.f32 %v281_v11, %v1275_v32  ;;  %v422_v2 = vand.u32 4294901760, %v278_v38  ;;  %v294_v11 = vld [vmem:[%s15438_s1 + $0x240] sm:$0xff]  ;;  %v303_v37 = vld [vmem:[%s15438_s1 + $0x288] sm:$0xff] }
  0x2b   : > { %16069 = vst [vmem:[#allocation23_spill] sm:$0xff] %v10275_v52  ;;  %8336 = vmatprep.subr.bf16.mxu0 %v10275_v52  ;;  %v1273_v3 = vand.u32 4294901760, %v272_v43  ;;  %v1277_v20 = vand.u32 4294901760, %v280_v44  ;;  %v10303_v8 = vsub.f32 %v270_v33, %v418_v0  ;;  %v424_v22 = vand.u32 4294901760, %v287_v55  ;;  %v311_v52 = vld [vmem:[%s15438_s1 + $0x2c8] sm:$0xff] }
  0x2c   : > { %16070 = vst [vmem:[#allocation24_spill] sm:$0xff] %v10292_v59  ;;  %8528 = vmatprep.subr.bf16.mxu1 %v10292_v59  ;;  %v428_v27 = vand.u32 4294901760, %v295_v56  ;;  %v1279_v10 = vand.u32 4294901760, %v289_v57  ;;  %v10314_v31 = vpack.c.bf16 %v422_v2, %v418_v0  ;;  %v10316_v32 = vsub.f32 %v278_v38, %v422_v2  ;;  %v296_v59 = vld [vmem:[%s15438_s1 + $0x250] sm:$0xff] }
  0x2d   : > { %v10318_v33 = vpack.c.bf16 %v1277_v20, %v1273_v3  ;;  %v10320_v9 = vsub.f32 %v272_v43, %v1273_v3  ;;  %v10331_v0 = vsub.f32 %v280_v44, %v1277_v20  ;;  %v10335_v2 = vsub.f32 %v287_v55, %v424_v22  ;;  %v305_v55 = vld [vmem:[%s15438_s1 + $0x298] sm:$0xff] }
  0x2e   : > { %16071 = vst [vmem:[#allocation25_spill] sm:$0xff] %v10314_v31  ;;  %v10333_v38 = vpack.c.bf16 %v428_v27, %v424_v22  ;;  %v10337_v43 = vsub.f32 %v295_v56, %v428_v27  ;;  %8338 = vmatpush1.bf16.msra.mxu0 %v10314_v31  ;;  %v1283_v3 = vand.u32 4294901760, %v297_v21  ;;  %v10341_v34 = vsub.f32 %v289_v57, %v1279_v10  ;;  %v313_v56 = vld [vmem:[%s15438_s1 + $0x2d8] sm:$0xff]  ;;  %v310_v31 = vld [vmem:[%s15438_s1 + $0x2c0] sm:$0xff] }
  0x2f   : > { %16072 = vst [vmem:[#allocation26_spill] sm:$0xff] %v10318_v33  ;;  %8530 = vmatpush1.bf16.msra.mxu1 %v10318_v33  ;;  %v426_v13 = vand.u32 4294901760, %v286_v29  ;;  %v430_v4 = vand.u32 4294901760, %v294_v11  ;;  %v1281_v6 = vand.u32 4294901760, %v288_v30  ;;  %v1285_v44 = vand.u32 4294901760, %v296_v59 }
  0x30   : > { %16073 = vst [vmem:[#allocation27_spill] sm:$0xff] %v10333_v38  ;;  %16074 = vst [vmem:[#allocation28_spill] sm:$0xff] %v10341_v34  ;;  %8340 = vmatprep.subr.bf16.mxu0 %v10333_v38  ;;  %v432_v20 = vand.u32 4294901760, %v303_v37  ;;  %v436_v61 = vand.u32 4294901760, %v311_v52  ;;  %v10350_v22 = vpack.c.bf16 %v1283_v3, %v1279_v10  ;;  %v10352_v57 = vsub.f32 %v297_v21, %v1283_v3  ;;  %v302_v38 = vld [vmem:[%s15438_s1 + $0x280] sm:$0xff] }
  0x31   : > { %v10354_v27 = vpack.c.bf16 %v430_v4, %v426_v13  ;;  %v10356_v33 = vsub.f32 %v286_v29, %v426_v13  ;;  %v10367_v10 = vsub.f32 %v294_v11, %v430_v4  ;;  %v10369_v21 = vpack.c.bf16 %v1285_v44, %v1281_v6  ;;  %v312_v29 = vld [vmem:[%s15438_s1 + $0x2d0] sm:$0xff] }
  0x32   : > { %16075 = vst [vmem:[#allocation29_spill] sm:$0xff] %v10350_v22  ;;  %16076 = vst [vmem:[#allocation30_spill] sm:$0xff] %v10352_v57  ;;  %v10371_v3 = vsub.f32 %v288_v30, %v1281_v6  ;;  %v10373_v13 = vsub.f32 %v296_v59, %v1285_v44  ;;  %8532 = vmatprep.subr.bf16.mxu1 %v10350_v22  ;;  %v10387_v4 = vpack.c.bf16 %v436_v61, %v432_v20 }
  0x33   : > { %16077 = vst [vmem:[#allocation31_spill] sm:$0xff] %v10354_v27  ;;  %16078 = vst [vmem:[#allocation32_spill] sm:$0xff] %v10356_v33  ;;  %8342 = vmatpush1.bf16.msra.mxu0 %v10354_v27  ;;  %v10389_v6 = vsub.f32 %v303_v37, %v432_v20  ;;  %v10391_v59 = vsub.f32 %v311_v52, %v436_v61  ;;  %v1287_v11 = vand.u32 4294901760, %v305_v55  ;;  %8534 = vmatpush1.bf16.msra.mxu1 %v10369_v21  ;;  %v321_v61 = vld [vmem:[%s15438_s1 + $0x318] sm:$0xff] }
  0x34   : > { %16079 = vst [vmem:[#allocation33_spill] sm:$0xff] %v10367_v10  ;;  %16080 = vst [vmem:[#allocation34_spill] sm:$0xff] %v10369_v21  ;;  %v1291_v30 = vand.u32 4294901760, %v313_v56  ;;  %v434_v44 = vand.u32 4294901760, %v302_v38  ;;  %v438_v25 = vand.u32 4294901760, %v310_v31  ;;  %v1289_v23 = vand.u32 4294901760, %v304_v48  ;;  %8344 = vmatprep.subr.bf16.mxu0 %v10387_v4 }
  0x35   : > { %16081 = vst [vmem:[#allocation35_spill] sm:$0xff] %v10373_v13  ;;  %16082 = vst [vmem:[#allocation36_spill] sm:$0xff] %v10387_v4  ;;  %v10395_v22 = vsub.f32 %v305_v55, %v1287_v11  ;;  %v1293_v27 = vand.u32 4294901760, %v312_v29  ;;  %v440_v16 = vand.u32 4294901760, %v319_v39  ;;  %v444_v13 = vand.u32 4294901760, %v327_v46  ;;  %v329_v37 = vld [vmem:[%s15438_s1 + $0x358] sm:$0xff] }
  0x36   : > { %16083 = vst [vmem:[#allocation37_spill] sm:$0xff] %v10389_v6  ;;  %16084 = vst [vmem:[#allocation38_spill] sm:$0xff] %v10391_v59  ;;  %v10403_v52 = vpack.c.bf16 %v1291_v30, %v1287_v11  ;;  %v10405_v20 = vsub.f32 %v313_v56, %v1291_v30  ;;  %v10407_v21 = vpack.c.bf16 %v438_v25, %v434_v44  ;;  %v318_v55 = vld [vmem:[%s15438_s1 + $0x300] sm:$0xff]  ;;  %v320_v59 = vld [vmem:[%s15438_s1 + $0x310] sm:$0xff] }
  0x37   : > { %16085 = vst [vmem:[#allocation39_spill] sm:$0xff] %v10395_v22  ;;  %v10409_v4 = vsub.f32 %v302_v38, %v434_v44  ;;  %v326_v22 = vld [vmem:[%s15438_s1 + $0x340] sm:$0xff]  ;;  %v10425_v56 = vsub.f32 %v310_v31, %v438_v25  ;;  %v10427_v11 = vpack.c.bf16 %v1293_v27, %v1289_v23  ;;  %v10429_v38 = vsub.f32 %v304_v48, %v1289_v23  ;;  %v328_v44 = vld [vmem:[%s15438_s1 + $0x350] sm:$0xff] }
  0x38   : > { %16086 = vst [vmem:[#allocation40_spill] sm:$0xff] %v10403_v52  ;;  %16087 = vst [vmem:[#allocation41_spill] sm:$0xff] %v10405_v20  ;;  %v10431_v30 = vsub.f32 %v312_v29, %v1293_v27  ;;  %v343_v20 = vld [vmem:[%s15438_s1 + $0x3c8] sm:$0xff]  ;;  %8536 = vmatprep.subr.bf16.mxu1 %v10403_v52  ;;  %8346 = vmatpush1.bf16.msra.mxu0 %v10407_v21  ;;  %v10444_v23 = vpack.c.bf16 %v444_v13, %v440_v16  ;;  %v1295_v31 = vand.u32 4294901760, %v321_v61 }
  0x39   : > { %16088 = vst [vmem:[#allocation42_spill] sm:$0xff] %v10407_v21  ;;  %16089 = vst [vmem:[#allocation43_spill] sm:$0xff] %v10409_v4  ;;  %v335_v4 = vld [vmem:[%s15438_s1 + $0x388] sm:$0xff]  ;;  %v10446_v25 = vsub.f32 %v319_v39, %v440_v16  ;;  %v10448_v48 = vsub.f32 %v327_v46, %v444_v13  ;;  %8538 = vmatpush1.bf16.msra.mxu1 %v10427_v11  ;;  %v1299_v27 = vand.u32 4294901760, %v329_v37  ;;  %v442_v29 = vand.u32 4294901760, %v318_v55  ;;  %v337_v16 = vld [vmem:[%s15438_s1 + $0x398] sm:$0xff] }
  0x3a   : > { %16090 = vst [vmem:[#allocation44_spill] sm:$0xff] %v10425_v56  ;;  %16091 = vst [vmem:[#allocation45_spill] sm:$0xff] %v10427_v11  ;;  %8348 = vmatprep.subr.bf16.mxu0 %v10444_v23  ;;  %v10452_v56 = vsub.f32 %v321_v61, %v1295_v31  ;;  %v1301_v52 = vand.u32 4294901760, %v328_v44  ;;  %v448_v21 = vand.u32 4294901760, %v335_v4  ;;  %v452_v6 = vand.u32 4294901760, %v343_v20  ;;  %v345_v39 = vld [vmem:[%s15438_s1 + $0x3d8] sm:$0xff] }
  0x3b   : > { %16092 = vst [vmem:[#allocation46_spill] sm:$0xff] %v10429_v38  ;;  %16093 = vst [vmem:[#allocation47_spill] sm:$0xff] %v10431_v30  ;;  %v446_v30 = vand.u32 4294901760, %v326_v22  ;;  %v1297_v38 = vand.u32 4294901760, %v320_v59  ;;  %v10461_v46 = vpack.c.bf16 %v1299_v27, %v1295_v31  ;;  %v10463_v13 = vsub.f32 %v329_v37, %v1299_v27 }
  0x3c   : > { %16094 = vst [vmem:[#allocation48_spill] sm:$0xff] %v10444_v23  ;;  %16095 = vst [vmem:[#allocation49_spill] sm:$0xff] %v10446_v25  ;;  %v10467_v61 = vsub.f32 %v318_v55, %v442_v29  ;;  %v334_v23 = vld [vmem:[%s15438_s1 + $0x380] sm:$0xff]  ;;  %v10484_v55 = vsub.f32 %v328_v44, %v1301_v52 }
  0x3d   : > { %16096 = vst [vmem:[#allocation50_spill] sm:$0xff] %v10448_v48  ;;  %16097 = vst [vmem:[#allocation51_spill] sm:$0xff] %v10452_v56  ;;  %v10465_v11 = vpack.c.bf16 %v446_v30, %v442_v29  ;;  %v342_v56 = vld [vmem:[%s15438_s1 + $0x3c0] sm:$0xff]  ;;  %v336_v48 = vld [vmem:[%s15438_s1 + $0x390] sm:$0xff]  ;;  %v10478_v31 = vsub.f32 %v326_v22, %v446_v30  ;;  %v10480_v37 = vpack.c.bf16 %v1301_v52, %v1297_v38  ;;  %8540 = vmatprep.subr.bf16.mxu1 %v10461_v46 }
  0x3e   : > { %16098 = vst [vmem:[#allocation52_spill] sm:$0xff] %v10461_v46  ;;  %16099 = vst [vmem:[#allocation53_spill] sm:$0xff] %v10463_v13  ;;  %v10482_v27 = vsub.f32 %v320_v59, %v1297_v38  ;;  %v344_v29 = vld [vmem:[%s15438_s1 + $0x3d0] sm:$0xff]  ;;  %v10493_v13 = vsub.f32 %v335_v4, %v448_v21  ;;  %v10495_v22 = vsub.f32 %v343_v20, %v452_v6  ;;  %v1303_v30 = vand.u32 4294901760, %v337_v16 }
  0x3f   : > { %16100 = vst [vmem:[#allocation54_spill] sm:$0xff] %v10465_v11  ;;  %16101 = vst [vmem:[#allocation55_spill] sm:$0xff] %v10467_v61  ;;  %8350 = vmatpush1.bf16.msra.mxu0 %v10465_v11  ;;  %v10491_v61 = vpack.c.bf16 %v452_v6, %v448_v21  ;;  %8542 = vmatpush1.bf16.msra.mxu1 %v10480_v37  ;;  %v1307_v59 = vand.u32 4294901760, %v345_v39  ;;  %v450_v52 = vand.u32 4294901760, %v334_v23  ;;  %v454_v38 = vand.u32 4294901760, %v342_v56 }
  0x40   : > { %16102 = vst [vmem:[#allocation56_spill] sm:$0xff] %v10478_v31  ;;  %16103 = vst [vmem:[#allocation57_spill] sm:$0xff] %v10480_v37  ;;  %v1305_v44 = vand.u32 4294901760, %v336_v48  ;;  %v10502_v11 = vsub.f32 %v337_v16, %v1303_v30  ;;  %v1309_v46 = vand.u32 4294901760, %v344_v29  ;;  %v15521_v21 = vand.u32 4294901760, %v10126_v17 }
  0x41   : > { %16104 = vst [vmem:[#allocation58_spill] sm:$0xff] %v10482_v27  ;;  %16105 = vst [vmem:[#allocation59_spill] sm:$0xff] %v10484_v55  ;;  %8352 = vmatprep.subr.bf16.mxu0 %v10491_v61  ;;  %v15520_v4 = vand.u32 4294901760, %v10128_v18  ;;  %v10506_v6 = vpack.c.bf16 %v1307_v59, %v1303_v30  ;;  %v10508_v20 = vsub.f32 %v345_v39, %v1307_v59  ;;  %v15529_v30 = vand.u32 4294901760, %v10143_v24 }
  0x42   : > { %16106 = vst [vmem:[#allocation60_spill] sm:$0xff] %v10491_v61  ;;  %16107 = vst [vmem:[#allocation61_spill] sm:$0xff] %v10493_v13  ;;  %v10512_v37 = vsub.f32 %v334_v23, %v450_v52  ;;  %v221_v13 = vld [vmem:[%s220_s19] sm:$0xff]  ;;  %v10514_v55 = vsub.f32 %v342_v56, %v454_v38  ;;  %v10516_v27 = vpack.c.bf16 %v1309_v46, %v1305_v44  ;;  %v15524_v56 = vand.u32 4294901760, %v10130_v19  ;;  %s7477_s19 = sshll.u32 %s214_s18, 3 }
  0x43   : > { %16108 = vst [vmem:[#allocation62_spill] sm:$0xff] %v10495_v22  ;;  %16109 = vst [vmem:[#allocation63_spill] sm:$0xff] %v10506_v6  ;;  %v10510_v22 = vpack.c.bf16 %v454_v38, %v450_v52  ;;  %v10518_v16 = vsub.f32 %v336_v48, %v1305_v44  ;;  %v10520_v61 = vsub.f32 %v344_v29, %v1309_v46  ;;  %8544 = vmatprep.subr.bf16.mxu1 %v10506_v6  ;;  %s216_s26 = scalar_lea.vmem [#allocation3], %s7477_s19 }
  0x44   : > { %16110 = vst [vmem:[#allocation64_spill] sm:$0xff] %v10508_v20  ;;  %16112 = vst [vmem:[#allocation66_spill] sm:$0xff] %v10514_v55  ;;  %v503_v39 = vsub.f32 %v10126_v17, %v15521_v21  ;;  %v515_v23 = vsub.f32 %v10128_v18, %v15520_v4  ;;  %8546 = vmatpush1.bf16.msra.mxu1 %v10516_v27  ;;  %v10533_v48 = vand.u32 4294901760, %v221_v13  ;;  %v15536_v46 = vand.u32 4294901760, %v10147_v26  ;;  %s7414_s27 = sshll.u32 %s216_s26, 4  ;;  %s15397_s27 = int_to_ptr.vmem [resolvable:$true] %s7414_s27 }
  0x45   : > { %16111 = vst [vmem:[#allocation65_spill] sm:$0xff] %v10510_v22  ;;  %16113 = vst [vmem:[#allocation67_spill] sm:$0xff] %v10516_v27  ;;  %8354 = vmatpush1.bf16.msra.mxu0 %v10510_v22  ;;  %v15537_v29 = vand.u32 4294901760, %v10153_v28  ;;  %v15543_v59 = vand.u32 4294901760, %v10168_v40  ;;  %v1358_v44 = vsub.f32 %v10130_v19, %v15524_v56  ;;  %v1370_v4 = vsub.f32 %v10143_v24, %v15529_v30  ;;  %s9948_s10 = scalar_lea.vmem %s15397_s27, 128  ;;  %p9955_p0 = scmp.lt.s32.totalorder %s15397_s27, %s9953_s11 }
  0x46   : > { %16114 = vst [vmem:[#allocation68_spill] sm:$0xff] %v10518_v16  ;;  %16115 = vst [vmem:[#allocation69_spill] sm:$0xff] %v10520_v61  ;;  %v504_v52 = vand.u32 4294901760, %v503_v39  ;;  %v516_v38 = vand.u32 4294901760, %v515_v23  ;;  %v10545_v21 = vsub.f32 %v221_v13, %v10533_v48  ;;  %v509_v27 = vsub.f32 %v10147_v26, %v15536_v46  ;;  %p9949_p11 = scmp.ne.s32.totalorder %s15397_s27, %s9948_s10  ;;  %p9956_p1 = scmp.lt.s32.totalorder %s9954_s12, %s9948_s10 }
  0x47   : > { %16116 = vst [vmem:[#allocation70_spill] sm:$0xff] %v10533_v48  ;;  %v521_v39 = vsub.f32 %v10153_v28, %v15537_v29  ;;  %v1364_v23 = vsub.f32 %v10168_v40, %v15543_v59  ;;  %v1359_v22 = vand.u32 4294901760, %v1358_v44  ;;  %v1371_v6 = vand.u32 4294901760, %v1370_v4 }
  0x48   : > { %16117 = vst [vmem:[#allocation71_spill] sm:$0xff] %v10545_v21  ;;  %v8355_v56 = vpack.c.bf16 %v516_v38, %v504_v52  ;;  %v15541_v30 = vand.u32 4294901760, %v10170_v41  ;;  %v10558_v13 = vand.u32 4294901760, %v10545_v21  ;;  %v510_v48 = vand.u32 4294901760, %v509_v27  ;;  %p9950_p12 = pnand %p9949_p11, %p10085_p5  ;;  %p9957_p2 = por %p9956_p1, %p9955_p0 }
  0x49   : > { %v522_v24 = vand.u32 4294901760, %v521_v39  ;;  %v1365_v19 = vand.u32 4294901760, %v1364_v23  ;;  %v8547_v46 = vpack.c.bf16 %v1371_v6, %v1359_v22  ;;  %v15540_v28 = vand.u32 4294901760, %v10172_v42 }
  0x4a   : > { %16118 = vst [vmem:[#allocation72_spill] sm:$0xff] %v10558_v13  ;;  %8356 = vmatprep.subr.bf16.mxu0 %v8355_v56  ;;  %v1376_v29 = vsub.f32 %v10170_v41, %v15541_v30  ;;  %v15542_v52 = vand.u32 4294901760, %v10185_v47  ;;  %v492_v4 = vsub.f32 %v10545_v21, %v10558_v13  ;;  %v15544_v44 = vand.u32 4294901760, %v10189_v49  ;;  %p9951_p13 = pneg %p9950_p12 }
  0x4b   : > { %v8357_v38 = vpack.c.bf16 %v522_v24, %v510_v48  ;;  %v15545_v27 = vand.u32 4294901760, %v10195_v51  ;;  %8548 = vmatprep.subr.bf16.mxu1 %v8547_v46  ;;  %v527_v22 = vsub.f32 %v10172_v42, %v15540_v28  ;;  %v15546_v56 = vand.u32 4294901760, %v10197_v53 }
  0x4c   : > { %v1377_v39 = vand.u32 4294901760, %v1376_v29  ;;  %v539_v6 = vsub.f32 %v10185_v47, %v15542_v52  ;;  %v10576_v23 = vand.u32 4294901760, %v492_v4  ;;  %v1382_v24 = vsub.f32 %v10189_v49, %v15544_v44  ;;  %p9958_p3 = pnand %p9957_p2, %p9951_p13 }
  0x4d   : > { %v1394_v48 = vsub.f32 %v10195_v51, %v15545_v27  ;;  %v15555_v46 = vand.u32 4294901760, %v10209_v62  ;;  %v528_v28 = vand.u32 4294901760, %v527_v22  ;;  %v533_v52 = vsub.f32 %v10197_v53, %v15546_v56 }
  0x4e   : > { %16119 = vst [vmem:[#allocation73_spill] sm:$0xff] %v10576_v23  ;;  %v8549_v29 = vpack.c.bf16 %v1377_v39, %v1365_v19  ;;  %v540_v30 = vand.u32 4294901760, %v539_v6  ;;  %494 = vmatmul.mubr.f32.vlgmr.msra.gmra.mrb[0].mxu0 %v10576_v23  ;;  %1349 = vmatmul.mubr.f32.vlgmr.msra.gmra.mrb[0].mxu1 %v10576_v23  ;;  %v1383_v4 = vand.u32 4294901760, %v1382_v24  ;;  %v15551_v27 = vand.u32 4294901760, %v10211_v63 }
  0x4f   : > { %v1395_v59 = vand.u32 4294901760, %v1394_v48  ;;  %v545_v44 = vsub.f32 %v10209_v62, %v15555_v46  ;;  %8358 = vmatpush1.bf16.msra.mxu0 %v8357_v38  ;;  %v534_v39 = vand.u32 4294901760, %v533_v52  ;;  %v15552_v22 = vand.u32 4294901760, %v10224_v5 }
  0x50   : > { %8550 = vmatpush1.bf16.msra.mxu1 %v8549_v29  ;;  %v8359_v19 = vpack.c.bf16 %v540_v30, %v528_v28  ;;  %v15553_v6 = vand.u32 4294901760, %v10228_v7  ;;  %v1388_v24 = vsub.f32 %v10211_v63, %v15551_v27  ;;  %v15554_v48 = vand.u32 4294901760, %v10240_v12 }
  0x51   : > { %v8551_v56 = vpack.c.bf16 %v1395_v59, %v1383_v4  ;;  %v546_v13 = vand.u32 4294901760, %v545_v44  ;;  %v16120_v23 = vmov 0.0   ;;  %v1400_v28 = vsub.f32 %v10224_v5, %v15552_v22 }
  0x52   : > { %724 = vmatprep.mubr.f32.mxu0 %v16120_v23  ;;  %1579 = vmatprep.mubr.f32.mxu1 %v16120_v23  ;;  %v551_v30 = vsub.f32 %v10228_v7, %v15553_v6  ;;  %v15556_v59 = vand.u32 4294901760, %v10244_v14  ;;  %v15567_v52 = vand.u32 4294901760, %v10246_v15  ;;  %v1389_v44 = vand.u32 4294901760, %v1388_v24 }
  0x53   : > { %8360 = vmatprep.subr.bf16.mxu0 %v8359_v19  ;;  %8552 = vmatprep.subr.bf16.mxu1 %v8551_v56  ;;  %v8361_v38 = vpack.c.bf16 %v546_v13, %v534_v39  ;;  %v563_v29 = vsub.f32 %v10240_v12, %v15554_v48  ;;  %v15559_v4 = vand.u32 4294901760, %v10256_v35  ;;  %v1401_v19 = vand.u32 4294901760, %v1400_v28 }
  0x54   : > { %v552_v27 = vand.u32 4294901760, %v551_v30  ;;  %v1406_v22 = vsub.f32 %v10244_v14, %v15556_v59  ;;  %v1418_v6 = vsub.f32 %v10246_v15, %v15567_v52  ;;  %v15560_v39 = vand.u32 4294901760, %v10258_v36 }
  0x55   : > { %8362 = vmatpush1.bf16.msra.mxu0 %v8361_v38  ;;  %v564_v56 = vand.u32 4294901760, %v563_v29  ;;  %v557_v13 = vsub.f32 %v10256_v35, %v15559_v4  ;;  %v15564_v24 = vand.u32 4294901760, %v10271_v45  ;;  %v8553_v28 = vpack.c.bf16 %v1401_v19, %v1389_v44 }
  0x56   : > { %v1407_v30 = vand.u32 4294901760, %v1406_v22  ;;  %v1419_v48 = vand.u32 4294901760, %v1418_v6  ;;  %v15561_v46 = vand.u32 4294901760, %v10273_v50  ;;  %v569_v38 = vsub.f32 %v10258_v36, %v15560_v39 }
  0x57   : > { %v8363_v59 = vpack.c.bf16 %v564_v56, %v552_v27  ;;  %v558_v21 = vand.u32 4294901760, %v557_v13  ;;  %v1412_v29 = vsub.f32 %v10271_v45, %v15564_v24  ;;  %8554 = vmatpush1.bf16.msra.mxu1 %v8553_v28  ;;  %v15562_v22 = vand.u32 4294901760, %v10277_v54 }
  0x58   : > { %v8555_v4 = vpack.c.bf16 %v1419_v48, %v1407_v30  ;;  %v1424_v44 = vsub.f32 %v10273_v50, %v15561_v46  ;;  %v15563_v6 = vand.u32 4294901760, %v10290_v58  ;;  %v570_v27 = vand.u32 4294901760, %v569_v38 }
  0x59   : > { %8364 = vmatprep.subr.bf16.mxu0 %v8363_v59  ;;  %v1413_v19 = vand.u32 4294901760, %v1412_v29  ;;  %v15565_v56 = vand.u32 4294901760, %v10294_v60  ;;  %v15566_v13 = vand.u32 4294901760, %v10297_v1  ;;  %v575_v48 = vsub.f32 %v10277_v54, %v15562_v22 }
  0x5a   : > { %8556 = vmatprep.subr.bf16.mxu1 %v8555_v4  ;;  %v1425_v39 = vand.u32 4294901760, %v1424_v44  ;;  %v587_v28 = vsub.f32 %v10290_v58, %v15563_v6  ;;  %v15573_v30 = vand.u32 4294901760, %v10303_v8  ;;  %v8365_v46 = vpack.c.bf16 %v570_v27, %v558_v21 }
  0x5b   : > { %v1430_v59 = vsub.f32 %v10294_v60, %v15565_v56  ;;  %v1442_v4 = vsub.f32 %v10297_v1, %v15566_v13  ;;  %v15572_v38 = vand.u32 4294901760, %v10316_v32  ;;  %v576_v44 = vand.u32 4294901760, %v575_v48 }
  0x5c   : > { %v8557_v29 = vpack.c.bf16 %v1425_v39, %v1413_v19  ;;  %v588_v22 = vand.u32 4294901760, %v587_v28  ;;  %v581_v6 = vsub.f32 %v10303_v8, %v15573_v30  ;;  %8366 = vmatpush1.bf16.msra.mxu0 %v8365_v46  ;;  %v15568_v56 = vand.u32 4294901760, %v10320_v9 }
  0x5d   : > { %v1431_v24 = vand.u32 4294901760, %v1430_v59  ;;  %v1443_v21 = vand.u32 4294901760, %v1442_v4  ;;  %v593_v27 = vsub.f32 %v10316_v32, %v15572_v38  ;;  %v15569_v39 = vand.u32 4294901760, %v10331_v0  ;;  %v16121_v38 = vld [vmem:[#allocation35_spill] sm:$0xff] }
  0x5e   : > { %8558 = vmatpush1.bf16.msra.mxu1 %v8557_v29  ;;  %v8367_v13 = vpack.c.bf16 %v588_v22, %v576_v44  ;;  %v582_v52 = vand.u32 4294901760, %v581_v6  ;;  %v15570_v19 = vand.u32 4294901760, %v10335_v2  ;;  %v1436_v46 = vsub.f32 %v10320_v9, %v15568_v56 }
  0x5f   : > { %v8559_v48 = vpack.c.bf16 %v1443_v21, %v1431_v24  ;;  %v594_v28 = vand.u32 4294901760, %v593_v27  ;;  %v15571_v59 = vand.u32 4294901760, %v10337_v43  ;;  %v1448_v4 = vsub.f32 %v10331_v0, %v15569_v39 }
  0x60   : > { %8368 = vmatprep.subr.bf16.mxu0 %v8367_v13  ;;  %v599_v22 = vsub.f32 %v10335_v2, %v15570_v19  ;;  %v15574_v6 = vand.u32 4294901760, %v10341_v34  ;;  %v15578_v24 = vand.u32 4294901760, %v10352_v57  ;;  %v1437_v44 = vand.u32 4294901760, %v1436_v46 }
  0x61   : > { %8560 = vmatprep.subr.bf16.mxu1 %v8559_v48  ;;  %v8369_v29 = vpack.c.bf16 %v594_v28, %v582_v52  ;;  %v611_v21 = vsub.f32 %v10337_v43, %v15571_v59  ;;  %v15577_v13 = vand.u32 4294901760, %v10356_v33  ;;  %v1449_v27 = vand.u32 4294901760, %v1448_v4 }
  0x62   : > { %v600_v56 = vand.u32 4294901760, %v599_v22  ;;  %v1454_v39 = vsub.f32 %v10341_v34, %v15574_v6  ;;  %v1466_v19 = vsub.f32 %v10352_v57, %v15578_v24  ;;  %v15581_v28 = vand.u32 4294901760, %v10367_v10 }
  0x63   : > { %8370 = vmatpush1.bf16.msra.mxu0 %v8369_v29  ;;  %v612_v48 = vand.u32 4294901760, %v611_v21  ;;  %v605_v52 = vsub.f32 %v10356_v33, %v15577_v13  ;;  %v15587_v46 = vand.u32 4294901760, %v10371_v3  ;;  %v8561_v4 = vpack.c.bf16 %v1449_v27, %v1437_v44  ;;  %v16123_v27 = vld [vmem:[#allocation38_spill] sm:$0xff] }
  0x64   : > { %v1455_v22 = vand.u32 4294901760, %v1454_v39  ;;  %v1467_v59 = vand.u32 4294901760, %v1466_v19  ;;  %v15586_v30 = vand.u32 4294901760, %v16121_v38  ;;  %v617_v29 = vsub.f32 %v10367_v10, %v15581_v28  ;;  %v16122_v39 = vld [vmem:[#allocation37_spill] sm:$0xff] }
  0x65   : > { %v8371_v6 = vpack.c.bf16 %v612_v48, %v600_v56  ;;  %v606_v34 = vand.u32 4294901760, %v605_v52  ;;  %v1460_v21 = vsub.f32 %v10371_v3, %v15587_v46  ;;  %8562 = vmatpush1.bf16.msra.mxu1 %v8561_v4  ;;  %v15589_v19 = vand.u32 4294901760, %v16122_v39  ;;  %v16124_v52 = vld [vmem:[#allocation39_spill] sm:$0xff]  ;;  %v16125_v28 = vld [vmem:[#allocation41_spill] sm:$0xff] }
  0x66   : > { %v8563_v13 = vpack.c.bf16 %v1467_v59, %v1455_v22  ;;  %v1472_v44 = vsub.f32 %v16121_v38, %v15586_v30  ;;  %v15590_v24 = vand.u32 4294901760, %v16123_v27  ;;  %v618_v56 = vand.u32 4294901760, %v617_v29  ;;  %v16126_v22 = vld [vmem:[#allocation43_spill] sm:$0xff]  ;;  %v16127_v29 = vld [vmem:[#allocation44_spill] sm:$0xff] }
  0x67   : > { %8372 = vmatprep.subr.bf16.mxu0 %v8371_v6  ;;  %v1461_v48 = vand.u32 4294901760, %v1460_v21  ;;  %v15592_v33 = vand.u32 4294901760, %v16124_v52  ;;  %v15594_v10 = vand.u32 4294901760, %v16125_v28  ;;  %v623_v59 = vsub.f32 %v16122_v39, %v15589_v19  ;;  %v16129_v39 = vld [vmem:[#allocation47_spill] sm:$0xff] }
  0x68   : > { %8564 = vmatprep.subr.bf16.mxu1 %v8563_v13  ;;  %v1473_v57 = vand.u32 4294901760, %v1472_v44  ;;  %v635_v4 = vsub.f32 %v16123_v27, %v15590_v24  ;;  %v15599_v30 = vand.u32 4294901760, %v16126_v22  ;;  %v8373_v46 = vpack.c.bf16 %v618_v56, %v606_v34 }
  0x69   : > { %v1478_v6 = vsub.f32 %v16124_v52, %v15592_v33  ;;  %v1490_v13 = vsub.f32 %v16125_v28, %v15594_v10  ;;  %v15597_v21 = vand.u32 4294901760, %v16127_v29  ;;  %v624_v38 = vand.u32 4294901760, %v623_v59  ;;  %v16128_v33 = vld [vmem:[#allocation46_spill] sm:$0xff] }
  0x6a   : > { %v8565_v44 = vpack.c.bf16 %v1473_v57, %v1461_v48  ;;  %v636_v19 = vand.u32 4294901760, %v635_v4  ;;  %v629_v24 = vsub.f32 %v16126_v22, %v15599_v30  ;;  %8374 = vmatpush1.bf16.msra.mxu0 %v8373_v46  ;;  %v15598_v52 = vand.u32 4294901760, %v16128_v33 }
  0x6b   : > { %v1479_v27 = vand.u32 4294901760, %v1478_v6  ;;  %v1491_v34 = vand.u32 4294901760, %v1490_v13  ;;  %v641_v56 = vsub.f32 %v16127_v29, %v15597_v21  ;;  %v15602_v57 = vand.u32 4294901760, %v16129_v39  ;;  %v16130_v6 = vld [vmem:[#allocation50_spill] sm:$0xff] }
  0x6c   : > { %8566 = vmatpush1.bf16.msra.mxu1 %v8565_v44  ;;  %v8375_v10 = vpack.c.bf16 %v636_v19, %v624_v38  ;;  %v630_v28 = vand.u32 4294901760, %v629_v24  ;;  %v15603_v48 = vand.u32 4294901760, %v10446_v25  ;;  %v1484_v46 = vsub.f32 %v16128_v33, %v15598_v52  ;;  %v16131_v24 = vld [vmem:[#allocation51_spill] sm:$0xff]  ;;  %v16132_v44 = vld [vmem:[#allocation53_spill] sm:$0xff] }
  0x6d   : > { %v8567_v59 = vpack.c.bf16 %v1491_v34, %v1479_v27  ;;  %v642_v4 = vand.u32 4294901760, %v641_v56  ;;  %v15604_v13 = vand.u32 4294901760, %v16130_v6  ;;  %v1496_v21 = vsub.f32 %v16129_v39, %v15602_v57 }
  0x6e   : > { %8376 = vmatprep.subr.bf16.mxu0 %v8375_v10  ;;  %v647_v38 = vsub.f32 %v10446_v25, %v15603_v48  ;;  %v15609_v19 = vand.u32 4294901760, %v16131_v24  ;;  %v15612_v27 = vand.u32 4294901760, %v16132_v44  ;;  %v1485_v56 = vand.u32 4294901760, %v1484_v46  ;;  %v16133_v10 = vld [vmem:[#allocation55_spill] sm:$0xff]  ;;  %v16134_v46 = vld [vmem:[#allocation58_spill] sm:$0xff] }
  0x6f   : > { %8568 = vmatprep.subr.bf16.mxu1 %v8567_v59  ;;  %v8377_v34 = vpack.c.bf16 %v642_v4, %v630_v28  ;;  %v659_v52 = vsub.f32 %v16130_v6, %v15604_v13  ;;  %v15611_v30 = vand.u32 4294901760, %v16133_v10  ;;  %v1497_v33 = vand.u32 4294901760, %v1496_v21  ;;  %v16135_v25 = vld [vmem:[#allocation59_spill] sm:$0xff] }
  0x70   : > { %v648_v29 = vand.u32 4294901760, %v647_v38  ;;  %v1502_v57 = vsub.f32 %v16131_v24, %v15609_v19  ;;  %v1514_v48 = vsub.f32 %v16132_v44, %v15612_v27  ;;  %v15613_v4 = vand.u32 4294901760, %v10478_v31 }
  0x71   : > { %8378 = vmatpush1.bf16.msra.mxu0 %v8377_v34  ;;  %v660_v59 = vand.u32 4294901760, %v659_v52  ;;  %v653_v28 = vsub.f32 %v16133_v10, %v15611_v30  ;;  %v15619_v13 = vand.u32 4294901760, %v16134_v46  ;;  %v8569_v21 = vpack.c.bf16 %v1497_v33, %v1485_v56  ;;  %v16137_v56 = vld [vmem:[#allocation62_spill] sm:$0xff] }
  0x72   : > { %v1503_v38 = vand.u32 4294901760, %v1502_v57  ;;  %v1515_v6 = vand.u32 4294901760, %v1514_v48  ;;  %v15616_v39 = vand.u32 4294901760, %v16135_v25  ;;  %v665_v34 = vsub.f32 %v10478_v31, %v15613_v4  ;;  %v16136_v57 = vld [vmem:[#allocation61_spill] sm:$0xff] }
  0x73   : > { %v8379_v19 = vpack.c.bf16 %v660_v59, %v648_v29  ;;  %v654_v24 = vand.u32 4294901760, %v653_v28  ;;  %v1508_v52 = vsub.f32 %v16134_v46, %v15619_v13  ;;  %8570 = vmatpush1.bf16.msra.mxu1 %v8569_v21  ;;  %v15617_v48 = vand.u32 4294901760, %v16136_v57 }
  0x74   : > { %v8571_v30 = vpack.c.bf16 %v1515_v6, %v1503_v38  ;;  %v1520_v33 = vsub.f32 %v16135_v25, %v15616_v39  ;;  %v15618_v27 = vand.u32 4294901760, %v16137_v56  ;;  %v666_v29 = vand.u32 4294901760, %v665_v34 }
  0x75   : > { %8380 = vmatprep.subr.bf16.mxu0 %v8379_v19  ;;  %v1509_v59 = vand.u32 4294901760, %v1508_v52  ;;  %v15620_v28 = vand.u32 4294901760, %v10502_v11  ;;  %v15621_v4 = vand.u32 4294901760, %v10508_v20  ;;  %v671_v6 = vsub.f32 %v16136_v57, %v15617_v48 }
  0x76   : > { %8572 = vmatprep.subr.bf16.mxu1 %v8571_v30  ;;  %v1521_v31 = vand.u32 4294901760, %v1520_v33  ;;  %v683_v21 = vsub.f32 %v16137_v56, %v15618_v27  ;;  %v15627_v38 = vand.u32 4294901760, %v10512_v37  ;;  %v8381_v39 = vpack.c.bf16 %v666_v29, %v654_v24 }
  0x77   : > { %v1526_v19 = vsub.f32 %v10502_v11, %v15620_v28  ;;  %v1538_v30 = vsub.f32 %v10508_v20, %v15621_v4  ;;  %v15626_v34 = vand.u32 4294901760, %v10514_v55  ;;  %v672_v33 = vand.u32 4294901760, %v671_v6 }
  0x78   : > { %v8573_v52 = vpack.c.bf16 %v1521_v31, %v1509_v59  ;;  %v684_v48 = vand.u32 4294901760, %v683_v21  ;;  %v677_v27 = vsub.f32 %v10512_v37, %v15627_v38  ;;  %8382 = vmatpush1.bf16.msra.mxu0 %v8381_v39  ;;  %v15624_v28 = vand.u32 4294901760, %v10518_v16 }
  0x79   : > { %v1527_v13 = vand.u32 4294901760, %v1526_v19  ;;  %v1539_v24 = vand.u32 4294901760, %v1538_v30  ;;  %v689_v29 = vsub.f32 %v10514_v55, %v15626_v34  ;;  %v15625_v31 = vand.u32 4294901760, %v10520_v61 }
  0x7a   : > { %8574 = vmatpush1.bf16.msra.mxu1 %v8573_v52  ;;  %v8383_v4 = vpack.c.bf16 %v684_v48, %v672_v33  ;;  %v678_v20 = vand.u32 4294901760, %v677_v27  ;;  %v1532_v21 = vsub.f32 %v10518_v16, %v15624_v28  ;;  %v8387_v19 = vpack.c.bf16 %v10128_v18, %v10126_v17  ;;  %v16138_v52 = vld [vmem:[#allocation9_spill] sm:$0xff] }
  0x7b   : > { %v8575_v59 = vpack.c.bf16 %v1539_v24, %v1527_v13  ;;  %v690_v6 = vand.u32 4294901760, %v689_v29  ;;  %v1544_v39 = vsub.f32 %v10520_v61, %v15625_v31  ;;  %v16139_v13 = vld [vmem:[#allocation11_spill] sm:$0xff]  ;;  %v16140_v24 = vld [vmem:[#allocation13_spill] sm:$0xff]  ;;  %v16141_v31 = vld [vmem:[#allocation70_spill] sm:$0xff]  ;;  %v16144_v18 = vand.u32 4294901760, %v10147_v26 }
  0x7c   : > { %8384 = vmatprep.subr.bf16.mxu0 %v8383_v4  ;;  %v1533_v48 = vand.u32 4294901760, %v1532_v21  ;;  %v8579_v33 = vpack.c.bf16 %v16139_v13, %v16138_v52  ;;  %v8389_v29 = vpack.c.bf16 %v16140_v24, %v10147_v26  ;;  %v8391_v4 = vpack.c.bf16 %v10185_v47, %v10172_v42 }
  0x7d   : > { %8576 = vmatprep.subr.bf16.mxu1 %v8575_v59  ;;  %v8385_v30 = vpack.c.bf16 %v690_v6, %v678_v20  ;;  %v1545_v27 = vand.u32 4294901760, %v1544_v39  ;;  %v8581_v20 = vpack.c.bf16 %v10170_v41, %v10168_v40  ;;  %v8583_v59 = vpack.c.bf16 %v10195_v51, %v10189_v49 }
  0x7e   : > { %v8393_v6 = vpack.c.bf16 %v10209_v62, %v10197_v53  ;;  %v8585_v21 = vpack.c.bf16 %v10224_v5, %v10211_v63  ;;  %v8395_v39 = vpack.c.bf16 %v10240_v12, %v10228_v7  ;;  %v16143_v34 = vand.u32 4294901760, %v16139_v13 }
  0x7f   : > { %8386 = vmatpush1.bf16.msra.mxu0 %v8385_v30  ;;  %v8577_v28 = vpack.c.bf16 %v1545_v27, %v1533_v48  ;;  %v8589_v30 = vpack.c.bf16 %v10273_v50, %v10271_v45  ;;  %v8399_v48 = vpack.c.bf16 %v10290_v58, %v10277_v54  ;;  %v8591_v27 = vpack.c.bf16 %v10297_v1, %v10294_v60 }
  0x80   : > { %8388 = vmatprep.subr.bf16.mxu0 %v8387_v19  ;;  %v8397_v19 = vpack.c.bf16 %v10258_v36, %v10256_v35  ;;  %v16146_v61 = vand.u32 4294901760, %v10168_v40  ;;  %v16147_v16 = vand.u32 4294901760, %v10170_v41  ;;  %v16150_v26 = vand.u32 4294901760, %v10189_v49 }
  0x81   : > { %8578 = vmatpush1.bf16.msra.mxu1 %v8577_v28  ;;  %v8587_v28 = vpack.c.bf16 %v10246_v15, %v10244_v14  ;;  %v16152_v40 = vand.u32 4294901760, %v10197_v53  ;;  %v16153_v41 = vand.u32 4294901760, %v10209_v62  ;;  %v16157_v49 = vand.u32 4294901760, %v10240_v12 }
  0x82   : > { %726 = vmatmul.mubr.f32.vlgmr.msra.gmra.mrb[0].mxu0 %v16141_v31  ;;  %8580 = vmatprep.subr.bf16.mxu1 %v8579_v33  ;;  %v8401_v33 = vpack.c.bf16 %v10316_v32, %v10303_v8  ;;  %v10847_v55 = vpack.c.bf16 %v16147_v16, %v16146_v61  ;;  %v16159_v53 = vand.u32 4294901760, %v10246_v15  ;;  %v16164_v12 = vand.u32 4294901760, %v10277_v54 }
  0x83   : > { %8390 = vmatpush1.bf16.msra.mxu0 %v8389_v29  ;;  %v8403_v29 = vpack.c.bf16 %v10337_v43, %v10335_v2  ;;  %860 = vmatprep.mubr.f32.mxu0 %v16120_v23  ;;  %v10865_v61 = vpack.c.bf16 %v16153_v41, %v16152_v40  ;;  %v16166_v15 = vand.u32 4294901760, %v10294_v60  ;;  %v16171_v54 = vand.u32 4294901760, %v10331_v0 }
  0x84   : > { %8392 = vmatprep.subr.bf16.mxu0 %v8391_v4  ;;  %1581 = vmatmul.mubr.f32.vlgmr.msra.gmra.mrb[0].mxu1 %v16141_v31  ;;  %v16142_v4 = vand.u32 4294901760, %v16138_v52  ;;  %v16145_v31 = vand.u32 4294901760, %v16140_v24  ;;  %v16148_v52 = vand.u32 4294901760, %v10172_v42  ;;  %v16151_v24 = vand.u32 4294901760, %v10195_v51 }
  0x85   : > { %8582 = vmatpush1.bf16.msra.mxu1 %v8581_v20  ;;  %1715 = vmatprep.mubr.f32.mxu1 %v16120_v23  ;;  %v16154_v42 = vand.u32 4294901760, %v10211_v63  ;;  %v16158_v20 = vand.u32 4294901760, %v10244_v14  ;;  %v16161_v63 = vand.u32 4294901760, %v10258_v36  ;;  %v16165_v14 = vand.u32 4294901760, %v10290_v58 }
  0x86   : > { %v10834_v38 = vpack.c.bf16 %v16143_v34, %v16142_v4  ;;  %v10841_v17 = vpack.c.bf16 %v16145_v31, %v16144_v18  ;;  %v16149_v34 = vand.u32 4294901760, %v10185_v47  ;;  %8584 = vmatprep.subr.bf16.mxu1 %v8583_v59  ;;  %v10859_v18 = vpack.c.bf16 %v16151_v24, %v16150_v26  ;;  %v16174_v24 = vld [vmem:[#allocation28_spill] sm:$0xff] }
  0x87   : > { %8394 = vmatpush1.bf16.msra.mxu0 %v8393_v6  ;;  %v16155_v47 = vand.u32 4294901760, %v10224_v5  ;;  %v16156_v31 = vand.u32 4294901760, %v10228_v7  ;;  %v10883_v62 = vpack.c.bf16 %v16159_v53, %v16158_v20  ;;  %v16160_v59 = vand.u32 4294901760, %v10256_v35  ;;  %v16184_v53 = vld [vmem:[#allocation35_spill] sm:$0xff] }
  0x88   : > { %v10853_v13 = vpack.c.bf16 %v16149_v34, %v16148_v52  ;;  %8396 = vmatprep.subr.bf16.mxu0 %v8395_v39  ;;  %v16162_v6 = vand.u32 4294901760, %v10271_v45  ;;  %v16163_v7 = vand.u32 4294901760, %v10273_v50  ;;  %v10901_v4 = vpack.c.bf16 %v16165_v14, %v16164_v12  ;;  %v16192_v14 = vld [vmem:[#allocation39_spill] sm:$0xff] }
  0x89   : > { %v10871_v16 = vpack.c.bf16 %v16155_v47, %v16154_v42  ;;  %v10877_v51 = vpack.c.bf16 %v16157_v49, %v16156_v31  ;;  %v10889_v5 = vpack.c.bf16 %v16161_v63, %v16160_v59  ;;  %v16167_v35 = vand.u32 4294901760, %v10297_v1  ;;  %8586 = vmatpush1.bf16.msra.mxu1 %v8585_v21  ;;  %v16178_v42 = vld [vmem:[#allocation32_spill] sm:$0xff]  ;;  %v16180_v31 = vld [vmem:[#allocation33_spill] sm:$0xff] }
  0x8a   : > { %v10895_v39 = vpack.c.bf16 %v16163_v7, %v16162_v6  ;;  %v16168_v36 = vand.u32 4294901760, %v10303_v8  ;;  %v16169_v45 = vand.u32 4294901760, %v10316_v32  ;;  %v16170_v50 = vand.u32 4294901760, %v10320_v9  ;;  %v16176_v8 = vld [vmem:[#allocation30_spill] sm:$0xff]  ;;  %8588 = vmatprep.subr.bf16.mxu1 %v8587_v28 }
  0x8b   : > { %v10907_v52 = vpack.c.bf16 %v16167_v35, %v16166_v15  ;;  %v16172_v58 = vand.u32 4294901760, %v10335_v2  ;;  %v16173_v60 = vand.u32 4294901760, %v10337_v43  ;;  %v16175_v40 = vand.u32 4294901760, %v16174_v24  ;;  %8398 = vmatpush1.bf16.msra.mxu0 %v8397_v19  ;;  %v16187_v43 = vld [vmem:[#allocation37_spill] sm:$0xff]  ;;  %v16189_v6 = vld [vmem:[#allocation38_spill] sm:$0xff] }
  0x8c   : > { %v10913_v34 = vpack.c.bf16 %v16169_v45, %v16168_v36  ;;  %v10919_v26 = vpack.c.bf16 %v16171_v54, %v16170_v50  ;;  %v16177_v41 = vand.u32 4294901760, %v16176_v8  ;;  %v16179_v47 = vand.u32 4294901760, %v16178_v42  ;;  %v16194_v35 = vld [vmem:[#allocation41_spill] sm:$0xff]  ;;  %v16198_v54 = vld [vmem:[#allocation44_spill] sm:$0xff]  ;;  %8400 = vmatprep.subr.bf16.mxu0 %v8399_v48  ;;  %v16201_v28 = vld [vmem:[#allocation46_spill] sm:$0xff] }
  0x8d   : > { %v10925_v1 = vpack.c.bf16 %v16173_v60, %v16172_v58  ;;  %v16181_v49 = vand.u32 4294901760, %v16180_v31  ;;  %v16183_v21 = vand.u32 4294901760, %v10371_v3  ;;  %v16185_v2 = vand.u32 4294901760, %v16184_v53  ;;  %8590 = vmatpush1.bf16.msra.mxu1 %v8589_v30 }
  0x8e   : > { %v10931_v32 = vpack.c.bf16 %v16177_v41, %v16175_v40  ;;  %v16188_v63 = vand.u32 4294901760, %v16187_v43  ;;  %v16190_v7 = vand.u32 4294901760, %v16189_v6  ;;  %v16193_v15 = vand.u32 4294901760, %v16192_v14  ;;  %v16203_v40 = vld [vmem:[#allocation47_spill] sm:$0xff]  ;;  %8592 = vmatprep.subr.bf16.mxu1 %v8591_v27 }
  0x8f   : > { %v10937_v20 = vpack.c.bf16 %v16181_v49, %v16179_v47  ;;  %v10943_v59 = vpack.c.bf16 %v16185_v2, %v16183_v21  ;;  %v16195_v36 = vand.u32 4294901760, %v16194_v35  ;;  %v16197_v50 = vand.u32 4294901760, %v16126_v22  ;;  %v16206_v49 = vld [vmem:[#allocation49_spill] sm:$0xff]  ;;  %v16208_v2 = vld [vmem:[#allocation50_spill] sm:$0xff]  ;;  %8402 = vmatpush1.bf16.msra.mxu0 %v8401_v33 }
  0x90   : > { %v10949_v12 = vpack.c.bf16 %v16190_v7, %v16188_v63  ;;  %v16199_v58 = vand.u32 4294901760, %v16198_v54  ;;  %v16202_v19 = vand.u32 4294901760, %v16201_v28  ;;  %v16204_v41 = vand.u32 4294901760, %v16203_v40  ;;  %8404 = vmatprep.subr.bf16.mxu0 %v8403_v29 }
  0x91   : > { %16182 = vst [vmem:[#allocation43_spill] sm:$0xff] %v10937_v20  ;;  %16186 = vst [vmem:[#allocation53_spill] sm:$0xff] %v10943_v59  ;;  %v10955_v45 = vpack.c.bf16 %v16195_v36, %v16193_v15  ;;  %v16207_v21 = vand.u32 4294901760, %v16206_v49  ;;  %v16209_v63 = vand.u32 4294901760, %v16208_v2  ;;  %v16211_v15 = vld [vmem:[#allocation51_spill] sm:$0xff]  ;;  %v16215_v48 = vand.u32 4294901760, %v16133_v10 }
  0x92   : > { %16191 = vst [vmem:[#allocation55_spill] sm:$0xff] %v10949_v12  ;;  %v10961_v60 = vpack.c.bf16 %v16199_v58, %v16197_v50  ;;  %v10967_v47 = vpack.c.bf16 %v16204_v41, %v16202_v19  ;;  %v16212_v36 = vand.u32 4294901760, %v16211_v15  ;;  %v16216_v50 = vld [vmem:[#allocation56_spill] sm:$0xff]  ;;  %v16219_v19 = vand.u32 4294901760, %v16134_v46 }
  0x93   : > { %16196 = vst [vmem:[#allocation58_spill] sm:$0xff] %v10955_v45  ;;  %v10973_v7 = vpack.c.bf16 %v16209_v63, %v16207_v21  ;;  %v16213_v45 = vand.u32 4294901760, %v16132_v44  ;;  %v16217_v58 = vand.u32 4294901760, %v16216_v50  ;;  %v16220_v41 = vand.u32 4294901760, %v16135_v25 }
  0x94   : > { %16200 = vst [vmem:[#allocation59_spill] sm:$0xff] %v10961_v60  ;;  %16205 = vst [vmem:[#allocation61_spill] sm:$0xff] %v10967_v47  ;;  %v16222_v21 = vand.u32 4294901760, %v16136_v57  ;;  %v16223_v63 = vand.u32 4294901760, %v16137_v56  ;;  %v8407_v30 = vpack.c.bf16 %v16189_v6, %v16187_v43  ;;  %v8409_v27 = vpack.c.bf16 %v16198_v54, %v16126_v22  ;;  %v16243_v43 = vld [vmem:[#allocation19_spill] sm:$0xff]  ;;  %v16244_v6 = vld [vmem:[#allocation18_spill] sm:$0xff] }
  0x95   : > { %16210 = vst [vmem:[#allocation62_spill] sm:$0xff] %v10973_v7  ;;  %v10979_v59 = vpack.c.bf16 %v16213_v45, %v16212_v36  ;;  %v10985_v60 = vpack.c.bf16 %v16217_v58, %v16215_v48  ;;  %v10991_v47 = vpack.c.bf16 %v16220_v41, %v16219_v19  ;;  %v16225_v45 = vand.u32 4294901760, %v10502_v11  ;;  %v16226_v36 = vld [vmem:[#allocation64_spill] sm:$0xff]  ;;  %v16229_v58 = vld [vmem:[#allocation66_spill] sm:$0xff]  ;;  %v16247_v54 = vld [vmem:[#allocation23_spill] sm:$0xff] }
  0x96   : > { %v10997_v7 = vpack.c.bf16 %v16223_v63, %v16222_v21  ;;  %v16228_v48 = vand.u32 4294901760, %v10512_v37  ;;  %v8593_v19 = vpack.c.bf16 %v10331_v0, %v10320_v9  ;;  %v16231_v41 = vld [vmem:[#allocation68_spill] sm:$0xff]  ;;  %v16233_v21 = vld [vmem:[#allocation69_spill] sm:$0xff]  ;;  %v8597_v9 = vpack.c.bf16 %v16184_v53, %v10371_v3 }
  0x97   : > { %16214 = vst [vmem:[#allocation9_spill] sm:$0xff] %v10979_v59  ;;  %16218 = vst [vmem:[#allocation11_spill] sm:$0xff] %v10985_v60  ;;  %v16227_v59 = vand.u32 4294901760, %v16226_v36  ;;  %v16230_v60 = vand.u32 4294901760, %v16229_v58  ;;  %v16234_v63 = vand.u32 4294901760, %v16233_v21  ;;  %v8599_v0 = vpack.c.bf16 %v16194_v35, %v16192_v14  ;;  %v16242_v53 = vld [vmem:[#allocation17_spill] sm:$0xff] }
  0x98   : > { %16221 = vst [vmem:[#allocation13_spill] sm:$0xff] %v10991_v47  ;;  %16224 = vst [vmem:[#allocation28_spill] sm:$0xff] %v10997_v7  ;;  %v16232_v47 = vand.u32 4294901760, %v16231_v41  ;;  %8594 = vmatpush1.bf16.msra.mxu1 %v8593_v19  ;;  %v8411_v33 = vpack.c.bf16 %v16208_v2, %v16206_v49  ;;  %v8601_v29 = vpack.c.bf16 %v16203_v40, %v16201_v28  ;;  %v16245_v14 = vld [vmem:[#allocation20_spill] sm:$0xff]  ;;  %v16246_v35 = vld [vmem:[#allocation21_spill] sm:$0xff] }
  0x99   : > { %v11003_v12 = vpack.c.bf16 %v16227_v59, %v16225_v45  ;;  %v11009_v20 = vpack.c.bf16 %v16230_v60, %v16228_v48  ;;  %v8595_v59 = vpack.c.bf16 %v16176_v8, %v16174_v24  ;;  %v8405_v45 = vpack.c.bf16 %v16180_v31, %v16178_v42  ;;  %v16248_v60 = vld [vmem:[#allocation22_spill] sm:$0xff]  ;;  %v16249_v28 = vld [vmem:[#allocation24_spill] sm:$0xff]  ;;  %v16250_v40 = vld [vmem:[#allocation25_spill] sm:$0xff] }
  0x9a   : > { %v11017_v7 = vpack.c.bf16 %v16234_v63, %v16232_v47  ;;  %v8603_v3 = vpack.c.bf16 %v16132_v44, %v16211_v15  ;;  %v8413_v24 = vpack.c.bf16 %v16216_v50, %v16133_v10  ;;  %v8415_v22 = vpack.c.bf16 %v16137_v56, %v16136_v57  ;;  %v16235_v10 = vld [vmem:[#allocation6_spill] sm:$0xff]  ;;  %v16236_v57 = vld [vmem:[#allocation71_spill] sm:$0xff]  ;;  %v16241_v56 = vld [vmem:[#allocation16_spill] sm:$0xff] }
  0x9b   : > { %8596 = vmatprep.subr.bf16.mxu1 %v8595_v59  ;;  %8406 = vmatpush1.bf16.msra.mxu0 %v8405_v45  ;;  %v8605_v8 = vpack.c.bf16 %v16135_v25, %v16134_v46  ;;  %v8607_v42 = vpack.c.bf16 %v16226_v36, %v10502_v11  ;;  %v8417_v31 = vpack.c.bf16 %v16229_v58, %v10512_v37  ;;  %v16237_v25 = vld [vmem:[#allocation10_spill] sm:$0xff]  ;;  %v16238_v46 = vld [vmem:[#allocation12_spill] sm:$0xff]  ;;  %v16239_v11 = vld [vmem:[#allocation15_spill] sm:$0xff] }
  0x9c   : > { %8408 = vmatprep.subr.bf16.mxu0 %v8407_v30  ;;  %8598 = vmatpush1.bf16.msra.mxu1 %v8597_v9  ;;  %v8609_v44 = vpack.c.bf16 %v16233_v21, %v16231_v41  ;;  %v16240_v37 = vld [vmem:[#allocation14_spill] sm:$0xff]  ;;  %v16251_v47 = vld [vmem:[#allocation27_spill] sm:$0xff]  ;;  %v16253_v2 = vld [vmem:[#allocation29_spill] sm:$0xff] }
  0x9d   : > { %8600 = vmatprep.subr.bf16.mxu1 %v8599_v0  ;;  %v16252_v49 = vld [vmem:[#allocation26_spill] sm:$0xff]  ;;  %v16254_v15 = vld [vmem:[#allocation31_spill] sm:$0xff]  ;;  %v16255_v50 = vld [vmem:[#allocation36_spill] sm:$0xff] }
  0x9e   : > { %v16256_v36 = vld [vmem:[#allocation34_spill] sm:$0xff]  ;;  %v16257_v48 = vld [vmem:[#allocation40_spill] sm:$0xff]  ;;  %v16260_v41 = vld [vmem:[#allocation45_spill] sm:$0xff] }
  0x9f   : > { %8410 = vmatpush1.bf16.msra.mxu0 %v8409_v27  ;;  %v16258_v58 = vld [vmem:[#allocation42_spill] sm:$0xff]  ;;  %v16259_v19 = vld [vmem:[#allocation48_spill] sm:$0xff]  ;;  %v16264_v45 = vld [vmem:[#allocation7_spill] sm:$0xff] }
  0xa0   : > { %8412 = vmatprep.subr.bf16.mxu0 %v8411_v33  ;;  %8602 = vmatpush1.bf16.msra.mxu1 %v8601_v29  ;;  %v16261_v21 = vld [vmem:[#allocation52_spill] sm:$0xff]  ;;  %v16262_v63 = vld [vmem:[#allocation54_spill] sm:$0xff]  ;;  %v16265_v30 = vand.u32 4294901760, %v16264_v45  ;;  %v16268_v33 = vld [vmem:[#allocation57_spill] sm:$0xff] }
  0xa1   : > { %8604 = vmatprep.subr.bf16.mxu1 %v8603_v3  ;;  %v16263_v59 = vld [vmem:[#allocation60_spill] sm:$0xff]  ;;  %v16269_v29 = vld [vmem:[#allocation63_spill] sm:$0xff]  ;;  %v16270_v3 = vld [vmem:[#allocation65_spill] sm:$0xff] }
  0xa2   : > { %v16266_v9 = vld [vmem:[#allocation8_spill] sm:$0xff] }
  0xa3   : > { %8414 = vmatpush1.bf16.msra.mxu0 %v8413_v24  ;;  %v16267_v0 = vand.u32 4294901760, %v16266_v9  ;;  %v16271_v24 = vld [vmem:[#allocation67_spill] sm:$0xff] }
  0xa4   : > { %8416 = vmatprep.subr.bf16.mxu0 %v8415_v22  ;;  %8606 = vmatpush1.bf16.msra.mxu1 %v8605_v8  ;;  %v16272_v22 = vld [vmem:[#allocation72_spill] sm:$0xff]  ;;  %v251_v8 = vld [vmem:[%s15438_s1 + $0xe8] sm:$0xff]  ;;  %v253_v9 = vld [vmem:[%s15438_s1 + $0xf8] sm:$0xff] }
  0xa5   : > { %8608 = vmatprep.subr.bf16.mxu1 %v8607_v42  ;;  %v8451_v27 = vpack.c.bf16 %v16267_v0, %v16265_v30  ;;  %v16274_v42 = vld [vmem:[#allocation55_spill] sm:$0xff]  ;;  %v16277_v0 = vld [vmem:[#allocation53_spill] sm:$0xff] }
  0xa6   : > { %v245_v30 = vld [vmem:[%s15438_s1 + $0xb8] sm:$0xff] }
  0xa7   : > { %8418 = vmatpush1.bf16.msra.mxu0 %v8417_v31 }
  0xa8   : > { %8420 = vmatprep.subr.bf16.mxu0 %v16235_v10  ;;  %8610 = vmatpush1.bf16.msra.mxu1 %v8609_v44 }
  0xa9   : > { %8612 = vmatprep.subr.bf16.mxu1 %v16237_v25 }
  0xaa   : > { %863 = vmatmul.mubr.f32.vlgmr.msra.gmra.mrb[0].mxu0 %v16236_v57 }
  0xab   : > { %8422 = vmatpush1.bf16.msra.mxu0 %v16238_v46  ;;  %965 = vmatprep.mubr.f32.mxu0 %v16120_v23 }
  0xac   : > { %8424 = vmatprep.subr.bf16.mxu0 %v16239_v11  ;;  %1718 = vmatmul.mubr.f32.vlgmr.msra.gmra.mrb[0].mxu1 %v16236_v57  ;;  %v16280_v57 = vld [vmem:[#allocation58_spill] sm:$0xff] }
  0xad   : > { %8614 = vmatpush1.bf16.msra.mxu1 %v16240_v37  ;;  %1820 = vmatprep.mubr.f32.mxu1 %v16120_v23 }
  0xae   : > { %8616 = vmatprep.subr.bf16.mxu1 %v16241_v56 }
  0xaf   : > { %8426 = vmatpush1.bf16.msra.mxu0 %v16242_v53 }
  0xb0   : > { %8428 = vmatprep.subr.bf16.mxu0 %v16243_v43 }
  0xb1   : > { %8618 = vmatpush1.bf16.msra.mxu1 %v16244_v6 }
  0xb2   : > { %8620 = vmatprep.subr.bf16.mxu1 %v16245_v14 }
  0xb3   : > { %8430 = vmatpush1.bf16.msra.mxu0 %v16246_v35 }
  0xb4   : > { %8432 = vmatprep.subr.bf16.mxu0 %v16247_v54 }
  0xb5   : > { %8622 = vmatpush1.bf16.msra.mxu1 %v16248_v60 }
  0xb6   : > { %8624 = vmatprep.subr.bf16.mxu1 %v16249_v28 }
  0xb7   : > { %8434 = vmatpush1.bf16.msra.mxu0 %v16250_v40 }
  0xb8   : > { %8436 = vmatprep.subr.bf16.mxu0 %v16251_v47 }
  0xb9   : > { %8626 = vmatpush1.bf16.msra.mxu1 %v16252_v49 }
  0xba   : > { %8628 = vmatprep.subr.bf16.mxu1 %v16253_v2 }
  0xbb   : > { %8438 = vmatpush1.bf16.msra.mxu0 %v16254_v15 }
  0xbc   : > { %8440 = vmatprep.subr.bf16.mxu0 %v16255_v50 }
  0xbd   : > { %8630 = vmatpush1.bf16.msra.mxu1 %v16256_v36 }
  0xbe   : > { %8632 = vmatprep.subr.bf16.mxu1 %v16257_v48 }
  0xbf   : > { %8442 = vmatpush1.bf16.msra.mxu0 %v16258_v58 }
  0xc0   : > { %8444 = vmatprep.subr.bf16.mxu0 %v16259_v19 }
  0xc1   : > { %8634 = vmatpush1.bf16.msra.mxu1 %v16260_v41 }
  0xc2   : > { %8636 = vmatprep.subr.bf16.mxu1 %v16261_v21  ;;  %v16297_v21 = vld [vmem:[#allocation28_spill] sm:$0xff] }
  0xc3   : > { %8446 = vmatpush1.bf16.msra.mxu0 %v16262_v63  ;;  %v261_v63 = vld [vmem:[%s15438_s1 + $0x138] sm:$0xff] }
  0xc4   : > { %8448 = vmatprep.subr.bf16.mxu0 %v16263_v59 }
  0xc5   : > { %8638 = vmatpush1.bf16.msra.mxu1 %v16268_v33 }
  0xc6   : > { %8640 = vmatprep.subr.bf16.mxu1 %v16269_v29 }
  0xc7   : > { %8450 = vmatpush1.bf16.msra.mxu0 %v16270_v3  ;;  %v16285_v3 = vld [vmem:[#allocation62_spill] sm:$0xff] }
  0xc8   : > { %8452 = vmatprep.subr.bf16.mxu0 %v8451_v27 }
  0xc9   : > { %8642 = vmatpush1.bf16.msra.mxu1 %v16271_v24  ;;  %v16281_v24 = vld [vmem:[#allocation59_spill] sm:$0xff] }
  0xca   : > { %969 = vmatmul.mubr.f32.vlgmr.msra.gmra.mrb[0].mxu0 %v16272_v22  ;;  %8644 = vmatprep.subr.bf16.mxu1 %v10834_v38  ;;  %v229_v38 = vld [vmem:[%s15438_s1 + $0x38] sm:$0xff] }
  0xcb   : > { %8454 = vmatpush1.bf16.msra.mxu0 %v10841_v17  ;;  %1135 = vmatprep.mubr.f32.mxu0 %v16120_v23  ;;  %v227_v17 = vld [vmem:[%s15438_s1 + $0x28] sm:$0xff] }
  0xcc   : > { %8456 = vmatprep.subr.bf16.mxu0 %v10853_v13  ;;  %1824 = vmatmul.mubr.f32.vlgmr.msra.gmra.mrb[0].mxu1 %v16272_v22  ;;  %v237_v13 = vld [vmem:[%s15438_s1 + $0x78] sm:$0xff]  ;;  %v2114_v22 = vand.u32 4294901760, %v251_v8 }
  0xcd   : > { %8646 = vmatpush1.bf16.msra.mxu1 %v10847_v55  ;;  %1990 = vmatprep.mubr.f32.mxu1 %v16120_v23  ;;  %v235_v55 = vld [vmem:[%s15438_s1 + $0x68] sm:$0xff] }
  0xce   : > { %8648 = vmatprep.subr.bf16.mxu1 %v10859_v18  ;;  %v226_v18 = vld [vmem:[%s15438_s1 + $0x20] sm:$0xff] }
  0xcf   : > { %8458 = vmatpush1.bf16.msra.mxu0 %v10865_v61  ;;  %v234_v61 = vld [vmem:[%s15438_s1 + $0x60] sm:$0xff] }
  0xd0   : > { %8460 = vmatprep.subr.bf16.mxu0 %v10877_v51  ;;  %v2106_v51 = vand.u32 4294901760, %v235_v55 }
  0xd1   : > { %8650 = vmatpush1.bf16.msra.mxu1 %v10871_v16  ;;  %v2102_v16 = vand.u32 4294901760, %v227_v17 }
  0xd2   : > { %8652 = vmatprep.subr.bf16.mxu1 %v10883_v62  ;;  %v2957_v62 = vand.u32 4294901760, %v229_v38  ;;  %v11153_v27 = vsub.f32 %v235_v55, %v2106_v51 }
  0xd3   : > { %8462 = vmatpush1.bf16.msra.mxu0 %v10889_v5  ;;  %v2961_v5 = vand.u32 4294901760, %v237_v13  ;;  %v11142_v31 = vpack.c.bf16 %v2106_v51, %v2102_v16  ;;  %v11144_v44 = vsub.f32 %v227_v17, %v2102_v16  ;;  %v242_v17 = vld [vmem:[%s15438_s1 + $0xa0] sm:$0xff] }
  0xd4   : > { %8464 = vmatprep.subr.bf16.mxu0 %v10901_v4  ;;  %v236_v4 = vld [vmem:[%s15438_s1 + $0x70] sm:$0xff]  ;;  %16278 = vst [vmem:[#allocation33_spill] sm:$0xff] %v11153_v27  ;;  %v250_v16 = vld [vmem:[%s15438_s1 + $0xe0] sm:$0xff]  ;;  %v2112_v33 = vand.u32 4294901760, %v242_v17 }
  0xd5   : > { %8654 = vmatpush1.bf16.msra.mxu1 %v10895_v39  ;;  %v228_v39 = vld [vmem:[%s15438_s1 + $0x30] sm:$0xff]  ;;  %16275 = vst [vmem:[#allocation30_spill] sm:$0xff] %v11142_v31  ;;  %16276 = vst [vmem:[#allocation32_spill] sm:$0xff] %v11144_v44  ;;  %v11165_v31 = vsub.f32 %v229_v38, %v2957_v62  ;;  %v11167_v55 = vsub.f32 %v237_v13, %v2961_v5  ;;  %v2969_v38 = vand.u32 4294901760, %v253_v9  ;;  %v259_v13 = vld [vmem:[%s15438_s1 + $0x128] sm:$0xff] }
  0xd6   : > { %8656 = vmatprep.subr.bf16.mxu1 %v10907_v52  ;;  %v16273_v52 = vld [vmem:[#allocation43_spill] sm:$0xff]  ;;  %v2959_v45 = vand.u32 4294901760, %v228_v39 }
  0xd7   : > { %8466 = vmatpush1.bf16.msra.mxu0 %v10913_v34  ;;  %v2104_v34 = vand.u32 4294901760, %v226_v18  ;;  %16282 = vst [vmem:[#allocation37_spill] sm:$0xff] %v11165_v31  ;;  %16283 = vst [vmem:[#allocation38_spill] sm:$0xff] %v11167_v55 }
  0xd8   : > { %8468 = vmatprep.subr.bf16.mxu0 %v10925_v1  ;;  %v2108_v1 = vand.u32 4294901760, %v234_v61 }
  0xd9   : > { %8658 = vmatpush1.bf16.msra.mxu1 %v10919_v26  ;;  %v243_v26 = vld [vmem:[%s15438_s1 + $0xa8] sm:$0xff]  ;;  %v11178_v29 = vsub.f32 %v226_v18, %v2104_v34 }
  0xda   : > { %8660 = vmatprep.subr.bf16.mxu1 %v10931_v32  ;;  %v2963_v32 = vand.u32 4294901760, %v236_v4  ;;  %v11169_v51 = vpack.c.bf16 %v2108_v1, %v2104_v34  ;;  %v16290_v18 = vld [vmem:[#allocation61_spill] sm:$0xff] }
  0xdb   : > { %8470 = vmatpush1.bf16.msra.mxu0 %v16273_v52  ;;  %v11155_v52 = vpack.c.bf16 %v2961_v5, %v2957_v62  ;;  %16286 = vst [vmem:[#allocation41_spill] sm:$0xff] %v11178_v29  ;;  %v267_v62 = vld [vmem:[%s15438_s1 + $0x168] sm:$0xff] }
  0xdc   : > { %8472 = vmatprep.subr.bf16.mxu0 %v16274_v42  ;;  %v2110_v42 = vand.u32 4294901760, %v243_v26  ;;  %16284 = vst [vmem:[#allocation39_spill] sm:$0xff] %v11169_v51  ;;  %v11188_v5 = vpack.c.bf16 %v2963_v32, %v2959_v45  ;;  %v11190_v51 = vsub.f32 %v228_v39, %v2959_v45  ;;  %v16293_v39 = vld [vmem:[#allocation9_spill] sm:$0xff]  ;;  %v16294_v45 = vld [vmem:[#allocation11_spill] sm:$0xff] }
  0xdd   : > { %8662 = vmatpush1.bf16.msra.mxu1 %v16277_v0  ;;  %16279 = vst [vmem:[#allocation35_spill] sm:$0xff] %v11155_v52  ;;  %v244_v0 = vld [vmem:[%s15438_s1 + $0xb0] sm:$0xff] }
  0xde   : > { %8664 = vmatprep.subr.bf16.mxu1 %v16280_v57  ;;  %v252_v52 = vld [vmem:[%s15438_s1 + $0xf0] sm:$0xff]  ;;  %v11180_v57 = vsub.f32 %v234_v61, %v2108_v1  ;;  %16288 = vst [vmem:[#allocation46_spill] sm:$0xff] %v11188_v5  ;;  %16289 = vst [vmem:[#allocation47_spill] sm:$0xff] %v11190_v51  ;;  %v11193_v61 = vsub.f32 %v236_v4, %v2963_v32  ;;  %v11195_v34 = vpack.c.bf16 %v2114_v22, %v2110_v42  ;;  %v269_v5 = vld [vmem:[%s15438_s1 + $0x178] sm:$0xff] }
  0xdf   : > { %8474 = vmatpush1.bf16.msra.mxu0 %v16281_v24  ;;  %v2965_v24 = vand.u32 4294901760, %v245_v30  ;;  %v2967_v1 = vand.u32 4294901760, %v244_v0  ;;  %v2971_v59 = vand.u32 4294901760, %v252_v52  ;;  %v11205_v51 = vsub.f32 %v243_v26, %v2110_v42  ;;  %v268_v42 = vld [vmem:[%s15438_s1 + $0x170] sm:$0xff] }
  0xe0   : > { %8476 = vmatprep.subr.bf16.mxu0 %v16285_v3  ;;  %16287 = vst [vmem:[#allocation44_spill] sm:$0xff] %v11180_v57  ;;  %v2116_v3 = vand.u32 4294901760, %v250_v16  ;;  %16291 = vst [vmem:[#allocation49_spill] sm:$0xff] %v11193_v61  ;;  %v11207_v4 = vsub.f32 %v251_v8, %v2114_v22  ;;  %v2118_v32 = vand.u32 4294901760, %v259_v13  ;;  %v266_v61 = vld [vmem:[%s15438_s1 + $0x160] sm:$0xff]  ;;  %v11220_v26 = vsub.f32 %v253_v9, %v2969_v38  ;;  %v260_v8 = vld [vmem:[%s15438_s1 + $0x130] sm:$0xff] }
  0xe1   : > { %8666 = vmatpush1.bf16.msra.mxu1 %v16290_v18  ;;  %16292 = vst [vmem:[#allocation50_spill] sm:$0xff] %v11195_v34  ;;  %16295 = vst [vmem:[#allocation51_spill] sm:$0xff] %v11205_v51  ;;  %v2122_v18 = vand.u32 4294901760, %v267_v62  ;;  %v258_v34 = vld [vmem:[%s15438_s1 + $0x120] sm:$0xff]  ;;  %v11216_v57 = vpack.c.bf16 %v2969_v38, %v2965_v24  ;;  %v11222_v22 = vsub.f32 %v242_v17, %v2112_v33  ;;  %v283_v9 = vld [vmem:[%s15438_s1 + $0x1e8] sm:$0xff] }
  0xe2   : > { %8668 = vmatprep.subr.bf16.mxu1 %v16293_v39  ;;  %16296 = vst [vmem:[#allocation56_spill] sm:$0xff] %v11207_v4  ;;  %v11218_v39 = vsub.f32 %v245_v30, %v2965_v24  ;;  %16300 = vst [vmem:[#allocation68_spill] sm:$0xff] %v11220_v26  ;;  %v11232_v4 = vsub.f32 %v250_v16, %v2116_v3  ;;  %v275_v30 = vld [vmem:[%s15438_s1 + $0x1a8] sm:$0xff]  ;;  %v11241_v24 = vpack.c.bf16 %v2971_v59, %v2967_v1 }
  0xe3   : > { %8478 = vmatpush1.bf16.msra.mxu0 %v16294_v45  ;;  %16298 = vst [vmem:[#allocation64_spill] sm:$0xff] %v11216_v57  ;;  %16301 = vst [vmem:[#allocation69_spill] sm:$0xff] %v11222_v22  ;;  %v11230_v45 = vpack.c.bf16 %v2116_v3, %v2112_v33  ;;  %v2977_v57 = vand.u32 4294901760, %v269_v5  ;;  %v16304_v17 = vld [vmem:[#allocation13_spill] sm:$0xff]  ;;  %v11243_v38 = vsub.f32 %v244_v0, %v2967_v1  ;;  %v2120_v33 = vand.u32 4294901760, %v258_v34  ;;  %v285_v0 = vld [vmem:[%s15438_s1 + $0x1f8] sm:$0xff] }
  0xe4   : > { %8480 = vmatprep.subr.bf16.mxu0 %v16297_v21  ;;  %16299 = vst [vmem:[#allocation66_spill] sm:$0xff] %v11218_v39  ;;  %16303 = vst [vmem:[#allocation10_spill] sm:$0xff] %v11232_v4  ;;  %v2973_v21 = vand.u32 4294901760, %v261_v63  ;;  %v11247_v16 = vsub.f32 %v252_v52, %v2971_v59  ;;  %v11249_v3 = vpack.c.bf16 %v2122_v18, %v2118_v32  ;;  %v2975_v4 = vand.u32 4294901760, %v260_v8  ;;  %v274_v52 = vld [vmem:[%s15438_s1 + $0x1a0] sm:$0xff] }
  0xe5   : > { %16302 = vst [vmem:[#allocation6_spill] sm:$0xff] %v11230_v45  ;;  %8670 = vmatpush1.bf16.msra.mxu1 %v16304_v17  ;;  %16305 = vst [vmem:[#allocation12_spill] sm:$0xff] %v11241_v24  ;;  %v2124_v45 = vand.u32 4294901760, %v266_v61  ;;  %v2979_v22 = vand.u32 4294901760, %v268_v42  ;;  %v277_v17 = vld [vmem:[%s15438_s1 + $0x1b8] sm:$0xff]  ;;  %v11258_v1 = vsub.f32 %v259_v13, %v2118_v32  ;;  %v2130_v59 = vand.u32 4294901760, %v283_v9 }
  0xe6   : > { %16306 = vst [vmem:[#allocation15_spill] sm:$0xff] %v11243_v38  ;;  %8672 = vmatprep.subr.bf16.mxu1 %v11003_v12  ;;  %16307 = vst [vmem:[#allocation14_spill] sm:$0xff] %v11247_v16  ;;  %v11260_v12 = vsub.f32 %v267_v62, %v2122_v18  ;;  %v282_v24 = vld [vmem:[%s15438_s1 + $0x1e0] sm:$0xff]  ;;  %v11270_v16 = vsub.f32 %v261_v63, %v2973_v21  ;;  %v11272_v38 = vsub.f32 %v269_v5, %v2977_v57  ;;  %v276_v13 = vld [vmem:[%s15438_s1 + $0x1b0] sm:$0xff] }
  0xe7   : > { %8482 = vmatpush1.bf16.msra.mxu0 %v11009_v20  ;;  %16308 = vst [vmem:[#allocation16_spill] sm:$0xff] %v11249_v3  ;;  %16309 = vst [vmem:[#allocation17_spill] sm:$0xff] %v11258_v1  ;;  %v2126_v20 = vand.u32 4294901760, %v275_v30  ;;  %v11268_v3 = vpack.c.bf16 %v2977_v57, %v2973_v21  ;;  %v284_v62 = vld [vmem:[%s15438_s1 + $0x1f0] sm:$0xff]  ;;  %v11284_v18 = vpack.c.bf16 %v2124_v45, %v2120_v33  ;;  %v2981_v57 = vand.u32 4294901760, %v277_v17  ;;  %v299_v21 = vld [vmem:[%s15438_s1 + $0x268] sm:$0xff] }
  0xe8   : > { %8484 = vmatprep.subr.bf16.mxu0 %v16235_v10  ;;  %16310 = vst [vmem:[#allocation19_spill] sm:$0xff] %v11260_v12  ;;  %16312 = vst [vmem:[#allocation20_spill] sm:$0xff] %v11270_v16  ;;  %v11274_v10 = vsub.f32 %v258_v34, %v2120_v33  ;;  %v16315_v32 = vld [vmem:[#allocation70_spill] sm:$0xff]  ;;  %v11286_v63 = vsub.f32 %v266_v61, %v2124_v45  ;;  %v2985_v5 = vand.u32 4294901760, %v285_v0  ;;  %v291_v34 = vld [vmem:[%s15438_s1 + $0x228] sm:$0xff]  ;;  %v2128_v61 = vand.u32 4294901760, %v274_v52 }
  0xe9   : > { %16311 = vst [vmem:[#allocation18_spill] sm:$0xff] %v11268_v3  ;;  %16313 = vst [vmem:[#allocation21_spill] sm:$0xff] %v11272_v38  ;;  %8674 = vmatpush1.bf16.msra.mxu1 %v11017_v7  ;;  %v11296_v7 = vpack.c.bf16 %v2979_v22, %v2975_v4  ;;  %v11298_v33 = vsub.f32 %v260_v8, %v2975_v4  ;;  %v2132_v45 = vand.u32 4294901760, %v282_v24  ;;  %v2138_v8 = vand.u32 4294901760, %v299_v21 }
  0xea   : > { %16314 = vst [vmem:[#allocation23_spill] sm:$0xff] %v11274_v10  ;;  %1137 = vmatmul.mubr.f32.vlgmr.msra.gmra.mrb[0].mxu0 %v16315_v32  ;;  %16316 = vst [vmem:[#allocation22_spill] sm:$0xff] %v11284_v18  ;;  %8676 = vmatprep.subr.bf16.mxu1 %v16237_v25  ;;  %v11302_v18 = vsub.f32 %v268_v42, %v2979_v22  ;;  %v11304_v3 = vpack.c.bf16 %v2130_v59, %v2126_v20  ;;  %v2987_v10 = vand.u32 4294901760, %v284_v62  ;;  %v293_v25 = vld [vmem:[%s15438_s1 + $0x238] sm:$0xff] }
  0xeb   : > { %16317 = vst [vmem:[#allocation24_spill] sm:$0xff] %v11286_v63  ;;  %8486 = vmatpush1.bf16.msra.mxu0 %v16238_v46  ;;  %16318 = vst [vmem:[#allocation25_spill] sm:$0xff] %v11296_v7  ;;  %1239 = vmatprep.mubr.f32.mxu0 %v16120_v23  ;;  %v2983_v63 = vand.u32 4294901760, %v276_v13  ;;  %v301_v46 = vld [vmem:[%s15438_s1 + $0x278] sm:$0xff]  ;;  %v11313_v4 = vsub.f32 %v275_v30, %v2126_v20  ;;  %v2134_v22 = vand.u32 4294901760, %v291_v34  ;;  %v298_v30 = vld [vmem:[%s15438_s1 + $0x260] sm:$0xff] }
  0xec   : > { %16319 = vst [vmem:[#allocation27_spill] sm:$0xff] %v11298_v33  ;;  %8488 = vmatprep.subr.bf16.mxu0 %v16239_v11  ;;  %16320 = vst [vmem:[#allocation26_spill] sm:$0xff] %v11302_v18  ;;  %1992 = vmatmul.mubr.f32.vlgmr.msra.gmra.mrb[0].mxu1 %v16315_v32  ;;  %v11315_v11 = vsub.f32 %v283_v9, %v2130_v59  ;;  %v11319_v42 = vpack.c.bf16 %v2985_v5, %v2981_v57  ;;  %v290_v18 = vld [vmem:[%s15438_s1 + $0x220] sm:$0xff]  ;;  %v2993_v20 = vand.u32 4294901760, %v301_v46  ;;  %v300_v59 = vld [vmem:[%s15438_s1 + $0x270] sm:$0xff] }
  0xed   : > { %16321 = vst [vmem:[#allocation29_spill] sm:$0xff] %v11304_v3  ;;  %16322 = vst [vmem:[#allocation31_spill] sm:$0xff] %v11313_v4  ;;  %8678 = vmatpush1.bf16.msra.mxu1 %v16240_v37  ;;  %2094 = vmatprep.mubr.f32.mxu1 %v16120_v23  ;;  %v11321_v7 = vsub.f32 %v277_v17, %v2981_v57  ;;  %v11323_v3 = vsub.f32 %v285_v0, %v2985_v5  ;;  %v292_v37 = vld [vmem:[%s15438_s1 + $0x230] sm:$0xff]  ;;  %v2989_v0 = vand.u32 4294901760, %v293_v25  ;;  %v307_v57 = vld [vmem:[%s15438_s1 + $0x2a8] sm:$0xff] }
  0xee   : > { %16323 = vst [vmem:[#allocation36_spill] sm:$0xff] %v11315_v11  ;;  %16324 = vst [vmem:[#allocation34_spill] sm:$0xff] %v11319_v42  ;;  %8680 = vmatprep.subr.bf16.mxu1 %v16241_v56  ;;  %v11336_v9 = vpack.c.bf16 %v2132_v45, %v2128_v61  ;;  %v11338_v17 = vsub.f32 %v274_v52, %v2128_v61  ;;  %v315_v56 = vld [vmem:[%s15438_s1 + $0x2e8] sm:$0xff]  ;;  %v11352_v52 = vpack.c.bf16 %v2987_v10, %v2983_v63 }
  0xef   : > { %16325 = vst [vmem:[#allocation40_spill] sm:$0xff] %v11321_v7  ;;  %16326 = vst [vmem:[#allocation42_spill] sm:$0xff] %v11323_v3  ;;  %8490 = vmatpush1.bf16.msra.mxu0 %v16242_v53  ;;  %v11350_v53 = vsub.f32 %v282_v24, %v2132_v45  ;;  %v11354_v5 = vsub.f32 %v276_v13, %v2983_v63  ;;  %v11356_v61 = vsub.f32 %v284_v62, %v2987_v10  ;;  %v306_v63 = vld [vmem:[%s15438_s1 + $0x2a0] sm:$0xff] }
  0xf0   : > { %16327 = vst [vmem:[#allocation48_spill] sm:$0xff] %v11336_v9  ;;  %16328 = vst [vmem:[#allocation45_spill] sm:$0xff] %v11338_v17  ;;  %8492 = vmatprep.subr.bf16.mxu0 %v16243_v43  ;;  %v11358_v17 = vpack.c.bf16 %v2138_v8, %v2134_v22  ;;  %v11360_v3 = vsub.f32 %v291_v34, %v2134_v22  ;;  %v2136_v7 = vand.u32 4294901760, %v290_v18  ;;  %v2140_v11 = vand.u32 4294901760, %v298_v30  ;;  %v309_v9 = vld [vmem:[%s15438_s1 + $0x2b8] sm:$0xff]  ;;  %v314_v34 = vld [vmem:[%s15438_s1 + $0x2e0] sm:$0xff] }
  0xf1   : > { %16329 = vst [vmem:[#allocation7_spill] sm:$0xff] %v11350_v53  ;;  %16330 = vst [vmem:[#allocation8_spill] sm:$0xff] %v11352_v52  ;;  %v317_v43 = vld [vmem:[%s15438_s1 + $0x2f8] sm:$0xff]  ;;  %8682 = vmatpush1.bf16.msra.mxu1 %v16244_v6  ;;  %v2991_v24 = vand.u32 4294901760, %v292_v37  ;;  %v2995_v13 = vand.u32 4294901760, %v300_v59  ;;  %v2142_v10 = vand.u32 4294901760, %v307_v57  ;;  %v11377_v45 = vsub.f32 %v299_v21, %v2138_v8 }
  0xf2   : > { %16331 = vst [vmem:[#allocation43_spill] sm:$0xff] %v11354_v5  ;;  %16332 = vst [vmem:[#allocation55_spill] sm:$0xff] %v11356_v61  ;;  %v2146_v62 = vand.u32 4294901760, %v315_v56  ;;  %8684 = vmatprep.subr.bf16.mxu1 %v16245_v14  ;;  %v11379_v22 = vpack.c.bf16 %v2993_v20, %v2989_v0  ;;  %v11381_v6 = vsub.f32 %v293_v25, %v2989_v0  ;;  %v2997_v5 = vand.u32 4294901760, %v309_v9  ;;  %v308_v14 = vld [vmem:[%s15438_s1 + $0x2b0] sm:$0xff] }
  0xf3   : > { %16333 = vst [vmem:[#allocation53_spill] sm:$0xff] %v11358_v17  ;;  %16334 = vst [vmem:[#allocation58_spill] sm:$0xff] %v11360_v3  ;;  %8494 = vmatpush1.bf16.msra.mxu0 %v16246_v35  ;;  %v11384_v3 = vsub.f32 %v301_v46, %v2993_v20  ;;  %v11386_v61 = vsub.f32 %v290_v18, %v2136_v7  ;;  %v3001_v53 = vand.u32 4294901760, %v317_v43  ;;  %v316_v35 = vld [vmem:[%s15438_s1 + $0x2f0] sm:$0xff]  ;;  %v2144_v8 = vand.u32 4294901760, %v306_v63  ;;  %v323_v18 = vld [vmem:[%s15438_s1 + $0x328] sm:$0xff] }
  0xf4   : > { %16335 = vst [vmem:[#allocation59_spill] sm:$0xff] %v11377_v45  ;;  %16336 = vst [vmem:[#allocation62_spill] sm:$0xff] %v11379_v22  ;;  %8496 = vmatprep.subr.bf16.mxu0 %v16247_v54  ;;  %v11394_v21 = vpack.c.bf16 %v2140_v11, %v2136_v7  ;;  %v11396_v25 = vsub.f32 %v298_v30, %v2140_v11  ;;  %v2148_v54 = vand.u32 4294901760, %v314_v34  ;;  %v331_v46 = vld [vmem:[%s15438_s1 + $0x368] sm:$0xff]  ;;  %v325_v30 = vld [vmem:[%s15438_s1 + $0x338] sm:$0xff] }
  0xf5   : > { %8686 = vmatpush1.bf16.msra.mxu1 %v16248_v60  ;;  %v11405_v0 = vpack.c.bf16 %v2995_v13, %v2991_v24  ;;  %v11407_v20 = vsub.f32 %v292_v37, %v2991_v24  ;;  %v11409_v7 = vsub.f32 %v300_v59, %v2995_v13  ;;  %v11411_v11 = vpack.c.bf16 %v2146_v62, %v2142_v10  ;;  %v333_v45 = vld [vmem:[%s15438_s1 + $0x378] sm:$0xff]  ;;  %v322_v60 = vld [vmem:[%s15438_s1 + $0x320] sm:$0xff] }
  0xf6   : > { %16337 = vst [vmem:[#allocation61_spill] sm:$0xff] %v11394_v21  ;;  %8688 = vmatprep.subr.bf16.mxu1 %v16249_v28  ;;  %v11424_v37 = vsub.f32 %v307_v57, %v2142_v10  ;;  %v11426_v59 = vsub.f32 %v315_v56, %v2146_v62  ;;  %v2999_v24 = vand.u32 4294901760, %v308_v14  ;;  %v3003_v13 = vand.u32 4294901760, %v316_v35  ;;  %v332_v28 = vld [vmem:[%s15438_s1 + $0x370] sm:$0xff] }
  0xf7   : > { %16338 = vst [vmem:[#allocation9_spill] sm:$0xff] %v11405_v0  ;;  %16339 = vst [vmem:[#allocation11_spill] sm:$0xff] %v11407_v20  ;;  %8498 = vmatpush1.bf16.msra.mxu0 %v16250_v40  ;;  %v330_v0 = vld [vmem:[%s15438_s1 + $0x360] sm:$0xff]  ;;  %v11438_v40 = vpack.c.bf16 %v3001_v53, %v2997_v5  ;;  %v11440_v57 = vsub.f32 %v309_v9, %v2997_v5  ;;  %v2150_v56 = vand.u32 4294901760, %v323_v18  ;;  %v2154_v10 = vand.u32 4294901760, %v331_v46 }
  0xf8   : > { %16340 = vst [vmem:[#allocation28_spill] sm:$0xff] %v11409_v7  ;;  %16341 = vst [vmem:[#allocation13_spill] sm:$0xff] %v11411_v11  ;;  %v324_v11 = vld [vmem:[%s15438_s1 + $0x330] sm:$0xff]  ;;  %8500 = vmatprep.subr.bf16.mxu0 %v16251_v47  ;;  %v11442_v62 = vsub.f32 %v317_v43, %v3001_v53  ;;  %v3009_v21 = vand.u32 4294901760, %v333_v45  ;;  %v2152_v22 = vand.u32 4294901760, %v322_v60  ;;  %v2156_v52 = vand.u32 4294901760, %v330_v0 }
  0xf9   : > { %16342 = vst [vmem:[#allocation74_spill] sm:$0xff] %v11424_v37  ;;  %16343 = vst [vmem:[#allocation75_spill] sm:$0xff] %v11426_v59  ;;  %v11444_v59 = vpack.c.bf16 %v2148_v54, %v2144_v8  ;;  %v3005_v37 = vand.u32 4294901760, %v325_v30  ;;  %8690 = vmatpush1.bf16.msra.mxu1 %v16252_v49  ;;  %v3007_v7 = vand.u32 4294901760, %v324_v11  ;;  %v3011_v20 = vand.u32 4294901760, %v332_v28 }
  0xfa   : > { %16344 = vst [vmem:[#allocation76_spill] sm:$0xff] %v11438_v40  ;;  %16345 = vst [vmem:[#allocation77_spill] sm:$0xff] %v11440_v57  ;;  %8692 = vmatprep.subr.bf16.mxu1 %v16253_v2  ;;  %v11449_v47 = vsub.f32 %v306_v63, %v2144_v8  ;;  %v11451_v9 = vsub.f32 %v314_v34, %v2148_v54  ;;  %v11453_v53 = vpack.c.bf16 %v3003_v13, %v2999_v24  ;;  %v339_v2 = vld [vmem:[%s15438_s1 + $0x3a8] sm:$0xff] }
  0xfb   : > { %16346 = vst [vmem:[#allocation78_spill] sm:$0xff] %v11444_v59  ;;  %8502 = vmatpush1.bf16.msra.mxu0 %v16254_v15  ;;  %v11456_v5 = vsub.f32 %v308_v14, %v2999_v24  ;;  %v11458_v43 = vsub.f32 %v316_v35, %v3003_v13  ;;  %v11460_v49 = vpack.c.bf16 %v2154_v10, %v2150_v56  ;;  %v347_v15 = vld [vmem:[%s15438_s1 + $0x3e8] sm:$0xff] }
  0xfc   : > { %16347 = vst [vmem:[#allocation79_spill] sm:$0xff] %v11451_v9  ;;  %16348 = vst [vmem:[#allocation80_spill] sm:$0xff] %v11453_v53  ;;  %8504 = vmatprep.subr.bf16.mxu0 %v16255_v50  ;;  %v11462_v59 = vsub.f32 %v323_v18, %v2150_v56  ;;  %v11470_v63 = vsub.f32 %v331_v46, %v2154_v10  ;;  %v11472_v34 = vpack.c.bf16 %v3009_v21, %v3005_v37  ;;  %v341_v46 = vld [vmem:[%s15438_s1 + $0x3b8] sm:$0xff] }
  0xfd   : > { %16349 = vst [vmem:[#allocation81_spill] sm:$0xff] %v11456_v5  ;;  %16350 = vst [vmem:[#allocation82_spill] sm:$0xff] %v11458_v43  ;;  %v11474_v50 = vsub.f32 %v325_v30, %v3005_v37  ;;  %v11476_v14 = vsub.f32 %v333_v45, %v3009_v21  ;;  %8694 = vmatpush1.bf16.msra.mxu1 %v16256_v36  ;;  %v11479_v35 = vpack.c.bf16 %v2156_v52, %v2152_v22  ;;  %v349_v30 = vld [vmem:[%s15438_s1 + $0x3f8] sm:$0xff]  ;;  %v338_v36 = vld [vmem:[%s15438_s1 + $0x3a0] sm:$0xff] }
  0xfe   : > { %16351 = vst [vmem:[#allocation83_spill] sm:$0xff] %v11460_v49  ;;  %16352 = vst [vmem:[#allocation84_spill] sm:$0xff] %v11462_v59  ;;  %v11481_v8 = vsub.f32 %v322_v60, %v2152_v22  ;;  %v11483_v54 = vsub.f32 %v330_v0, %v2156_v52  ;;  %v11485_v18 = vpack.c.bf16 %v3011_v20, %v3007_v7  ;;  %8696 = vmatprep.subr.bf16.mxu1 %v16257_v48  ;;  %v346_v0 = vld [vmem:[%s15438_s1 + $0x3e0] sm:$0xff]  ;;  %v340_v60 = vld [vmem:[%s15438_s1 + $0x3b0] sm:$0xff] }
  0xff   : > { %16353 = vst [vmem:[#allocation85_spill] sm:$0xff] %v11470_v63  ;;  %16354 = vst [vmem:[#allocation86_spill] sm:$0xff] %v11472_v34  ;;  %8506 = vmatpush1.bf16.msra.mxu0 %v16258_v58  ;;  %v11498_v52 = vsub.f32 %v324_v11, %v3007_v7  ;;  %v11500_v45 = vsub.f32 %v332_v28, %v3011_v20  ;;  %v2158_v22 = vand.u32 4294901760, %v339_v2  ;;  %v2162_v21 = vand.u32 4294901760, %v347_v15  ;;  %v348_v48 = vld [vmem:[%s15438_s1 + $0x3f0] sm:$0xff]  ;;  %v16363_v58 = vld [vmem:[#allocation52_spill] sm:$0xff] }
 0x100   : > { %16355 = vst [vmem:[#allocation87_spill] sm:$0xff] %v11474_v50  ;;  %16356 = vst [vmem:[#allocation88_spill] sm:$0xff] %v11479_v35  ;;  %8508 = vmatprep.subr.bf16.mxu0 %v16259_v19  ;;  %v3013_v24 = vand.u32 4294901760, %v341_v46  ;;  %v3017_v13 = vand.u32 4294901760, %v349_v30  ;;  %v2160_v28 = vand.u32 4294901760, %v338_v36  ;;  %v2164_v19 = vand.u32 4294901760, %v346_v0 }
 0x101   : > { %16357 = vst [vmem:[#allocation89_spill] sm:$0xff] %v11483_v54  ;;  %16358 = vst [vmem:[#allocation90_spill] sm:$0xff] %v11485_v18  ;;  %v11516_v37 = vsub.f32 %v339_v2, %v2158_v22  ;;  %8698 = vmatpush1.bf16.msra.mxu1 %v16260_v41  ;;  %v3015_v56 = vand.u32 4294901760, %v340_v60  ;;  %v16362_v18 = vld [vmem:[#allocation44_spill] sm:$0xff]  ;;  %v16364_v20 = vld [vmem:[#allocation54_spill] sm:$0xff]  ;;  %v11523_v7 = vpack.c.bf16 %v2162_v21, %v2158_v22  ;;  %v3019_v11 = vand.u32 4294901760, %v348_v48 }
 0x102   : > { %16359 = vst [vmem:[#allocation91_spill] sm:$0xff] %v11498_v52  ;;  %16360 = vst [vmem:[#allocation92_spill] sm:$0xff] %v11500_v45  ;;  %8700 = vmatprep.subr.bf16.mxu1 %v16363_v58  ;;  %v16366_v2 = vld [vmem:[#allocation47_spill] sm:$0xff]  ;;  %v16367_v34 = vld [vmem:[#allocation49_spill] sm:$0xff]  ;;  %v16369_v41 = vand.u32 4294901760, %v11144_v44  ;;  %v16370_v10 = vand.u32 4294901760, %v11153_v27  ;;  %v11542_v53 = vpack.c.bf16 %v3017_v13, %v3013_v24  ;;  %v11546_v54 = vsub.f32 %v349_v30, %v3017_v13 }
 0x103   : > { %16361 = vst [vmem:[#allocation93_spill] sm:$0xff] %v11516_v37  ;;  %8510 = vmatpush1.bf16.msra.mxu0 %v16364_v20  ;;  %16365 = vst [vmem:[#allocation52_spill] sm:$0xff] %v11523_v7  ;;  %v16368_v45 = vld [vmem:[#allocation60_spill] sm:$0xff]  ;;  %v16371_v58 = vand.u32 4294901760, %v11165_v31  ;;  %v16372_v20 = vand.u32 4294901760, %v11167_v55  ;;  %v11540_v7 = vsub.f32 %v347_v15, %v2162_v21  ;;  %v16378_v21 = vld [vmem:[#allocation63_spill] sm:$0xff]  ;;  %v11560_v30 = vsub.f32 %v338_v36, %v2160_v28 }
 0x104   : > { %8512 = vmatprep.subr.bf16.mxu0 %v16368_v45  ;;  %v2213_v52 = vsub.f32 %v11144_v44, %v16369_v41  ;;  %v2225_v35 = vsub.f32 %v11153_v27, %v16370_v10  ;;  %16373 = vst [vmem:[#allocation54_spill] sm:$0xff] %v11542_v53  ;;  %v11544_v45 = vsub.f32 %v341_v46, %v3013_v24  ;;  %v16374_v41 = vld [vmem:[#allocation57_spill] sm:$0xff]  ;;  %v16376_v10 = vand.u32 4294901760, %v11178_v29  ;;  %v16385_v27 = vld [vmem:[#allocation67_spill] sm:$0xff] }
 0x105   : > { %v3068_v22 = vsub.f32 %v11165_v31, %v16371_v58  ;;  %v3080_v37 = vsub.f32 %v11167_v55, %v16372_v20  ;;  %8702 = vmatpush1.bf16.msra.mxu1 %v16374_v41  ;;  %v11549_v44 = vpack.c.bf16 %v2164_v19, %v2160_v28  ;;  %v16377_v31 = vand.u32 4294901760, %v16362_v18  ;;  %v16379_v46 = vld [vmem:[#allocation65_spill] sm:$0xff] }
 0x106   : > { %v2219_v58 = vsub.f32 %v11178_v29, %v16376_v10  ;;  %8704 = vmatprep.subr.bf16.mxu1 %v16378_v21  ;;  %v16380_v24 = vand.u32 4294901760, %v16366_v2  ;;  %v16381_v41 = vand.u32 4294901760, %v16367_v34  ;;  %v16382_v29 = vld [vmem:[#allocation56_spill] sm:$0xff]  ;;  %v2214_v15 = vand.u32 4294901760, %v2213_v52 }
 0x107   : > { %16375 = vst [vmem:[#allocation60_spill] sm:$0xff] %v11549_v44  ;;  %v2231_v20 = vsub.f32 %v16362_v18, %v16377_v31  ;;  %8514 = vmatpush1.bf16.msra.mxu0 %v16379_v46  ;;  %v16383_v18 = vld [vmem:[#allocation30_spill] sm:$0xff]  ;;  %v2226_v21 = vand.u32 4294901760, %v2225_v35  ;;  %v3069_v55 = vand.u32 4294901760, %v3068_v22  ;;  %v3081_v46 = vand.u32 4294901760, %v3080_v37  ;;  %v16388_v37 = vld [vmem:[#allocation39_spill] sm:$0xff] }
 0x108   : > { %v11565_v13 = vsub.f32 %v16366_v2, %v16380_v24  ;;  %v11570_v10 = vsub.f32 %v16367_v34, %v16381_v41  ;;  %8708 = vmatprep.subr.bf16.mxu0 %v16383_v18  ;;  %v11574_v36 = vsub.f32 %v346_v0, %v2164_v19  ;;  %v11576_v28 = vpack.c.bf16 %v3019_v11, %v3015_v56  ;;  %v16387_v0 = vld [vmem:[#allocation35_spill] sm:$0xff]  ;;  %v16404_v24 = vld [vmem:[#allocation24_spill] sm:$0xff] }
 0x109   : > { %8706 = vmatpush1.bf16.msra.mxu1 %v16385_v27  ;;  %v11582_v41 = vsub.f32 %v340_v60, %v3015_v56  ;;  %v2220_v31 = vand.u32 4294901760, %v2219_v58  ;;  %v2232_v18 = vand.u32 4294901760, %v2231_v20  ;;  %v16386_v35 = vand.u32 4294901760, %v11205_v51  ;;  %v16390_v56 = vld [vmem:[#allocation50_spill] sm:$0xff] }
 0x10a   : > { %16384 = vst [vmem:[#allocation57_spill] sm:$0xff] %v11576_v28  ;;  %1241 = vmatmul.mubr.f32.vlgmr.msra.gmra.mrb[0].mxu0 %v16315_v32  ;;  %8900 = vmatprep.subr.bf16.mxu1 %v16387_v0  ;;  %v11589_v19 = vsub.f32 %v348_v48, %v3019_v11  ;;  %v3075_v22 = vand.u32 4294901760, %v11565_v13  ;;  %v3087_v27 = vand.u32 4294901760, %v11570_v10  ;;  %v16389_v2 = vand.u32 4294901760, %v16382_v29  ;;  %v16392_v48 = vld [vmem:[#allocation10_spill] sm:$0xff] }
 0x10b   : > { %v2237_v52 = vsub.f32 %v11205_v51, %v16386_v35  ;;  %8710 = vmatpush1.bf16.msra.mxu0 %v16388_v37  ;;  %2198 = vmatprep.mubr.f32.mxu0 %v16120_v23  ;;  %v11598_v58 = vpack.c.bf16 %v2226_v21, %v2214_v15  ;;  %v11600_v20 = vpack.c.bf16 %v3081_v46, %v3069_v55  ;;  %v16391_v35 = vld [vmem:[#allocation69_spill] sm:$0xff]  ;;  %v16393_v13 = vand.u32 4294901760, %v11218_v39  ;;  %v16395_v37 = vld [vmem:[#allocation15_spill] sm:$0xff]  ;;  %v16396_v15 = vld [vmem:[#allocation14_spill] sm:$0xff] }
 0x10c   : > { %v2249_v60 = vsub.f32 %v16382_v29, %v16389_v2  ;;  %8712 = vmatprep.subr.bf16.mxu0 %v16390_v56  ;;  %2096 = vmatmul.mubr.f32.vlgmr.msra.gmra.mrb[0].mxu1 %v16315_v32  ;;  %v16394_v2 = vand.u32 4294901760, %v11220_v26  ;;  %v16397_v55 = vld [vmem:[#allocation46_spill] sm:$0xff]  ;;  %v11615_v46 = vpack.c.bf16 %v2232_v18, %v2220_v31  ;;  %v16401_v32 = vld [vmem:[#allocation16_spill] sm:$0xff]  ;;  %v16402_v18 = vand.u32 4294901760, %v16391_v35 }
 0x10d   : > { %v3092_v10 = vsub.f32 %v11218_v39, %v16393_v13  ;;  %8902 = vmatpush1.bf16.msra.mxu1 %v16397_v55  ;;  %3053 = vmatprep.mubr.f32.mxu1 %v16120_v23  ;;  %v2238_v11 = vand.u32 4294901760, %v2237_v52  ;;  %v16398_v13 = vld [vmem:[#allocation64_spill] sm:$0xff]  ;;  %v16399_v39 = vld [vmem:[#allocation6_spill] sm:$0xff]  ;;  %v16403_v52 = vand.u32 4294901760, %v16392_v48  ;;  %v16405_v55 = vand.u32 4294901760, %v16395_v37 }
 0x10e   : > { %v3104_v56 = vsub.f32 %v11220_v26, %v16394_v2  ;;  %8904 = vmatprep.subr.bf16.mxu1 %v16398_v13  ;;  %v2250_v2 = vand.u32 4294901760, %v2249_v60  ;;  %v16400_v26 = vld [vmem:[#allocation23_spill] sm:$0xff]  ;;  %v11628_v31 = vsub.f32 %v16391_v35, %v16402_v18  ;;  %v16406_v13 = vand.u32 4294901760, %v16396_v15  ;;  %v16407_v35 = vld [vmem:[#allocation12_spill] sm:$0xff]  ;;  %v16410_v0 = vld [vmem:[#allocation26_spill] sm:$0xff] }
 0x10f   : > { %8714 = vmatpush1.bf16.msra.mxu0 %v16399_v39  ;;  %v11633_v34 = vsub.f32 %v16392_v48, %v16403_v52  ;;  %v3093_v39 = vand.u32 4294901760, %v3092_v10  ;;  %v16408_v52 = vand.u32 4294901760, %v11258_v1  ;;  %v16409_v10 = vand.u32 4294901760, %v11260_v12  ;;  %v16411_v48 = vld [vmem:[#allocation18_spill] sm:$0xff] }
 0x110   : > { %8716 = vmatprep.subr.bf16.mxu0 %v16401_v32  ;;  %v3105_v21 = vand.u32 4294901760, %v3104_v56  ;;  %v11640_v32 = vsub.f32 %v16395_v37, %v16405_v55  ;;  %v11645_v18 = vsub.f32 %v16396_v15, %v16406_v13  ;;  %v16412_v13 = vld [vmem:[#allocation22_spill] sm:$0xff]  ;;  %v16416_v37 = vld [vmem:[#allocation29_spill] sm:$0xff] }
 0x111   : > { %8906 = vmatpush1.bf16.msra.mxu1 %v16407_v35  ;;  %v11651_v60 = vsub.f32 %v11258_v1, %v16408_v52  ;;  %v11656_v56 = vsub.f32 %v11260_v12, %v16409_v10  ;;  %v16413_v35 = vand.u32 4294901760, %v11270_v16  ;;  %v16414_v52 = vand.u32 4294901760, %v11272_v38 }
 0x112   : > { %8908 = vmatprep.subr.bf16.mxu1 %v16411_v48  ;;  %v16415_v10 = vand.u32 4294901760, %v16400_v26  ;;  %v11678_v48 = vpack.c.bf16 %v3087_v27, %v3075_v22  ;;  %v16418_v12 = vand.u32 4294901760, %v16404_v24  ;;  %v16421_v27 = vld [vmem:[#allocation25_spill] sm:$0xff] }
 0x113   : > { %8718 = vmatpush1.bf16.msra.mxu0 %v16412_v13  ;;  %v11665_v15 = vsub.f32 %v11270_v16, %v16413_v35  ;;  %v11670_v1 = vsub.f32 %v11272_v38, %v16414_v52  ;;  %v11680_v13 = vpack.c.bf16 %v2250_v2, %v2238_v11  ;;  %v16419_v16 = vand.u32 4294901760, %v11298_v33  ;;  %v16431_v22 = vld [vmem:[#allocation61_spill] sm:$0xff]  ;;  %v16432_v11 = vld [vmem:[#allocation40_spill] sm:$0xff] }
 0x114   : > { %v11675_v55 = vsub.f32 %v16400_v26, %v16415_v10  ;;  %8720 = vmatprep.subr.bf16.mxu0 %v16416_v37  ;;  %16417 = vst [vmem:[#allocation63_spill] sm:$0xff] %v11678_v48  ;;  %v11685_v35 = vsub.f32 %v16404_v24, %v16418_v12  ;;  %v11692_v38 = vpack.c.bf16 %v3105_v21, %v3093_v39  ;;  %v16422_v2 = vand.u32 4294901760, %v16410_v0  ;;  %v16424_v21 = vld [vmem:[#allocation48_spill] sm:$0xff]  ;;  %v16433_v26 = vld [vmem:[#allocation42_spill] sm:$0xff]  ;;  %v16445_v12 = vld [vmem:[#allocation45_spill] sm:$0xff] }
 0x115   : > { %v11690_v52 = vsub.f32 %v11298_v33, %v16419_v16  ;;  %8910 = vmatpush1.bf16.msra.mxu1 %v16421_v27  ;;  %v16423_v39 = vand.u32 4294901760, %v11313_v4  ;;  %v16425_v27 = vld [vmem:[#allocation11_spill] sm:$0xff]  ;;  %v16427_v33 = vld [vmem:[#allocation8_spill] sm:$0xff]  ;;  %v16434_v37 = vand.u32 4294901760, %v11386_v61 }
 0x116   : > { %16420 = vst [vmem:[#allocation65_spill] sm:$0xff] %v11692_v38  ;;  %v11703_v24 = vsub.f32 %v16410_v0, %v16422_v2  ;;  %8912 = vmatprep.subr.bf16.mxu1 %v11319_v42  ;;  %v15736_v42 = vand.u32 4294901760, %v11384_v3  ;;  %v16426_v0 = vld [vmem:[#allocation28_spill] sm:$0xff]  ;;  %v16435_v2 = vand.u32 4294901760, %v11396_v25  ;;  %v16437_v10 = vand.u32 4294901760, %v16425_v27 }
 0x117   : > { %v11708_v16 = vsub.f32 %v11313_v4, %v16423_v39  ;;  %8722 = vmatpush1.bf16.msra.mxu0 %v16424_v21  ;;  %v15737_v39 = vand.u32 4294901760, %v11381_v6  ;;  %v16430_v21 = vld [vmem:[#allocation62_spill] sm:$0xff]  ;;  %v16438_v51 = vand.u32 4294901760, %v16426_v0 }
 0x118   : > { %8724 = vmatprep.subr.bf16.mxu0 %v11358_v17  ;;  %v16428_v17 = vld [vmem:[#allocation36_spill] sm:$0xff]  ;;  %v11743_v29 = vpack.c.bf16 %v16435_v2, %v16434_v37  ;;  %v16449_v37 = vand.u32 4294901760, %v11440_v57  ;;  %v16450_v2 = vand.u32 4294901760, %v11442_v62 }
 0x119   : > { %8914 = vmatpush1.bf16.msra.mxu1 %v16427_v33  ;;  %v11733_v4 = vpack.c.bf16 %v15736_v42, %v15737_v39  ;;  %v11749_v42 = vpack.c.bf16 %v16438_v51, %v16437_v10  ;;  %v16440_v39 = vld [vmem:[#allocation13_spill] sm:$0xff]  ;;  %v16444_v10 = vand.u32 4294901760, %v16428_v17 }
 0x11a   : > { %8916 = vmatprep.subr.bf16.mxu1 %v16430_v21  ;;  %16436 = vst [vmem:[#allocation11_spill] sm:$0xff] %v11743_v29  ;;  %v16442_v21 = vld [vmem:[#allocation75_spill] sm:$0xff]  ;;  %v16443_v51 = vld [vmem:[#allocation9_spill] sm:$0xff]  ;;  %v11777_v29 = vpack.c.bf16 %v16450_v2, %v16449_v37  ;;  %v16458_v37 = vand.u32 4294901760, %v11456_v5  ;;  %v16459_v2 = vand.u32 4294901760, %v11458_v43  ;;  %v16471_v5 = vand.u32 4294901760, %v11476_v14 }
 0x11b   : > { %16429 = vst [vmem:[#allocation67_spill] sm:$0xff] %v11733_v4  ;;  %8726 = vmatpush1.bf16.msra.mxu0 %v16431_v22  ;;  %16439 = vst [vmem:[#allocation28_spill] sm:$0xff] %v11749_v42  ;;  %v16441_v4 = vld [vmem:[#allocation74_spill] sm:$0xff]  ;;  %v11764_v22 = vsub.f32 %v16428_v17, %v16444_v10  ;;  %v16447_v38 = vand.u32 4294901760, %v16442_v21  ;;  %v16453_v10 = vand.u32 4294901760, %v16432_v11  ;;  %v16467_v17 = vand.u32 4294901760, %v11462_v59 }
 0x11c   : > { %8728 = vmatprep.subr.bf16.mxu0 %v16440_v39  ;;  %v16446_v33 = vand.u32 4294901760, %v16441_v4  ;;  %16451 = vst [vmem:[#allocation75_spill] sm:$0xff] %v11777_v29  ;;  %v16454_v39 = vld [vmem:[#allocation7_spill] sm:$0xff]  ;;  %v11797_v29 = vpack.c.bf16 %v16459_v2, %v16458_v37  ;;  %v16464_v37 = vld [vmem:[#allocation80_spill] sm:$0xff]  ;;  %v16465_v2 = vand.u32 4294901760, %v16433_v26  ;;  %v16473_v43 = vld [vmem:[#allocation86_spill] sm:$0xff] }
 0x11d   : > { %8918 = vmatpush1.bf16.msra.mxu1 %v16443_v51  ;;  %v16452_v51 = vld [vmem:[#allocation78_spill] sm:$0xff]  ;;  %v11784_v42 = vsub.f32 %v16432_v11, %v16453_v10  ;;  %v16476_v59 = vand.u32 4294901760, %v11481_v8 }
 0x11e   : > { %v11771_v48 = vpack.c.bf16 %v16447_v38, %v16446_v33  ;;  %8920 = vmatprep.subr.bf16.mxu1 %v11438_v40  ;;  %v16455_v38 = vand.u32 4294901760, %v11449_v47  ;;  %v16456_v33 = vand.u32 4294901760, %v11451_v9  ;;  %16460 = vst [vmem:[#allocation95_spill] sm:$0xff] %v11797_v29  ;;  %v16463_v9 = vld [vmem:[#allocation92_spill] sm:$0xff]  ;;  %v16466_v29 = vld [vmem:[#allocation43_spill] sm:$0xff]  ;;  %v16468_v40 = vand.u32 4294901760, %v11470_v63 }
 0x11f   : > { %8730 = vmatpush1.bf16.msra.mxu0 %v16452_v51  ;;  %v3152_v51 = vsub.f32 %v16433_v26, %v16465_v2  ;;  %v2298_v2 = vand.u32 4294901760, %v11764_v22  ;;  %v16475_v26 = vld [vmem:[#allocation55_spill] sm:$0xff]  ;;  %v16486_v22 = vand.u32 4294901760, %v16454_v39 }
 0x120   : > { %16448 = vst [vmem:[#allocation74_spill] sm:$0xff] %v11771_v48  ;;  %v11791_v48 = vpack.c.bf16 %v16456_v33, %v16455_v38  ;;  %8732 = vmatprep.subr.bf16.mxu0 %v11460_v49  ;;  %v16461_v38 = vld [vmem:[#allocation89_spill] sm:$0xff]  ;;  %v11817_v49 = vpack.c.bf16 %v16468_v40, %v16467_v17  ;;  %v16470_v33 = vand.u32 4294901760, %v11474_v50 }
 0x121   : > { %8922 = vmatpush1.bf16.msra.mxu1 %v16464_v37  ;;  %v16474_v37 = vld [vmem:[#allocation88_spill] sm:$0xff]  ;;  %v16477_v63 = vand.u32 4294901760, %v16461_v38  ;;  %v2303_v10 = vsub.f32 %v16454_v39, %v16486_v22  ;;  %v16488_v38 = vand.u32 4294901760, %v11540_v7  ;;  %v16495_v39 = vand.u32 4294901760, %v11560_v30 }
 0x122   : > { %16457 = vst [vmem:[#allocation94_spill] sm:$0xff] %v11791_v48  ;;  %v16462_v48 = vld [vmem:[#allocation91_spill] sm:$0xff]  ;;  %v11823_v11 = vpack.c.bf16 %v16471_v5, %v16470_v33  ;;  %8924 = vmatprep.subr.bf16.mxu1 %v16473_v43  ;;  %v16482_v33 = vld [vmem:[#allocation52_spill] sm:$0xff] }
 0x123   : > { %16469 = vst [vmem:[#allocation91_spill] sm:$0xff] %v11817_v49  ;;  %8734 = vmatpush1.bf16.msra.mxu0 %v16474_v37  ;;  %v11833_v17 = vpack.c.bf16 %v16477_v63, %v16476_v59  ;;  %v16479_v40 = vand.u32 4294901760, %v16462_v48  ;;  %v16480_v49 = vand.u32 4294901760, %v16463_v9  ;;  %v16490_v63 = vand.u32 4294901760, %v11544_v45 }
 0x124   : > { %16472 = vst [vmem:[#allocation92_spill] sm:$0xff] %v11823_v11  ;;  %8736 = vmatprep.subr.bf16.mxu0 %v16482_v33  ;;  %v16483_v11 = vld [vmem:[#allocation93_spill] sm:$0xff]  ;;  %v16503_v33 = vand.u32 4294901760, %v11640_v32  ;;  %v3141_v32 = vand.u32 4294901760, %v11784_v42 }
 0x125   : > { %16478 = vst [vmem:[#allocation55_spill] sm:$0xff] %v11833_v17  ;;  %v11839_v5 = vpack.c.bf16 %v16480_v49, %v16479_v40  ;;  %v16484_v49 = vld [vmem:[#allocation90_spill] sm:$0xff]  ;;  %v16485_v40 = vand.u32 4294901760, %v16445_v12  ;;  %v16487_v43 = vand.u32 4294901760, %v16483_v11  ;;  %v16491_v17 = vand.u32 4294901760, %v11546_v54 }
 0x126   : > { %8926 = vmatpush1.bf16.msra.mxu1 %v16484_v49  ;;  %v16494_v49 = vld [vmem:[#allocation58_spill] sm:$0xff] }
 0x127   : > { %16481 = vst [vmem:[#allocation96_spill] sm:$0xff] %v11839_v5  ;;  %v2291_v37 = vsub.f32 %v16445_v12, %v16485_v40  ;;  %v11861_v5 = vpack.c.bf16 %v16488_v38, %v16487_v43  ;;  %v11867_v59 = vpack.c.bf16 %v16491_v17, %v16490_v63  ;;  %8928 = vmatprep.subr.bf16.mxu1 %v11542_v53  ;;  %v16493_v40 = vand.u32 4294901760, %v16466_v29 }
 0x128   : > { %8738 = vmatpush1.bf16.msra.mxu0 %v11549_v44  ;;  %v16496_v43 = vand.u32 4294901760, %v11574_v36  ;;  %v16499_v17 = vand.u32 4294901760, %v11589_v19  ;;  %v16504_v53 = vand.u32 4294901760, %v11645_v18  ;;  %v3153_v18 = vand.u32 4294901760, %v3152_v51 }
 0x129   : > { %16489 = vst [vmem:[#allocation93_spill] sm:$0xff] %v11861_v5  ;;  %16492 = vst [vmem:[#allocation97_spill] sm:$0xff] %v11867_v59  ;;  %v3146_v22 = vsub.f32 %v16466_v29, %v16493_v40  ;;  %v16498_v5 = vand.u32 4294901760, %v11582_v41  ;;  %8740 = vmatprep.subr.bf16.mxu0 %v11598_v58  ;;  %v16501_v59 = vand.u32 4294901760, %v11628_v31  ;;  %v16502_v40 = vand.u32 4294901760, %v11633_v34 }
 0x12a   : > { %v11879_v38 = vpack.c.bf16 %v16496_v43, %v16495_v39  ;;  %v8937_v29 = vpack.c.bf16 %v16504_v53, %v16503_v33  ;;  %v16505_v39 = vand.u32 4294901760, %v16475_v26  ;;  %v16508_v58 = vand.u32 4294901760, %v11656_v56  ;;  %8930 = vmatpush1.bf16.msra.mxu1 %v11576_v28  ;;  %v16511_v53 = vld [vmem:[#allocation73_spill] sm:$0xff] }
 0x12b   : > { %v11885_v63 = vpack.c.bf16 %v16499_v17, %v16498_v5  ;;  %v8745_v44 = vpack.c.bf16 %v16502_v40, %v16501_v59  ;;  %v16507_v5 = vand.u32 4294901760, %v11651_v60  ;;  %v16509_v31 = vand.u32 4294901760, %v11665_v15  ;;  %2204 = vmatmul.mubr.f32.vlgmr.msra.gmra.mrb[2].mxu0 %v16511_v53  ;;  %8932 = vmatprep.subr.bf16.mxu1 %v11600_v20 }
 0x12c   : > { %16497 = vst [vmem:[#allocation58_spill] sm:$0xff] %v11879_v38  ;;  %v3158_v43 = vsub.f32 %v16475_v26, %v16505_v39  ;;  %v16506_v38 = vld [vmem:[#allocation59_spill] sm:$0xff]  ;;  %v16510_v34 = vand.u32 4294901760, %v11670_v1  ;;  %v16512_v33 = vand.u32 4294901760, %v11675_v55  ;;  %v16513_v40 = vand.u32 4294901760, %v11685_v35  ;;  %8742 = vmatpush1.bf16.msra.mxu0 %v11615_v46  ;;  %2434 = vmatprep.mubr.f32.mxu0 %v16120_v23 }
 0x12d   : > { %16500 = vst [vmem:[#allocation98_spill] sm:$0xff] %v11885_v63  ;;  %v15763_v12 = vand.u32 4294901760, %v16506_v38  ;;  %v8747_v17 = vpack.c.bf16 %v16508_v58, %v16507_v5  ;;  %v16514_v56 = vand.u32 4294901760, %v11690_v52  ;;  %v16515_v39 = vand.u32 4294901760, %v11703_v24  ;;  %8744 = vmatprep.subr.bf16.mxu0 %v11680_v13  ;;  %3059 = vmatmul.mubr.f32.vlgmr.msra.gmra.mrb[2].mxu1 %v16511_v53 }
 0x12e   : > { %v8939_v59 = vpack.c.bf16 %v16510_v34, %v16509_v31  ;;  %v8749_v60 = vpack.c.bf16 %v16513_v40, %v16512_v33  ;;  %v16516_v1 = vand.u32 4294901760, %v11708_v16  ;;  %v2292_v42 = vand.u32 4294901760, %v2291_v37  ;;  %v16523_v33 = vld [vmem:[#allocation63_spill] sm:$0xff]  ;;  %3289 = vmatprep.mubr.f32.mxu1 %v16120_v23 }
 0x12f   : > { %v8941_v15 = vpack.c.bf16 %v16515_v39, %v16514_v56  ;;  %v2304_v51 = vand.u32 4294901760, %v2303_v10  ;;  %v3147_v58 = vand.u32 4294901760, %v3146_v22  ;;  %v16517_v55 = vand.u32 4294901760, %v16494_v49  ;;  %8934 = vmatpush1.bf16.msra.mxu1 %v16523_v33 }
 0x130   : > { %v8751_v5 = vpack.c.bf16 %v2298_v2, %v16516_v1  ;;  %v3159_v52 = vand.u32 4294901760, %v3158_v43  ;;  %v2321_v24 = vsub.f32 %v16506_v38, %v15763_v12  ;;  %v16518_v16 = vand.u32 4294901760, %v11381_v6  ;;  %v16527_v1 = vld [vmem:[#allocation65_spill] sm:$0xff]  ;;  %8746 = vmatpush1.bf16.msra.mxu0 %v8745_v44 }
 0x131   : > { %v2309_v35 = vsub.f32 %v16494_v49, %v16517_v55  ;;  %v16519_v46 = vand.u32 4294901760, %v11384_v3  ;;  %v8943_v37 = vpack.c.bf16 %v3153_v18, %v3141_v32  ;;  %v16520_v13 = vand.u32 4294901760, %v11386_v61  ;;  %8936 = vmatprep.subr.bf16.mxu1 %v16527_v1  ;;  %8748 = vmatprep.subr.bf16.mxu0 %v8747_v17 }
 0x132   : > { %v3164_v20 = vsub.f32 %v11381_v6, %v16518_v16  ;;  %v16521_v22 = vand.u32 4294901760, %v11396_v25  ;;  %v16522_v31 = vand.u32 4294901760, %v16425_v27  ;;  %v16524_v40 = vand.u32 4294901760, %v16426_v0 }
 0x133   : > { %v3176_v10 = vsub.f32 %v11384_v3, %v16519_v46  ;;  %v2315_v2 = vsub.f32 %v11386_v61, %v16520_v13  ;;  %v16525_v32 = vand.u32 4294901760, %v16441_v4  ;;  %v16526_v53 = vand.u32 4294901760, %v16442_v21  ;;  %8938 = vmatpush1.bf16.msra.mxu1 %v8937_v29  ;;  %v16537_v29 = vld [vmem:[#allocation84_spill] sm:$0xff] }
 0x134   : > { %v2327_v43 = vsub.f32 %v11396_v25, %v16521_v22  ;;  %v3170_v34 = vsub.f32 %v16425_v27, %v16522_v31  ;;  %v3182_v56 = vsub.f32 %v16426_v0, %v16524_v40  ;;  %v8753_v55 = vpack.c.bf16 %v2304_v51, %v2292_v42  ;;  %v16531_v42 = vld [vmem:[#allocation79_spill] sm:$0xff]  ;;  %8940 = vmatprep.subr.bf16.mxu1 %v8939_v59 }
 0x135   : > { %v2333_v18 = vsub.f32 %v16441_v4, %v16525_v32  ;;  %v2345_v39 = vsub.f32 %v16442_v21, %v16526_v53  ;;  %v2310_v16 = vand.u32 4294901760, %v2309_v35  ;;  %v16528_v46 = vand.u32 4294901760, %v11440_v57  ;;  %8750 = vmatpush1.bf16.msra.mxu0 %v8749_v60 }
 0x136   : > { %v16529_v22 = vand.u32 4294901760, %v11442_v62  ;;  %v8945_v33 = vpack.c.bf16 %v3159_v52, %v3147_v58  ;;  %v2322_v40 = vand.u32 4294901760, %v2321_v24  ;;  %v3165_v32 = vand.u32 4294901760, %v3164_v20  ;;  %v16533_v52 = vld [vmem:[#allocation81_spill] sm:$0xff]  ;;  %8752 = vmatprep.subr.bf16.mxu0 %v8751_v5 }
 0x137   : > { %v3188_v13 = vsub.f32 %v11440_v57, %v16528_v46  ;;  %v3177_v53 = vand.u32 4294901760, %v3176_v10  ;;  %v2316_v12 = vand.u32 4294901760, %v2315_v2  ;;  %v2328_v63 = vand.u32 4294901760, %v2327_v43  ;;  %v16535_v10 = vld [vmem:[#allocation82_spill] sm:$0xff]  ;;  %8942 = vmatpush1.bf16.msra.mxu1 %v8941_v15 }
 0x138   : > { %v3200_v31 = vsub.f32 %v11442_v62, %v16529_v22  ;;  %v16530_v1 = vand.u32 4294901760, %v11449_v47  ;;  %v16532_v51 = vand.u32 4294901760, %v16531_v42  ;;  %v3171_v46 = vand.u32 4294901760, %v3170_v34  ;;  %8944 = vmatprep.subr.bf16.mxu1 %v8943_v37 }
 0x139   : > { %v3183_v28 = vand.u32 4294901760, %v3182_v56  ;;  %v2334_v57 = vand.u32 4294901760, %v2333_v18  ;;  %v2346_v22 = vand.u32 4294901760, %v2345_v39  ;;  %v3189_v17 = vand.u32 4294901760, %v3188_v13  ;;  %v16539_v18 = vld [vmem:[#allocation85_spill] sm:$0xff]  ;;  %8754 = vmatpush1.bf16.msra.mxu0 %v8753_v55 }
 0x13a   : > { %v2339_v44 = vsub.f32 %v11449_v47, %v16530_v1  ;;  %v2351_v35 = vsub.f32 %v16531_v42, %v16532_v51  ;;  %v3201_v58 = vand.u32 4294901760, %v3200_v31  ;;  %v16534_v24 = vand.u32 4294901760, %v16533_v52 }
 0x13b   : > { %v16536_v2 = vand.u32 4294901760, %v16535_v10  ;;  %v8755_v1 = vpack.c.bf16 %v2322_v40, %v2310_v16  ;;  %v8947_v51 = vpack.c.bf16 %v3177_v53, %v3165_v32  ;;  %v16538_v34 = vand.u32 4294901760, %v16537_v29  ;;  %8946 = vmatpush1.bf16.msra.mxu1 %v8945_v33 }
 0x13c   : > { %v3194_v20 = vsub.f32 %v16533_v52, %v16534_v24  ;;  %v16540_v59 = vand.u32 4294901760, %v16539_v18  ;;  %v2340_v39 = vand.u32 4294901760, %v2339_v44  ;;  %v2352_v13 = vand.u32 4294901760, %v2351_v35 }
 0x13d   : > { %v3206_v43 = vsub.f32 %v16535_v10, %v16536_v2  ;;  %v2357_v56 = vsub.f32 %v16537_v29, %v16538_v34  ;;  %v16541_v31 = vand.u32 4294901760, %v11474_v50  ;;  %v16542_v52 = vand.u32 4294901760, %v11476_v14  ;;  %v16544_v2 = vld [vmem:[#allocation89_spill] sm:$0xff]  ;;  %8756 = vmatprep.subr.bf16.mxu0 %v8755_v1  ;;  %8948 = vmatprep.subr.bf16.mxu1 %v8947_v51 }
 0x13e   : > { %v2369_v60 = vsub.f32 %v16539_v18, %v16540_v59  ;;  %v8757_v16 = vpack.c.bf16 %v2328_v63, %v2316_v12  ;;  %v8949_v40 = vpack.c.bf16 %v3183_v28, %v3171_v46  ;;  %v16543_v32 = vand.u32 4294901760, %v11481_v8 }
 0x13f   : > { %v3212_v24 = vsub.f32 %v11474_v50, %v16541_v31  ;;  %v3224_v5 = vsub.f32 %v11476_v14, %v16542_v52  ;;  %v16545_v34 = vand.u32 4294901760, %v16544_v2  ;;  %v8759_v35 = vpack.c.bf16 %v2346_v22, %v2334_v57 }
 0x140   : > { %v2363_v53 = vsub.f32 %v11481_v8, %v16543_v32  ;;  %v8951_v59 = vpack.c.bf16 %v3201_v58, %v3189_v17  ;;  %v3195_v31 = vand.u32 4294901760, %v3194_v20  ;;  %v3207_v50 = vand.u32 4294901760, %v3206_v43  ;;  %8758 = vmatpush1.bf16.msra.mxu0 %v8757_v16  ;;  %8950 = vmatpush1.bf16.msra.mxu1 %v8949_v40 }
 0x141   : > { %v2375_v44 = vsub.f32 %v16544_v2, %v16545_v34  ;;  %v2358_v10 = vand.u32 4294901760, %v2357_v56  ;;  %v2370_v52 = vand.u32 4294901760, %v2369_v60  ;;  %v16546_v12 = vand.u32 4294901760, %v16483_v11  ;;  %8760 = vmatprep.subr.bf16.mxu0 %v8759_v35 }
 0x142   : > { %v16547_v63 = vand.u32 4294901760, %v11540_v7  ;;  %v8761_v46 = vpack.c.bf16 %v2352_v13, %v2340_v39  ;;  %v3213_v32 = vand.u32 4294901760, %v3212_v24  ;;  %v3225_v34 = vand.u32 4294901760, %v3224_v5  ;;  %8952 = vmatprep.subr.bf16.mxu1 %v8951_v59 }
 0x143   : > { %v2381_v28 = vsub.f32 %v16483_v11, %v16546_v12  ;;  %v16548_v37 = vand.u32 4294901760, %v16462_v48  ;;  %v2364_v55 = vand.u32 4294901760, %v2363_v53  ;;  %v2376_v22 = vand.u32 4294901760, %v2375_v44 }
 0x144   : > { %v2393_v15 = vsub.f32 %v11540_v7, %v16547_v63  ;;  %v16549_v17 = vand.u32 4294901760, %v16463_v9  ;;  %v16550_v20 = vand.u32 4294901760, %v11544_v45  ;;  %v16551_v1 = vand.u32 4294901760, %v11546_v54  ;;  %8762 = vmatpush1.bf16.msra.mxu0 %v8761_v46  ;;  %v16558_v46 = vld [vmem:[#allocation37_spill] sm:$0xff] }
 0x145   : > { %v3218_v57 = vsub.f32 %v16462_v48, %v16548_v37  ;;  %v16552_v60 = vand.u32 4294901760, %v11560_v30  ;;  %v16553_v39 = vand.u32 4294901760, %v11574_v36  ;;  %v8763_v24 = vpack.c.bf16 %v2370_v52, %v2358_v10 }
 0x146   : > { %v3230_v58 = vsub.f32 %v16463_v9, %v16549_v17  ;;  %v3236_v43 = vsub.f32 %v11544_v45, %v16550_v20  ;;  %v3248_v56 = vsub.f32 %v11546_v54, %v16551_v1  ;;  %v2382_v5 = vand.u32 4294901760, %v2381_v28 }
 0x147   : > { %v2387_v33 = vsub.f32 %v11560_v30, %v16552_v60  ;;  %v2399_v13 = vsub.f32 %v11574_v36, %v16553_v39  ;;  %v2394_v53 = vand.u32 4294901760, %v2393_v15  ;;  %v8953_v44 = vpack.c.bf16 %v3207_v50, %v3195_v31  ;;  %8764 = vmatprep.subr.bf16.mxu0 %v8763_v24  ;;  %v16561_v60 = vld [vmem:[#allocation44_spill] sm:$0xff]  ;;  %v16562_v39 = vld [vmem:[#allocation51_spill] sm:$0xff] }
 0x148   : > { %v8955_v12 = vpack.c.bf16 %v3225_v34, %v3213_v32  ;;  %v3219_v51 = vand.u32 4294901760, %v3218_v57  ;;  %v8765_v16 = vpack.c.bf16 %v2376_v22, %v2364_v55  ;;  %v3231_v63 = vand.u32 4294901760, %v3230_v58  ;;  %v16556_v57 = vld [vmem:[#allocation32_spill] sm:$0xff]  ;;  %v16557_v55 = vld [vmem:[#allocation33_spill] sm:$0xff]  ;;  %v16559_v58 = vld [vmem:[#allocation38_spill] sm:$0xff] }
 0x149   : > { %v16554_v37 = vand.u32 4294901760, %v11582_v41  ;;  %v16555_v20 = vand.u32 4294901760, %v11589_v19  ;;  %v3237_v35 = vand.u32 4294901760, %v3236_v43  ;;  %v3249_v10 = vand.u32 4294901760, %v3248_v56  ;;  %8954 = vmatpush1.bf16.msra.mxu1 %v8953_v44  ;;  %v16560_v56 = vld [vmem:[#allocation41_spill] sm:$0xff] }
 0x14a   : > { %v2388_v52 = vand.u32 4294901760, %v2387_v33  ;;  %v2400_v28 = vand.u32 4294901760, %v2399_v13  ;;  %v8767_v50 = vpack.c.bf16 %v2394_v53, %v2382_v5  ;;  %v8957_v40 = vpack.c.bf16 %v3231_v63, %v3219_v51  ;;  %8956 = vmatprep.subr.bf16.mxu1 %v8955_v12  ;;  %8766 = vmatpush1.bf16.msra.mxu0 %v8765_v16  ;;  %v16563_v13 = vld [vmem:[#allocation56_spill] sm:$0xff]  ;;  %v16564_v5 = vld [vmem:[#allocation70_spill] sm:$0xff]  ;;  %v16565_v53 = vld [vmem:[#allocation47_spill] sm:$0xff] }
 0x14b   : > { %v3242_v17 = vsub.f32 %v11582_v41, %v16554_v37  ;;  %v3254_v1 = vsub.f32 %v11589_v19, %v16555_v20  ;;  %v8959_v32 = vpack.c.bf16 %v3249_v10, %v3237_v35  ;;  %v8771_v22 = vpack.c.bf16 %v16557_v55, %v16556_v57  ;;  %v16566_v44 = vld [vmem:[#allocation49_spill] sm:$0xff]  ;;  %v16567_v51 = vld [vmem:[#allocation66_spill] sm:$0xff]  ;;  %v16568_v16 = vld [vmem:[#allocation68_spill] sm:$0xff] }
 0x14c   : > { %v8769_v34 = vpack.c.bf16 %v2400_v28, %v2388_v52  ;;  %8768 = vmatprep.subr.bf16.mxu0 %v8767_v50  ;;  %v8963_v43 = vpack.c.bf16 %v16559_v58, %v16558_v46  ;;  %v8773_v33 = vpack.c.bf16 %v16561_v60, %v16560_v56  ;;  %v8775_v24 = vpack.c.bf16 %v16563_v13, %v16562_v39  ;;  %v16569_v37 = vld [vmem:[#allocation69_spill] sm:$0xff]  ;;  %v16572_v35 = vld [vmem:[#allocation19_spill] sm:$0xff]  ;;  %v16574_v28 = vld [vmem:[#allocation14_spill] sm:$0xff] }
 0x14d   : > { %v3243_v31 = vand.u32 4294901760, %v3242_v17  ;;  %v3255_v15 = vand.u32 4294901760, %v3254_v1  ;;  %8958 = vmatpush1.bf16.msra.mxu1 %v8957_v40  ;;  %v8965_v12 = vpack.c.bf16 %v16566_v44, %v16565_v53  ;;  %v8967_v63 = vpack.c.bf16 %v16568_v16, %v16567_v51  ;;  %v16570_v17 = vld [vmem:[#allocation10_spill] sm:$0xff]  ;;  %v16571_v1 = vld [vmem:[#allocation17_spill] sm:$0xff]  ;;  %v16573_v52 = vld [vmem:[#allocation15_spill] sm:$0xff] }
 0x14e   : > { %8960 = vmatprep.subr.bf16.mxu1 %v8959_v32  ;;  %8770 = vmatpush1.bf16.msra.mxu0 %v8769_v34  ;;  %v8777_v20 = vpack.c.bf16 %v16570_v17, %v16569_v37  ;;  %v8779_v10 = vpack.c.bf16 %v16572_v35, %v16571_v1  ;;  %v8969_v50 = vpack.c.bf16 %v16574_v28, %v16573_v52  ;;  %v16575_v40 = vld [vmem:[#allocation20_spill] sm:$0xff]  ;;  %v16577_v32 = vld [vmem:[#allocation23_spill] sm:$0xff]  ;;  %v16584_v52 = vld [vmem:[#allocation42_spill] sm:$0xff] }
 0x14f   : > { %v8961_v59 = vpack.c.bf16 %v3255_v15, %v3243_v31  ;;  %8772 = vmatprep.subr.bf16.mxu0 %v8771_v22  ;;  %v16576_v31 = vld [vmem:[#allocation21_spill] sm:$0xff]  ;;  %v16578_v34 = vld [vmem:[#allocation24_spill] sm:$0xff]  ;;  %v16586_v35 = vld [vmem:[#allocation7_spill] sm:$0xff] }
 0x150   : > { %v8971_v15 = vpack.c.bf16 %v16576_v31, %v16575_v40  ;;  %v8781_v22 = vpack.c.bf16 %v16578_v34, %v16577_v32  ;;  %v16583_v28 = vld [vmem:[#allocation40_spill] sm:$0xff]  ;;  %v8787_v34 = vpack.c.bf16 %v16506_v38, %v16494_v49 }
 0x151   : > { %8962 = vmatpush1.bf16.msra.mxu1 %v8961_v59  ;;  %2436 = vmatmul.mubr.f32.vlgmr.msra.gmra.mrb[2].mxu0 %v16564_v5  ;;  %v16579_v59 = vld [vmem:[#allocation31_spill] sm:$0xff] }
 0x152   : > { %8964 = vmatprep.subr.bf16.mxu1 %v8963_v43  ;;  %8774 = vmatpush1.bf16.msra.mxu0 %v8773_v33  ;;  %v16580_v43 = vld [vmem:[#allocation36_spill] sm:$0xff] }
 0x153   : > { %8776 = vmatprep.subr.bf16.mxu0 %v8775_v24  ;;  %2570 = vmatprep.mubr.f32.mxu0 %v16120_v23  ;;  %v8783_v33 = vpack.c.bf16 %v16580_v43, %v16579_v59  ;;  %v16581_v24 = vld [vmem:[#allocation27_spill] sm:$0xff] }
 0x154   : > { %3291 = vmatmul.mubr.f32.vlgmr.msra.gmra.mrb[2].mxu1 %v16564_v5 }
 0x155   : > { %8966 = vmatpush1.bf16.msra.mxu1 %v8965_v12  ;;  %3425 = vmatprep.mubr.f32.mxu1 %v16120_v23  ;;  %v16582_v12 = vld [vmem:[#allocation26_spill] sm:$0xff] }
 0x156   : > { %8968 = vmatprep.subr.bf16.mxu1 %v8967_v63  ;;  %8778 = vmatpush1.bf16.msra.mxu0 %v8777_v20  ;;  %v8973_v5 = vpack.c.bf16 %v16582_v12, %v16581_v24  ;;  %v8975_v63 = vpack.c.bf16 %v16584_v52, %v16583_v28  ;;  %v16585_v20 = vld [vmem:[#allocation45_spill] sm:$0xff] }
 0x157   : > { %8780 = vmatprep.subr.bf16.mxu0 %v8779_v10  ;;  %v8785_v1 = vpack.c.bf16 %v16586_v35, %v16585_v20  ;;  %v16587_v10 = vld [vmem:[#allocation43_spill] sm:$0xff] }
 0x158   : > { %v8977_v43 = vpack.c.bf16 %v16475_v26, %v16587_v10 }
 0x159   : > { %8970 = vmatpush1.bf16.msra.mxu1 %v8969_v50  ;;  %v8979_v50 = vpack.c.bf16 %v11384_v3, %v11381_v6  ;;  %v8795_v3 = vpack.c.bf16 %v16539_v18, %v16537_v29  ;;  %v16590_v6 = vld [vmem:[#allocation82_spill] sm:$0xff]  ;;  %v16604_v18 = vld [vmem:[#allocation29_spill] sm:$0xff] }
 0x15a   : > { %8972 = vmatprep.subr.bf16.mxu1 %v8971_v15  ;;  %8782 = vmatpush1.bf16.msra.mxu0 %v8781_v22  ;;  %v8789_v15 = vpack.c.bf16 %v11396_v25, %v11386_v61  ;;  %v8791_v22 = vpack.c.bf16 %v16442_v21, %v16441_v4  ;;  %v16589_v61 = vld [vmem:[#allocation81_spill] sm:$0xff]  ;;  %v16591_v25 = vld [vmem:[#allocation87_spill] sm:$0xff]  ;;  %v8991_v21 = vpack.c.bf16 %v11546_v54, %v11544_v45  ;;  %v16596_v54 = vld [vmem:[#allocation50_spill] sm:$0xff] }
 0x15b   : > { %8784 = vmatprep.subr.bf16.mxu0 %v8783_v33  ;;  %v8981_v33 = vpack.c.bf16 %v16426_v0, %v16425_v27  ;;  %v8985_v4 = vpack.c.bf16 %v16590_v6, %v16589_v61  ;;  %v8987_v0 = vpack.c.bf16 %v11476_v14, %v16591_v25  ;;  %v8797_v27 = vpack.c.bf16 %v16544_v2, %v11481_v8  ;;  %v16592_v8 = vld [vmem:[#allocation30_spill] sm:$0xff]  ;;  %v16605_v2 = vld [vmem:[#allocation25_spill] sm:$0xff]  ;;  %v16616_v61 = vld [vmem:[#allocation83_spill] sm:$0xff] }
 0x15c   : > { %v8993_v14 = vpack.c.bf16 %v11589_v19, %v11582_v41  ;;  %v16597_v45 = vld [vmem:[#allocation46_spill] sm:$0xff]  ;;  %v16600_v41 = vld [vmem:[#allocation16_spill] sm:$0xff] }
 0x15d   : > { %8974 = vmatpush1.bf16.msra.mxu1 %v8973_v5  ;;  %v16588_v5 = vld [vmem:[#allocation77_spill] sm:$0xff]  ;;  %v16601_v19 = vld [vmem:[#allocation12_spill] sm:$0xff]  ;;  %v16603_v29 = vld [vmem:[#allocation22_spill] sm:$0xff] }
 0x15e   : > { %8976 = vmatprep.subr.bf16.mxu1 %v8975_v63  ;;  %8786 = vmatpush1.bf16.msra.mxu0 %v8785_v1  ;;  %v8983_v63 = vpack.c.bf16 %v11442_v62, %v16588_v5  ;;  %v8793_v1 = vpack.c.bf16 %v16531_v42, %v11449_v47  ;;  %v8799_v62 = vpack.c.bf16 %v11540_v7, %v16483_v11  ;;  %v16593_v7 = vld [vmem:[#allocation71_spill] sm:$0xff]  ;;  %v16602_v11 = vld [vmem:[#allocation18_spill] sm:$0xff]  ;;  %v16612_v5 = vld [vmem:[#allocation13_spill] sm:$0xff] }
 0x15f   : > { %8788 = vmatprep.subr.bf16.mxu0 %v8787_v34  ;;  %v8989_v47 = vpack.c.bf16 %v16463_v9, %v16462_v48  ;;  %v8801_v42 = vpack.c.bf16 %v11574_v36, %v11560_v30  ;;  %v16594_v9 = vld [vmem:[#allocation35_spill] sm:$0xff]  ;;  %v16598_v30 = vld [vmem:[#allocation64_spill] sm:$0xff]  ;;  %v16599_v36 = vld [vmem:[#allocation6_spill] sm:$0xff] }
 0x160   : > { %v16595_v48 = vld [vmem:[#allocation39_spill] sm:$0xff]  ;;  %v16606_v34 = vld [vmem:[#allocation34_spill] sm:$0xff]  ;;  %v16617_v6 = vld [vmem:[#allocation80_spill] sm:$0xff] }
 0x161   : > { %8978 = vmatpush1.bf16.msra.mxu1 %v8977_v43  ;;  %v16607_v43 = vld [vmem:[#allocation48_spill] sm:$0xff] }
 0x162   : > { %8980 = vmatprep.subr.bf16.mxu1 %v8979_v50  ;;  %8790 = vmatpush1.bf16.msra.mxu0 %v8789_v15  ;;  %v16608_v50 = vld [vmem:[#allocation53_spill] sm:$0xff]  ;;  %v16609_v15 = vld [vmem:[#allocation8_spill] sm:$0xff] }
 0x163   : > { %8792 = vmatprep.subr.bf16.mxu0 %v8791_v22  ;;  %v16610_v22 = vld [vmem:[#allocation62_spill] sm:$0xff]  ;;  %v16619_v25 = vld [vmem:[#allocation88_spill] sm:$0xff] }
 0x165   : > { %8982 = vmatpush1.bf16.msra.mxu1 %v8981_v33  ;;  %v16611_v33 = vld [vmem:[#allocation61_spill] sm:$0xff] }
 0x166   : > { %8984 = vmatprep.subr.bf16.mxu1 %v8983_v63  ;;  %8794 = vmatpush1.bf16.msra.mxu0 %v8793_v1  ;;  %v16613_v63 = vld [vmem:[#allocation9_spill] sm:$0xff]  ;;  %v16614_v1 = vld [vmem:[#allocation76_spill] sm:$0xff] }
 0x167   : > { %8796 = vmatprep.subr.bf16.mxu0 %v8795_v3  ;;  %v16615_v3 = vld [vmem:[#allocation78_spill] sm:$0xff] }
 0x169   : > { %8986 = vmatpush1.bf16.msra.mxu1 %v8985_v4  ;;  %v16618_v4 = vld [vmem:[#allocation86_spill] sm:$0xff] }
 0x16a   : > { %8988 = vmatprep.subr.bf16.mxu1 %v8987_v0  ;;  %8798 = vmatpush1.bf16.msra.mxu0 %v8797_v27  ;;  %v16620_v0 = vld [vmem:[#allocation52_spill] sm:$0xff]  ;;  %v16621_v27 = vand.u32 4294901760, %v16556_v57  ;;  %v16630_v57 = vand.u32 4294901760, %v16562_v39  ;;  %v16638_v39 = vand.u32 4294901760, %v16569_v37 }
 0x16b   : > { %8800 = vmatprep.subr.bf16.mxu0 %v8799_v62  ;;  %v16622_v62 = vand.u32 4294901760, %v16557_v55  ;;  %v16631_v55 = vand.u32 4294901760, %v16563_v13  ;;  %v16639_v13 = vand.u32 4294901760, %v16570_v17  ;;  %v16646_v17 = vld [vmem:[#allocation14_spill] sm:$0xff] }
 0x16d   : > { %8990 = vmatpush1.bf16.msra.mxu1 %v8989_v47  ;;  %v8835_v47 = vpack.c.bf16 %v16622_v62, %v16621_v27  ;;  %v8839_v27 = vpack.c.bf16 %v16631_v55, %v16630_v57  ;;  %v16632_v62 = vld [vmem:[#allocation57_spill] sm:$0xff]  ;;  %v16642_v57 = vld [vmem:[#allocation19_spill] sm:$0xff] }
 0x16e   : > { %8992 = vmatprep.subr.bf16.mxu1 %v8991_v21  ;;  %8802 = vmatpush1.bf16.msra.mxu0 %v8801_v42  ;;  %v16623_v21 = vld [vmem:[#allocation90_spill] sm:$0xff] }
 0x16f   : > { %8804 = vmatprep.subr.bf16.mxu0 %v16592_v8  ;;  %v16624_v42 = vld [vmem:[#allocation54_spill] sm:$0xff] }
 0x171   : > { %8994 = vmatpush1.bf16.msra.mxu1 %v8993_v14  ;;  %2573 = vmatmul.mubr.f32.vlgmr.msra.gmra.mrb[2].mxu0 %v16593_v7  ;;  %v16625_v14 = vld [vmem:[#allocation60_spill] sm:$0xff] }
 0x172   : > { %8996 = vmatprep.subr.bf16.mxu1 %v16594_v9  ;;  %8806 = vmatpush1.bf16.msra.mxu0 %v16595_v48 }
 0x173   : > { %8808 = vmatprep.subr.bf16.mxu0 %v16596_v54  ;;  %2675 = vmatprep.mubr.f32.mxu0 %v16120_v23 }
 0x174   : > { %3428 = vmatmul.mubr.f32.vlgmr.msra.gmra.mrb[2].mxu1 %v16593_v7  ;;  %v16626_v7 = vand.u32 4294901760, %v16558_v46  ;;  %v16634_v46 = vand.u32 4294901760, %v16565_v53  ;;  %v16643_v53 = vand.u32 4294901760, %v16642_v57 }
 0x175   : > { %8998 = vmatpush1.bf16.msra.mxu1 %v16597_v45  ;;  %3530 = vmatprep.mubr.f32.mxu1 %v16120_v23 }
 0x176   : > { %9000 = vmatprep.subr.bf16.mxu1 %v16598_v30  ;;  %8810 = vmatpush1.bf16.msra.mxu0 %v16599_v36 }
 0x177   : > { %8812 = vmatprep.subr.bf16.mxu0 %v16600_v41 }
 0x179   : > { %9002 = vmatpush1.bf16.msra.mxu1 %v16601_v19 }
 0x17a   : > { %9004 = vmatprep.subr.bf16.mxu1 %v16602_v11  ;;  %8814 = vmatpush1.bf16.msra.mxu0 %v16603_v29 }
 0x17b   : > { %8816 = vmatprep.subr.bf16.mxu0 %v16604_v18 }
 0x17d   : > { %9006 = vmatpush1.bf16.msra.mxu1 %v16605_v2 }
 0x17e   : > { %9008 = vmatprep.subr.bf16.mxu1 %v16606_v34  ;;  %8818 = vmatpush1.bf16.msra.mxu0 %v16607_v43 }
 0x17f   : > { %8820 = vmatprep.subr.bf16.mxu0 %v16608_v50 }
 0x181   : > { %9010 = vmatpush1.bf16.msra.mxu1 %v16609_v15 }
 0x182   : > { %9012 = vmatprep.subr.bf16.mxu1 %v16610_v22  ;;  %8822 = vmatpush1.bf16.msra.mxu0 %v16611_v33 }
 0x183   : > { %8824 = vmatprep.subr.bf16.mxu0 %v16612_v5 }
 0x185   : > { %9014 = vmatpush1.bf16.msra.mxu1 %v16613_v63 }
 0x186   : > { %9016 = vmatprep.subr.bf16.mxu1 %v16614_v1  ;;  %8826 = vmatpush1.bf16.msra.mxu0 %v16615_v3 }
 0x187   : > { %8828 = vmatprep.subr.bf16.mxu0 %v16616_v61 }
 0x189   : > { %9018 = vmatpush1.bf16.msra.mxu1 %v16617_v6  ;;  %v16627_v6 = vand.u32 4294901760, %v16559_v58  ;;  %v16635_v58 = vand.u32 4294901760, %v16566_v44  ;;  %v12167_v44 = vld [vmem:[%s15440_s3 + $0x30] sm:$0xff] }
 0x18a   : > { %9020 = vmatprep.subr.bf16.mxu1 %v16618_v4  ;;  %8830 = vmatpush1.bf16.msra.mxu0 %v16619_v25  ;;  %v16628_v25 = vand.u32 4294901760, %v16560_v56  ;;  %v16636_v56 = vand.u32 4294901760, %v16567_v51  ;;  %v12172_v51 = vld [vmem:[%s15440_s3 + $0x38] sm:$0xff]  ;;  %v15778_v57 = vand.u32 4294901760, %v12167_v44 }
 0x18b   : > { %8832 = vmatprep.subr.bf16.mxu0 %v16620_v0  ;;  %v9027_v4 = vpack.c.bf16 %v16627_v6, %v16626_v7  ;;  %v16629_v0 = vand.u32 4294901760, %v16561_v60  ;;  %v9029_v6 = vpack.c.bf16 %v16635_v58, %v16634_v46  ;;  %v16637_v60 = vand.u32 4294901760, %v16568_v16  ;;  %v16644_v16 = vld [vmem:[#allocation15_spill] sm:$0xff] }
 0x18c   : > { %v16645_v37 = vand.u32 4294901760, %v16644_v16  ;;  %v16650_v58 = vand.u32 4294901760, %v16577_v32  ;;  %v16656_v32 = vand.u32 4294901760, %v16581_v24  ;;  %v16659_v16 = vand.u32 4294901760, %v16584_v52 }
 0x18d   : > { %9022 = vmatpush1.bf16.msra.mxu1 %v16623_v21  ;;  %v8837_v61 = vpack.c.bf16 %v16629_v0, %v16628_v25  ;;  %v9031_v25 = vpack.c.bf16 %v16637_v60, %v16636_v56  ;;  %v8841_v0 = vpack.c.bf16 %v16639_v13, %v16638_v39  ;;  %v16651_v56 = vld [vmem:[#allocation24_spill] sm:$0xff]  ;;  %v12232_v52 = vsub.f32 %v12167_v44, %v15778_v57 }
 0x18e   : > { %9024 = vmatprep.subr.bf16.mxu1 %v16624_v42  ;;  %8834 = vmatpush1.bf16.msra.mxu0 %v16625_v14  ;;  %v16633_v42 = vld [vmem:[#allocation72_spill] sm:$0xff]  ;;  %v16652_v60 = vand.u32 4294901760, %v16651_v56  ;;  %v16666_v56 = vand.u32 4294901760, %v16475_v26 }
 0x18f   : > { %8836 = vmatprep.subr.bf16.mxu0 %v8835_v47  ;;  %v16640_v47 = vld [vmem:[#allocation17_spill] sm:$0xff]  ;;  %v16654_v13 = vld [vmem:[#allocation36_spill] sm:$0xff]  ;;  %v15780_v26 = vand.u32 4294901760, %v12232_v52 }
 0x190   : > { %v16641_v7 = vand.u32 4294901760, %v16640_v47  ;;  %v8845_v39 = vpack.c.bf16 %v16652_v60, %v16650_v58  ;;  %v16655_v47 = vand.u32 4294901760, %v16654_v13  ;;  %v16665_v58 = vand.u32 4294901760, %v16587_v10  ;;  %v12267_v10 = vld [vmem:[%s15440_s3 + $0xe8] sm:$0xff] }
 0x191   : > { %9026 = vmatpush1.bf16.msra.mxu1 %v16632_v62  ;;  %2679 = vmatmul.mubr.f32.vlgmr.msra.gmra.mrb[2].mxu0 %v16633_v42  ;;  %16668 = vst [vmem:[#allocation63_spill] sm:$0xff] %v12267_v10 }
 0x192   : > { %9028 = vmatprep.subr.bf16.mxu1 %v9027_v4  ;;  %8838 = vmatpush1.bf16.msra.mxu0 %v8837_v61  ;;  %v8843_v55 = vpack.c.bf16 %v16643_v53, %v16641_v7  ;;  %v16647_v61 = vand.u32 4294901760, %v16646_v17  ;;  %v12210_v53 = vld [vmem:[%s15440_s3 + $0xd0] sm:$0xff]  ;;  %v16660_v17 = vand.u32 4294901760, %v16585_v20  ;;  %v12249_v20 = vld [vmem:[%s15440_s3 + $0x58] sm:$0xff]  ;;  %v9041_v60 = vpack.c.bf16 %v16666_v56, %v16665_v58 }
 0x193   : > { %8840 = vmatprep.subr.bf16.mxu0 %v8839_v27  ;;  %2845 = vmatprep.mubr.f32.mxu0 %v16120_v23  ;;  %v16649_v27 = vand.u32 4294901760, %v16576_v31  ;;  %v12201_v31 = vld [vmem:[%s15440_s3 + $0x48] sm:$0xff]  ;;  %16664 = vst [vmem:[#allocation59_spill] sm:$0xff] %v12249_v20  ;;  %v15774_v13 = vand.u32 4294901760, %v12249_v20 }
 0x194   : > { %3534 = vmatmul.mubr.f32.vlgmr.msra.gmra.mrb[2].mxu1 %v16633_v42  ;;  %v9033_v4 = vpack.c.bf16 %v16647_v61, %v16645_v37  ;;  %v16648_v42 = vand.u32 4294901760, %v16575_v40  ;;  %v12196_v40 = vld [vmem:[%s15440_s3 + $0x40] sm:$0xff]  ;;  %v16661_v61 = vand.u32 4294901760, %v16586_v35 }
 0x195   : > { %9030 = vmatpush1.bf16.msra.mxu1 %v9029_v6  ;;  %3700 = vmatprep.mubr.f32.mxu1 %v16120_v23  ;;  %v16653_v6 = vand.u32 4294901760, %v16579_v59  ;;  %v16657_v59 = vand.u32 4294901760, %v16582_v12  ;;  %v16662_v12 = vand.u32 4294901760, %v16494_v49  ;;  %v15776_v49 = vand.u32 4294901760, %v12196_v40 }
 0x196   : > { %9032 = vmatprep.subr.bf16.mxu1 %v9031_v25  ;;  %8842 = vmatpush1.bf16.msra.mxu0 %v8841_v0  ;;  %v9035_v46 = vpack.c.bf16 %v16649_v27, %v16648_v42  ;;  %v15777_v25 = vand.u32 4294901760, %v12172_v51  ;;  %v8849_v24 = vpack.c.bf16 %v16661_v61, %v16660_v17  ;;  %v12227_v27 = vld [vmem:[%s15440_s3 + $0xd8] sm:$0xff]  ;;  %v15782_v61 = vand.u32 4294901760, %v12267_v10 }
 0x197   : > { %8844 = vmatprep.subr.bf16.mxu0 %v8843_v55  ;;  %v8847_v7 = vpack.c.bf16 %v16655_v47, %v16653_v6  ;;  %v9037_v0 = vpack.c.bf16 %v16657_v59, %v16656_v32  ;;  %v16658_v55 = vand.u32 4294901760, %v16583_v28  ;;  %v12244_v28 = vld [vmem:[%s15440_s3 + $0x50] sm:$0xff]  ;;  %v12262_v47 = vld [vmem:[%s15440_s3 + $0xe0] sm:$0xff]  ;;  %v12274_v32 = vsub.f32 %v12196_v40, %v15776_v49 }
 0x198   : > { %v12237_v35 = vsub.f32 %v12172_v51, %v15777_v25  ;;  %v15772_v6 = vand.u32 4294901760, %v12244_v28  ;;  %16667 = vst [vmem:[#allocation73_spill] sm:$0xff] %v12262_v47  ;;  %v15781_v17 = vand.u32 4294901760, %v12262_v47  ;;  %v12319_v58 = vsub.f32 %v12249_v20, %v15774_v13  ;;  %v12335_v13 = vld [vmem:[%s15440_s3 + $0xf8] sm:$0xff]  ;;  %v16679_v49 = vld [vmem:[#allocation28_spill] sm:$0xff] }
 0x199   : > { %9034 = vmatpush1.bf16.msra.mxu1 %v9033_v4  ;;  %v9039_v37 = vpack.c.bf16 %v16659_v16, %v16658_v55  ;;  %v16663_v4 = vand.u32 4294901760, %v16506_v38  ;;  %v15775_v38 = vand.u32 4294901760, %v12201_v31  ;;  %v12289_v55 = vld [vmem:[%s15440_s3 + $0x68] sm:$0xff]  ;;  %16676 = vst [vmem:[#allocation89_spill] sm:$0xff] %v12335_v13  ;;  %v16686_v25 = vld [vmem:[#allocation95_spill] sm:$0xff] }
 0x19a   : > { %9036 = vmatprep.subr.bf16.mxu1 %v9035_v46  ;;  %8846 = vmatpush1.bf16.msra.mxu0 %v8845_v39  ;;  %v15773_v46 = vand.u32 4294901760, %v12210_v53  ;;  %v15771_v39 = vand.u32 4294901760, %v12227_v27  ;;  %16670 = vst [vmem:[#allocation79_spill] sm:$0xff] %v12289_v55  ;;  %v12352_v57 = vsub.f32 %v12262_v47, %v15781_v17 }
 0x19b   : > { %v8851_v42 = vpack.c.bf16 %v16663_v4, %v16662_v12  ;;  %8848 = vmatprep.subr.bf16.mxu0 %v8847_v7  ;;  %v15779_v7 = vand.u32 4294901760, %v12237_v35  ;;  %v12279_v59 = vsub.f32 %v12201_v31, %v15775_v38  ;;  %v16672_v12 = vld [vmem:[#allocation67_spill] sm:$0xff] }
 0x19c   : > { %v12294_v16 = vsub.f32 %v12210_v53, %v15773_v46  ;;  %v16673_v4 = vld [vmem:[#allocation11_spill] sm:$0xff]  ;;  %v15793_v17 = vand.u32 4294901760, %v12352_v57 }
 0x19d   : > { %9038 = vmatpush1.bf16.msra.mxu1 %v9037_v0  ;;  %v12284_v0 = vld [vmem:[%s15440_s3 + $0x60] sm:$0xff]  ;;  %v12345_v38 = vld [vmem:[%s15440_s3 + $0x78] sm:$0xff] }
 0x19e   : > { %9040 = vmatprep.subr.bf16.mxu1 %v9039_v37  ;;  %8850 = vmatpush1.bf16.msra.mxu0 %v8849_v24  ;;  %16669 = vst [vmem:[#allocation65_spill] sm:$0xff] %v12284_v0  ;;  %v12299_v37 = vsub.f32 %v12227_v27, %v15771_v39  ;;  %v12307_v24 = vpack.c.bf16 %v15779_v7, %v15780_v26  ;;  %v15785_v56 = vand.u32 4294901760, %v12284_v0  ;;  %v16674_v39 = vld [vmem:[#allocation74_spill] sm:$0xff]  ;;  %16678 = vst [vmem:[#allocation33_spill] sm:$0xff] %v12345_v38  ;;  %v16681_v46 = vld [vmem:[#allocation75_spill] sm:$0xff] }
 0x19f   : > { %8852 = vmatprep.subr.bf16.mxu0 %v8851_v42  ;;  %v12314_v42 = vsub.f32 %v12244_v28, %v15772_v6  ;;  %v12329_v6 = vld [vmem:[%s15440_s3 + $0xf0] sm:$0xff]  ;;  %v12357_v7 = vsub.f32 %v12267_v10, %v15782_v61  ;;  %v16683_v61 = vand.u32 4294901760, %v12289_v55 }
 0x1a0   : > { %16671 = vst [vmem:[#allocation84_spill] sm:$0xff] %v12307_v24  ;;  %16675 = vst [vmem:[#allocation85_spill] sm:$0xff] %v12329_v6 }
 0x1a1   : > { %9042 = vmatpush1.bf16.msra.mxu1 %v9041_v60  ;;  %v12372_v60 = vsub.f32 %v12284_v0, %v15785_v56  ;;  %v12377_v24 = vsub.f32 %v12289_v55, %v16683_v61  ;;  %v16687_v56 = vand.u32 4294901760, %v12294_v16  ;;  %v16690_v61 = vand.u32 4294901760, %v12314_v42 }
 0x1a2   : > { %9044 = vmatprep.subr.bf16.mxu1 %v16672_v12  ;;  %8854 = vmatpush1.bf16.msra.mxu0 %v16673_v4  ;;  %v15784_v12 = vand.u32 4294901760, %v12274_v32  ;;  %v15783_v4 = vand.u32 4294901760, %v12279_v59 }
 0x1a3   : > { %8856 = vmatprep.subr.bf16.mxu0 %v16674_v39  ;;  %v12340_v39 = vld [vmem:[%s15440_s3 + $0x70] sm:$0xff]  ;;  %16684 = vst [vmem:[#allocation38_spill] sm:$0xff] %v12377_v24 }
 0x1a4   : > { %16677 = vst [vmem:[#allocation32_spill] sm:$0xff] %v12340_v39  ;;  %v12363_v26 = vpack.c.bf16 %v15783_v4, %v15784_v12  ;;  %v16685_v4 = vld [vmem:[#allocation91_spill] sm:$0xff]  ;;  %v16702_v12 = vand.u32 4294901760, %v12345_v38 }
 0x1a5   : > { %9046 = vmatpush1.bf16.msra.mxu1 %v16679_v49  ;;  %v16682_v49 = vld [vmem:[#allocation94_spill] sm:$0xff] }
 0x1a6   : > { %16680 = vst [vmem:[#allocation37_spill] sm:$0xff] %v12363_v26  ;;  %9048 = vmatprep.subr.bf16.mxu1 %v16681_v46  ;;  %8858 = vmatpush1.bf16.msra.mxu0 %v16682_v49  ;;  %v16688_v26 = vand.u32 4294901760, %v12299_v37  ;;  %v16693_v46 = vld [vmem:[#allocation92_spill] sm:$0xff]  ;;  %v16694_v49 = vld [vmem:[#allocation55_spill] sm:$0xff]  ;;  %v12422_v10 = vsub.f32 %v12345_v38, %v16702_v12 }
 0x1a7   : > { %8860 = vmatprep.subr.bf16.mxu0 %v16685_v4  ;;  %v16691_v4 = vand.u32 4294901760, %v12319_v58 }
 0x1a8   : > { %v12389_v0 = vpack.c.bf16 %v16688_v26, %v16687_v56  ;;  %v16695_v26 = vld [vmem:[#allocation93_spill] sm:$0xff]  ;;  %v16696_v56 = vand.u32 4294901760, %v12329_v6  ;;  %16703 = vst [vmem:[#allocation49_spill] sm:$0xff] %v12422_v10 }
 0x1a9   : > { %9050 = vmatpush1.bf16.msra.mxu1 %v16686_v25  ;;  %v12395_v55 = vpack.c.bf16 %v16691_v4, %v16690_v61  ;;  %v15792_v25 = vand.u32 4294901760, %v12357_v7  ;;  %v16698_v61 = vand.u32 4294901760, %v12335_v13 }
 0x1aa   : > { %16689 = vst [vmem:[#allocation41_spill] sm:$0xff] %v12389_v0  ;;  %9052 = vmatprep.subr.bf16.mxu1 %v16693_v46  ;;  %8862 = vmatpush1.bf16.msra.mxu0 %v16694_v49  ;;  %v12407_v0 = vsub.f32 %v12329_v6, %v16696_v56  ;;  %v16700_v49 = vand.u32 4294901760, %v12340_v39 }
 0x1ab   : > { %16692 = vst [vmem:[#allocation44_spill] sm:$0xff] %v12395_v55  ;;  %8864 = vmatprep.subr.bf16.mxu0 %v16695_v26  ;;  %v12412_v46 = vsub.f32 %v12335_v13, %v16698_v61  ;;  %v16704_v26 = vld [vmem:[#allocation96_spill] sm:$0xff]  ;;  %v12429_v56 = vpack.c.bf16 %v15792_v25, %v15793_v17  ;;  %v16706_v61 = vand.u32 4294901760, %v12372_v60  ;;  %v16707_v55 = vand.u32 4294901760, %v12377_v24  ;;  %v16711_v17 = vld [vmem:[#allocation98_spill] sm:$0xff] }
 0x1ac   : > { %16697 = vst [vmem:[#allocation51_spill] sm:$0xff] %v12407_v0  ;;  %v12417_v4 = vsub.f32 %v12340_v39, %v16700_v49  ;;  %v16709_v49 = vld [vmem:[#allocation97_spill] sm:$0xff]  ;;  %v16710_v39 = vld [vmem:[#allocation58_spill] sm:$0xff]  ;;  %v15797_v12 = vand.u32 4294901760, %v12407_v0  ;;  %v15794_v25 = vand.u32 4294901760, %v12422_v10 }
 0x1ad   : > { %16699 = vst [vmem:[#allocation56_spill] sm:$0xff] %v12412_v46  ;;  %9054 = vmatpush1.bf16.msra.mxu1 %v16704_v26  ;;  %16705 = vst [vmem:[#allocation66_spill] sm:$0xff] %v12429_v56  ;;  %v12435_v13 = vpack.c.bf16 %v16707_v55, %v16706_v61  ;;  %v15796_v26 = vand.u32 4294901760, %v12412_v46  ;;  %v16712_v56 = vld [vmem:[#allocation70_spill] sm:$0xff] }
 0x1ae   : > { %16701 = vst [vmem:[#allocation47_spill] sm:$0xff] %v12417_v4  ;;  %9056 = vmatprep.subr.bf16.mxu1 %v16709_v49  ;;  %8866 = vmatpush1.bf16.msra.mxu0 %v16710_v39  ;;  %v15795_v38 = vand.u32 4294901760, %v12417_v4  ;;  %v12471_v39 = vld [vmem:[%s15440_s3 + $0x88] sm:$0xff]  ;;  %v12520_v61 = vld [vmem:[%s15440_s3 + $0x10] sm:$0xff] }
 0x1af   : > { %16708 = vst [vmem:[#allocation68_spill] sm:$0xff] %v12435_v13  ;;  %8868 = vmatprep.subr.bf16.mxu0 %v16592_v8  ;;  %v12450_v55 = vpack.c.bf16 %v15796_v26, %v15797_v12  ;;  %v16741_v46 = vand.u32 4294901760, %v12471_v39 }
 0x1b0   : > { %v12456_v8 = vpack.c.bf16 %v15794_v25, %v15795_v38  ;;  %v12532_v25 = vld [vmem:[%s15440_s3 + $0x18] sm:$0xff]  ;;  %v12544_v38 = vld [vmem:[%s15440_s3 + $0xa8] sm:$0xff] }
 0x1b1   : > { %9058 = vmatpush1.bf16.msra.mxu1 %v16711_v17  ;;  %2847 = vmatmul.mubr.f32.vlgmr.msra.gmra.mrb[2].mxu0 %v16712_v56  ;;  %16713 = vst [vmem:[#allocation69_spill] sm:$0xff] %v12450_v55  ;;  %v12466_v17 = vld [vmem:[%s15440_s3 + $0x80] sm:$0xff] }
 0x1b2   : > { %16714 = vst [vmem:[#allocation10_spill] sm:$0xff] %v12456_v8  ;;  %9060 = vmatprep.subr.bf16.mxu1 %v16594_v9  ;;  %8870 = vmatpush1.bf16.msra.mxu0 %v16595_v48  ;;  %v12480_v9 = vld [vmem:[%s15440_s3] sm:$0xff]  ;;  %v15800_v48 = vand.u32 4294901760, %v12466_v17 }
 0x1b3   : > { %8872 = vmatprep.subr.bf16.mxu0 %v16596_v54  ;;  %2949 = vmatprep.mubr.f32.mxu0 %v16120_v23  ;;  %v15799_v54 = vand.u32 4294901760, %v12471_v39 }
 0x1b4   : > { %3702 = vmatmul.mubr.f32.vlgmr.msra.gmra.mrb[2].mxu1 %v16712_v56 }
 0x1b5   : > { %9062 = vmatpush1.bf16.msra.mxu1 %v16597_v45  ;;  %3804 = vmatprep.mubr.f32.mxu1 %v16120_v23  ;;  %v12488_v45 = vld [vmem:[%s15440_s3 + $0x8] sm:$0xff]  ;;  %v15798_v23 = vand.u32 4294901760, %v12480_v9 }
 0x1b6   : > { %9064 = vmatprep.subr.bf16.mxu1 %v16598_v30  ;;  %8874 = vmatpush1.bf16.msra.mxu0 %v16599_v36  ;;  %v12495_v30 = vld [vmem:[%s15440_s3 + $0x90] sm:$0xff]  ;;  %v12502_v36 = vld [vmem:[%s15440_s3 + $0x98] sm:$0xff] }
 0x1b7   : > { %8876 = vmatprep.subr.bf16.mxu0 %v16600_v41  ;;  %v12508_v41 = vsub.f32 %v12466_v17, %v15800_v48  ;;  %v15803_v49 = vand.u32 4294901760, %v12502_v36 }
 0x1b9   : > { %9066 = vmatpush1.bf16.msra.mxu1 %v16601_v19  ;;  %16715 = vst [vmem:[#allocation20_spill] sm:$0xff] %v12508_v41  ;;  %v12513_v19 = vsub.f32 %v12471_v39, %v15799_v54  ;;  %v15805_v26 = vand.u32 4294901760, %v12508_v41  ;;  %v12566_v48 = vsub.f32 %v12502_v36, %v15803_v49 }
 0x1ba   : > { %9068 = vmatprep.subr.bf16.mxu1 %v16602_v11  ;;  %8878 = vmatpush1.bf16.msra.mxu0 %v16603_v29  ;;  %v15801_v11 = vand.u32 4294901760, %v12488_v45  ;;  %v15802_v29 = vand.u32 4294901760, %v12495_v30 }
 0x1bb   : > { %8880 = vmatprep.subr.bf16.mxu0 %v16604_v18  ;;  %16716 = vst [vmem:[#allocation21_spill] sm:$0xff] %v12513_v19  ;;  %v12526_v18 = vsub.f32 %v12480_v9, %v15798_v23  ;;  %v15804_v12 = vand.u32 4294901760, %v12513_v19  ;;  %16720 = vst [vmem:[#allocation26_spill] sm:$0xff] %v12566_v48  ;;  %v4178_v49 = vsub.f32 %v12508_v41, %v15805_v26  ;;  %v16734_v10 = vand.u32 4294901760, %v12566_v48 }
 0x1bc   : > { %v12558_v23 = vsub.f32 %v12495_v30, %v15802_v29  ;;  %v12573_v29 = vld [vmem:[%s15440_s3 + $0x20] sm:$0xff] }
 0x1bd   : > { %9070 = vmatpush1.bf16.msra.mxu1 %v16605_v2  ;;  %16717 = vst [vmem:[#allocation23_spill] sm:$0xff] %v12526_v18  ;;  %v12539_v2 = vld [vmem:[%s15440_s3 + $0xa0] sm:$0xff]  ;;  %v16723_v8 = vand.u32 4294901760, %v12526_v18  ;;  %v4179_v13 = vand.u32 4294901760, %v4178_v49  ;;  %v4199_v4 = vsub.f32 %v12566_v48, %v16734_v10 }
 0x1be   : > { %9072 = vmatprep.subr.bf16.mxu1 %v16606_v34  ;;  %8882 = vmatpush1.bf16.msra.mxu0 %v16607_v43  ;;  %v12552_v34 = vsub.f32 %v12488_v45, %v15801_v11  ;;  %16719 = vst [vmem:[#allocation27_spill] sm:$0xff] %v12558_v23  ;;  %v4185_v43 = vsub.f32 %v12513_v19, %v15804_v12  ;;  %v16722_v12 = vand.u32 4294901760, %v12532_v25  ;;  %v16724_v19 = vand.u32 4294901760, %v12539_v2  ;;  %v16726_v11 = vld [vmem:[#allocation83_spill] sm:$0xff]  ;;  %v16739_v48 = vld [vmem:[#allocation52_spill] sm:$0xff] }
 0x1bf   : > { %8884 = vmatprep.subr.bf16.mxu0 %v16608_v50  ;;  %v16721_v50 = vand.u32 4294901760, %v12520_v61  ;;  %v4066_v55 = vsub.f32 %v12526_v18, %v16723_v8 }
 0x1c0   : > { %16718 = vst [vmem:[#allocation31_spill] sm:$0xff] %v12552_v34  ;;  %v12609_v26 = vsub.f32 %v12532_v25, %v16722_v12  ;;  %v16725_v12 = vand.u32 4294901760, %v12544_v38 }
 0x1c1   : > { %9074 = vmatpush1.bf16.msra.mxu1 %v16609_v15  ;;  %v12578_v15 = vld [vmem:[%s15440_s3 + $0x28] sm:$0xff]  ;;  %v12593_v54 = vsub.f32 %v12520_v61, %v16721_v50  ;;  %v4186_v50 = vand.u32 4294901760, %v4185_v43 }
 0x1c2   : > { %9076 = vmatprep.subr.bf16.mxu1 %v16610_v22  ;;  %8886 = vmatpush1.bf16.msra.mxu0 %v16611_v33  ;;  %v12598_v22 = vld [vmem:[%s15440_s3 + $0xb0] sm:$0xff]  ;;  %v12603_v33 = vld [vmem:[%s15440_s3 + $0xb8] sm:$0xff]  ;;  %v12626_v41 = vsub.f32 %v12544_v38, %v16725_v12  ;;  %v16729_v12 = vand.u32 4294901760, %v12573_v29  ;;  %v16731_v6 = vand.u32 4294901760, %v12578_v15  ;;  %v16743_v20 = vand.u32 4294901760, %v12609_v26 }
 0x1c3   : > { %8888 = vmatprep.subr.bf16.mxu0 %v16612_v5  ;;  %v12621_v5 = vsub.f32 %v12539_v2, %v16724_v19  ;;  %v16727_v19 = vand.u32 4294901760, %v12552_v34  ;;  %v16737_v47 = vand.u32 4294901760, %v12598_v22  ;;  %v9123_v43 = vpack.c.bf16 %v4186_v50, %v4179_v13 }
 0x1c4   : > { %v12659_v8 = vsub.f32 %v12578_v15, %v16731_v6  ;;  %v4087_v10 = vsub.f32 %v12609_v26, %v16743_v20 }
 0x1c5   : > { %9078 = vmatpush1.bf16.msra.mxu1 %v16613_v63  ;;  %v4073_v18 = vsub.f32 %v12552_v34, %v16727_v19  ;;  %v12654_v19 = vsub.f32 %v12573_v29, %v16729_v12  ;;  %v16733_v63 = vld [vmem:[#allocation80_spill] sm:$0xff]  ;;  %v4067_v34 = vand.u32 4294901760, %v4066_v55  ;;  %v12672_v6 = vsub.f32 %v12598_v22, %v16737_v47 }
 0x1c6   : > { %9080 = vmatprep.subr.bf16.mxu1 %v16614_v1  ;;  %8890 = vmatpush1.bf16.msra.mxu0 %v16615_v3  ;;  %v12640_v1 = vld [vmem:[%s15440_s3 + $0xc0] sm:$0xff]  ;;  %v12645_v3 = vld [vmem:[%s15440_s3 + $0xc8] sm:$0xff]  ;;  %16732 = vst [vmem:[#allocation42_spill] sm:$0xff] %v12659_v8  ;;  %v16742_v47 = vand.u32 4294901760, %v12593_v54  ;;  %v15832_v13 = vand.u32 4294901760, %v12659_v8 }
 0x1c7   : > { %8892 = vmatprep.subr.bf16.mxu0 %v16726_v11  ;;  %v16728_v11 = vand.u32 4294901760, %v12558_v23  ;;  %16730 = vst [vmem:[#allocation40_spill] sm:$0xff] %v12654_v19  ;;  %v16736_v12 = vld [vmem:[#allocation88_spill] sm:$0xff] }
 0x1c8   : > { %v4080_v24 = vsub.f32 %v12593_v54, %v16742_v47  ;;  %v16750_v47 = vand.u32 4294901760, %v12645_v3 }
 0x1c9   : > { %v4192_v49 = vsub.f32 %v12558_v23, %v16728_v11  ;;  %9082 = vmatpush1.bf16.msra.mxu1 %v16733_v63  ;;  %v16735_v23 = vld [vmem:[#allocation86_spill] sm:$0xff]  ;;  %v16738_v63 = vand.u32 4294901760, %v12603_v33  ;;  %v15833_v11 = vand.u32 4294901760, %v12654_v19 }
 0x1ca   : > { %9084 = vmatprep.subr.bf16.mxu1 %v16735_v23  ;;  %8894 = vmatpush1.bf16.msra.mxu0 %v16736_v12  ;;  %v4074_v23 = vand.u32 4294901760, %v4073_v18  ;;  %v16740_v12 = vand.u32 4294901760, %v12466_v17  ;;  %v16744_v17 = vand.u32 4294901760, %v12480_v9  ;;  %v16746_v18 = vand.u32 4294901760, %v12621_v5 }
 0x1cb   : > { %v12677_v55 = vsub.f32 %v12603_v33, %v16738_v63  ;;  %8896 = vmatprep.subr.bf16.mxu0 %v16739_v48  ;;  %v4193_v63 = vand.u32 4294901760, %v4192_v49  ;;  %v4200_v48 = vand.u32 4294901760, %v4199_v4  ;;  %v16747_v49 = vand.u32 4294901760, %v12626_v41 }
 0x1cc   : > { %v12686_v0 = vpack.c.bf16 %v16741_v46, %v16740_v12  ;;  %v16745_v46 = vand.u32 4294901760, %v12488_v45  ;;  %v4206_v50 = vsub.f32 %v12621_v5, %v16746_v18  ;;  %v16748_v12 = vld [vmem:[#allocation54_spill] sm:$0xff]  ;;  %v16749_v45 = vand.u32 4294901760, %v12640_v1 }
 0x1cd   : > { %9086 = vmatpush1.bf16.msra.mxu1 %v16623_v21  ;;  %v4213_v20 = vsub.f32 %v12626_v41, %v16747_v49  ;;  %v15831_v21 = vand.u32 4294901760, %v12672_v6  ;;  %v16752_v18 = vand.u32 4294901760, %v12495_v30  ;;  %v4088_v9 = vand.u32 4294901760, %v4087_v10 }
 0x1ce   : > { %v12701_v39 = vpack.c.bf16 %v16745_v46, %v16744_v17  ;;  %9088 = vmatprep.subr.bf16.mxu1 %v16748_v12  ;;  %8898 = vmatpush1.bf16.msra.mxu0 %v16625_v14  ;;  %v12716_v4 = vsub.f32 %v12640_v1, %v16749_v45  ;;  %v12721_v17 = vsub.f32 %v12645_v3, %v16750_v47  ;;  %v16753_v14 = vand.u32 4294901760, %v12502_v36 }
 0x1cf   : > { %v9125_v46 = vpack.c.bf16 %v4074_v23, %v4067_v34  ;;  %9092 = vmatprep.subr.bf16.mxu0 %v12686_v0  ;;  %v4081_v12 = vand.u32 4294901760, %v4080_v24  ;;  %v4094_v45 = vsub.f32 %v12654_v19, %v15833_v11  ;;  %v4101_v47 = vsub.f32 %v12659_v8, %v15832_v13 }
 0x1d0   : > { %16751 = vst [vmem:[#allocation45_spill] sm:$0xff] %v12721_v17  ;;  %v12728_v49 = vpack.c.bf16 %v16753_v14, %v16752_v18  ;;  %v9127_v34 = vpack.c.bf16 %v4200_v48, %v4193_v63  ;;  %v16754_v30 = vand.u32 4294901760, %v12520_v61  ;;  %v16755_v36 = vand.u32 4294901760, %v12532_v25 }
 0x1d1   : > { %9090 = vmatpush1.bf16.msra.mxu1 %v16632_v62  ;;  %2951 = vmatmul.mubr.f32.vlgmr.msra.gmra.mrb[2].mxu0 %v16712_v56  ;;  %v4207_v24 = vand.u32 4294901760, %v4206_v50  ;;  %v4214_v10 = vand.u32 4294901760, %v4213_v20  ;;  %v4220_v18 = vsub.f32 %v12672_v6, %v15831_v21  ;;  %v16757_v62 = vand.u32 4294901760, %v12677_v55 }
 0x1d2   : > { %v12742_v23 = vpack.c.bf16 %v16755_v36, %v16754_v30  ;;  %9124 = vmatprep.subr.bf16.mxu1 %v9123_v43  ;;  %9094 = vmatpush3.bf16.msra.mxu0 %v12701_v39  ;;  %v15835_v63 = vand.u32 4294901760, %v12716_v4  ;;  %v15834_v61 = vand.u32 4294901760, %v12721_v17  ;;  %v16758_v25 = vand.u32 4294901760, %v12539_v2 }
 0x1d3   : > { %v4227_v14 = vsub.f32 %v12677_v55, %v16757_v62  ;;  %9096 = vmatprep.subr.bf16.mxu0 %v12728_v49  ;;  %v16759_v43 = vand.u32 4294901760, %v12544_v38  ;;  %v352_v50 = vlaneseq  ;;  %v4095_v20 = vand.u32 4294901760, %v4094_v45 }
 0x1d4   : > { %16756 = vst [vmem:[#allocation7_spill] sm:$0xff] %v12742_v23  ;;  %3806 = vmatmul.mubr.f32.vlgmr.msra.gmra.mrb[2].mxu1 %v16712_v56  ;;  %v4102_v30 = vand.u32 4294901760, %v4101_v47  ;;  %v16761_v36 = vand.u32 4294901760, %v12232_v52  ;;  %v16762_v21 = vand.u32 4294901760, %v12237_v35  ;;  %v9129_v11 = vpack.c.bf16 %v4088_v9, %v4081_v12 }
 0x1d5   : > { %v12758_v48 = vpack.c.bf16 %v16759_v43, %v16758_v25  ;;  %9126 = vmatpush3.bf16.msra.mxu1 %v9125_v46  ;;  %v9131_v2 = vpack.c.bf16 %v4214_v10, %v4207_v24  ;;  %v16763_v38 = vand.u32 4294901760, %v12573_v29  ;;  %v16764_v25 = vand.u32 4294901760, %v12578_v15 }
 0x1d6   : > { %v4108_v62 = vsub.f32 %v12232_v52, %v16761_v36  ;;  %v4115_v13 = vsub.f32 %v12237_v35, %v16762_v21  ;;  %9128 = vmatprep.subr.bf16.mxu1 %v9127_v34  ;;  %9098 = vmatpush3.bf16.msra.mxu0 %v12742_v23  ;;  %v4221_v56 = vand.u32 4294901760, %v4220_v18  ;;  %v4228_v45 = vand.u32 4294901760, %v4227_v14 }
 0x1d7   : > { %16760 = vst [vmem:[#allocation43_spill] sm:$0xff] %v12758_v48  ;;  %v12771_v43 = vpack.c.bf16 %v16764_v25, %v16763_v38  ;;  %v4234_v47 = vsub.f32 %v12716_v4, %v15835_v63  ;;  %v4241_v21 = vsub.f32 %v12721_v17, %v15834_v61  ;;  %9100 = vmatprep.subr.bf16.mxu0 %v12758_v48  ;;  %v16765_v29 = vand.u32 4294901760, %v12598_v22  ;;  %v16802_v61 = vld [vmem:[#allocation79_spill] sm:$0xff] }
 0x1d8   : > { %v16766_v15 = vand.u32 4294901760, %v12603_v33  ;;  %v12787_v46 = vshrl.u32 %v352_v50, 7  ;;  %v9133_v12 = vpack.c.bf16 %v4102_v30, %v4095_v20  ;;  %v4109_v34 = vand.u32 4294901760, %v4108_v62 }
 0x1d9   : > { %v4116_v24 = vand.u32 4294901760, %v4115_v13  ;;  %9130 = vmatpush3.bf16.msra.mxu1 %v9129_v11  ;;  %v16769_v10 = vand.u32 4294901760, %v12274_v32  ;;  %v16770_v14 = vand.u32 4294901760, %v12279_v59  ;;  %v16771_v22 = vand.u32 4294901760, %v12294_v16 }
 0x1da   : > { %v12785_v9 = vpack.c.bf16 %v16766_v15, %v16765_v29  ;;  %16768 = vst [vmem:[#allocation81_spill] sm:$0xff] %v12787_v46  ;;  %v16772_v38 = vand.u32 4294901760, %v12299_v37  ;;  %9132 = vmatprep.subr.bf16.mxu1 %v9131_v2  ;;  %9102 = vmatpush3.bf16.msra.mxu0 %v12771_v43  ;;  %v9135_v11 = vpack.c.bf16 %v4228_v45, %v4221_v56  ;;  %v16773_v13 = vand.u32 4294901760, %v12167_v44 }
 0x1db   : > { %v4122_v18 = vsub.f32 %v12274_v32, %v16769_v10  ;;  %v4129_v36 = vsub.f32 %v12279_v59, %v16770_v14  ;;  %v4248_v33 = vsub.f32 %v12294_v16, %v16771_v22  ;;  %v16774_v20 = vand.u32 4294901760, %v12172_v51 }
 0x1dc   : > { %16767 = vst [vmem:[#allocation77_spill] sm:$0xff] %v12785_v9  ;;  %v4255_v50 = vsub.f32 %v12299_v37, %v16772_v38  ;;  %v4235_v62 = vand.u32 4294901760, %v4234_v47  ;;  %v4242_v25 = vand.u32 4294901760, %v4241_v21  ;;  %9104 = vmatprep.subr.bf16.mxu0 %v12785_v9  ;;  %v354_v29 = vsub.s32 0, %v12787_v46  ;;  %v12825_v47 = vld [vmem:[%s15439_s2] sm:$0xff] }
 0x1dd   : > { %v12806_v30 = vpack.c.bf16 %v16774_v20, %v16773_v13  ;;  %v16775_v15 = vand.u32 4294901760, %v12640_v1  ;;  %v16776_v10 = vand.u32 4294901760, %v12645_v3  ;;  %v16777_v56 = vand.u32 4294901760, %v12196_v40  ;;  %16779 = vst [vmem:[#allocation82_spill] sm:$0xff] %v12825_v47  ;;  %9134 = vmatpush3.bf16.msra.mxu1 %v9133_v12 }
 0x1de   : > { %v16778_v44 = vand.u32 4294901760, %v12201_v31  ;;  %v9137_v51 = vpack.c.bf16 %v4116_v24, %v4109_v34  ;;  %v358_v21 = vsub.s32 1, %v12787_v46  ;;  %v16780_v1 = vand.u32 4294901760, %v12314_v42  ;;  %9136 = vmatprep.subr.bf16.mxu1 %v9135_v11 }
 0x1df   : > { %v12814_v2 = vpack.c.bf16 %v16776_v10, %v16775_v15  ;;  %v16781_v14 = vand.u32 4294901760, %v12319_v58  ;;  %v4123_v31 = vand.u32 4294901760, %v4122_v18  ;;  %v4130_v22 = vand.u32 4294901760, %v4129_v36  ;;  %9106 = vmatpush3.bf16.msra.mxu0 %v12806_v30 }
 0x1e0   : > { %v12820_v45 = vpack.c.bf16 %v16778_v44, %v16777_v56  ;;  %v4136_v3 = vsub.f32 %v12314_v42, %v16780_v1  ;;  %v4249_v38 = vand.u32 4294901760, %v4248_v33  ;;  %v4256_v34 = vand.u32 4294901760, %v4255_v50 }
 0x1e1   : > { %v4143_v40 = vsub.f32 %v12319_v58, %v16781_v14  ;;  %v9139_v24 = vpack.c.bf16 %v4242_v25, %v4235_v62  ;;  %v16782_v13 = vand.u32 4294901760, %v12352_v57  ;;  %v16783_v15 = vand.u32 4294901760, %v12357_v7  ;;  %9108 = vmatprep.subr.bf16.mxu0 %v12814_v2  ;;  %9138 = vmatpush3.bf16.msra.mxu1 %v9137_v51  ;;  %v16788_v14 = vld [vmem:[#allocation59_spill] sm:$0xff] }
 0x1e2   : > { %v355_v56 = vrot.slane %v12825_v47, %v354_v29  ;;  %v16784_v12 = vand.u32 4294901760, %v12210_v53  ;;  %v16785_v18 = vand.u32 4294901760, %v12227_v27  ;;  %v359_v33 = vrot.slane %v12825_v47, %v358_v21  ;;  %v16790_v27 = vld [vmem:[#allocation38_spill] sm:$0xff] }
 0x1e3   : > { %v4262_v20 = vsub.f32 %v12352_v57, %v16782_v13  ;;  %v4269_v10 = vsub.f32 %v12357_v7, %v16783_v15  ;;  %v4137_v50 = vand.u32 4294901760, %v4136_v3  ;;  %v4144_v11 = vand.u32 4294901760, %v4143_v40  ;;  %9140 = vmatprep.subr.bf16.mxu1 %v9139_v24  ;;  %9110 = vmatpush3.bf16.msra.mxu0 %v12820_v45  ;;  %v16792_v40 = vld [vmem:[#allocation51_spill] sm:$0xff]  ;;  %v1242_v24 = vpop.f32.mrb[0].mxu0 }
 0x1e4   : > { %v12847_v36 = vpack.c.bf16 %v16785_v18, %v16784_v12  ;;  %v16786_v62 = vand.u32 4294901760, %v12372_v60  ;;  %v9141_v44 = vpack.c.bf16 %v4130_v22, %v4123_v31  ;;  %v9143_v1 = vpack.c.bf16 %v4256_v34, %v4249_v38  ;;  %v16794_v31 = vld [vmem:[#allocation56_spill] sm:$0xff]  ;;  %v16796_v38 = vld [vmem:[#allocation73_spill] sm:$0xff] }
 0x1e5   : > { %v16787_v29 = vand.u32 4294901760, %v12244_v28  ;;  %v16789_v13 = vand.u32 4294901760, %v16788_v14  ;;  %v16791_v15 = vand.u32 4294901760, %v16790_v27  ;;  %v4263_v21 = vand.u32 4294901760, %v4262_v20 }
 0x1e6   : > { %v4150_v25 = vsub.f32 %v12372_v60, %v16786_v62  ;;  %v4270_v3 = vand.u32 4294901760, %v4269_v10  ;;  %v16793_v18 = vand.u32 4294901760, %v16792_v40  ;;  %v16795_v22 = vand.u32 4294901760, %v16794_v31  ;;  %9112 = vmatprep.subr.bf16.mxu0 %v12847_v36  ;;  %v16798_v62 = vld [vmem:[#allocation63_spill] sm:$0xff]  ;;  %v16800_v10 = vld [vmem:[#allocation65_spill] sm:$0xff]  ;;  %9142 = vmatpush3.bf16.msra.mxu1 %v9141_v44  ;;  %v12889_v44 = vpop.f32.mrb[0].mxu1 }
 0x1e7   : > { %v12857_v53 = vpack.c.bf16 %v16789_v13, %v16787_v29  ;;  %v4157_v12 = vsub.f32 %v16790_v27, %v16791_v15  ;;  %v16797_v34 = vand.u32 4294901760, %v16796_v38  ;;  %v16799_v29 = vand.u32 4294901760, %v16798_v62  ;;  %v16806_v62 = vld [vmem:[#allocation49_spill] sm:$0xff]  ;;  %9144 = vmatprep.subr.bf16.mxu1 %v9143_v1  ;;  %16808 = vst [vmem:[#allocation87_spill] sm:$0xff] %v12889_v44 }
 0x1e8   : > { %v4276_v51 = vsub.f32 %v16792_v40, %v16793_v18  ;;  %v4283_v28 = vsub.f32 %v16794_v31, %v16795_v22  ;;  %v9145_v13 = vpack.c.bf16 %v4144_v11, %v4137_v50  ;;  %v4151_v20 = vand.u32 4294901760, %v4150_v25  ;;  %v1244_v22 = vpop.f32.mrb[1].mxu0  ;;  %v16804_v31 = vld [vmem:[#allocation47_spill] sm:$0xff] }
 0x1e9   : > { %v12874_v14 = vpack.c.bf16 %v16799_v29, %v16797_v34  ;;  %v16801_v15 = vand.u32 4294901760, %v16800_v10  ;;  %v16803_v63 = vand.u32 4294901760, %v16802_v61  ;;  %v9859_v47 = vadd.f32 %v1242_v24, %v355_v56  ;;  %9114 = vmatpush3.bf16.msra.mxu0 %v12857_v53  ;;  %v16809_v56 = vld [vmem:[#allocation85_spill] sm:$0xff] }
 0x1ea   : > { %v4158_v46 = vand.u32 4294901760, %v4157_v12  ;;  %v16805_v40 = vand.u32 4294901760, %v16804_v31  ;;  %v16807_v34 = vand.u32 4294901760, %v16806_v62  ;;  %v9860_v50 = vadd.f32 %v1244_v22, %v359_v33  ;;  %v16811_v24 = vld [vmem:[#allocation89_spill] sm:$0xff]  ;;  %9146 = vmatpush3.bf16.msra.mxu1 %v9145_v13 }
 0x1eb   : > { %v12880_v18 = vpack.c.bf16 %v16803_v63, %v16801_v15  ;;  %v9147_v11 = vpack.c.bf16 %v4270_v3, %v4263_v21  ;;  %v4277_v61 = vand.u32 4294901760, %v4276_v51  ;;  %v4284_v63 = vand.u32 4294901760, %v4283_v28  ;;  %9116 = vmatprep.subr.bf16.mxu0 %v12874_v14  ;;  %v16815_v28 = vld [vmem:[#allocation32_spill] sm:$0xff]  ;;  %v16820_v13 = vld [vmem:[#allocation21_spill] sm:$0xff] }
 0x1ec   : > { %v4164_v38 = vsub.f32 %v16804_v31, %v16805_v40  ;;  %v4171_v29 = vsub.f32 %v16806_v62, %v16807_v34  ;;  %v3812_v25 = vmax.f32 %v9859_v47, 0.0  ;;  %v16810_v12 = vand.u32 4294901760, %v16809_v56  ;;  %v12898_v34 = vpop.f32.mrb[1].mxu1  ;;  %v16817_v56 = vld [vmem:[#allocation33_spill] sm:$0xff] }
 0x1ed   : > { %v16812_v40 = vand.u32 4294901760, %v16811_v24  ;;  %v3813_v15 = vmax.f32 %v9860_v50, 0.0  ;;  %16813 = vst [vmem:[#allocation30_spill] sm:$0xff] %v12898_v34  ;;  %v9149_v1 = vpack.c.bf16 %v4158_v46, %v4151_v20  ;;  %9148 = vmatprep.subr.bf16.mxu1 %v9147_v11  ;;  %9118 = vmatpush3.bf16.msra.mxu0 %v12880_v18  ;;  %v9151_v51 = vpack.c.bf16 %v4284_v63, %v4277_v61  ;;  %v16819_v46 = vld [vmem:[#allocation20_spill] sm:$0xff]  ;;  %v12995_v34 = vld [vmem:[%s15440_s3 + $0x150] sm:$0xff] }
 0x1ee   : > { %v12900_v33 = vand.u32 4294901760, %v3812_v25  ;;  %v4165_v21 = vand.u32 4294901760, %v4164_v38  ;;  %v4172_v3 = vand.u32 4294901760, %v4171_v29  ;;  %v16816_v22 = vand.u32 4294901760, %v16815_v28  ;;  %v16822_v28 = vld [vmem:[#allocation31_spill] sm:$0xff]  ;;  %16835 = vst [vmem:[#allocation22_spill] sm:$0xff] %v12995_v34 }
 0x1ef   : > { %v12896_v10 = vpack.c.bf16 %v16812_v40, %v16810_v12  ;;  %v12902_v47 = vand.u32 4294901760, %v3813_v15  ;;  %v16818_v12 = vand.u32 4294901760, %v16817_v56  ;;  %v9155_v20 = vpack.c.bf16 %v16820_v13, %v16819_v46  ;;  %9150 = vmatpush3.bf16.msra.mxu1 %v9149_v1  ;;  %v12930_v1 = vld [vmem:[%s15440_s3 + $0x130] sm:$0xff] }
 0x1f0   : > { %16814 = vst [vmem:[#allocation71_spill] sm:$0xff] %v12900_v33  ;;  %v12912_v50 = vsub.f32 %v3812_v25, %v12900_v33  ;;  %v9153_v11 = vpack.c.bf16 %v4172_v3, %v4165_v21  ;;  %9152 = vmatprep.subr.bf16.mxu1 %v9151_v51  ;;  %16823 = vst [vmem:[#allocation35_spill] sm:$0xff] %v12930_v1  ;;  %v12935_v21 = vld [vmem:[%s15440_s3 + $0x138] sm:$0xff]  ;;  %v16826_v56 = vld [vmem:[#allocation26_spill] sm:$0xff] }
 0x1f1   : > { %v12909_v24 = vpack.c.bf16 %v16818_v12, %v16816_v22  ;;  %9120 = vmatprep.subr.bf16.mxu0 %v12896_v10  ;;  %v4047_v38 = vsub.f32 %v3813_v15, %v12902_v47  ;;  %4287 = vmatprep.mubr.f32.mxu1 %v12902_v47  ;;  %v16821_v15 = vld [vmem:[#allocation23_spill] sm:$0xff]  ;;  %16824 = vst [vmem:[#allocation39_spill] sm:$0xff] %v12935_v21  ;;  %v16834_v44 = vand.u32 4294901760, %v12935_v21 }
 0x1f2   : > { %v15842_v29 = vand.u32 4294901760, %v12912_v50  ;;  %v9157_v22 = vpack.c.bf16 %v16822_v28, %v16821_v15  ;;  %v16825_v51 = vld [vmem:[#allocation27_spill] sm:$0xff] }
 0x1f3   : > { %9122 = vmatpush3.bf16.msra.mxu0 %v12909_v24  ;;  %v4048_v61 = vand.u32 4294901760, %v4047_v38  ;;  %9154 = vmatpush3.bf16.msra.mxu1 %v9153_v11  ;;  %v9159_v12 = vpack.c.bf16 %v16826_v56, %v16825_v51 }
 0x1f4   : > { %9156 = vmatprep.subr.bf16.mxu0 %v9155_v20  ;;  %v4055_v63 = vsub.f32 %v12912_v50, %v15842_v29  ;;  %9188 = vmatprep.subr.bf16.mxu1 %v12686_v0  ;;  %v15847_v20 = vand.u32 4294901760, %v12930_v1  ;;  %v9165_v29 = vpack.c.bf16 %v12659_v8, %v12654_v19  ;;  %v13021_v19 = vld [vmem:[%s15440_s3 + $0x1e0] sm:$0xff] }
 0x1f5   : > { %v4049_v25 = vsub.f32 %v4047_v38, %v4048_v61 }
 0x1f6   : > { %4289 = vmatmul.mubr.f32.vlgmr.msra.gmra.mrb[4].mxu1 %v12900_v33  ;;  %v4056_v3 = vand.u32 4294901760, %v4055_v63  ;;  %v12949_v63 = vld [vmem:[%s15440_s3 + $0x1c0] sm:$0xff]  ;;  %v12985_v11 = vsub.f32 %v12930_v1, %v15847_v20  ;;  %v12990_v33 = vsub.f32 %v12935_v21, %v16834_v44  ;;  %v9167_v21 = vpack.c.bf16 %v12677_v55, %v12672_v6 }
 0x1f7   : > { %v4050_v40 = vand.u32 4294901760, %v4049_v25  ;;  %9190 = vmatpush3.bf16.msra.mxu1 %v12701_v39  ;;  %4531 = vmatprep.mubr.f32.mxu1 %v4048_v61  ;;  %v9161_v25 = vpack.c.bf16 %v12609_v26, %v12593_v54  ;;  %16827 = vst [vmem:[#allocation50_spill] sm:$0xff] %v12949_v63  ;;  %v9163_v61 = vpack.c.bf16 %v12626_v41, %v12621_v5 }
 0x1f8   : > { %9192 = vmatprep.subr.bf16.mxu1 %v12728_v49  ;;  %16833 = vst [vmem:[#allocation18_spill] sm:$0xff] %v12985_v11  ;;  %v9169_v1 = vpack.c.bf16 %v12237_v35, %v12232_v52 }
 0x1f9   : > { %4051 = vmatprep.mubr.f32.mxu0 %v4050_v40  ;;  %v12956_v40 = vld [vmem:[%s15440_s3 + $0x1c8] sm:$0xff] }
 0x1fa   : > { %4057 = vmatmul.mubr.f32.vlgmr.msra.gmra.mrb[4].mxu0 %v4056_v3  ;;  %16828 = vst [vmem:[#allocation46_spill] sm:$0xff] %v12956_v40  ;;  %v12972_v3 = vld [vmem:[%s15440_s3 + $0x1d0] sm:$0xff]  ;;  %v15852_v20 = vand.u32 4294901760, %v12956_v40 }
 0x1fb   : > { %9158 = vmatpush3.bf16.msra.mxu0 %v9157_v22  ;;  %4424 = vmatprep.mubr.f32.mxu0 %v4047_v38  ;;  %v12961_v38 = vld [vmem:[%s15440_s3 + $0x140] sm:$0xff]  ;;  %v12966_v22 = vld [vmem:[%s15440_s3 + $0x148] sm:$0xff]  ;;  %16831 = vst [vmem:[#allocation16_spill] sm:$0xff] %v12972_v3 }
 0x1fc   : > { %9160 = vmatprep.subr.bf16.mxu0 %v9159_v12  ;;  %16829 = vst [vmem:[#allocation64_spill] sm:$0xff] %v12961_v38  ;;  %16830 = vst [vmem:[#allocation6_spill] sm:$0xff] %v12966_v22  ;;  %9194 = vmatpush3.bf16.msra.mxu1 %v12742_v23  ;;  %v12977_v12 = vld [vmem:[%s15440_s3 + $0x1d8] sm:$0xff]  ;;  %v16837_v23 = vand.u32 4294901760, %v12949_v63  ;;  %v13031_v8 = vsub.f32 %v12956_v40, %v15852_v20  ;;  %v16838_v52 = vand.u32 4294901760, %v12961_v38  ;;  %v16839_v44 = vand.u32 4294901760, %v12966_v22 }
 0x1fd   : > { %16832 = vst [vmem:[#allocation12_spill] sm:$0xff] %v12977_v12  ;;  %9196 = vmatprep.subr.bf16.mxu1 %v12758_v48  ;;  %v13000_v48 = vld [vmem:[%s15440_s3 + $0x158] sm:$0xff]  ;;  %v16843_v20 = vand.u32 4294901760, %v12972_v3 }
 0x1fe   : > { %16836 = vst [vmem:[#allocation29_spill] sm:$0xff] %v13000_v48  ;;  %v13036_v35 = vsub.f32 %v12961_v38, %v16838_v52  ;;  %v13056_v52 = vld [vmem:[%s15440_s3 + $0x168] sm:$0xff]  ;;  %v16844_v38 = vand.u32 4294901760, %v12977_v12 }
 0x1ff   : > { %9162 = vmatpush3.bf16.msra.mxu0 %v9161_v25  ;;  %v13026_v25 = vsub.f32 %v12949_v63, %v16837_v23  ;;  %v13046_v23 = vld [vmem:[%s15440_s3 + $0x1e8] sm:$0xff]  ;;  %16842 = vst [vmem:[#allocation48_spill] sm:$0xff] %v13056_v52  ;;  %v9173_v63 = vpack.c.bf16 %v12279_v59, %v12274_v32  ;;  %v13112_v32 = vld [vmem:[%s15440_s3 + $0x1f8] sm:$0xff] }
 0x200   : > { %9164 = vmatprep.subr.bf16.mxu0 %v9163_v61  ;;  %9198 = vmatpush3.bf16.msra.mxu1 %v12771_v43  ;;  %v13041_v61 = vsub.f32 %v12966_v22, %v16839_v44  ;;  %16840 = vst [vmem:[#allocation25_spill] sm:$0xff] %v13046_v23  ;;  %v9171_v44 = vpack.c.bf16 %v12721_v17, %v12716_v4  ;;  %v16846_v17 = vand.u32 4294901760, %v13000_v48  ;;  %16851 = vst [vmem:[#allocation62_spill] sm:$0xff] %v13112_v32 }
 0x201   : > { %9200 = vmatprep.subr.bf16.mxu1 %v12785_v9  ;;  %v13063_v22 = vsub.f32 %v12972_v3, %v16843_v20  ;;  %v13068_v40 = vsub.f32 %v12977_v12, %v16844_v38  ;;  %v16847_v3 = vand.u32 4294901760, %v12985_v11  ;;  %v16848_v38 = vand.u32 4294901760, %v12990_v33 }
 0x202   : > { %v13081_v20 = vsub.f32 %v13000_v48, %v16846_v17  ;;  %v15866_v17 = vand.u32 4294901760, %v13026_v25  ;;  %v15865_v48 = vand.u32 4294901760, %v13031_v8  ;;  %v15867_v11 = vand.u32 4294901760, %v13036_v35 }
 0x203   : > { %9166 = vmatpush3.bf16.msra.mxu0 %v9165_v29  ;;  %v13051_v29 = vld [vmem:[%s15440_s3 + $0x160] sm:$0xff]  ;;  %v13087_v12 = vpack.c.bf16 %v16848_v38, %v16847_v3  ;;  %v13101_v38 = vld [vmem:[%s15440_s3 + $0x1f0] sm:$0xff] }
 0x204   : > { %16841 = vst [vmem:[#allocation34_spill] sm:$0xff] %v13051_v29  ;;  %9168 = vmatprep.subr.bf16.mxu0 %v9167_v21  ;;  %9202 = vmatpush3.bf16.msra.mxu1 %v12806_v30  ;;  %v16845_v21 = vand.u32 4294901760, %v12995_v34  ;;  %16850 = vst [vmem:[#allocation8_spill] sm:$0xff] %v13101_v38  ;;  %v13117_v3 = vld [vmem:[%s15440_s3 + $0x170] sm:$0xff] }
 0x205   : > { %16849 = vst [vmem:[#allocation53_spill] sm:$0xff] %v13087_v12  ;;  %9204 = vmatprep.subr.bf16.mxu1 %v12814_v2  ;;  %16852 = vst [vmem:[#allocation61_spill] sm:$0xff] %v13117_v3 }
 0x206   : > { %v13076_v9 = vsub.f32 %v12995_v34, %v16845_v21  ;;  %v9175_v21 = vpack.c.bf16 %v12299_v37, %v12294_v16  ;;  %v13122_v16 = vld [vmem:[%s15440_s3 + $0x178] sm:$0xff]  ;;  %v16857_v34 = vand.u32 4294901760, %v13021_v19 }
 0x207   : > { %9170 = vmatpush3.bf16.msra.mxu0 %v9169_v1  ;;  %v9177_v1 = vpack.c.bf16 %v12319_v58, %v12314_v42  ;;  %16853 = vst [vmem:[#allocation13_spill] sm:$0xff] %v13122_v16  ;;  %v13131_v58 = vpack.c.bf16 %v15865_v48, %v15866_v17  ;;  %v16858_v42 = vand.u32 4294901760, %v13046_v23  ;;  %v16859_v48 = vand.u32 4294901760, %v13051_v29 }
 0x208   : > { %9172 = vmatprep.subr.bf16.mxu0 %v9171_v44  ;;  %9206 = vmatpush3.bf16.msra.mxu1 %v12820_v45  ;;  %v16855_v44 = vand.u32 4294901760, %v13041_v61  ;;  %v13143_v37 = vsub.f32 %v13021_v19, %v16857_v34  ;;  %v16864_v34 = vand.u32 4294901760, %v13076_v9 }
 0x209   : > { %16854 = vst [vmem:[#allocation9_spill] sm:$0xff] %v13131_v58  ;;  %9208 = vmatprep.subr.bf16.mxu1 %v12847_v36  ;;  %v13148_v12 = vsub.f32 %v13046_v23, %v16858_v42  ;;  %v13153_v17 = vsub.f32 %v13051_v29, %v16859_v48  ;;  %v9179_v23 = vpack.c.bf16 %v12357_v7, %v12352_v57  ;;  %v16865_v58 = vand.u32 4294901760, %v13081_v20  ;;  %v16872_v7 = vld [vmem:[#allocation56_spill] sm:$0xff] }
 0x20a   : > { %v13137_v59 = vpack.c.bf16 %v16855_v44, %v15867_v11  ;;  %v16860_v44 = vand.u32 4294901760, %v13056_v52  ;;  %v9181_v48 = vpack.c.bf16 %v16790_v27, %v12372_v60  ;;  %v16870_v60 = vand.u32 4294901760, %v13122_v16 }
 0x20b   : > { %9174 = vmatpush3.bf16.msra.mxu0 %v9173_v63  ;;  %v16862_v63 = vand.u32 4294901760, %v13068_v40  ;;  %v13179_v42 = vpack.c.bf16 %v16865_v58, %v16864_v34  ;;  %v16869_v34 = vand.u32 4294901760, %v13117_v3 }
 0x20c   : > { %16856 = vst [vmem:[#allocation76_spill] sm:$0xff] %v13137_v59  ;;  %v13158_v11 = vsub.f32 %v13056_v52, %v16860_v44  ;;  %9176 = vmatprep.subr.bf16.mxu0 %v9175_v21  ;;  %9210 = vmatpush3.bf16.msra.mxu1 %v12857_v53  ;;  %v16861_v44 = vand.u32 4294901760, %v13063_v22  ;;  %v16867_v21 = vand.u32 4294901760, %v13101_v38  ;;  %v13204_v27 = vsub.f32 %v13122_v16, %v16870_v60  ;;  %v16936_v52 = vld [vmem:[#allocation66_spill] sm:$0xff] }
 0x20d   : > { %16866 = vst [vmem:[#allocation90_spill] sm:$0xff] %v13179_v42  ;;  %9212 = vmatprep.subr.bf16.mxu1 %v12874_v14  ;;  %v13199_v57 = vsub.f32 %v13117_v3, %v16869_v34  ;;  %v16873_v42 = vand.u32 4294901760, %v13143_v37  ;;  %v16876_v34 = vand.u32 4294901760, %v13153_v17 }
 0x20e   : > { %v13173_v59 = vpack.c.bf16 %v16862_v63, %v16861_v44  ;;  %v13189_v44 = vsub.f32 %v13101_v38, %v16867_v21  ;;  %v16868_v63 = vand.u32 4294901760, %v13112_v32  ;;  %v16877_v3 = vand.u32 4294901760, %v13158_v11 }
 0x20f   : > { %9178 = vmatpush3.bf16.msra.mxu0 %v9177_v1  ;;  %v16871_v1 = vld [vmem:[#allocation51_spill] sm:$0xff] }
 0x210   : > { %16863 = vst [vmem:[#allocation78_spill] sm:$0xff] %v13173_v59  ;;  %v13194_v58 = vsub.f32 %v13112_v32, %v16868_v63  ;;  %9180 = vmatprep.subr.bf16.mxu0 %v9179_v23  ;;  %v9183_v21 = vpack.c.bf16 %v16872_v7, %v16871_v1  ;;  %9214 = vmatpush3.bf16.msra.mxu1 %v12880_v18  ;;  %v16874_v63 = vand.u32 4294901760, %v13148_v12  ;;  %v15874_v7 = vand.u32 4294901760, %v13189_v44 }
 0x211   : > { %v13219_v32 = vpack.c.bf16 %v16877_v3, %v16876_v34  ;;  %9216 = vmatprep.subr.bf16.mxu1 %v12896_v10  ;;  %v9185_v23 = vpack.c.bf16 %v16806_v62, %v16804_v31  ;;  %v15873_v1 = vand.u32 4294901760, %v13199_v57  ;;  %v16880_v3 = vand.u32 4294901760, %v16820_v13 }
 0x212   : > { %v13213_v59 = vpack.c.bf16 %v16874_v63, %v16873_v42  ;;  %v15871_v60 = vand.u32 4294901760, %v13194_v58  ;;  %v15872_v42 = vand.u32 4294901760, %v13204_v27  ;;  %v16879_v63 = vand.u32 4294901760, %v16819_v46 }
 0x213   : > { %16878 = vst [vmem:[#allocation57_spill] sm:$0xff] %v13219_v32  ;;  %9182 = vmatpush3.bf16.msra.mxu0 %v9181_v48  ;;  %v16883_v46 = vand.u32 4294901760, %v16821_v15  ;;  %v16884_v13 = vand.u32 4294901760, %v16822_v28  ;;  %v13267_v15 = vld [vmem:[%s15440_s3 + $0x188] sm:$0xff]  ;;  %v16889_v28 = vand.u32 4294901760, %v12593_v54  ;;  %v16893_v54 = vld [vmem:[#allocation82_spill] sm:$0xff] }
 0x214   : > { %16875 = vst [vmem:[#allocation60_spill] sm:$0xff] %v13213_v59  ;;  %9184 = vmatprep.subr.bf16.mxu0 %v9183_v21  ;;  %v9219_v34 = vpack.c.bf16 %v16880_v3, %v16879_v63  ;;  %9218 = vmatpush3.bf16.msra.mxu1 %v12909_v24  ;;  %v13237_v31 = vpack.c.bf16 %v15871_v60, %v15874_v7  ;;  %v16885_v21 = vand.u32 4294901760, %v12912_v50  ;;  %v16886_v63 = vand.u32 4294901760, %v16825_v51  ;;  %v16909_v7 = vld [vmem:[#allocation45_spill] sm:$0xff] }
 0x215   : > { %v13243_v62 = vpack.c.bf16 %v15872_v42, %v15873_v1  ;;  %9252 = vmatprep.subr.bf16.mxu1 %v12686_v0  ;;  %v9221_v48 = vpack.c.bf16 %v16884_v13, %v16883_v46  ;;  %v16887_v3 = vand.u32 4294901760, %v16826_v56  ;;  %v13259_v42 = vld [vmem:[%s15440_s3 + $0x180] sm:$0xff]  ;;  %v16888_v0 = vld [vmem:[#allocation81_spill] sm:$0xff]  ;;  %v16890_v51 = vand.u32 4294901760, %v12609_v26 }
 0x216   : > { %16881 = vst [vmem:[#allocation72_spill] sm:$0xff] %v13237_v31  ;;  %v16892_v46 = vand.u32 4294901760, %v12626_v41  ;;  %v13290_v26 = vld [vmem:[%s15440_s3 + $0x108] sm:$0xff]  ;;  %v16896_v41 = vld [vmem:[#allocation40_spill] sm:$0xff]  ;;  %v16908_v1 = vand.u32 4294901760, %v12716_v4 }
 0x217   : > { %16882 = vst [vmem:[#allocation17_spill] sm:$0xff] %v13243_v62  ;;  %9186 = vmatpush3.bf16.msra.mxu0 %v9185_v23  ;;  %4535 = vmatmul.mubr.f32.vlgmr.msra.gmra.mrb[6].mxu1 %v16885_v21  ;;  %v9223_v60 = vpack.c.bf16 %v16887_v3, %v16886_v63  ;;  %v366_v23 = vsub.s32 3, %v16888_v0  ;;  %v9225_v56 = vpack.c.bf16 %v16890_v51, %v16889_v28  ;;  %v16898_v21 = vld [vmem:[#allocation42_spill] sm:$0xff]  ;;  %v13374_v4 = vld [vmem:[%s15440_s3 + $0x120] sm:$0xff] }
 0x218   : > { %9220 = vmatprep.subr.bf16.mxu0 %v9219_v34  ;;  %9254 = vmatpush3.bf16.msra.mxu1 %v12701_v39  ;;  %v15876_v39 = vand.u32 4294901760, %v13259_v42  ;;  %v16891_v34 = vand.u32 4294901760, %v12621_v5  ;;  %v16895_v5 = vld [vmem:[#allocation43_spill] sm:$0xff]  ;;  %v16899_v63 = vand.u32 4294901760, %v16898_v21  ;;  %v16927_v59 = vand.u32 4294901760, %v13374_v4 }
 0x219   : > { %4805 = vmatprep.mubr.f32.mxu1 %v12902_v47  ;;  %9256 = vmatprep.subr.bf16.mxu1 %v12728_v49  ;;  %v13285_v49 = vld [vmem:[%s15440_s3 + $0x100] sm:$0xff] }
 0x21a   : > { %4427 = vmatmul.mubr.f32.vlgmr.msra.gmra.mrb[6].mxu0 %v12912_v50  ;;  %v9227_v13 = vpack.c.bf16 %v16892_v46, %v16891_v34  ;;  %v15875_v50 = vand.u32 4294901760, %v13267_v15  ;;  %v13302_v28 = vsub.f32 %v13259_v42, %v15876_v39  ;;  %v15877_v51 = vand.u32 4294901760, %v13285_v49 }
 0x21b   : > { %9222 = vmatpush3.bf16.msra.mxu0 %v9221_v48  ;;  %4701 = vmatprep.mubr.f32.mxu0 %v12902_v47  ;;  %v367_v47 = vrot.slane %v16893_v54, %v366_v23  ;;  %v16897_v48 = vand.u32 4294901760, %v16896_v41  ;;  %v15878_v34 = vand.u32 4294901760, %v13290_v26  ;;  %v13309_v23 = vld [vmem:[%s15440_s3 + $0x190] sm:$0xff]  ;;  %v16901_v46 = vand.u32 4294901760, %v12672_v6 }
 0x21c   : > { %9224 = vmatprep.subr.bf16.mxu0 %v9223_v60  ;;  %v16894_v60 = vld [vmem:[#allocation7_spill] sm:$0xff]  ;;  %16900 = vst [vmem:[#allocation19_spill] sm:$0xff] %v13302_v28  ;;  %v13323_v41 = vsub.f32 %v13267_v15, %v15875_v50  ;;  %v16910_v50 = vand.u32 4294901760, %v16909_v7  ;;  %v13379_v7 = vld [vmem:[%s15440_s3 + $0x128] sm:$0xff] }
 0x21d   : > { %9258 = vmatpush3.bf16.msra.mxu1 %v16894_v60  ;;  %v9229_v3 = vpack.c.bf16 %v16899_v63, %v16897_v48  ;;  %v16902_v60 = vand.u32 4294901760, %v12677_v55  ;;  %v16904_v48 = vld [vmem:[#allocation30_spill] sm:$0xff] }
 0x21e   : > { %9260 = vmatprep.subr.bf16.mxu1 %v16895_v5  ;;  %16903 = vst [vmem:[#allocation15_spill] sm:$0xff] %v13323_v41  ;;  %v9862_v21 = vadd.f32 %v16904_v48, %v367_v47  ;;  %v13330_v63 = vld [vmem:[%s15440_s3 + $0x110] sm:$0xff]  ;;  %v13348_v47 = vld [vmem:[%s15440_s3 + $0x1a8] sm:$0xff]  ;;  %v13354_v48 = vsub.f32 %v13285_v49, %v15877_v51  ;;  %v9235_v39 = vpack.c.bf16 %v16910_v50, %v16908_v1 }
 0x21f   : > { %9226 = vmatpush3.bf16.msra.mxu0 %v9225_v56  ;;  %v13314_v56 = vld [vmem:[%s15440_s3 + $0x198] sm:$0xff]  ;;  %v9231_v5 = vpack.c.bf16 %v16902_v60, %v16901_v46  ;;  %v15880_v60 = vand.u32 4294901760, %v13330_v63 }
 0x220   : > { %9228 = vmatprep.subr.bf16.mxu0 %v9227_v13  ;;  %v16905_v13 = vld [vmem:[#allocation77_spill] sm:$0xff]  ;;  %v13338_v46 = vld [vmem:[%s15440_s3 + $0x118] sm:$0xff]  ;;  %16906 = vst [vmem:[#allocation14_spill] sm:$0xff] %v13354_v48  ;;  %v3815_v55 = vmax.f32 %v9862_v21, 0.0  ;;  %v16913_v50 = vand.u32 4294901760, %v13314_v56  ;;  %v16915_v21 = vld [vmem:[#allocation84_spill] sm:$0xff] }
 0x221   : > { %9262 = vmatpush3.bf16.msra.mxu1 %v12771_v43  ;;  %v13343_v43 = vld [vmem:[%s15440_s3 + $0x1a0] sm:$0xff]  ;;  %v16917_v31 = vand.u32 4294901760, %v13338_v46 }
 0x222   : > { %9264 = vmatprep.subr.bf16.mxu1 %v16905_v13  ;;  %v13359_v13 = vsub.f32 %v13290_v26, %v15878_v34  ;;  %v16916_v34 = vand.u32 4294901760, %v13302_v28  ;;  %v13418_v62 = vand.u32 4294901760, %v3815_v55 }
 0x223   : > { %9230 = vmatpush3.bf16.msra.mxu0 %v9229_v3  ;;  %v15879_v3 = vand.u32 4294901760, %v13323_v41 }
 0x224   : > { %16907 = vst [vmem:[#allocation24_spill] sm:$0xff] %v13359_v13  ;;  %9232 = vmatprep.subr.bf16.mxu0 %v9231_v5  ;;  %v13390_v5 = vsub.f32 %v13314_v56, %v16913_v50  ;;  %v5040_v6 = vsub.f32 %v13302_v28, %v16916_v34  ;;  %v13406_v50 = vld [vmem:[%s15440_s3 + $0x1b8] sm:$0xff]  ;;  %v13414_v34 = vsub.f32 %v13330_v63, %v15880_v60  ;;  %v16921_v60 = vand.u32 4294901760, %v13348_v47 }
 0x225   : > { %9266 = vmatpush3.bf16.msra.mxu1 %v12806_v30  ;;  %v16911_v30 = vand.u32 4294901760, %v13309_v23 }
 0x226   : > { %9268 = vmatprep.subr.bf16.mxu1 %v12814_v2  ;;  %16914 = vst [vmem:[#allocation67_spill] sm:$0xff] %v13390_v5  ;;  %v13434_v2 = vsub.f32 %v13348_v47, %v16921_v60  ;;  %v5041_v28 = vand.u32 4294901760, %v5040_v6  ;;  %v16925_v60 = vand.u32 4294901760, %v13359_v13 }
 0x227   : > { %v13385_v1 = vsub.f32 %v13309_v23, %v16911_v30  ;;  %9234 = vmatpush3.bf16.msra.mxu0 %v16915_v21  ;;  %v13401_v30 = vld [vmem:[%s15440_s3 + $0x1b0] sm:$0xff]  ;;  %v5047_v21 = vsub.f32 %v13323_v41, %v15879_v3  ;;  %v16919_v3 = vand.u32 4294901760, %v13343_v43  ;;  %v16923_v41 = vld [vmem:[#allocation37_spill] sm:$0xff] }
 0x228   : > { %9236 = vmatprep.subr.bf16.mxu0 %v9235_v39  ;;  %v13424_v39 = vsub.f32 %v13338_v46, %v16917_v31  ;;  %16922 = vst [vmem:[#allocation28_spill] sm:$0xff] %v13434_v2  ;;  %v4935_v38 = vsub.f32 %v13359_v13, %v16925_v60  ;;  %v13453_v31 = vsub.f32 %v13374_v4, %v16927_v59  ;;  %v16934_v60 = vand.u32 4294901760, %v13406_v50 }
 0x229   : > { %16912 = vst [vmem:[#allocation36_spill] sm:$0xff] %v13385_v1  ;;  %9270 = vmatpush3.bf16.msra.mxu1 %v12820_v45  ;;  %v13429_v32 = vsub.f32 %v13343_v43, %v16919_v3  ;;  %v16924_v3 = vand.u32 4294901760, %v13354_v48  ;;  %v5048_v51 = vand.u32 4294901760, %v5047_v21  ;;  %v16931_v59 = vand.u32 4294901760, %v13385_v1 }
 0x22a   : > { %16918 = vst [vmem:[#allocation11_spill] sm:$0xff] %v13424_v39  ;;  %9272 = vmatprep.subr.bf16.mxu1 %v12847_v36  ;;  %v16926_v36 = vld [vmem:[#allocation41_spill] sm:$0xff]  ;;  %16928 = vst [vmem:[#allocation75_spill] sm:$0xff] %v13453_v31  ;;  %v13482_v21 = vsub.f32 %v13406_v50, %v16934_v60  ;;  %v16938_v29 = vand.u32 4294901760, %v13424_v39 }
 0x22b   : > { %16920 = vst [vmem:[#allocation74_spill] sm:$0xff] %v13429_v32  ;;  %9238 = vmatpush3.bf16.msra.mxu0 %v16923_v41  ;;  %v4928_v16 = vsub.f32 %v13354_v48, %v16924_v3  ;;  %v16929_v41 = vand.u32 4294901760, %v13379_v7  ;;  %v13461_v3 = vsub.f32 %v3815_v55, %v13418_v62  ;;  %v5054_v45 = vsub.f32 %v13385_v1, %v16931_v59 }
 0x22c   : > { %9240 = vmatprep.subr.bf16.mxu0 %v16926_v36  ;;  %v16933_v55 = vand.u32 4294901760, %v13401_v30  ;;  %v16935_v36 = vld [vmem:[#allocation44_spill] sm:$0xff]  ;;  %v4936_v48 = vand.u32 4294901760, %v4935_v38  ;;  %v9315_v59 = vpack.c.bf16 %v5048_v51, %v5041_v28  ;;  %v16937_v1 = vand.u32 4294901760, %v13414_v34 }
 0x22d   : > { %v13458_v6 = vsub.f32 %v13379_v7, %v16929_v41  ;;  %9274 = vmatpush3.bf16.msra.mxu1 %v12857_v53  ;;  %v16932_v41 = vand.u32 4294901760, %v13390_v5  ;;  %v16939_v38 = vand.u32 4294901760, %v13429_v32  ;;  %v16940_v28 = vand.u32 4294901760, %v13434_v2 }
 0x22e   : > { %9276 = vmatprep.subr.bf16.mxu1 %v12874_v14  ;;  %v13477_v53 = vsub.f32 %v13401_v30, %v16933_v55  ;;  %v4929_v14 = vand.u32 4294901760, %v4928_v16  ;;  %v4949_v16 = vsub.f32 %v13424_v39, %v16938_v29  ;;  %v16941_v55 = vld [vmem:[#allocation68_spill] sm:$0xff]  ;;  %v16942_v29 = vld [vmem:[#allocation69_spill] sm:$0xff]  ;;  %v16943_v39 = vand.u32 4294901760, %v13259_v42 }
 0x22f   : > { %16930 = vst [vmem:[#allocation94_spill] sm:$0xff] %v13458_v6  ;;  %v5061_v13 = vsub.f32 %v13390_v5, %v16932_v41  ;;  %9242 = vmatpush3.bf16.msra.mxu0 %v16935_v36  ;;  %v4942_v41 = vsub.f32 %v13414_v34, %v16937_v1  ;;  %v5075_v51 = vsub.f32 %v13434_v2, %v16940_v28  ;;  %v5055_v1 = vand.u32 4294901760, %v5054_v45 }
 0x230   : > { %9244 = vmatprep.subr.bf16.mxu0 %v16936_v52  ;;  %v5068_v52 = vsub.f32 %v13429_v32, %v16939_v38  ;;  %v9317_v5 = vpack.c.bf16 %v4936_v48, %v4929_v14  ;;  %v16944_v38 = vand.u32 4294901760, %v13267_v15  ;;  %v16946_v45 = vand.u32 4294901760, %v13458_v6 }
 0x231   : > { %9278 = vmatpush3.bf16.msra.mxu1 %v12880_v18  ;;  %v5062_v36 = vand.u32 4294901760, %v5061_v13  ;;  %v15901_v18 = vand.u32 4294901760, %v13477_v53  ;;  %v4943_v28 = vand.u32 4294901760, %v4942_v41  ;;  %v16947_v48 = vand.u32 4294901760, %v13461_v3 }
 0x232   : > { %9280 = vmatprep.subr.bf16.mxu1 %v12896_v10  ;;  %v13511_v32 = vpack.c.bf16 %v16944_v38, %v16943_v39  ;;  %v16945_v10 = vand.u32 4294901760, %v13453_v31  ;;  %v4963_v60 = vsub.f32 %v13458_v6, %v16946_v45  ;;  %v4950_v42 = vand.u32 4294901760, %v4949_v16 }
 0x233   : > { %9246 = vmatpush3.bf16.msra.mxu0 %v16941_v55  ;;  %v4911_v14 = vsub.f32 %v13461_v3, %v16947_v48  ;;  %v5069_v55 = vand.u32 4294901760, %v5068_v52  ;;  %v5076_v15 = vand.u32 4294901760, %v5075_v51  ;;  %v9319_v39 = vpack.c.bf16 %v5062_v36, %v5055_v1  ;;  %v16954_v36 = vld [vmem:[#allocation71_spill] sm:$0xff] }
 0x234   : > { %9248 = vmatprep.subr.bf16.mxu0 %v16942_v29  ;;  %v4956_v13 = vsub.f32 %v13453_v31, %v16945_v10  ;;  %v5082_v41 = vsub.f32 %v13477_v53, %v15901_v18  ;;  %v16948_v29 = vand.u32 4294901760, %v13482_v21  ;;  %v362_v10 = vsub.s32 2, %v16888_v0  ;;  %v16955_v18 = vld [vmem:[#allocation18_spill] sm:$0xff] }
 0x235   : > { %9282 = vmatpush3.bf16.msra.mxu1 %v12909_v24  ;;  %v16949_v24 = vld [vmem:[#allocation10_spill] sm:$0xff]  ;;  %v16950_v45 = vand.u32 4294901760, %v13285_v49  ;;  %v16951_v16 = vand.u32 4294901760, %v13290_v26  ;;  %v16953_v51 = vand.u32 4294901760, %v13314_v56  ;;  %v16957_v26 = vand.u32 4294901760, %v12990_v33 }
 0x236   : > { %9316 = vmatprep.subr.bf16.mxu1 %v9315_v59  ;;  %v5089_v38 = vsub.f32 %v13482_v21, %v16948_v29  ;;  %v16952_v59 = vand.u32 4294901760, %v13309_v23  ;;  %v4957_v48 = vand.u32 4294901760, %v4956_v13  ;;  %v4964_v29 = vand.u32 4294901760, %v4963_v60 }
 0x237   : > { %9250 = vmatpush3.bf16.msra.mxu0 %v16949_v24  ;;  %v13535_v52 = vpack.c.bf16 %v16951_v16, %v16950_v45  ;;  %v16956_v24 = vand.u32 4294901760, %v16955_v18  ;;  %v4977_v45 = vsub.f32 %v12990_v33, %v16957_v26  ;;  %v4912_v23 = vand.u32 4294901760, %v4911_v14 }
 0x238   : > { %v13541_v1 = vpack.c.bf16 %v16953_v51, %v16952_v59  ;;  %4807 = vmatmul.mubr.f32.vlgmr.msra.gmra.mrb[8].mxu1 %v16954_v36  ;;  %9284 = vmatprep.subr.bf16.mxu0 %v13511_v32  ;;  %v9321_v56 = vpack.c.bf16 %v4950_v42, %v4943_v28  ;;  %v9323_v16 = vpack.c.bf16 %v5076_v15, %v5069_v55  ;;  %v5083_v59 = vand.u32 4294901760, %v5082_v41 }
 0x239   : > { %v4970_v49 = vsub.f32 %v16955_v18, %v16956_v24  ;;  %9318 = vmatpush3.bf16.msra.mxu1 %v9317_v5  ;;  %5149 = vmatprep.mubr.f32.mxu1 %v13418_v62  ;;  %v5090_v13 = vand.u32 4294901760, %v5089_v38  ;;  %v16958_v60 = vand.u32 4294901760, %v13026_v25  ;;  %v16959_v24 = vand.u32 4294901760, %v13031_v8 }
 0x23a   : > { %4703 = vmatmul.mubr.f32.vlgmr.msra.gmra.mrb[8].mxu0 %v16954_v36  ;;  %9320 = vmatprep.subr.bf16.mxu1 %v9319_v39  ;;  %v363_v5 = vrot.slane %v16893_v54, %v362_v10  ;;  %v16960_v28 = vand.u32 4294901760, %v13330_v63  ;;  %v16961_v14 = vand.u32 4294901760, %v13338_v46  ;;  %v9325_v55 = vpack.c.bf16 %v4964_v29, %v4957_v48 }
 0x23b   : > { %v5096_v51 = vsub.f32 %v13026_v25, %v16958_v60  ;;  %v5103_v0 = vsub.f32 %v13031_v8, %v16959_v24  ;;  %9286 = vmatpush3.bf16.msra.mxu0 %v13535_v52  ;;  %4913 = vmatprep.mubr.f32.mxu0 %v4912_v23  ;;  %v16963_v15 = vand.u32 4294901760, %v13343_v43  ;;  %v16964_v39 = vand.u32 4294901760, %v13348_v47 }
 0x23c   : > { %v13565_v42 = vpack.c.bf16 %v16961_v14, %v16960_v28  ;;  %9288 = vmatprep.subr.bf16.mxu0 %v13541_v1  ;;  %v4971_v38 = vand.u32 4294901760, %v4970_v49  ;;  %v4978_v54 = vand.u32 4294901760, %v4977_v45  ;;  %v16966_v10 = vand.u32 4294901760, %v13036_v35 }
 0x23d   : > { %v13572_v41 = vpack.c.bf16 %v16964_v39, %v16963_v15  ;;  %9322 = vmatpush3.bf16.msra.mxu1 %v9321_v56  ;;  %v16967_v46 = vand.u32 4294901760, %v13041_v61  ;;  %v16968_v26 = vand.u32 4294901760, %v13063_v22  ;;  %v16969_v43 = vand.u32 4294901760, %v13068_v40  ;;  %v16976_v15 = vld [vmem:[#allocation87_spill] sm:$0xff] }
 0x23e   : > { %16962 = vst [vmem:[#allocation91_spill] sm:$0xff] %v13565_v42  ;;  %v4984_v63 = vsub.f32 %v13036_v35, %v16966_v10  ;;  %9324 = vmatprep.subr.bf16.mxu1 %v9323_v16  ;;  %v9327_v29 = vpack.c.bf16 %v5090_v13, %v5083_v59  ;;  %v5097_v49 = vand.u32 4294901760, %v5096_v51  ;;  %v5104_v45 = vand.u32 4294901760, %v5103_v0 }
 0x23f   : > { %16965 = vst [vmem:[#allocation95_spill] sm:$0xff] %v13572_v41  ;;  %v4991_v36 = vsub.f32 %v13041_v61, %v16967_v46  ;;  %v5110_v48 = vsub.f32 %v13063_v22, %v16968_v26  ;;  %v5117_v47 = vsub.f32 %v13068_v40, %v16969_v43  ;;  %9290 = vmatpush3.bf16.msra.mxu0 %v13565_v42  ;;  %v16970_v23 = vand.u32 4294901760, %v13374_v4  ;;  %v16981_v26 = vld [vmem:[#allocation35_spill] sm:$0xff] }
 0x240   : > { %v16971_v56 = vand.u32 4294901760, %v13379_v7  ;;  %v16973_v24 = vand.u32 4294901760, %v13401_v30  ;;  %v16974_v28 = vand.u32 4294901760, %v13406_v50  ;;  %v9861_v39 = vadd.f32 %v16976_v15, %v363_v5  ;;  %9292 = vmatprep.subr.bf16.mxu0 %v13572_v41 }
 0x241   : > { %v9329_v16 = vpack.c.bf16 %v4978_v54, %v4971_v38  ;;  %v16977_v0 = vand.u32 4294901760, %v13076_v9  ;;  %v16978_v4 = vand.u32 4294901760, %v13081_v20  ;;  %9326 = vmatpush3.bf16.msra.mxu1 %v9325_v55  ;;  %v4985_v13 = vand.u32 4294901760, %v4984_v63 }
 0x242   : > { %v13591_v60 = vpack.c.bf16 %v16971_v56, %v16970_v23  ;;  %v13597_v14 = vpack.c.bf16 %v16974_v28, %v16973_v24  ;;  %v4992_v30 = vand.u32 4294901760, %v4991_v36  ;;  %v5111_v51 = vand.u32 4294901760, %v5110_v48  ;;  %9328 = vmatprep.subr.bf16.mxu1 %v9327_v29  ;;  %v16983_v23 = vld [vmem:[#allocation39_spill] sm:$0xff]  ;;  %v16985_v48 = vld [vmem:[#allocation50_spill] sm:$0xff] }
 0x243   : > { %v4998_v59 = vsub.f32 %v13076_v9, %v16977_v0  ;;  %v5005_v7 = vsub.f32 %v13081_v20, %v16978_v4  ;;  %v5118_v50 = vand.u32 4294901760, %v5117_v47  ;;  %v9331_v10 = vpack.c.bf16 %v5104_v45, %v5097_v49  ;;  %v16987_v29 = vld [vmem:[#allocation46_spill] sm:$0xff] }
 0x244   : > { %16972 = vst [vmem:[#allocation92_spill] sm:$0xff] %v13591_v60  ;;  %16975 = vst [vmem:[#allocation55_spill] sm:$0xff] %v13597_v14  ;;  %v16979_v5 = vand.u32 4294901760, %v13143_v37  ;;  %v16980_v38 = vand.u32 4294901760, %v13148_v12  ;;  %9294 = vmatpush3.bf16.msra.mxu0 %v13591_v60  ;;  %v16982_v43 = vand.u32 4294901760, %v16981_v26  ;;  %v16984_v55 = vand.u32 4294901760, %v16983_v23 }
 0x245   : > { %v3814_v36 = vmax.f32 %v9861_v39, 0.0  ;;  %9296 = vmatprep.subr.bf16.mxu0 %v13597_v14  ;;  %v16986_v47 = vand.u32 4294901760, %v16985_v48  ;;  %v16988_v49 = vand.u32 4294901760, %v16987_v29  ;;  %v4999_v56 = vand.u32 4294901760, %v4998_v59  ;;  %9330 = vmatpush3.bf16.msra.mxu1 %v9329_v16  ;;  %v17000_v48 = vld [vmem:[#allocation12_spill] sm:$0xff] }
 0x246   : > { %v5124_v46 = vsub.f32 %v13143_v37, %v16979_v5  ;;  %v5131_v54 = vsub.f32 %v13148_v12, %v16980_v38  ;;  %v13618_v63 = vpack.c.bf16 %v16984_v55, %v16982_v43  ;;  %v5006_v24 = vand.u32 4294901760, %v5005_v7  ;;  %9332 = vmatprep.subr.bf16.mxu1 %v9331_v10  ;;  %v16993_v7 = vld [vmem:[#allocation64_spill] sm:$0xff] }
 0x247   : > { %v13625_v45 = vpack.c.bf16 %v16988_v49, %v16986_v47  ;;  %v9333_v28 = vpack.c.bf16 %v4992_v30, %v4985_v13  ;;  %v9335_v15 = vpack.c.bf16 %v5118_v50, %v5111_v51  ;;  %v16989_v0 = vand.u32 4294901760, %v13153_v17  ;;  %v16995_v30 = vld [vmem:[#allocation6_spill] sm:$0xff] }
 0x248   : > { %v16990_v5 = vand.u32 4294901760, %v13158_v11  ;;  %v5125_v38 = vand.u32 4294901760, %v5124_v46  ;;  %v5132_v26 = vand.u32 4294901760, %v5131_v54  ;;  %v16991_v43 = vand.u32 4294901760, %v13189_v44  ;;  %9298 = vmatpush3.bf16.msra.mxu0 %v13618_v63  ;;  %v16998_v46 = vld [vmem:[#allocation16_spill] sm:$0xff] }
 0x249   : > { %v5012_v4 = vsub.f32 %v13153_v17, %v16989_v0  ;;  %v16992_v59 = vand.u32 4294901760, %v13194_v58  ;;  %v16994_v13 = vand.u32 4294901760, %v16993_v7  ;;  %v16996_v51 = vand.u32 4294901760, %v16995_v30  ;;  %9300 = vmatprep.subr.bf16.mxu0 %v13625_v45  ;;  %9334 = vmatpush3.bf16.msra.mxu1 %v9333_v28  ;;  %v17004_v30 = vld [vmem:[#allocation22_spill] sm:$0xff] }
 0x24a   : > { %v5019_v39 = vsub.f32 %v13158_v11, %v16990_v5  ;;  %v5138_v23 = vsub.f32 %v13189_v44, %v16991_v43  ;;  %v13646_v55 = vand.u32 4294901760, %v3814_v36  ;;  %v9337_v10 = vpack.c.bf16 %v5006_v24, %v4999_v56  ;;  %9336 = vmatprep.subr.bf16.mxu1 %v9335_v15 }
 0x24b   : > { %v5145_v16 = vsub.f32 %v13194_v58, %v16992_v59  ;;  %v13644_v50 = vpack.c.bf16 %v16996_v51, %v16994_v13  ;;  %v16999_v54 = vand.u32 4294901760, %v16998_v46  ;;  %v17001_v47 = vand.u32 4294901760, %v17000_v48  ;;  %v17006_v46 = vld [vmem:[#allocation29_spill] sm:$0xff] }
 0x24c   : > { %16997 = vst [vmem:[#allocation93_spill] sm:$0xff] %v13646_v55  ;;  %v5013_v49 = vand.u32 4294901760, %v5012_v4  ;;  %v5020_v0 = vand.u32 4294901760, %v5019_v39  ;;  %v17002_v5 = vand.u32 4294901760, %v13199_v57  ;;  %v17003_v59 = vand.u32 4294901760, %v13204_v27  ;;  %v17009_v48 = vld [vmem:[#allocation25_spill] sm:$0xff] }
 0x24d   : > { %v13653_v29 = vpack.c.bf16 %v17001_v47, %v16999_v54  ;;  %v9339_v13 = vpack.c.bf16 %v5132_v26, %v5125_v38  ;;  %v5139_v56 = vand.u32 4294901760, %v5138_v23  ;;  %v5146_v24 = vand.u32 4294901760, %v5145_v16  ;;  %9302 = vmatpush3.bf16.msra.mxu0 %v13644_v50  ;;  %9338 = vmatpush3.bf16.msra.mxu1 %v9337_v10  ;;  %v17017_v10 = vld [vmem:[#allocation62_spill] sm:$0xff] }
 0x24e   : > { %v5026_v43 = vsub.f32 %v13199_v57, %v17002_v5  ;;  %v5033_v7 = vsub.f32 %v13204_v27, %v17003_v59  ;;  %v17005_v51 = vand.u32 4294901760, %v17004_v30  ;;  %v17007_v28 = vand.u32 4294901760, %v17006_v46  ;;  %v17011_v5 = vld [vmem:[#allocation34_spill] sm:$0xff]  ;;  %v17015_v46 = vld [vmem:[#allocation8_spill] sm:$0xff] }
 0x24f   : > { %v13669_v39 = vsub.f32 %v3814_v36, %v13646_v55  ;;  %9304 = vmatprep.subr.bf16.mxu0 %v13653_v29  ;;  %v17008_v54 = vand.u32 4294901760, %v13021_v19  ;;  %v17010_v15 = vand.u32 4294901760, %v17009_v48  ;;  %v9341_v26 = vpack.c.bf16 %v5020_v0, %v5013_v49  ;;  %9340 = vmatprep.subr.bf16.mxu1 %v9339_v13  ;;  %v17013_v36 = vld [vmem:[#allocation48_spill] sm:$0xff] }
 0x250   : > { %v13666_v4 = vpack.c.bf16 %v17007_v28, %v17005_v51  ;;  %v5027_v23 = vand.u32 4294901760, %v5026_v43  ;;  %v5034_v16 = vand.u32 4294901760, %v5033_v7  ;;  %v9343_v47 = vpack.c.bf16 %v5146_v24, %v5139_v56  ;;  %v17019_v7 = vld [vmem:[#allocation61_spill] sm:$0xff] }
 0x251   : > { %v13676_v38 = vpack.c.bf16 %v17010_v15, %v17008_v54  ;;  %v17012_v59 = vand.u32 4294901760, %v17011_v5  ;;  %v17014_v30 = vand.u32 4294901760, %v17013_v36  ;;  %v15903_v19 = vand.u32 4294901760, %v13669_v39  ;;  %9342 = vmatpush3.bf16.msra.mxu1 %v9341_v26  ;;  %v17021_v56 = vld [vmem:[#allocation13_spill] sm:$0xff]  ;;  %v17023_v15 = vld [vmem:[#allocation19_spill] sm:$0xff]  ;;  %v17025_v26 = vld [vmem:[#allocation14_spill] sm:$0xff] }
 0x252   : > { %9306 = vmatpush3.bf16.msra.mxu0 %v13666_v4  ;;  %v17016_v28 = vand.u32 4294901760, %v17015_v46  ;;  %v17018_v49 = vand.u32 4294901760, %v17017_v10  ;;  %v9345_v43 = vpack.c.bf16 %v5034_v16, %v5027_v23  ;;  %9344 = vmatprep.subr.bf16.mxu1 %v9343_v47  ;;  %v17020_v13 = vand.u32 4294901760, %v17019_v7  ;;  %v17024_v5 = vld [vmem:[#allocation15_spill] sm:$0xff]  ;;  %v17026_v23 = vld [vmem:[#allocation24_spill] sm:$0xff] }
 0x253   : > { %v13683_v51 = vpack.c.bf16 %v17014_v30, %v17012_v59  ;;  %9308 = vmatprep.subr.bf16.mxu0 %v13676_v38  ;;  %v17022_v24 = vand.u32 4294901760, %v17021_v56  ;;  %v4917_v48 = vsub.f32 %v13669_v39, %v15903_v19  ;;  %v9347_v59 = vpack.c.bf16 %v17024_v5, %v17023_v15  ;;  %v17027_v36 = vld [vmem:[#allocation36_spill] sm:$0xff]  ;;  %v17028_v30 = vld [vmem:[#allocation67_spill] sm:$0xff] }
 0x254   : > { %v13691_v0 = vpack.c.bf16 %v17018_v49, %v17016_v28  ;;  %v9349_v16 = vpack.c.bf16 %v17026_v23, %v17025_v26  ;;  %v9351_v46 = vpack.c.bf16 %v17028_v30, %v17027_v36  ;;  %v13716_v28 = vld [vmem:[%s15440_s3 + $0x230] sm:$0xff]  ;;  %v13721_v10 = vld [vmem:[%s15440_s3 + $0x238] sm:$0xff]  ;;  %v17031_v49 = vand.u32 4294901760, %v13461_v3 }
 0x255   : > { %v13698_v54 = vpack.c.bf16 %v17022_v24, %v17020_v13  ;;  %9346 = vmatpush3.bf16.msra.mxu1 %v9345_v43  ;;  %v4918_v47 = vand.u32 4294901760, %v4917_v48  ;;  %17029 = vst [vmem:[#allocation96_spill] sm:$0xff] %v13716_v28  ;;  %17030 = vst [vmem:[#allocation97_spill] sm:$0xff] %v13721_v10  ;;  %v17032_v43 = vld [vmem:[#allocation11_spill] sm:$0xff]  ;;  %v15911_v13 = vand.u32 4294901760, %v13716_v28  ;;  %v17033_v24 = vld [vmem:[#allocation74_spill] sm:$0xff] }
 0x256   : > { %9310 = vmatpush3.bf16.msra.mxu0 %v13683_v51  ;;  %9380 = vmatprep.subr.bf16.mxu1 %v13511_v32  ;;  %v9353_v7 = vpack.c.bf16 %v17032_v43, %v13414_v34  ;;  %v9355_v48 = vpack.c.bf16 %v13434_v2, %v17033_v24  ;;  %v13766_v19 = vld [vmem:[%s15440_s3 + $0x2d8] sm:$0xff]  ;;  %v9361_v2 = vpack.c.bf16 %v12990_v33, %v16955_v18 }
 0x257   : > { %9312 = vmatprep.subr.bf16.mxu0 %v13691_v0  ;;  %17039 = vst [vmem:[#allocation86_spill] sm:$0xff] %v13766_v19  ;;  %v13771_v56 = vsub.f32 %v13716_v28, %v15911_v13  ;;  %v9363_v13 = vpack.c.bf16 %v13031_v8, %v13026_v25  ;;  %v13805_v28 = vld [vmem:[%s15440_s3 + $0x2e0] sm:$0xff]  ;;  %v13822_v8 = vld [vmem:[%s15440_s3 + $0x2e8] sm:$0xff] }
 0x258   : > { %5151 = vmatmul.mubr.f32.vlgmr.msra.gmra.mrb[10].mxu1 %v13646_v55  ;;  %v17040_v55 = vand.u32 4294901760, %v13721_v10  ;;  %17043 = vst [vmem:[#allocation54_spill] sm:$0xff] %v13805_v28  ;;  %17045 = vst [vmem:[#allocation59_spill] sm:$0xff] %v13822_v8  ;;  %v13827_v25 = vld [vmem:[%s15440_s3 + $0x260] sm:$0xff] }
 0x259   : > { %9382 = vmatpush3.bf16.msra.mxu1 %v13535_v52  ;;  %5393 = vmatprep.mubr.f32.mxu1 %v17031_v49  ;;  %v13761_v49 = vld [vmem:[%s15440_s3 + $0x2d0] sm:$0xff]  ;;  %17046 = vst [vmem:[#allocation38_spill] sm:$0xff] %v13827_v25 }
 0x25a   : > { %9314 = vmatpush3.bf16.msra.mxu0 %v13698_v54  ;;  %9384 = vmatprep.subr.bf16.mxu1 %v13541_v1  ;;  %17038 = vst [vmem:[#allocation80_spill] sm:$0xff] %v13761_v49 }
 0x25b   : > { %9348 = vmatprep.subr.bf16.mxu0 %v9347_v59  ;;  %v13737_v59 = vld [vmem:[%s15440_s3 + $0x2c0] sm:$0xff] }
 0x25c   : > { %17034 = vst [vmem:[#allocation58_spill] sm:$0xff] %v13737_v59 }
 0x25d   : > { %4919 = vmatmul.mubr.f32.vlgmr.msra.gmra.mrb[10].mxu0 %v4918_v47  ;;  %9386 = vmatpush3.bf16.msra.mxu1 %v13565_v42  ;;  %v13753_v47 = vld [vmem:[%s15440_s3 + $0x248] sm:$0xff]  ;;  %v9359_v42 = vpack.c.bf16 %v13482_v21, %v13477_v53 }
 0x25e   : > { %9350 = vmatpush3.bf16.msra.mxu0 %v9349_v16  ;;  %5286 = vmatprep.mubr.f32.mxu0 %v13461_v3  ;;  %v13742_v3 = vld [vmem:[%s15440_s3 + $0x2c8] sm:$0xff]  ;;  %v13748_v16 = vld [vmem:[%s15440_s3 + $0x240] sm:$0xff]  ;;  %17037 = vst [vmem:[#allocation83_spill] sm:$0xff] %v13753_v47 }
 0x25f   : > { %9352 = vmatprep.subr.bf16.mxu0 %v9351_v46  ;;  %17035 = vst [vmem:[#allocation98_spill] sm:$0xff] %v13742_v3  ;;  %17036 = vst [vmem:[#allocation70_spill] sm:$0xff] %v13748_v16  ;;  %9388 = vmatprep.subr.bf16.mxu1 %v13572_v41  ;;  %v9357_v46 = vpack.c.bf16 %v13458_v6, %v13453_v31  ;;  %v13776_v6 = vsub.f32 %v13721_v10, %v17040_v55  ;;  %v15914_v31 = vand.u32 4294901760, %v13737_v59  ;;  %v13790_v55 = vld [vmem:[%s15440_s3 + $0x250] sm:$0xff] }
 0x260   : > { %17041 = vst [vmem:[#allocation88_spill] sm:$0xff] %v13790_v55  ;;  %v17044_v33 = vand.u32 4294901760, %v13742_v3  ;;  %v17049_v41 = vand.u32 4294901760, %v13753_v47 }
 0x261   : > { %9390 = vmatpush3.bf16.msra.mxu1 %v13591_v60  ;;  %v13812_v10 = vsub.f32 %v13737_v59, %v15914_v31  ;;  %v17048_v31 = vand.u32 4294901760, %v13748_v16  ;;  %v17051_v60 = vand.u32 4294901760, %v13766_v19  ;;  %v9365_v59 = vpack.c.bf16 %v13041_v61, %v13036_v35  ;;  %v13879_v61 = vld [vmem:[%s15440_s3 + $0x2f0] sm:$0xff] }
 0x262   : > { %9354 = vmatpush3.bf16.msra.mxu0 %v9353_v7  ;;  %9392 = vmatprep.subr.bf16.mxu1 %v13597_v14  ;;  %v13817_v18 = vsub.f32 %v13742_v3, %v17044_v33  ;;  %v13842_v7 = vsub.f32 %v13753_v47, %v17049_v41  ;;  %v17050_v14 = vand.u32 4294901760, %v13761_v49  ;;  %v17052_v41 = vand.u32 4294901760, %v13771_v56 }
 0x263   : > { %9356 = vmatprep.subr.bf16.mxu0 %v9355_v48  ;;  %v13795_v48 = vld [vmem:[%s15440_s3 + $0x258] sm:$0xff]  ;;  %v13837_v33 = vsub.f32 %v13748_v16, %v17048_v31  ;;  %v13855_v31 = vsub.f32 %v13766_v19, %v17051_v60  ;;  %v17053_v3 = vand.u32 4294901760, %v13776_v6  ;;  %v9367_v16 = vpack.c.bf16 %v13068_v40, %v13063_v22 }
 0x264   : > { %17042 = vst [vmem:[#allocation52_spill] sm:$0xff] %v13795_v48  ;;  %v9369_v19 = vpack.c.bf16 %v13081_v20, %v13076_v9  ;;  %v17055_v60 = vand.u32 4294901760, %v13790_v55  ;;  %v17056_v9 = vand.u32 4294901760, %v13795_v48  ;;  %v13896_v20 = vld [vmem:[%s15440_s3 + $0x2f8] sm:$0xff]  ;;  %v17057_v35 = vand.u32 4294901760, %v13805_v28 }
 0x265   : > { %9394 = vmatpush3.bf16.msra.mxu1 %v13618_v63  ;;  %v13862_v47 = vpack.c.bf16 %v17053_v3, %v17052_v41  ;;  %v15926_v3 = vand.u32 4294901760, %v13812_v10  ;;  %v15925_v41 = vand.u32 4294901760, %v13817_v18 }
 0x266   : > { %9358 = vmatpush3.bf16.msra.mxu0 %v9357_v46  ;;  %v13832_v46 = vld [vmem:[%s15440_s3 + $0x268] sm:$0xff]  ;;  %9396 = vmatprep.subr.bf16.mxu1 %v13625_v45  ;;  %v13886_v40 = vsub.f32 %v13790_v55, %v17055_v60  ;;  %v13891_v22 = vsub.f32 %v13795_v48, %v17056_v9  ;;  %v13906_v60 = vld [vmem:[%s15440_s3 + $0x278] sm:$0xff]  ;;  %v17066_v55 = vand.u32 4294901760, %v13855_v31 }
 0x267   : > { %17047 = vst [vmem:[#allocation73_spill] sm:$0xff] %v13832_v46  ;;  %9360 = vmatprep.subr.bf16.mxu0 %v9359_v42  ;;  %v13850_v42 = vsub.f32 %v13761_v49, %v17050_v14  ;;  %17054 = vst [vmem:[#allocation63_spill] sm:$0xff] %v13862_v47  ;;  %v13914_v49 = vsub.f32 %v13805_v28, %v17057_v35  ;;  %v13920_v14 = vpack.c.bf16 %v15925_v41, %v15926_v3 }
 0x268   : > { %v17059_v47 = vand.u32 4294901760, %v13822_v8  ;;  %v17061_v35 = vand.u32 4294901760, %v13832_v46  ;;  %v17062_v41 = vand.u32 4294901760, %v13837_v33  ;;  %v17063_v3 = vand.u32 4294901760, %v13842_v7 }
 0x269   : > { %9398 = vmatpush3.bf16.msra.mxu1 %v13644_v50  ;;  %17058 = vst [vmem:[#allocation65_spill] sm:$0xff] %v13920_v14 }
 0x26a   : > { %9362 = vmatpush3.bf16.msra.mxu0 %v9361_v2  ;;  %9400 = vmatprep.subr.bf16.mxu1 %v13653_v29  ;;  %v13926_v48 = vsub.f32 %v13822_v8, %v17059_v47  ;;  %v17060_v2 = vand.u32 4294901760, %v13827_v25  ;;  %v13936_v28 = vsub.f32 %v13832_v46, %v17061_v35  ;;  %v13942_v14 = vpack.c.bf16 %v17063_v3, %v17062_v41 }
 0x26b   : > { %9364 = vmatprep.subr.bf16.mxu0 %v9363_v13  ;;  %v13901_v13 = vld [vmem:[%s15440_s3 + $0x270] sm:$0xff]  ;;  %v15933_v47 = vand.u32 4294901760, %v13879_v61  ;;  %v15932_v8 = vand.u32 4294901760, %v13896_v20  ;;  %v9371_v35 = vpack.c.bf16 %v13148_v12, %v13143_v37  ;;  %v15934_v46 = vand.u32 4294901760, %v13886_v40 }
 0x26c   : > { %v13931_v9 = vsub.f32 %v13827_v25, %v17060_v2  ;;  %17064 = vst [vmem:[#allocation79_spill] sm:$0xff] %v13942_v14  ;;  %v15931_v25 = vand.u32 4294901760, %v13891_v22  ;;  %v15936_v3 = vand.u32 4294901760, %v13914_v49  ;;  %v17065_v41 = vand.u32 4294901760, %v13850_v42  ;;  %v17117_v14 = vld [vmem:[#allocation78_spill] sm:$0xff] }
 0x26d   : > { %9402 = vmatpush3.bf16.msra.mxu1 %v13666_v4  ;;  %v15935_v12 = vand.u32 4294901760, %v13926_v48  ;;  %v17072_v37 = vand.u32 4294901760, %v13906_v60 }
 0x26e   : > { %9366 = vmatpush3.bf16.msra.mxu0 %v9365_v59  ;;  %v9373_v59 = vpack.c.bf16 %v13158_v11, %v13153_v17  ;;  %v13960_v2 = vpack.c.bf16 %v17066_v55, %v17065_v41  ;;  %9404 = vmatprep.subr.bf16.mxu1 %v13676_v38  ;;  %v13970_v11 = vpack.c.bf16 %v15931_v25, %v15934_v46  ;;  %v17070_v41 = vand.u32 4294901760, %v13901_v13 }
 0x26f   : > { %9368 = vmatprep.subr.bf16.mxu0 %v9367_v16  ;;  %v13975_v17 = vsub.f32 %v13879_v61, %v15933_v47  ;;  %v13980_v55 = vsub.f32 %v13896_v20, %v15932_v8  ;;  %v13990_v25 = vsub.f32 %v13906_v60, %v17072_v37  ;;  %v13999_v8 = vpack.c.bf16 %v15935_v12, %v15936_v3 }
 0x270   : > { %17067 = vst [vmem:[#allocation47_spill] sm:$0xff] %v13960_v2  ;;  %17068 = vst [vmem:[#allocation49_spill] sm:$0xff] %v13970_v11  ;;  %v13985_v16 = vsub.f32 %v13901_v13, %v17070_v41  ;;  %v17074_v41 = vand.u32 4294901760, %v13931_v9  ;;  %v17075_v47 = vand.u32 4294901760, %v13936_v28  ;;  %v17077_v3 = vand.u32 4294901760, %v17023_v15 }
 0x271   : > { %17069 = vst [vmem:[#allocation85_spill] sm:$0xff] %v13980_v55  ;;  %9406 = vmatpush3.bf16.msra.mxu1 %v13683_v51  ;;  %17073 = vst [vmem:[#allocation32_spill] sm:$0xff] %v13999_v8  ;;  %v15938_v12 = vand.u32 4294901760, %v13990_v25  ;;  %v17081_v15 = vand.u32 4294901760, %v17025_v26  ;;  %v14052_v26 = vld [vmem:[%s15440_s3 + $0x288] sm:$0xff]  ;;  %v17114_v8 = vld [vmem:[#allocation76_spill] sm:$0xff] }
 0x272   : > { %9370 = vmatpush3.bf16.msra.mxu0 %v9369_v19  ;;  %17071 = vst [vmem:[#allocation89_spill] sm:$0xff] %v13985_v16  ;;  %v9375_v19 = vpack.c.bf16 %v13194_v58, %v13189_v44  ;;  %v14005_v46 = vpack.c.bf16 %v17075_v47, %v17074_v41  ;;  %9408 = vmatprep.subr.bf16.mxu1 %v13691_v0  ;;  %v15940_v44 = vand.u32 4294901760, %v13975_v17  ;;  %v15937_v58 = vand.u32 4294901760, %v13980_v55 }
 0x273   : > { %9372 = vmatprep.subr.bf16.mxu0 %v9371_v35  ;;  %v9377_v35 = vpack.c.bf16 %v13204_v27, %v13199_v57  ;;  %v15939_v37 = vand.u32 4294901760, %v13985_v16  ;;  %v17078_v47 = vand.u32 4294901760, %v17024_v5  ;;  %v17082_v5 = vand.u32 4294901760, %v17026_v23 }
 0x274   : > { %17076 = vst [vmem:[#allocation33_spill] sm:$0xff] %v14005_v46  ;;  %v14023_v57 = vpack.c.bf16 %v15937_v58, %v15940_v44  ;;  %v17087_v23 = vand.u32 4294901760, %v17032_v43  ;;  %v17092_v43 = vld [vmem:[#allocation95_spill] sm:$0xff] }
 0x275   : > { %v9411_v41 = vpack.c.bf16 %v17078_v47, %v17077_v3  ;;  %9410 = vmatpush3.bf16.msra.mxu1 %v13698_v54  ;;  %v14029_v27 = vpack.c.bf16 %v15938_v12, %v15939_v37  ;;  %v17083_v3 = vand.u32 4294901760, %v13669_v39  ;;  %v17085_v47 = vand.u32 4294901760, %v17028_v30 }
 0x276   : > { %9374 = vmatpush3.bf16.msra.mxu0 %v9373_v59  ;;  %17079 = vst [vmem:[#allocation20_spill] sm:$0xff] %v14023_v57  ;;  %9444 = vmatprep.subr.bf16.mxu1 %v13511_v32  ;;  %v9413_v59 = vpack.c.bf16 %v17082_v5, %v17081_v15  ;;  %v14047_v32 = vld [vmem:[%s15440_s3 + $0x280] sm:$0xff]  ;;  %v17088_v30 = vand.u32 4294901760, %v17033_v24  ;;  %v17093_v24 = vld [vmem:[#allocation75_spill] sm:$0xff] }
 0x277   : > { %9376 = vmatprep.subr.bf16.mxu0 %v9375_v19  ;;  %17080 = vst [vmem:[#allocation21_spill] sm:$0xff] %v14029_v27  ;;  %v17084_v19 = vand.u32 4294901760, %v17027_v36  ;;  %v15944_v5 = vand.u32 4294901760, %v14047_v32 }
 0x278   : > { %5397 = vmatmul.mubr.f32.vlgmr.msra.gmra.mrb[12].mxu1 %v17083_v3 }
 0x279   : > { %v9415_v58 = vpack.c.bf16 %v17085_v47, %v17084_v19  ;;  %9446 = vmatpush3.bf16.msra.mxu1 %v13535_v52  ;;  %5667 = vmatprep.mubr.f32.mxu1 %v13418_v62  ;;  %v17086_v52 = vand.u32 4294901760, %v13414_v34  ;;  %v17091_v34 = vld [vmem:[#allocation91_spill] sm:$0xff] }
 0x27a   : > { %9378 = vmatpush3.bf16.msra.mxu0 %v9377_v35  ;;  %9448 = vmatprep.subr.bf16.mxu1 %v13541_v1  ;;  %v17089_v35 = vld [vmem:[#allocation28_spill] sm:$0xff] }
 0x27b   : > { %9412 = vmatprep.subr.bf16.mxu0 %v9411_v41  ;;  %v9417_v36 = vpack.c.bf16 %v17087_v23, %v17086_v52  ;;  %v17090_v41 = vand.u32 4294901760, %v17089_v35  ;;  %v14070_v1 = vld [vmem:[%s15440_s3 + $0x200] sm:$0xff]  ;;  %v14088_v23 = vld [vmem:[%s15440_s3 + $0x290] sm:$0xff]  ;;  %v17098_v35 = vand.u32 4294901760, %v13482_v21 }
 0x27c   : > { %v15941_v47 = vand.u32 4294901760, %v14070_v1  ;;  %v15945_v21 = vand.u32 4294901760, %v14088_v23 }
 0x27d   : > { %5289 = vmatmul.mubr.f32.vlgmr.msra.gmra.mrb[12].mxu0 %v13669_v39  ;;  %v9419_v15 = vpack.c.bf16 %v17090_v41, %v17088_v30  ;;  %v15943_v39 = vand.u32 4294901760, %v14052_v26  ;;  %9450 = vmatpush3.bf16.msra.mxu1 %v17091_v34  ;;  %v14093_v30 = vld [vmem:[%s15440_s3 + $0x298] sm:$0xff]  ;;  %v14102_v34 = vsub.f32 %v14047_v32, %v15944_v5  ;;  %v17107_v5 = vld [vmem:[#allocation53_spill] sm:$0xff] }
 0x27e   : > { %9414 = vmatpush3.bf16.msra.mxu0 %v9413_v59  ;;  %5563 = vmatprep.mubr.f32.mxu0 %v13418_v62  ;;  %v14075_v62 = vld [vmem:[%s15440_s3 + $0x208] sm:$0xff]  ;;  %v17095_v59 = vld [vmem:[#allocation94_spill] sm:$0xff] }
 0x27f   : > { %9416 = vmatprep.subr.bf16.mxu0 %v9415_v58  ;;  %9452 = vmatprep.subr.bf16.mxu1 %v17092_v43  ;;  %v17094_v58 = vand.u32 4294901760, %v17093_v24  ;;  %v17096_v3 = vand.u32 4294901760, %v17095_v59  ;;  %v15942_v52 = vand.u32 4294901760, %v14075_v62  ;;  %17099 = vst [vmem:[#allocation23_spill] sm:$0xff] %v14102_v34  ;;  %v14107_v43 = vsub.f32 %v14052_v26, %v15943_v39  ;;  %v17101_v24 = vld [vmem:[#allocation92_spill] sm:$0xff]  ;;  %v14121_v59 = vld [vmem:[%s15440_s3 + $0x218] sm:$0xff] }
 0x281   : > { %v9421_v19 = vpack.c.bf16 %v17096_v3, %v17094_v58  ;;  %17100 = vst [vmem:[#allocation31_spill] sm:$0xff] %v14107_v43  ;;  %9454 = vmatpush3.bf16.msra.mxu1 %v17101_v24  ;;  %v15946_v58 = vand.u32 4294901760, %v14093_v30  ;;  %v14126_v3 = vld [vmem:[%s15440_s3 + $0x2a0] sm:$0xff]  ;;  %v14141_v24 = vsub.f32 %v14075_v62, %v15942_v52  ;;  %v15948_v12 = vand.u32 4294901760, %v14107_v43 }
 0x282   : > { %9418 = vmatpush3.bf16.msra.mxu0 %v9417_v36  ;;  %v17097_v36 = vand.u32 4294901760, %v13477_v53  ;;  %v17102_v53 = vld [vmem:[#allocation55_spill] sm:$0xff]  ;;  %v14153_v52 = vld [vmem:[%s15440_s3 + $0x220] sm:$0xff] }
 0x283   : > { %9420 = vmatprep.subr.bf16.mxu0 %v9419_v15  ;;  %v14113_v15 = vld [vmem:[%s15440_s3 + $0x210] sm:$0xff]  ;;  %9456 = vmatprep.subr.bf16.mxu1 %v17102_v53  ;;  %17104 = vst [vmem:[#allocation26_spill] sm:$0xff] %v14141_v24  ;;  %v15947_v53 = vand.u32 4294901760, %v14102_v34  ;;  %v14169_v39 = vsub.f32 %v14093_v30, %v15946_v58  ;;  %v5909_v58 = vsub.f32 %v14107_v43, %v15948_v12  ;;  %v17116_v2 = vand.u32 4294901760, %v14141_v24  ;;  %v17133_v43 = vld [vmem:[#allocation72_spill] sm:$0xff] }
 0x284   : > { %v9423_v41 = vpack.c.bf16 %v17098_v35, %v17097_v36  ;;  %v14131_v36 = vld [vmem:[%s15440_s3 + $0x2a8] sm:$0xff]  ;;  %v14136_v35 = vsub.f32 %v14070_v1, %v15941_v47  ;;  %v15949_v37 = vand.u32 4294901760, %v14113_v15 }
 0x285   : > { %9458 = vmatpush3.bf16.msra.mxu1 %v13618_v63  ;;  %v14164_v63 = vsub.f32 %v14088_v23, %v15945_v21  ;;  %17106 = vst [vmem:[#allocation56_spill] sm:$0xff] %v14169_v39  ;;  %v14182_v21 = vld [vmem:[%s15440_s3 + $0x2b8] sm:$0xff]  ;;  %v17113_v44 = vand.u32 4294901760, %v14131_v36 }
 0x286   : > { %9422 = vmatpush3.bf16.msra.mxu0 %v9421_v19  ;;  %17103 = vst [vmem:[#allocation27_spill] sm:$0xff] %v14136_v35  ;;  %9460 = vmatprep.subr.bf16.mxu1 %v13625_v45  ;;  %v14177_v45 = vld [vmem:[%s15440_s3 + $0x2b0] sm:$0xff]  ;;  %v17108_v19 = vld [vmem:[#allocation9_spill] sm:$0xff]  ;;  %v14197_v27 = vsub.f32 %v14113_v15, %v15949_v37  ;;  %v17118_v37 = vand.u32 4294901760, %v14153_v52 }
 0x287   : > { %9424 = vmatprep.subr.bf16.mxu0 %v9423_v41  ;;  %v14158_v41 = vld [vmem:[%s15440_s3 + $0x228] sm:$0xff]  ;;  %17105 = vst [vmem:[#allocation51_spill] sm:$0xff] %v14164_v63  ;;  %v14212_v47 = vsub.f32 %v14131_v36, %v17113_v44  ;;  %v5797_v44 = vsub.f32 %v14141_v24, %v17116_v2  ;;  %v17122_v24 = vand.u32 4294901760, %v14169_v39  ;;  %v17124_v2 = vand.u32 4294901760, %v14182_v21 }
 0x288   : > { %v14230_v46 = vsub.f32 %v14153_v52, %v17118_v37  ;;  %v17121_v37 = vand.u32 4294901760, %v14164_v63 }
 0x289   : > { %9462 = vmatpush3.bf16.msra.mxu1 %v13644_v50  ;;  %v5910_v50 = vand.u32 4294901760, %v5909_v58  ;;  %v17126_v58 = vld [vmem:[#allocation90_spill] sm:$0xff] }
 0x28a   : > { %9426 = vmatpush3.bf16.msra.mxu0 %v17107_v5  ;;  %v5902_v5 = vsub.f32 %v14102_v34, %v15947_v53  ;;  %v17111_v53 = vand.u32 4294901760, %v14126_v3  ;;  %9464 = vmatprep.subr.bf16.mxu1 %v13653_v29 }
 0x28b   : > { %9428 = vmatprep.subr.bf16.mxu0 %v17108_v19  ;;  %v17109_v19 = vand.u32 4294901760, %v14121_v59 }
 0x28c   : > { %v14207_v12 = vsub.f32 %v14126_v3, %v17111_v53  ;;  %v17115_v53 = vand.u32 4294901760, %v14136_v35  ;;  %v5903_v29 = vand.u32 4294901760, %v5902_v5  ;;  %v5916_v5 = vsub.f32 %v14164_v63, %v17121_v37 }
 0x28d   : > { %v14202_v57 = vsub.f32 %v14121_v59, %v17109_v19  ;;  %v17119_v19 = vand.u32 4294901760, %v14158_v41  ;;  %9466 = vmatpush3.bf16.msra.mxu1 %v13666_v4  ;;  %v17123_v4 = vand.u32 4294901760, %v14177_v45  ;;  %v5798_v63 = vand.u32 4294901760, %v5797_v44 }
 0x28e   : > { %17112 = vst [vmem:[#allocation7_spill] sm:$0xff] %v14207_v12  ;;  %9430 = vmatpush3.bf16.msra.mxu0 %v17114_v8  ;;  %v5790_v11 = vsub.f32 %v14136_v35, %v17115_v53  ;;  %9468 = vmatprep.subr.bf16.mxu1 %v13676_v38  ;;  %v17127_v35 = vld [vmem:[#allocation60_spill] sm:$0xff]  ;;  %v9507_v37 = vpack.c.bf16 %v5910_v50, %v5903_v29  ;;  %v17131_v50 = vand.u32 4294901760, %v14212_v47  ;;  %v5917_v29 = vand.u32 4294901760, %v5916_v5 }
 0x28f   : > { %17110 = vst [vmem:[#allocation82_spill] sm:$0xff] %v14202_v57  ;;  %9432 = vmatprep.subr.bf16.mxu0 %v17117_v14  ;;  %v14235_v8 = vsub.f32 %v14158_v41, %v17119_v19  ;;  %v5923_v19 = vsub.f32 %v14169_v39, %v17122_v24  ;;  %v14252_v53 = vsub.f32 %v14177_v45, %v17123_v4  ;;  %v17128_v4 = vand.u32 4294901760, %v14197_v27  ;;  %v17132_v24 = vld [vmem:[#allocation57_spill] sm:$0xff] }
 0x290   : > { %v14257_v14 = vsub.f32 %v14182_v21, %v17124_v2  ;;  %v5791_v38 = vand.u32 4294901760, %v5790_v11  ;;  %v17129_v2 = vand.u32 4294901760, %v14202_v57  ;;  %v17130_v11 = vand.u32 4294901760, %v14207_v12 }
 0x291   : > { %17120 = vst [vmem:[#allocation43_spill] sm:$0xff] %v14235_v8  ;;  %9470 = vmatpush3.bf16.msra.mxu1 %v13683_v51  ;;  %v5804_v39 = vsub.f32 %v14197_v27, %v17128_v4  ;;  %v5937_v44 = vsub.f32 %v14212_v47, %v17131_v50  ;;  %v5924_v51 = vand.u32 4294901760, %v5923_v19  ;;  %v17136_v50 = vand.u32 4294901760, %v14230_v46 }
 0x292   : > { %17125 = vst [vmem:[#allocation40_spill] sm:$0xff] %v14257_v14  ;;  %9434 = vmatpush3.bf16.msra.mxu0 %v17126_v58  ;;  %v5811_v34 = vsub.f32 %v14202_v57, %v17129_v2  ;;  %9472 = vmatprep.subr.bf16.mxu1 %v13691_v0  ;;  %v15966_v58 = vand.u32 4294901760, %v14252_v53  ;;  %v9509_v2 = vpack.c.bf16 %v5798_v63, %v5791_v38  ;;  %v17134_v57 = vand.u32 4294901760, %v14047_v32 }
 0x293   : > { %9436 = vmatprep.subr.bf16.mxu0 %v17127_v35  ;;  %v5930_v35 = vsub.f32 %v14207_v12, %v17130_v11  ;;  %v17135_v11 = vand.u32 4294901760, %v14052_v26  ;;  %v5818_v0 = vsub.f32 %v14230_v46, %v17136_v50  ;;  %v17137_v5 = vand.u32 4294901760, %v14235_v8 }
 0x294   : > { %v5812_v4 = vand.u32 4294901760, %v5811_v34  ;;  %v5938_v63 = vand.u32 4294901760, %v5937_v44  ;;  %v9511_v32 = vpack.c.bf16 %v5924_v51, %v5917_v29  ;;  %v17138_v26 = vand.u32 4294901760, %v14257_v14  ;;  %v17144_v44 = vld [vmem:[#allocation93_spill] sm:$0xff] }
 0x295   : > { %v14285_v12 = vpack.c.bf16 %v17135_v11, %v17134_v57  ;;  %v5825_v19 = vsub.f32 %v14235_v8, %v17137_v5  ;;  %9474 = vmatpush3.bf16.msra.mxu1 %v13698_v54  ;;  %v5944_v57 = vsub.f32 %v14252_v53, %v15966_v58  ;;  %v17139_v11 = vld [vmem:[#allocation17_spill] sm:$0xff]  ;;  %v17140_v50 = vand.u32 4294901760, %v14070_v1 }
 0x296   : > { %9438 = vmatpush3.bf16.msra.mxu0 %v17132_v24  ;;  %v5805_v24 = vand.u32 4294901760, %v5804_v39  ;;  %9508 = vmatprep.subr.bf16.mxu1 %v9507_v37  ;;  %v5951_v38 = vsub.f32 %v14257_v14, %v17138_v26  ;;  %v17141_v54 = vand.u32 4294901760, %v14075_v62  ;;  %v17142_v34 = vand.u32 4294901760, %v14088_v23 }
 0x297   : > { %9440 = vmatprep.subr.bf16.mxu0 %v17133_v43  ;;  %v5931_v43 = vand.u32 4294901760, %v5930_v35  ;;  %v17143_v37 = vand.u32 4294901760, %v14093_v30  ;;  %v5819_v29 = vand.u32 4294901760, %v5818_v0  ;;  %v5826_v51 = vand.u32 4294901760, %v5825_v19 }
 0x298   : > { %v14305_v39 = vpack.c.bf16 %v17141_v54, %v17140_v50  ;;  %5669 = vmatmul.mubr.f32.vlgmr.msra.gmra.mrb[14].mxu1 %v17144_v44  ;;  %v17145_v5 = vand.u32 4294901760, %v13771_v56  ;;  %v17146_v62 = vand.u32 4294901760, %v13776_v6  ;;  %v9513_v23 = vpack.c.bf16 %v5812_v4, %v5805_v24 }
 0x299   : > { %v14311_v35 = vpack.c.bf16 %v17143_v37, %v17142_v34  ;;  %9510 = vmatpush3.bf16.msra.mxu1 %v9509_v2  ;;  %v5945_v30 = vand.u32 4294901760, %v5944_v57  ;;  %v5952_v50 = vand.u32 4294901760, %v5951_v38  ;;  %v17147_v54 = vand.u32 4294901760, %v13812_v10 }
 0x29a   : > { %9442 = vmatpush3.bf16.msra.mxu0 %v17139_v11  ;;  %v5832_v1 = vsub.f32 %v13771_v56, %v17145_v5  ;;  %v5839_v26 = vsub.f32 %v13776_v6, %v17146_v62  ;;  %v9515_v11 = vpack.c.bf16 %v5938_v63, %v5931_v43  ;;  %9512 = vmatprep.subr.bf16.mxu1 %v9511_v32  ;;  %v17148_v19 = vand.u32 4294901760, %v13817_v18 }
 0x29b   : > { %9476 = vmatprep.subr.bf16.mxu0 %v14285_v12  ;;  %v5958_v0 = vsub.f32 %v13812_v10, %v17147_v54  ;;  %v17149_v37 = vand.u32 4294901760, %v14113_v15  ;;  %v17150_v4 = vand.u32 4294901760, %v14121_v59  ;;  %v9517_v24 = vpack.c.bf16 %v5826_v51, %v5819_v29 }
 0x29c   : > { %v5965_v34 = vsub.f32 %v13817_v18, %v17148_v19  ;;  %v17151_v43 = vand.u32 4294901760, %v14126_v3  ;;  %v17152_v63 = vand.u32 4294901760, %v14131_v36  ;;  %v5833_v57 = vand.u32 4294901760, %v5832_v1 }
 0x29d   : > { %5565 = vmatmul.mubr.f32.vlgmr.msra.gmra.mrb[14].mxu0 %v17144_v44  ;;  %v14333_v2 = vpack.c.bf16 %v17150_v4, %v17149_v37  ;;  %v5840_v38 = vand.u32 4294901760, %v5839_v26  ;;  %9514 = vmatpush3.bf16.msra.mxu1 %v9513_v23  ;;  %v17153_v44 = vand.u32 4294901760, %v13837_v33  ;;  %v17154_v59 = vand.u32 4294901760, %v13842_v7 }
 0x29e   : > { %9478 = vmatpush3.bf16.msra.mxu0 %v14305_v39  ;;  %v14340_v32 = vpack.c.bf16 %v17152_v63, %v17151_v43  ;;  %v17155_v62 = vand.u32 4294901760, %v13850_v42  ;;  %v17156_v3 = vand.u32 4294901760, %v13855_v31  ;;  %9516 = vmatprep.subr.bf16.mxu1 %v9515_v11  ;;  %v9519_v51 = vpack.c.bf16 %v5952_v50, %v5945_v30  ;;  %v17163_v63 = vld [vmem:[#allocation81_spill] sm:$0xff] }
 0x29f   : > { %9480 = vmatprep.subr.bf16.mxu0 %v14311_v35  ;;  %v5846_v15 = vsub.f32 %v13837_v33, %v17153_v44  ;;  %v5853_v5 = vsub.f32 %v13842_v7, %v17154_v59  ;;  %v5959_v1 = vand.u32 4294901760, %v5958_v0  ;;  %v5966_v26 = vand.u32 4294901760, %v5965_v34 }
 0x2a0   : > { %v5972_v29 = vsub.f32 %v13850_v42, %v17155_v62  ;;  %v5979_v36 = vsub.f32 %v13855_v31, %v17156_v3  ;;  %v17157_v23 = vand.u32 4294901760, %v14153_v52  ;;  %v17158_v54 = vand.u32 4294901760, %v14158_v41 }
 0x2a1   : > { %v17160_v37 = vand.u32 4294901760, %v14177_v45  ;;  %v17161_v4 = vand.u32 4294901760, %v14182_v21  ;;  %v370_v44 = vsub.s32 4, %v17163_v63  ;;  %v9521_v11 = vpack.c.bf16 %v5840_v38, %v5833_v57  ;;  %9518 = vmatpush3.bf16.msra.mxu1 %v9517_v24 }
 0x2a2   : > { %9482 = vmatpush3.bf16.msra.mxu0 %v14333_v2  ;;  %v14359_v19 = vpack.c.bf16 %v17158_v54, %v17157_v23  ;;  %v374_v30 = vsub.s32 5, %v17163_v63  ;;  %v17164_v50 = vand.u32 4294901760, %v13886_v40  ;;  %v17165_v41 = vand.u32 4294901760, %v13891_v22  ;;  %9520 = vmatprep.subr.bf16.mxu1 %v9519_v51  ;;  %v17168_v54 = vld [vmem:[#allocation96_spill] sm:$0xff] }
 0x2a3   : > { %v14365_v43 = vpack.c.bf16 %v17161_v4, %v17160_v37  ;;  %9484 = vmatprep.subr.bf16.mxu0 %v14340_v32  ;;  %v5847_v45 = vand.u32 4294901760, %v5846_v15  ;;  %v5854_v21 = vand.u32 4294901760, %v5853_v5  ;;  %v5973_v34 = vand.u32 4294901760, %v5972_v29  ;;  %v17170_v4 = vld [vmem:[#allocation97_spill] sm:$0xff]  ;;  %v14392_v5 = vld [vmem:[%s15439_s2] sm:$0xff] }
 0x2a4   : > { %17159 = vst [vmem:[#allocation42_spill] sm:$0xff] %v14359_v19  ;;  %v5860_v52 = vsub.f32 %v13886_v40, %v17164_v50  ;;  %v5867_v0 = vsub.f32 %v13891_v22, %v17165_v41  ;;  %v5980_v59 = vand.u32 4294901760, %v5979_v36  ;;  %v9523_v62 = vpack.c.bf16 %v5966_v26, %v5959_v1  ;;  %17172 = vst [vmem:[#allocation77_spill] sm:$0xff] %v14392_v5  ;;  %v17173_v36 = vld [vmem:[#allocation58_spill] sm:$0xff] }
 0x2a5   : > { %17162 = vst [vmem:[#allocation30_spill] sm:$0xff] %v14365_v43  ;;  %v17166_v3 = vand.u32 4294901760, %v13914_v49  ;;  %v17167_v38 = vand.u32 4294901760, %v13926_v48  ;;  %v17169_v37 = vand.u32 4294901760, %v17168_v54  ;;  %v17171_v24 = vand.u32 4294901760, %v17170_v4  ;;  %v17175_v1 = vld [vmem:[#allocation98_spill] sm:$0xff]  ;;  %9522 = vmatpush3.bf16.msra.mxu1 %v9521_v11 }
 0x2a6   : > { %9486 = vmatpush3.bf16.msra.mxu0 %v14359_v19  ;;  %v371_v29 = vrot.slane %v14392_v5, %v370_v44  ;;  %v17174_v51 = vand.u32 4294901760, %v17173_v36  ;;  %v17176_v26 = vand.u32 4294901760, %v17175_v1  ;;  %v5861_v41 = vand.u32 4294901760, %v5860_v52  ;;  %9524 = vmatprep.subr.bf16.mxu1 %v9523_v62  ;;  %v17181_v11 = vld [vmem:[#allocation70_spill] sm:$0xff] }
 0x2a7   : > { %v5986_v57 = vsub.f32 %v13914_v49, %v17166_v3  ;;  %v5993_v23 = vsub.f32 %v13926_v48, %v17167_v38  ;;  %v14387_v15 = vpack.c.bf16 %v17171_v24, %v17169_v37  ;;  %9488 = vmatprep.subr.bf16.mxu0 %v14365_v43  ;;  %v5868_v3 = vand.u32 4294901760, %v5867_v0 }
 0x2a8   : > { %v14400_v50 = vpack.c.bf16 %v17176_v26, %v17174_v51  ;;  %v17177_v38 = vand.u32 4294901760, %v13931_v9  ;;  %v9525_v37 = vpack.c.bf16 %v5854_v21, %v5847_v45  ;;  %v375_v4 = vrot.slane %v14392_v5, %v374_v30  ;;  %v17183_v45 = vld [vmem:[#allocation83_spill] sm:$0xff] }
 0x2a9   : > { %v9527_v24 = vpack.c.bf16 %v5980_v59, %v5973_v34  ;;  %v17178_v44 = vand.u32 4294901760, %v13936_v28  ;;  %v5987_v36 = vand.u32 4294901760, %v5986_v57  ;;  %v5994_v1 = vand.u32 4294901760, %v5993_v23  ;;  %v2952_v59 = vpop.f32.mrb[2].mxu0  ;;  %v17185_v57 = vld [vmem:[#allocation80_spill] sm:$0xff] }
 0x2aa   : > { %v5874_v54 = vsub.f32 %v13931_v9, %v17177_v38  ;;  %v17179_v51 = vand.u32 4294901760, %v13975_v17  ;;  %v17180_v0 = vand.u32 4294901760, %v13980_v55  ;;  %9490 = vmatpush3.bf16.msra.mxu0 %v14387_v15  ;;  %v17182_v30 = vand.u32 4294901760, %v17181_v11  ;;  %v17187_v38 = vld [vmem:[#allocation86_spill] sm:$0xff]  ;;  %9526 = vmatpush3.bf16.msra.mxu1 %v9525_v37  ;;  %v2954_v63 = vpop.f32.mrb[3].mxu0 }
 0x2ab   : > { %v5881_v58 = vsub.f32 %v13936_v28, %v17178_v44  ;;  %v17184_v21 = vand.u32 4294901760, %v17183_v45  ;;  %9492 = vmatprep.subr.bf16.mxu0 %v14400_v50  ;;  %v9529_v62 = vpack.c.bf16 %v5868_v3, %v5861_v41  ;;  %v17186_v23 = vand.u32 4294901760, %v17185_v57  ;;  %9528 = vmatprep.subr.bf16.mxu1 %v9527_v24  ;;  %v17199_v24 = vld [vmem:[#allocation59_spill] sm:$0xff] }
 0x2ac   : > { %v6000_v52 = vsub.f32 %v13975_v17, %v17179_v51  ;;  %v6007_v26 = vsub.f32 %v13980_v55, %v17180_v0  ;;  %v17188_v44 = vand.u32 4294901760, %v17187_v38  ;;  %v5875_v5 = vand.u32 4294901760, %v5874_v54  ;;  %v17194_v54 = vld [vmem:[#allocation52_spill] sm:$0xff] }
 0x2ad   : > { %v14420_v34 = vpack.c.bf16 %v17184_v21, %v17182_v30  ;;  %v9863_v0 = vadd.f32 %v2952_v59, %v371_v29  ;;  %v5882_v55 = vand.u32 4294901760, %v5881_v58  ;;  %v17189_v11 = vand.u32 4294901760, %v13985_v16  ;;  %v17192_v29 = vld [vmem:[#allocation88_spill] sm:$0xff] }
 0x2ae   : > { %v14427_v51 = vpack.c.bf16 %v17188_v44, %v17186_v23  ;;  %v17190_v45 = vand.u32 4294901760, %v13990_v25  ;;  %v9864_v41 = vadd.f32 %v2954_v63, %v375_v4  ;;  %v9531_v3 = vpack.c.bf16 %v5994_v1, %v5987_v36  ;;  %v14435_v44 = vpop.f32.mrb[2].mxu1  ;;  %v17197_v63 = vld [vmem:[#allocation54_spill] sm:$0xff]  ;;  %9530 = vmatpush3.bf16.msra.mxu1 %v9529_v62 }
 0x2af   : > { %v5888_v30 = vsub.f32 %v13985_v16, %v17189_v11  ;;  %v6001_v57 = vand.u32 4294901760, %v6000_v52  ;;  %v6008_v38 = vand.u32 4294901760, %v6007_v26  ;;  %v3816_v23 = vmax.f32 %v9863_v0, 0.0  ;;  %17191 = vst [vmem:[#allocation45_spill] sm:$0xff] %v14435_v44  ;;  %9494 = vmatpush3.bf16.msra.mxu0 %v14420_v34  ;;  %v14444_v16 = vpop.f32.mrb[3].mxu1 }
 0x2b0   : > { %v5895_v21 = vsub.f32 %v13990_v25, %v17190_v45  ;;  %v17193_v58 = vand.u32 4294901760, %v17192_v29  ;;  %v17195_v37 = vand.u32 4294901760, %v17194_v54  ;;  %v3817_v11 = vmax.f32 %v9864_v41, 0.0  ;;  %17196 = vst [vmem:[#allocation84_spill] sm:$0xff] %v14444_v16  ;;  %9496 = vmatprep.subr.bf16.mxu0 %v14427_v51  ;;  %9532 = vmatprep.subr.bf16.mxu1 %v9531_v3  ;;  %v17202_v54 = vld [vmem:[#allocation38_spill] sm:$0xff] }
 0x2b1   : > { %v17198_v4 = vand.u32 4294901760, %v17197_v63  ;;  %v17200_v36 = vand.u32 4294901760, %v17199_v24  ;;  %v14453_v52 = vand.u32 4294901760, %v3816_v23  ;;  %v9533_v26 = vpack.c.bf16 %v5882_v55, %v5875_v5  ;;  %v17204_v63 = vld [vmem:[#allocation73_spill] sm:$0xff] }
 0x2b2   : > { %v14442_v59 = vpack.c.bf16 %v17195_v37, %v17193_v58  ;;  %v5889_v0 = vand.u32 4294901760, %v5888_v30  ;;  %v5896_v45 = vand.u32 4294901760, %v5895_v21  ;;  %v14455_v29 = vand.u32 4294901760, %v3817_v11 }
 0x2b3   : > { %v14451_v1 = vpack.c.bf16 %v17200_v36, %v17198_v4  ;;  %17201 = vst [vmem:[#allocation37_spill] sm:$0xff] %v14453_v52  ;;  %v9535_v41 = vpack.c.bf16 %v6008_v38, %v6001_v57  ;;  %v14458_v58 = vsub.f32 %v3816_v23, %v14453_v52  ;;  %v17203_v37 = vand.u32 4294901760, %v17202_v54  ;;  %9534 = vmatpush3.bf16.msra.mxu1 %v9533_v26  ;;  %v17210_v26 = vld [vmem:[#allocation23_spill] sm:$0xff]  ;;  %v14497_v54 = vld [vmem:[%s15440_s3 + $0x330] sm:$0xff] }
 0x2b4   : > { %9498 = vmatpush3.bf16.msra.mxu0 %v14442_v59  ;;  %v17205_v4 = vand.u32 4294901760, %v17204_v63  ;;  %v5771_v62 = vsub.f32 %v3817_v11, %v14455_v29  ;;  %6011 = vmatprep.mubr.f32.mxu1 %v14455_v29  ;;  %v17206_v55 = vand.u32 4294901760, %v13879_v61  ;;  %v17207_v5 = vand.u32 4294901760, %v13896_v20  ;;  %17214 = vst [vmem:[#allocation41_spill] sm:$0xff] %v14497_v54  ;;  %v17215_v63 = vld [vmem:[#allocation51_spill] sm:$0xff] }
 0x2b5   : > { %9500 = vmatprep.subr.bf16.mxu0 %v14451_v1  ;;  %v15972_v21 = vand.u32 4294901760, %v14458_v58  ;;  %v9537_v3 = vpack.c.bf16 %v5896_v45, %v5889_v0  ;;  %9536 = vmatprep.subr.bf16.mxu1 %v9535_v41  ;;  %v17208_v38 = vand.u32 4294901760, %v13901_v13  ;;  %v17209_v23 = vand.u32 4294901760, %v13906_v60  ;;  %v17211_v0 = vld [vmem:[#allocation31_spill] sm:$0xff]  ;;  %v17213_v60 = vld [vmem:[#allocation26_spill] sm:$0xff] }
 0x2b6   : > { %v14465_v24 = vpack.c.bf16 %v17205_v4, %v17203_v37  ;;  %v14474_v30 = vpack.c.bf16 %v17207_v5, %v17206_v55  ;;  %v5772_v57 = vand.u32 4294901760, %v5771_v62  ;;  %v9539_v45 = vpack.c.bf16 %v17211_v0, %v17210_v26  ;;  %v17212_v13 = vld [vmem:[#allocation27_spill] sm:$0xff]  ;;  %v17216_v4 = vld [vmem:[#allocation56_spill] sm:$0xff] }
 0x2b7   : > { %v14482_v11 = vpack.c.bf16 %v17209_v23, %v17208_v38  ;;  %v5779_v61 = vsub.f32 %v14458_v58, %v15972_v21  ;;  %9538 = vmatpush3.bf16.msra.mxu1 %v9537_v3  ;;  %v9541_v41 = vpack.c.bf16 %v17213_v60, %v17212_v13  ;;  %v9543_v55 = vpack.c.bf16 %v17216_v4, %v17215_v63  ;;  %v14505_v5 = vld [vmem:[%s15440_s3 + $0x338] sm:$0xff]  ;;  %v17218_v38 = vld [vmem:[#allocation82_spill] sm:$0xff] }
 0x2b8   : > { %9502 = vmatpush3.bf16.msra.mxu0 %v14465_v24  ;;  %v5773_v20 = vsub.f32 %v5771_v62, %v5772_v57  ;;  %9572 = vmatprep.subr.bf16.mxu1 %v14285_v12  ;;  %17217 = vst [vmem:[#allocation44_spill] sm:$0xff] %v14505_v5  ;;  %v15975_v3 = vand.u32 4294901760, %v14497_v54  ;;  %v9545_v23 = vpack.c.bf16 %v17218_v38, %v14197_v27 }
 0x2b9   : > { %9504 = vmatprep.subr.bf16.mxu0 %v14474_v30  ;;  %v5780_v37 = vand.u32 4294901760, %v5779_v61  ;;  %v15978_v61 = vand.u32 4294901760, %v14505_v5  ;;  %v9549_v21 = vpack.c.bf16 %v14235_v8, %v14230_v46  ;;  %v14563_v8 = vld [vmem:[%s15440_s3 + $0x3d8] sm:$0xff]  ;;  %v9555_v16 = vpack.c.bf16 %v13817_v18, %v13812_v10 }
 0x2ba   : > { %v5774_v36 = vand.u32 4294901760, %v5773_v20  ;;  %6013 = vmatmul.mubr.f32.vlgmr.msra.gmra.mrb[16].mxu1 %v14453_v52  ;;  %v17219_v20 = vld [vmem:[#allocation7_spill] sm:$0xff]  ;;  %17225 = vst [vmem:[#allocation18_spill] sm:$0xff] %v14563_v8  ;;  %v14610_v52 = vld [vmem:[%s15440_s3 + $0x360] sm:$0xff] }
 0x2bb   : > { %9574 = vmatpush3.bf16.msra.mxu1 %v14305_v39  ;;  %6255 = vmatprep.mubr.f32.mxu1 %v5772_v57  ;;  %v14518_v57 = vld [vmem:[%s15440_s3 + $0x3c0] sm:$0xff]  ;;  %v14552_v44 = vsub.f32 %v14505_v5, %v15978_v61  ;;  %v9557_v61 = vpack.c.bf16 %v13842_v7, %v13837_v33  ;;  %17233 = vst [vmem:[#allocation64_spill] sm:$0xff] %v14610_v52 }
 0x2bc   : > { %9506 = vmatpush3.bf16.msra.mxu0 %v14482_v11  ;;  %5775 = vmatprep.mubr.f32.mxu0 %v5774_v36  ;;  %v9547_v36 = vpack.c.bf16 %v14212_v47, %v17219_v20  ;;  %17220 = vst [vmem:[#allocation66_spill] sm:$0xff] %v14518_v57  ;;  %v14588_v5 = vld [vmem:[%s15440_s3 + $0x3e0] sm:$0xff]  ;;  %v17230_v10 = vand.u32 4294901760, %v14518_v57 }
 0x2bd   : > { %9540 = vmatprep.subr.bf16.mxu0 %v9539_v45  ;;  %9576 = vmatprep.subr.bf16.mxu1 %v14311_v35  ;;  %v14523_v45 = vld [vmem:[%s15440_s3 + $0x3c8] sm:$0xff]  ;;  %17228 = vst [vmem:[#allocation39_spill] sm:$0xff] %v14588_v5 }
 0x2be   : > { %17221 = vst [vmem:[#allocation68_spill] sm:$0xff] %v14523_v45  ;;  %v17231_v7 = vand.u32 4294901760, %v14523_v45 }
 0x2bf   : > { %5781 = vmatmul.mubr.f32.vlgmr.msra.gmra.mrb[16].mxu0 %v5780_v37  ;;  %9578 = vmatpush3.bf16.msra.mxu1 %v14333_v2  ;;  %v14540_v37 = vsub.f32 %v14497_v54, %v15975_v3  ;;  %v9551_v3 = vpack.c.bf16 %v14257_v14, %v14252_v53  ;;  %v14575_v54 = vld [vmem:[%s15440_s3 + $0x358] sm:$0xff] }
 0x2c0   : > { %9542 = vmatpush3.bf16.msra.mxu0 %v9541_v41  ;;  %6148 = vmatprep.mubr.f32.mxu0 %v5771_v62  ;;  %v14529_v62 = vld [vmem:[%s15440_s3 + $0x340] sm:$0xff]  ;;  %v14534_v41 = vld [vmem:[%s15440_s3 + $0x348] sm:$0xff]  ;;  %17227 = vst [vmem:[#allocation35_spill] sm:$0xff] %v14575_v54  ;;  %v14604_v18 = vsub.f32 %v14523_v45, %v17231_v7  ;;  %v9561_v45 = vpack.c.bf16 %v13891_v22, %v13886_v40  ;;  %v17245_v22 = vand.u32 4294901760, %v14575_v54  ;;  %v17249_v40 = vand.u32 4294901760, %v14588_v5 }
 0x2c1   : > { %9544 = vmatprep.subr.bf16.mxu0 %v9543_v55  ;;  %17222 = vst [vmem:[#allocation69_spill] sm:$0xff] %v14529_v62  ;;  %17223 = vst [vmem:[#allocation10_spill] sm:$0xff] %v14534_v41  ;;  %9580 = vmatprep.subr.bf16.mxu1 %v14340_v32  ;;  %v14545_v55 = vld [vmem:[%s15440_s3 + $0x3d0] sm:$0xff]  ;;  %v17236_v33 = vand.u32 4294901760, %v14534_v41 }
 0x2c2   : > { %17224 = vst [vmem:[#allocation71_spill] sm:$0xff] %v14545_v55  ;;  %17232 = vst [vmem:[#allocation46_spill] sm:$0xff] %v14604_v18 }
 0x2c3   : > { %9582 = vmatpush3.bf16.msra.mxu1 %v14359_v19 }
 0x2c4   : > { %9546 = vmatpush3.bf16.msra.mxu0 %v9545_v23  ;;  %9584 = vmatprep.subr.bf16.mxu1 %v14365_v43  ;;  %v9553_v23 = vpack.c.bf16 %v13776_v6, %v13771_v56  ;;  %v14593_v43 = vld [vmem:[%s15440_s3 + $0x3e8] sm:$0xff]  ;;  %v14599_v56 = vsub.f32 %v14518_v57, %v17230_v10  ;;  %v17235_v10 = vand.u32 4294901760, %v14529_v62  ;;  %v14627_v6 = vsub.f32 %v14534_v41, %v17236_v33 }
 0x2c5   : > { %9548 = vmatprep.subr.bf16.mxu0 %v9547_v36  ;;  %v14570_v36 = vld [vmem:[%s15440_s3 + $0x350] sm:$0xff]  ;;  %17229 = vst [vmem:[#allocation50_spill] sm:$0xff] %v14593_v43  ;;  %v17240_v33 = vand.u32 4294901760, %v14552_v44  ;;  %v9559_v57 = vpack.c.bf16 %v13855_v31, %v13850_v42  ;;  %v14698_v31 = vsub.f32 %v14588_v5, %v17249_v40  ;;  %v17250_v14 = vand.u32 4294901760, %v14593_v43 }
 0x2c6   : > { %17226 = vst [vmem:[#allocation87_spill] sm:$0xff] %v14570_v36  ;;  %v14622_v7 = vsub.f32 %v14529_v62, %v17235_v10  ;;  %17237 = vst [vmem:[#allocation16_spill] sm:$0xff] %v14627_v6  ;;  %v17239_v62 = vand.u32 4294901760, %v14540_v37  ;;  %v9563_v10 = vpack.c.bf16 %v13926_v48, %v13914_v49  ;;  %v14664_v42 = vld [vmem:[%s15440_s3 + $0x3f0] sm:$0xff]  ;;  %v17244_v49 = vand.u32 4294901760, %v14570_v36 }
 0x2c7   : > { %9586 = vmatpush3.bf16.msra.mxu1 %v14387_v15  ;;  %17243 = vst [vmem:[#allocation22_spill] sm:$0xff] %v14664_v42 }
 0x2c8   : > { %9550 = vmatpush3.bf16.msra.mxu0 %v9549_v21  ;;  %v14615_v21 = vld [vmem:[%s15440_s3 + $0x368] sm:$0xff]  ;;  %v14643_v41 = vpack.c.bf16 %v17240_v33, %v17239_v62  ;;  %9588 = vmatprep.subr.bf16.mxu1 %v14400_v50  ;;  %v15993_v62 = vand.u32 4294901760, %v14604_v18  ;;  %v17242_v33 = vand.u32 4294901760, %v14563_v8  ;;  %v14671_v48 = vsub.f32 %v14570_v36, %v17244_v49  ;;  %v14691_v49 = vld [vmem:[%s15440_s3 + $0x378] sm:$0xff] }
 0x2c9   : > { %17234 = vst [vmem:[#allocation6_spill] sm:$0xff] %v14615_v21  ;;  %9552 = vmatprep.subr.bf16.mxu0 %v9551_v3  ;;  %v17238_v3 = vand.u32 4294901760, %v14545_v55  ;;  %17248 = vst [vmem:[#allocation34_spill] sm:$0xff] %v14691_v49  ;;  %v17253_v40 = vand.u32 4294901760, %v14615_v21 }
 0x2ca   : > { %17241 = vst [vmem:[#allocation12_spill] sm:$0xff] %v14643_v41  ;;  %v14659_v41 = vsub.f32 %v14563_v8, %v17242_v33  ;;  %v14681_v33 = vld [vmem:[%s15440_s3 + $0x3f8] sm:$0xff]  ;;  %v17256_v8 = vand.u32 4294901760, %v14627_v6  ;;  %v16003_v6 = vand.u32 4294901760, %v14671_v48 }
 0x2cb   : > { %v14635_v19 = vsub.f32 %v14545_v55, %v17238_v3  ;;  %v15994_v55 = vand.u32 4294901760, %v14599_v56  ;;  %17246 = vst [vmem:[#allocation29_spill] sm:$0xff] %v14681_v33  ;;  %9590 = vmatpush3.bf16.msra.mxu1 %v14420_v34  ;;  %v14703_v3 = vsub.f32 %v14593_v43, %v17250_v14  ;;  %v14720_v5 = vsub.f32 %v14615_v21, %v17253_v40 }
 0x2cc   : > { %9554 = vmatpush3.bf16.msra.mxu0 %v9553_v23  ;;  %v14676_v23 = vsub.f32 %v14575_v54, %v17245_v22  ;;  %9592 = vmatprep.subr.bf16.mxu1 %v14427_v51  ;;  %v17252_v22 = vand.u32 4294901760, %v14610_v52  ;;  %v17255_v43 = vand.u32 4294901760, %v14622_v7  ;;  %v3949_v21 = vstv %s14617_s14 }
 0x2cd   : > { %9556 = vmatprep.subr.bf16.mxu0 %v9555_v16  ;;  %v14686_v16 = vld [vmem:[%s15440_s3 + $0x370] sm:$0xff]  ;;  %v14709_v54 = vpack.c.bf16 %v15993_v62, %v15994_v55  ;;  %17254 = vst [vmem:[#allocation8_spill] sm:$0xff] %v14720_v5  ;;  %v7550_v55 = vpop.f32.mrb[4].mxu1  ;;  %v9565_v14 = vpack.c.bf16 %v13936_v28, %v13931_v9  ;;  %v17258_v18 = vand.u32 4294901760, %v14635_v19 }
 0x2ce   : > { %17247 = vst [vmem:[#allocation25_spill] sm:$0xff] %v14686_v16  ;;  %v14715_v36 = vsub.f32 %v14610_v52, %v17252_v22  ;;  %v14727_v62 = vpack.c.bf16 %v17256_v8, %v17255_v43  ;;  %v7551_v40 = vpop.f32.mrb[5].mxu1  ;;  %v16002_v8 = vand.u32 4294901760, %v14676_v23  ;;  %v17265_v9 = vand.u32 4294901760, %v14686_v16 }
 0x2cf   : > { %17251 = vst [vmem:[#allocation48_spill] sm:$0xff] %v14709_v54  ;;  %v16001_v54 = vand.u32 4294901760, %v14659_v41  ;;  %v7552_v43 = vadd.f32 %v7551_v40, %v7550_v55  ;;  %9594 = vmatpush3.bf16.msra.mxu1 %v14442_v59  ;;  %v17260_v55 = vand.u32 4294901760, %v14664_v42 }
 0x2d0   : > { %17257 = vst [vmem:[#allocation62_spill] sm:$0xff] %v14727_v62  ;;  %9558 = vmatpush3.bf16.msra.mxu0 %v9557_v61  ;;  %v7515_v61 = vpop.f32.mrb[4].mxu0  ;;  %9596 = vmatprep.subr.bf16.mxu1 %v14451_v1  ;;  %v14759_v52 = vpack.c.bf16 %v16002_v8, %v16003_v6  ;;  %v14769_v28 = vsub.f32 %v14686_v16, %v17265_v9  ;;  %v17269_v8 = vld [vmem:[#allocation85_spill] sm:$0xff]  ;;  %v17273_v9 = vand.u32 4294901760, %v14715_v36 }
 0x2d1   : > { %9560 = vmatprep.subr.bf16.mxu0 %v9559_v57  ;;  %v14745_v57 = vpack.c.bf16 %v16001_v54, %v17258_v18  ;;  %v7516_v62 = vpop.f32.mrb[5].mxu0  ;;  %v14753_v40 = vsub.f32 %v14664_v42, %v17260_v55  ;;  %v17263_v54 = vand.u32 4294901760, %v14681_v33  ;;  %v17267_v55 = vand.u32 4294901760, %v14691_v49 }
 0x2d2   : > { %17262 = vst [vmem:[#allocation19_spill] sm:$0xff] %v14759_v52  ;;  %v7517_v18 = vadd.f32 %v7516_v62, %v7515_v61  ;;  %17266 = vst [vmem:[#allocation14_spill] sm:$0xff] %v14769_v28  ;;  %v9567_v62 = vpack.c.bf16 %v17269_v8, %v13975_v17  ;;  %v17271_v61 = vand.u32 4294901760, %v14703_v3  ;;  %v17274_v52 = vand.u32 4294901760, %v14720_v5 }
 0x2d3   : > { %17259 = vst [vmem:[#allocation61_spill] sm:$0xff] %v14745_v57  ;;  %17261 = vst [vmem:[#allocation13_spill] sm:$0xff] %v14753_v40  ;;  %v14764_v22 = vsub.f32 %v14681_v33, %v17263_v54  ;;  %v14774_v57 = vsub.f32 %v14691_v49, %v17267_v55  ;;  %9598 = vmatpush3.bf16.msra.mxu1 %v14465_v24  ;;  %v17270_v54 = vand.u32 4294901760, %v14698_v31  ;;  %v16006_v55 = vand.u32 4294901760, %v14769_v28  ;;  %v17315_v33 = vld [vmem:[#allocation47_spill] sm:$0xff] }
 0x2d4   : > { %9562 = vmatpush3.bf16.msra.mxu0 %v9561_v45  ;;  %v4059_v45 = vadd.f32 %v7517_v18, %v3949_v21  ;;  %v14789_v16 = vpack.c.bf16 %v17274_v52, %v17273_v9  ;;  %9600 = vmatprep.subr.bf16.mxu1 %v14474_v30  ;;  %v16008_v21 = vand.u32 4294901760, %v14753_v40  ;;  %v17277_v52 = vand.u32 4294901760, %v17210_v26 }
 0x2d5   : > { %17264 = vst [vmem:[#allocation15_spill] sm:$0xff] %v14764_v22  ;;  %17268 = vst [vmem:[#allocation24_spill] sm:$0xff] %v14774_v57  ;;  %9564 = vmatprep.subr.bf16.mxu0 %v9563_v10  ;;  %v14783_v6 = vpack.c.bf16 %v17271_v61, %v17270_v54  ;;  %v17276_v10 = vld [vmem:[#allocation89_spill] sm:$0xff]  ;;  %v16007_v18 = vand.u32 4294901760, %v14764_v22  ;;  %v16005_v54 = vand.u32 4294901760, %v14774_v57  ;;  %v17278_v61 = vand.u32 4294901760, %v17211_v0 }
 0x2d6   : > { %17275 = vst [vmem:[#allocation67_spill] sm:$0xff] %v14789_v16  ;;  %v9569_v17 = vpack.c.bf16 %v13990_v25, %v17276_v10  ;;  %v14795_v8 = vadd.f32 %v7552_v43, %v4059_v45  ;;  %v17281_v26 = vand.u32 4294901760, %v17212_v13  ;;  %v17282_v0 = vand.u32 4294901760, %v17213_v60  ;;  %v17286_v13 = vld [vmem:[#allocation81_spill] sm:$0xff] }
 0x2d7   : > { %17272 = vst [vmem:[#allocation36_spill] sm:$0xff] %v14783_v6  ;;  %v9603_v9 = vpack.c.bf16 %v17278_v61, %v17277_v52  ;;  %9602 = vmatpush3.bf16.msra.mxu1 %v14482_v11  ;;  %v14809_v25 = vpack.c.bf16 %v16007_v18, %v16008_v21  ;;  %v17284_v45 = vand.u32 4294901760, %v17215_v63  ;;  %v17285_v10 = vand.u32 4294901760, %v17216_v4  ;;  %v14831_v61 = vld [vmem:[%s15440_s3 + $0x380] sm:$0xff]  ;;  %v14972_v21 = vld [vmem:[%s15440_s3 + $0x3b0] sm:$0xff]  ;;  %v17312_v6 = vld [vmem:[#allocation79_spill] sm:$0xff] }
 0x2d8   : > { %9566 = vmatpush3.bf16.msra.mxu0 %v9565_v14  ;;  %v14815_v14 = vpack.c.bf16 %v16005_v54, %v16006_v55  ;;  %9636 = vmatprep.subr.bf16.mxu1 %v14285_v12  ;;  %v9605_v43 = vpack.c.bf16 %v17282_v0, %v17281_v26  ;;  %v14836_v12 = vld [vmem:[%s15440_s3 + $0x388] sm:$0xff]  ;;  %v382_v60 = vsub.s32 7, %v17286_v13  ;;  %v17287_v63 = vand.u32 4294901760, %v14197_v27 }
 0x2d9   : > { %9568 = vmatprep.subr.bf16.mxu0 %v9567_v62  ;;  %17279 = vst [vmem:[#allocation11_spill] sm:$0xff] %v14809_v25  ;;  %v17283_v62 = vand.u32 4294901760, %v14458_v58  ;;  %v9607_v52 = vpack.c.bf16 %v17285_v10, %v17284_v45  ;;  %v17288_v4 = vand.u32 4294901760, %v17218_v38  ;;  %v16011_v26 = vand.u32 4294901760, %v14836_v12  ;;  %v14862_v27 = vld [vmem:[%s15440_s3 + $0x308] sm:$0xff] }
 0x2da   : > { %17280 = vst [vmem:[#allocation74_spill] sm:$0xff] %v14815_v14  ;;  %v17290_v0 = vand.u32 4294901760, %v14212_v47  ;;  %v17293_v47 = vld [vmem:[#allocation43_spill] sm:$0xff] }
 0x2db   : > { %6259 = vmatmul.mubr.f32.vlgmr.msra.gmra.mrb[18].mxu1 %v17283_v62  ;;  %v14879_v10 = vsub.f32 %v14836_v12, %v16011_v26 }
 0x2dc   : > { %9570 = vmatpush3.bf16.msra.mxu0 %v9569_v17  ;;  %9638 = vmatpush3.bf16.msra.mxu1 %v14305_v39  ;;  %v9609_v17 = vpack.c.bf16 %v17288_v4, %v17287_v63  ;;  %v17289_v39 = vand.u32 4294901760, %v17219_v20  ;;  %v17292_v20 = vand.u32 4294901760, %v14230_v46  ;;  %v14886_v46 = vld [vmem:[%s15440_s3 + $0x390] sm:$0xff]  ;;  %v17298_v63 = vld [vmem:[#allocation40_spill] sm:$0xff] }
 0x2dd   : > { %9604 = vmatprep.subr.bf16.mxu0 %v9603_v9  ;;  %6529 = vmatprep.mubr.f32.mxu1 %v14455_v29  ;;  %v16012_v9 = vand.u32 4294901760, %v14831_v61  ;;  %17296 = vst [vmem:[#allocation91_spill] sm:$0xff] %v14879_v10  ;;  %v17299_v4 = vand.u32 4294901760, %v17298_v63  ;;  %v14920_v63 = vld [vmem:[%s15440_s3 + $0x3a8] sm:$0xff] }
 0x2de   : > { %9640 = vmatprep.subr.bf16.mxu1 %v14311_v35  ;;  %v14857_v35 = vld [vmem:[%s15440_s3 + $0x300] sm:$0xff] }
 0x2df   : > { %6151 = vmatmul.mubr.f32.vlgmr.msra.gmra.mrb[18].mxu0 %v14458_v58  ;;  %v9611_v58 = vpack.c.bf16 %v17290_v0, %v17289_v39  ;;  %v14874_v45 = vsub.f32 %v14831_v61, %v16012_v9  ;;  %v17300_v39 = vld [vmem:[#allocation84_spill] sm:$0xff] }
 0x2e0   : > { %9606 = vmatpush3.bf16.msra.mxu0 %v9605_v43  ;;  %6425 = vmatprep.mubr.f32.mxu0 %v14455_v29  ;;  %v17291_v29 = vld [vmem:[#allocation77_spill] sm:$0xff]  ;;  %v17294_v43 = vand.u32 4294901760, %v17293_v47  ;;  %v14902_v47 = vld [vmem:[%s15440_s3 + $0x310] sm:$0xff] }
 0x2e1   : > { %9608 = vmatprep.subr.bf16.mxu0 %v9607_v52  ;;  %v383_v38 = vrot.slane %v17291_v29, %v382_v60  ;;  %9642 = vmatpush3.bf16.msra.mxu1 %v14333_v2  ;;  %17295 = vst [vmem:[#allocation28_spill] sm:$0xff] %v14874_v45  ;;  %v16009_v2 = vand.u32 4294901760, %v14857_v35  ;;  %v14891_v52 = vld [vmem:[%s15440_s3 + $0x398] sm:$0xff]  ;;  %v17297_v60 = vand.u32 4294901760, %v14252_v53  ;;  %v16013_v53 = vand.u32 4294901760, %v14886_v46 }
 0x2e2   : > { %9644 = vmatprep.subr.bf16.mxu1 %v14340_v32  ;;  %v9613_v62 = vpack.c.bf16 %v17294_v43, %v17292_v20  ;;  %v16010_v32 = vand.u32 4294901760, %v14862_v27  ;;  %v17301_v20 = vld [vmem:[#allocation42_spill] sm:$0xff]  ;;  %v14907_v43 = vld [vmem:[%s15440_s3 + $0x318] sm:$0xff]  ;;  %v16017_v54 = vand.u32 4294901760, %v14902_v47 }
 0x2e3   : > { %v9866_v0 = vadd.f32 %v17300_v39, %v383_v38  ;;  %v14915_v38 = vld [vmem:[%s15440_s3 + $0x3a0] sm:$0xff]  ;;  %v16015_v39 = vand.u32 4294901760, %v14879_v10  ;;  %v16018_v55 = vand.u32 4294901760, %v14907_v43 }
 0x2e4   : > { %9610 = vmatpush3.bf16.msra.mxu0 %v9609_v17  ;;  %v9615_v17 = vpack.c.bf16 %v17299_v4, %v17297_v60  ;;  %v16014_v60 = vand.u32 4294901760, %v14891_v52  ;;  %v16016_v4 = vand.u32 4294901760, %v14874_v45 }
 0x2e5   : > { %9612 = vmatprep.subr.bf16.mxu0 %v9611_v58  ;;  %9646 = vmatpush3.bf16.msra.mxu1 %v17301_v20  ;;  %v17302_v58 = vld [vmem:[#allocation30_spill] sm:$0xff]  ;;  %v14927_v20 = vsub.f32 %v14857_v35, %v16009_v2  ;;  %v14942_v2 = vld [vmem:[%s15440_s3 + $0x320] sm:$0xff] }
 0x2e6   : > { %9648 = vmatprep.subr.bf16.mxu1 %v17302_v58  ;;  %v14932_v58 = vsub.f32 %v14862_v27, %v16010_v32  ;;  %v17307_v32 = vld [vmem:[#allocation63_spill] sm:$0xff]  ;;  %v6764_v26 = vsub.f32 %v14874_v45, %v16016_v4  ;;  %v14988_v4 = vsub.f32 %v14907_v43, %v16018_v55  ;;  %v17316_v9 = vand.u32 4294901760, %v14942_v2 }
 0x2e7   : > { %17303 = vst [vmem:[#allocation95_spill] sm:$0xff] %v14927_v20  ;;  %v17313_v45 = vand.u32 4294901760, %v14927_v20 }
 0x2e8   : > { %9614 = vmatpush3.bf16.msra.mxu0 %v9613_v62  ;;  %17304 = vst [vmem:[#allocation75_spill] sm:$0xff] %v14932_v58  ;;  %v3819_v62 = vmax.f32 %v9866_v0, 0.0  ;;  %v14958_v0 = vsub.f32 %v14891_v52, %v16014_v60  ;;  %v17308_v60 = vld [vmem:[#allocation65_spill] sm:$0xff]  ;;  %v17314_v49 = vand.u32 4294901760, %v14932_v58 }
 0x2e9   : > { %9616 = vmatprep.subr.bf16.mxu0 %v9615_v17  ;;  %9650 = vmatpush3.bf16.msra.mxu1 %v14387_v15  ;;  %v14947_v17 = vld [vmem:[%s15440_s3 + $0x328] sm:$0xff]  ;;  %v14953_v15 = vsub.f32 %v14886_v46, %v16013_v53 }
 0x2ea   : > { %9652 = vmatprep.subr.bf16.mxu1 %v14400_v50  ;;  %17306 = vst [vmem:[#allocation92_spill] sm:$0xff] %v14958_v0  ;;  %v6771_v50 = vsub.f32 %v14879_v10, %v16015_v39  ;;  %v14983_v39 = vsub.f32 %v14902_v47, %v16017_v54  ;;  %v14992_v18 = vand.u32 4294901760, %v3819_v62  ;;  %v17311_v54 = vand.u32 4294901760, %v14920_v63  ;;  %v7620_v16 = vpop.f32.mrb[6].mxu1 }
 0x2eb   : > { %17305 = vst [vmem:[#allocation94_spill] sm:$0xff] %v14953_v15  ;;  %v7621_v55 = vpop.f32.mrb[7].mxu1 }
 0x2ec   : > { %9618 = vmatpush3.bf16.msra.mxu0 %v17307_v32  ;;  %v14977_v32 = vld [vmem:[%s15440_s3 + $0x3b8] sm:$0xff]  ;;  %17309 = vst [vmem:[#allocation55_spill] sm:$0xff] %v14992_v18  ;;  %v15003_v25 = vsub.f32 %v14920_v63, %v17311_v54  ;;  %v6772_v10 = vand.u32 4294901760, %v6771_v50  ;;  %v6652_v54 = vsub.f32 %v14927_v20, %v17313_v45  ;;  %v15031_v50 = vsub.f32 %v3819_v62, %v14992_v18 }
 0x2ed   : > { %9620 = vmatprep.subr.bf16.mxu0 %v17308_v60  ;;  %9654 = vmatpush3.bf16.msra.mxu1 %v14420_v34  ;;  %v17310_v60 = vand.u32 4294901760, %v14915_v38 }
 0x2ee   : > { %9656 = vmatprep.subr.bf16.mxu1 %v14427_v51  ;;  %v6659_v51 = vsub.f32 %v14932_v58, %v17314_v49  ;;  %v7622_v49 = vadd.f32 %v7621_v55, %v7620_v16  ;;  %v17320_v16 = vand.u32 4294901760, %v14972_v21  ;;  %v17321_v55 = vand.u32 4294901760, %v14977_v32 }
 0x2ef   : > { %v14998_v14 = vsub.f32 %v14915_v38, %v17310_v60  ;;  %v6765_v60 = vand.u32 4294901760, %v6764_v26  ;;  %v17317_v26 = vand.u32 4294901760, %v14947_v17  ;;  %v6653_v57 = vand.u32 4294901760, %v6652_v54 }
 0x2f0   : > { %9622 = vmatpush3.bf16.msra.mxu0 %v17312_v6  ;;  %v15023_v6 = vsub.f32 %v14942_v2, %v17316_v9  ;;  %v17318_v9 = vand.u32 4294901760, %v14953_v15  ;;  %v15051_v34 = vsub.f32 %v14977_v32, %v17321_v55  ;;  %v17327_v54 = vand.u32 4294901760, %v15003_v25 }
 0x2f1   : > { %9624 = vmatprep.subr.bf16.mxu0 %v17315_v33  ;;  %v15028_v45 = vsub.f32 %v14947_v17, %v17317_v26  ;;  %9658 = vmatpush3.bf16.msra.mxu1 %v14442_v59  ;;  %v7585_v33 = vpop.f32.mrb[6].mxu0  ;;  %v17319_v26 = vand.u32 4294901760, %v14958_v0  ;;  %v15046_v59 = vsub.f32 %v14972_v21, %v17320_v16  ;;  %v9699_v42 = vpack.c.bf16 %v6772_v10, %v6765_v60  ;;  %v17329_v10 = vld [vmem:[#allocation20_spill] sm:$0xff] }
 0x2f2   : > { %v7586_v58 = vpop.f32.mrb[7].mxu0  ;;  %9660 = vmatprep.subr.bf16.mxu1 %v14451_v1  ;;  %v6778_v20 = vsub.f32 %v14953_v15, %v17318_v9  ;;  %v17322_v1 = vld [vmem:[#allocation49_spill] sm:$0xff]  ;;  %v6660_v9 = vand.u32 4294901760, %v6659_v51  ;;  %v17323_v15 = vld [vmem:[#allocation32_spill] sm:$0xff]  ;;  %v17325_v16 = vand.u32 4294901760, %v14988_v4  ;;  %v16042_v22 = vand.u32 4294901760, %v15023_v6 }
 0x2f3   : > { %v6785_v62 = vsub.f32 %v14958_v0, %v17319_v26  ;;  %v7587_v53 = vadd.f32 %v7586_v58, %v7585_v33  ;;  %v17324_v26 = vand.u32 4294901760, %v14983_v39  ;;  %v6799_v51 = vsub.f32 %v15003_v25, %v17327_v54 }
 0x2f4   : > { %9626 = vmatpush3.bf16.msra.mxu0 %v17322_v1  ;;  %v6673_v28 = vsub.f32 %v14988_v4, %v17325_v16  ;;  %v6779_v33 = vand.u32 4294901760, %v6778_v20  ;;  %v17331_v55 = vand.u32 4294901760, %v14836_v12  ;;  %v6680_v20 = vsub.f32 %v15023_v6, %v16042_v22 }
 0x2f5   : > { %9628 = vmatprep.subr.bf16.mxu0 %v17323_v15  ;;  %v6666_v0 = vsub.f32 %v14983_v39, %v17324_v26  ;;  %v4429_v58 = vadd.f32 %v7587_v53, %v14795_v8  ;;  %9662 = vmatpush3.bf16.msra.mxu1 %v14465_v24  ;;  %v17326_v15 = vand.u32 4294901760, %v14998_v14  ;;  %v6786_v1 = vand.u32 4294901760, %v6785_v62  ;;  %v17328_v53 = vld [vmem:[#allocation33_spill] sm:$0xff] }
 0x2f6   : > { %9664 = vmatprep.subr.bf16.mxu1 %v14474_v30  ;;  %v16041_v26 = vand.u32 4294901760, %v15046_v59  ;;  %v16040_v8 = vand.u32 4294901760, %v15051_v34  ;;  %v9701_v24 = vpack.c.bf16 %v6660_v9, %v6653_v57  ;;  %v17332_v62 = vand.u32 4294901760, %v15028_v45 }
 0x2f7   : > { %v6792_v60 = vsub.f32 %v14998_v14, %v17326_v15  ;;  %v15076_v16 = vadd.f32 %v7622_v49, %v4429_v58  ;;  %v17330_v15 = vand.u32 4294901760, %v14831_v61  ;;  %v6667_v30 = vand.u32 4294901760, %v6666_v0 }
 0x2f8   : > { %9630 = vmatpush3.bf16.msra.mxu0 %v17328_v53  ;;  %v6687_v53 = vsub.f32 %v15028_v45, %v17332_v62  ;;  %v17333_v57 = vand.u32 4294901760, %v15031_v50  ;;  %v6674_v61 = vand.u32 4294901760, %v6673_v28  ;;  %v6800_v12 = vand.u32 4294901760, %v6799_v51 }
 0x2f9   : > { %9632 = vmatprep.subr.bf16.mxu0 %v17329_v10  ;;  %v15083_v54 = vpack.c.bf16 %v17331_v55, %v17330_v15  ;;  %9666 = vmatpush3.bf16.msra.mxu1 %v14482_v11  ;;  %v6793_v9 = vand.u32 4294901760, %v6792_v60  ;;  %v9703_v55 = vpack.c.bf16 %v6786_v1, %v6779_v33  ;;  %v6806_v0 = vsub.f32 %v15046_v59, %v16041_v26  ;;  %v17334_v11 = vld [vmem:[#allocation21_spill] sm:$0xff] }
 0x2fa   : > { %v6635_v49 = vsub.f32 %v15031_v50, %v17333_v57  ;;  %9700 = vmatprep.subr.bf16.mxu1 %v9699_v42  ;;  %v6813_v58 = vsub.f32 %v15051_v34, %v16040_v8  ;;  %v378_v10 = vsub.s32 6, %v17286_v13  ;;  %v17335_v15 = vand.u32 4294901760, %v14857_v35  ;;  %v17339_v1 = vld [vmem:[#allocation37_spill] sm:$0xff] }
 0x2fb   : > { %v17336_v28 = vand.u32 4294901760, %v14862_v27  ;;  %v17337_v42 = vand.u32 4294901760, %v14886_v46  ;;  %v17338_v51 = vand.u32 4294901760, %v14891_v52  ;;  %v6681_v62 = vand.u32 4294901760, %v6680_v20 }
 0x2fc   : > { %9634 = vmatpush3.bf16.msra.mxu0 %v17334_v11  ;;  %6531 = vmatmul.mubr.f32.vlgmr.msra.gmra.mrb[20].mxu1 %v17339_v1  ;;  %v6688_v13 = vand.u32 4294901760, %v6687_v53  ;;  %v17340_v57 = vand.u32 4294901760, %v14540_v37  ;;  %v17341_v27 = vand.u32 4294901760, %v14552_v44  ;;  %v6636_v46 = vand.u32 4294901760, %v6635_v49 }
 0x2fd   : > { %v15107_v60 = vpack.c.bf16 %v17336_v28, %v17335_v15  ;;  %v15113_v33 = vpack.c.bf16 %v17338_v51, %v17337_v42  ;;  %9668 = vmatprep.subr.bf16.mxu0 %v15083_v54  ;;  %9702 = vmatpush3.bf16.msra.mxu1 %v9701_v24  ;;  %v9705_v52 = vpack.c.bf16 %v6674_v61, %v6667_v30  ;;  %v6807_v28 = vand.u32 4294901760, %v6806_v0  ;;  %v17343_v51 = vld [vmem:[#allocation46_spill] sm:$0xff] }
 0x2fe   : > { %v6694_v35 = vsub.f32 %v14540_v37, %v17340_v57  ;;  %v6701_v11 = vsub.f32 %v14552_v44, %v17341_v27  ;;  %6873 = vmatprep.mubr.f32.mxu1 %v14992_v18  ;;  %v9707_v15 = vpack.c.bf16 %v6800_v12, %v6793_v9  ;;  %9704 = vmatprep.subr.bf16.mxu1 %v9703_v55  ;;  %v6814_v20 = vand.u32 4294901760, %v6813_v58 }
 0x2ff   : > { %6427 = vmatmul.mubr.f32.vlgmr.msra.gmra.mrb[20].mxu0 %v17339_v1  ;;  %v17342_v53 = vand.u32 4294901760, %v14599_v56  ;;  %v17344_v57 = vand.u32 4294901760, %v17343_v51  ;;  %v379_v24 = vrot.slane %v17291_v29, %v378_v10  ;;  %v17345_v30 = vand.u32 4294901760, %v14902_v47  ;;  %v17350_v1 = vld [vmem:[#allocation16_spill] sm:$0xff] }
 0x300   : > { %9670 = vmatpush3.bf16.msra.mxu0 %v15107_v60  ;;  %6637 = vmatprep.mubr.f32.mxu0 %v6636_v46  ;;  %v17346_v49 = vand.u32 4294901760, %v14907_v43  ;;  %v9709_v9 = vpack.c.bf16 %v6688_v13, %v6681_v62  ;;  %v17347_v12 = vand.u32 4294901760, %v14915_v38  ;;  %v17348_v55 = vand.u32 4294901760, %v14920_v63 }
 0x301   : > { %v6820_v42 = vsub.f32 %v14599_v56, %v17342_v53  ;;  %v6827_v8 = vsub.f32 %v17343_v51, %v17344_v57  ;;  %9672 = vmatprep.subr.bf16.mxu0 %v15113_v33  ;;  %v6695_v58 = vand.u32 4294901760, %v6694_v35  ;;  %v6702_v29 = vand.u32 4294901760, %v6701_v11  ;;  %9706 = vmatpush3.bf16.msra.mxu1 %v9705_v52 }
 0x302   : > { %v15137_v61 = vpack.c.bf16 %v17346_v49, %v17345_v30  ;;  %v15144_v0 = vpack.c.bf16 %v17348_v55, %v17347_v12  ;;  %v17349_v10 = vand.u32 4294901760, %v14622_v7  ;;  %v17351_v43 = vand.u32 4294901760, %v17350_v1  ;;  %9708 = vmatprep.subr.bf16.mxu1 %v9707_v15  ;;  %v17358_v55 = vld [vmem:[#allocation45_spill] sm:$0xff] }
 0x303   : > { %v17352_v46 = vand.u32 4294901760, %v14635_v19  ;;  %v17353_v38 = vand.u32 4294901760, %v14659_v41  ;;  %v9711_v13 = vpack.c.bf16 %v6814_v20, %v6807_v28  ;;  %v6821_v35 = vand.u32 4294901760, %v6820_v42 }
 0x304   : > { %v6708_v47 = vsub.f32 %v14622_v7, %v17349_v10  ;;  %v6715_v27 = vsub.f32 %v17350_v1, %v17351_v43  ;;  %v6828_v11 = vand.u32 4294901760, %v6827_v8  ;;  %9674 = vmatpush3.bf16.msra.mxu0 %v15137_v61  ;;  %v17354_v52 = vand.u32 4294901760, %v14942_v2 }
 0x305   : > { %v6834_v62 = vsub.f32 %v14635_v19, %v17352_v46  ;;  %v6841_v63 = vsub.f32 %v14659_v41, %v17353_v38  ;;  %v17355_v53 = vand.u32 4294901760, %v14947_v17  ;;  %v17356_v30 = vand.u32 4294901760, %v14972_v21  ;;  %9676 = vmatprep.subr.bf16.mxu0 %v15144_v0  ;;  %9710 = vmatpush3.bf16.msra.mxu1 %v9709_v9  ;;  %v17363_v38 = vld [vmem:[#allocation41_spill] sm:$0xff] }
 0x306   : > { %v17357_v49 = vand.u32 4294901760, %v14977_v32  ;;  %v9865_v10 = vadd.f32 %v17358_v55, %v379_v24  ;;  %v9713_v15 = vpack.c.bf16 %v6702_v29, %v6695_v58  ;;  %v17359_v8 = vand.u32 4294901760, %v14671_v48  ;;  %9712 = vmatprep.subr.bf16.mxu1 %v9711_v13  ;;  %v17369_v13 = vld [vmem:[#allocation68_spill] sm:$0xff] }
 0x307   : > { %v15163_v57 = vpack.c.bf16 %v17355_v53, %v17354_v52  ;;  %v17360_v2 = vand.u32 4294901760, %v14676_v23  ;;  %v6709_v20 = vand.u32 4294901760, %v6708_v47  ;;  %v6716_v21 = vand.u32 4294901760, %v6715_v27  ;;  %v17365_v53 = vld [vmem:[#allocation44_spill] sm:$0xff] }
 0x308   : > { %v15169_v12 = vpack.c.bf16 %v17357_v49, %v17356_v30  ;;  %v6722_v28 = vsub.f32 %v14671_v48, %v17359_v8  ;;  %v6835_v42 = vand.u32 4294901760, %v6834_v62  ;;  %v6842_v32 = vand.u32 4294901760, %v6841_v63  ;;  %v17367_v62 = vld [vmem:[#allocation66_spill] sm:$0xff] }
 0x309   : > { %v6729_v17 = vsub.f32 %v14676_v23, %v17360_v2  ;;  %v9715_v43 = vpack.c.bf16 %v6828_v11, %v6821_v35  ;;  %v17361_v24 = vand.u32 4294901760, %v14698_v31  ;;  %v17362_v58 = vand.u32 4294901760, %v14703_v3  ;;  %9678 = vmatpush3.bf16.msra.mxu0 %v15163_v57  ;;  %9714 = vmatpush3.bf16.msra.mxu1 %v9713_v15 }
 0x30a   : > { %v17364_v52 = vand.u32 4294901760, %v17363_v38  ;;  %v17366_v9 = vand.u32 4294901760, %v17365_v53  ;;  %v3818_v27 = vmax.f32 %v9865_v10, 0.0  ;;  %9680 = vmatprep.subr.bf16.mxu0 %v15169_v12  ;;  %v17368_v63 = vand.u32 4294901760, %v17367_v62 }
 0x30b   : > { %v6848_v46 = vsub.f32 %v14698_v31, %v17361_v24  ;;  %v6855_v29 = vsub.f32 %v14703_v3, %v17362_v58  ;;  %v17370_v35 = vand.u32 4294901760, %v17369_v13  ;;  %v6723_v30 = vand.u32 4294901760, %v6722_v28  ;;  %9716 = vmatprep.subr.bf16.mxu1 %v9715_v43  ;;  %v17374_v28 = vld [vmem:[#allocation15_spill] sm:$0xff]  ;;  %v17382_v13 = vld [vmem:[#allocation18_spill] sm:$0xff] }
 0x30c   : > { %v15190_v47 = vpack.c.bf16 %v17366_v9, %v17364_v52  ;;  %v6730_v49 = vand.u32 4294901760, %v6729_v17  ;;  %v9717_v55 = vpack.c.bf16 %v6716_v21, %v6709_v20  ;;  %v9719_v8 = vpack.c.bf16 %v6842_v32, %v6835_v42  ;;  %v17376_v20 = vld [vmem:[#allocation69_spill] sm:$0xff]  ;;  %v17378_v42 = vld [vmem:[#allocation10_spill] sm:$0xff] }
 0x30d   : > { %v15197_v11 = vpack.c.bf16 %v17370_v35, %v17368_v63  ;;  %v17371_v2 = vand.u32 4294901760, %v14715_v36  ;;  %v17372_v58 = vand.u32 4294901760, %v14720_v5  ;;  %v6849_v38 = vand.u32 4294901760, %v6848_v46  ;;  %v17380_v46 = vld [vmem:[#allocation71_spill] sm:$0xff]  ;;  %v7655_v18 = vpop.f32.mrb[8].mxu0 }
 0x30e   : > { %v6856_v52 = vand.u32 4294901760, %v6855_v29  ;;  %v17373_v53 = vand.u32 4294901760, %v14753_v40  ;;  %v17375_v17 = vand.u32 4294901760, %v17374_v28  ;;  %9682 = vmatpush3.bf16.msra.mxu0 %v15190_v47  ;;  %v17377_v21 = vand.u32 4294901760, %v17376_v20  ;;  %9718 = vmatpush3.bf16.msra.mxu1 %v9717_v55  ;;  %v17390_v55 = vld [vmem:[#allocation35_spill] sm:$0xff] }
 0x30f   : > { %v6736_v24 = vsub.f32 %v14715_v36, %v17371_v2  ;;  %v6743_v10 = vsub.f32 %v14720_v5, %v17372_v58  ;;  %v17379_v32 = vand.u32 4294901760, %v17378_v42  ;;  %v15218_v63 = vand.u32 4294901760, %v3818_v27  ;;  %9684 = vmatprep.subr.bf16.mxu0 %v15197_v11  ;;  %9720 = vmatprep.subr.bf16.mxu1 %v9719_v8 }
 0x310   : > { %v6862_v9 = vsub.f32 %v14753_v40, %v17373_v53  ;;  %v6869_v15 = vsub.f32 %v17374_v28, %v17375_v17  ;;  %v9721_v43 = vpack.c.bf16 %v6730_v49, %v6723_v30  ;;  %v17381_v29 = vand.u32 4294901760, %v17380_v46  ;;  %v17384_v17 = vld [vmem:[#allocation14_spill] sm:$0xff]  ;;  %v7690_v46 = vpop.f32.mrb[8].mxu1 }
 0x311   : > { %v15216_v62 = vpack.c.bf16 %v17379_v32, %v17377_v21  ;;  %v17383_v35 = vand.u32 4294901760, %v17382_v13  ;;  %v6737_v58 = vand.u32 4294901760, %v6736_v24  ;;  %v6744_v53 = vand.u32 4294901760, %v6743_v10  ;;  %v17386_v21 = vld [vmem:[#allocation24_spill] sm:$0xff]  ;;  %v17398_v40 = vld [vmem:[#allocation6_spill] sm:$0xff] }
 0x312   : > { %v17385_v20 = vand.u32 4294901760, %v17384_v17  ;;  %v17387_v32 = vand.u32 4294901760, %v17386_v21  ;;  %v9723_v22 = vpack.c.bf16 %v6856_v52, %v6849_v38  ;;  %v6863_v30 = vand.u32 4294901760, %v6862_v9  ;;  %v17394_v38 = vld [vmem:[#allocation50_spill] sm:$0xff]  ;;  %9722 = vmatpush3.bf16.msra.mxu1 %v9721_v43 }
 0x313   : > { %v15225_v2 = vpack.c.bf16 %v17383_v35, %v17381_v29  ;;  %v6870_v49 = vand.u32 4294901760, %v6869_v15  ;;  %9686 = vmatpush3.bf16.msra.mxu0 %v15216_v62  ;;  %v17388_v29 = vld [vmem:[#allocation87_spill] sm:$0xff]  ;;  %v17391_v24 = vand.u32 4294901760, %v17390_v55  ;;  %v15241_v35 = vsub.f32 %v3818_v27, %v15218_v63  ;;  %v17400_v43 = vld [vmem:[#allocation22_spill] sm:$0xff] }
 0x314   : > { %v6750_v42 = vsub.f32 %v17384_v17, %v17385_v20  ;;  %v6757_v26 = vsub.f32 %v17386_v21, %v17387_v32  ;;  %v17389_v13 = vand.u32 4294901760, %v17388_v29  ;;  %v7691_v20 = vpop.f32.mrb[9].mxu1  ;;  %v17392_v32 = vld [vmem:[#allocation39_spill] sm:$0xff]  ;;  %v17395_v52 = vand.u32 4294901760, %v17394_v38  ;;  %9724 = vmatprep.subr.bf16.mxu1 %v9723_v22  ;;  %v17396_v17 = vld [vmem:[#allocation64_spill] sm:$0xff] }
 0x315   : > { %9688 = vmatprep.subr.bf16.mxu0 %v15225_v2  ;;  %v17393_v8 = vand.u32 4294901760, %v17392_v32  ;;  %v7692_v15 = vadd.f32 %v7691_v20, %v7690_v46  ;;  %v9725_v29 = vpack.c.bf16 %v6744_v53, %v6737_v58  ;;  %v17397_v28 = vand.u32 4294901760, %v17396_v17  ;;  %v17402_v53 = vld [vmem:[#allocation29_spill] sm:$0xff]  ;;  %v17406_v17 = vld [vmem:[#allocation34_spill] sm:$0xff]  ;;  %v17408_v38 = vld [vmem:[#allocation28_spill] sm:$0xff] }
 0x316   : > { %v15238_v10 = vpack.c.bf16 %v17391_v24, %v17389_v13  ;;  %v6751_v21 = vand.u32 4294901760, %v6750_v42  ;;  %v6758_v55 = vand.u32 4294901760, %v6757_v26  ;;  %v7656_v13 = vpop.f32.mrb[9].mxu0  ;;  %v9727_v24 = vpack.c.bf16 %v6870_v49, %v6863_v30 }
 0x317   : > { %v15248_v9 = vpack.c.bf16 %v17395_v52, %v17393_v8  ;;  %v7657_v27 = vadd.f32 %v7656_v13, %v7655_v18  ;;  %v17399_v32 = vand.u32 4294901760, %v17398_v40  ;;  %v6640_v8 = vand.u32 4294901760, %v15241_v35  ;;  %9726 = vmatpush3.bf16.msra.mxu1 %v9725_v29  ;;  %v17404_v40 = vld [vmem:[#allocation25_spill] sm:$0xff]  ;;  %v17411_v29 = vld [vmem:[#allocation75_spill] sm:$0xff]  ;;  %v17412_v13 = vld [vmem:[#allocation94_spill] sm:$0xff] }
 0x318   : > { %9690 = vmatpush3.bf16.msra.mxu0 %v15238_v10  ;;  %v17401_v58 = vand.u32 4294901760, %v17400_v43  ;;  %v17403_v26 = vand.u32 4294901760, %v17402_v53  ;;  %v9729_v18 = vpack.c.bf16 %v6758_v55, %v6751_v21  ;;  %9728 = vmatprep.subr.bf16.mxu1 %v9727_v24  ;;  %v17407_v30 = vand.u32 4294901760, %v17406_v17  ;;  %v17410_v21 = vld [vmem:[#allocation95_spill] sm:$0xff]  ;;  %v17413_v24 = vld [vmem:[#allocation92_spill] sm:$0xff] }
 0x319   : > { %v15255_v5 = vpack.c.bf16 %v17399_v32, %v17397_v28  ;;  %9692 = vmatprep.subr.bf16.mxu0 %v15248_v9  ;;  %v4705_v22 = vadd.f32 %v7657_v27, %v15076_v16  ;;  %v17405_v28 = vand.u32 4294901760, %v17404_v40  ;;  %v6641_v20 = vsub.f32 %v15241_v35, %v6640_v8  ;;  %v17409_v16 = vld [vmem:[#allocation91_spill] sm:$0xff] }
 0x31a   : > { %v15263_v42 = vpack.c.bf16 %v17403_v26, %v17401_v58  ;;  %v9731_v52 = vpack.c.bf16 %v17409_v16, %v17408_v38  ;;  %v9733_v55 = vpack.c.bf16 %v17411_v29, %v17410_v21  ;;  %v9735_v27 = vpack.c.bf16 %v17413_v24, %v17412_v13 }
 0x31b   : > { %v15271_v49 = vpack.c.bf16 %v17407_v30, %v17405_v28  ;;  %v4809_v46 = vadd.f32 %v7692_v15, %v4705_v22  ;;  %9730 = vmatpush3.bf16.msra.mxu1 %v9729_v18  ;;  %v6642_v15 = vand.u32 4294901760, %v6641_v20  ;;  %v17414_v32 = vand.u32 4294901760, %v15031_v50  ;;  %v17416_v30 = vld [vmem:[#allocation13_spill] sm:$0xff] }
 0x31c   : > { %9694 = vmatpush3.bf16.msra.mxu0 %v15255_v5  ;;  %9764 = vmatprep.subr.bf16.mxu1 %v15083_v54  ;;  %v9737_v43 = vpack.c.bf16 %v14988_v4, %v14983_v39  ;;  %v9739_v58 = vpack.c.bf16 %v15003_v25, %v14998_v14  ;;  %v9741_v53 = vpack.c.bf16 %v15028_v45, %v15023_v6 }
 0x31d   : > { %9696 = vmatprep.subr.bf16.mxu0 %v15263_v42  ;;  %v9743_v26 = vpack.c.bf16 %v15051_v34, %v15046_v59  ;;  %v9747_v22 = vpack.c.bf16 %v17343_v51, %v14599_v56  ;;  %v9749_v18 = vpack.c.bf16 %v17350_v1, %v14622_v7  ;;  %v9751_v40 = vpack.c.bf16 %v14659_v41, %v14635_v19  ;;  %v17415_v41 = vld [vmem:[#allocation8_spill] sm:$0xff] }
 0x31e   : > { %6875 = vmatmul.mubr.f32.vlgmr.msra.gmra.mrb[22].mxu1 %v15218_v63  ;;  %v9755_v51 = vpack.c.bf16 %v14703_v3, %v14698_v31  ;;  %v9757_v17 = vpack.c.bf16 %v17415_v41, %v14715_v36  ;;  %v17418_v3 = vld [vmem:[#allocation14_spill] sm:$0xff]  ;;  %v17419_v31 = vld [vmem:[#allocation24_spill] sm:$0xff] }
 0x31f   : > { %9766 = vmatpush3.bf16.msra.mxu1 %v15107_v60  ;;  %7117 = vmatprep.mubr.f32.mxu1 %v17414_v32  ;;  %v17423_v32 = vand.u32 4294901760, %v17411_v29  ;;  %v17429_v29 = vand.u32 4294901760, %v14998_v14  ;;  %v17436_v14 = vld [vmem:[#allocation48_spill] sm:$0xff] }
 0x320   : > { %9698 = vmatpush3.bf16.msra.mxu0 %v15271_v49  ;;  %9768 = vmatprep.subr.bf16.mxu1 %v15113_v33 }
 0x321   : > { %9732 = vmatprep.subr.bf16.mxu0 %v9731_v52  ;;  %v9761_v52 = vpack.c.bf16 %v17419_v31, %v17418_v3 }
 0x323   : > { %6643 = vmatmul.mubr.f32.vlgmr.msra.gmra.mrb[22].mxu0 %v6642_v15  ;;  %9770 = vmatpush3.bf16.msra.mxu1 %v15137_v61  ;;  %v17420_v15 = vand.u32 4294901760, %v17408_v38  ;;  %v17425_v38 = vand.u32 4294901760, %v17413_v24 }
 0x324   : > { %9734 = vmatpush3.bf16.msra.mxu0 %v9733_v55  ;;  %7010 = vmatprep.mubr.f32.mxu0 %v15031_v50  ;;  %v9745_v50 = vpack.c.bf16 %v14552_v44, %v14540_v37  ;;  %v9753_v37 = vpack.c.bf16 %v14676_v23, %v14671_v48  ;;  %v17417_v48 = vld [vmem:[#allocation15_spill] sm:$0xff] }
 0x325   : > { %9736 = vmatprep.subr.bf16.mxu0 %v9735_v27  ;;  %9772 = vmatprep.subr.bf16.mxu1 %v15144_v0  ;;  %v9759_v23 = vpack.c.bf16 %v17417_v48, %v17416_v30  ;;  %v17421_v27 = vand.u32 4294901760, %v17409_v16 }
 0x327   : > { %9774 = vmatpush3.bf16.msra.mxu1 %v15163_v57  ;;  %v9795_v36 = vpack.c.bf16 %v17421_v27, %v17420_v15 }
 0x328   : > { %9738 = vmatpush3.bf16.msra.mxu0 %v9737_v43  ;;  %9776 = vmatprep.subr.bf16.mxu1 %v15169_v12 }
 0x329   : > { %9740 = vmatprep.subr.bf16.mxu0 %v9739_v58  ;;  %v17424_v58 = vand.u32 4294901760, %v17412_v13  ;;  %v17430_v13 = vand.u32 4294901760, %v15003_v25  ;;  %v17435_v25 = vld [vmem:[#allocation12_spill] sm:$0xff] }
 0x32b   : > { %9778 = vmatpush3.bf16.msra.mxu1 %v15190_v47  ;;  %v7760_v44 = vpop.f32.mrb[10].mxu1  ;;  %v9799_v16 = vpack.c.bf16 %v17425_v38, %v17424_v58 }
 0x32c   : > { %9742 = vmatpush3.bf16.msra.mxu0 %v9741_v53  ;;  %9780 = vmatprep.subr.bf16.mxu1 %v15197_v11  ;;  %v7761_v56 = vpop.f32.mrb[11].mxu1  ;;  %v17426_v53 = vld [vmem:[#allocation55_spill] sm:$0xff] }
 0x32d   : > { %9744 = vmatprep.subr.bf16.mxu0 %v9743_v26  ;;  %v7762_v28 = vadd.f32 %v7761_v56, %v7760_v44 }
 0x32f   : > { %9782 = vmatpush3.bf16.msra.mxu1 %v15216_v62 }
 0x330   : > { %9746 = vmatpush3.bf16.msra.mxu0 %v9745_v50  ;;  %9784 = vmatprep.subr.bf16.mxu1 %v15225_v2  ;;  %v7725_v7 = vpop.f32.mrb[10].mxu0 }
 0x331   : > { %9748 = vmatprep.subr.bf16.mxu0 %v9747_v22  ;;  %v7726_v1 = vpop.f32.mrb[11].mxu0  ;;  %v17442_v22 = vld [vmem:[#allocation11_spill] sm:$0xff] }
 0x332   : > { %v7727_v19 = vadd.f32 %v7726_v1, %v7725_v7 }
 0x333   : > { %9786 = vmatpush3.bf16.msra.mxu1 %v15238_v10 }
 0x334   : > { %9750 = vmatpush3.bf16.msra.mxu0 %v9749_v18  ;;  %9788 = vmatprep.subr.bf16.mxu1 %v15248_v9  ;;  %v4921_v20 = vadd.f32 %v7727_v19, %v4809_v46  ;;  %v17422_v46 = vand.u32 4294901760, %v17410_v21 }
 0x335   : > { %9752 = vmatprep.subr.bf16.mxu0 %v9751_v40 }
 0x336   : > { %v5153_v55 = vadd.f32 %v7762_v28, %v4921_v20  ;;  %v9797_v43 = vpack.c.bf16 %v17423_v32, %v17422_v46 }
 0x337   : > { %9790 = vmatpush3.bf16.msra.mxu1 %v15255_v5 }
 0x338   : > { %9754 = vmatpush3.bf16.msra.mxu0 %v9753_v37  ;;  %9792 = vmatprep.subr.bf16.mxu1 %v15263_v42 }
 0x339   : > { %9756 = vmatprep.subr.bf16.mxu0 %v9755_v51 }
 0x33b   : > { %9794 = vmatpush3.bf16.msra.mxu1 %v15271_v49 }
 0x33c   : > { %9758 = vmatpush3.bf16.msra.mxu0 %v9757_v17  ;;  %9828 = vmatprep.subr.bf16.mxu1 %v15083_v54  ;;  %v17427_v54 = vand.u32 4294901760, %v14983_v39  ;;  %v17434_v39 = vand.u32 4294901760, %v15051_v34 }
 0x33d   : > { %9760 = vmatprep.subr.bf16.mxu0 %v9759_v23 }
 0x33e   : > { %7121 = vmatmul.mubr.f32.vlgmr.msra.gmra.mrb[24].mxu1 %v6640_v8  ;;  %v17428_v8 = vand.u32 4294901760, %v14988_v4  ;;  %v17433_v4 = vand.u32 4294901760, %v15046_v59  ;;  %v17438_v59 = vld [vmem:[#allocation61_spill] sm:$0xff] }
 0x33f   : > { %9830 = vmatpush3.bf16.msra.mxu1 %v15107_v60  ;;  %7391 = vmatprep.mubr.f32.mxu1 %v17426_v53  ;;  %v9803_v60 = vpack.c.bf16 %v17430_v13, %v17429_v29 }
 0x340   : > { %9762 = vmatpush3.bf16.msra.mxu0 %v9761_v52  ;;  %9832 = vmatprep.subr.bf16.mxu1 %v15113_v33  ;;  %v9801_v21 = vpack.c.bf16 %v17428_v8, %v17427_v54  ;;  %v17431_v33 = vand.u32 4294901760, %v15023_v6  ;;  %v9807_v26 = vpack.c.bf16 %v17434_v39, %v17433_v4  ;;  %v17437_v6 = vld [vmem:[#allocation62_spill] sm:$0xff] }
 0x341   : > { %9796 = vmatprep.subr.bf16.mxu0 %v9795_v36 }
 0x343   : > { %7013 = vmatmul.mubr.f32.vlgmr.msra.gmra.mrb[24].mxu0 %v15241_v35  ;;  %9834 = vmatpush3.bf16.msra.mxu1 %v15137_v61  ;;  %v17432_v35 = vand.u32 4294901760, %v15028_v45 }
 0x344   : > { %9798 = vmatpush3.bf16.msra.mxu0 %v9797_v43  ;;  %7287 = vmatprep.mubr.f32.mxu0 %v17426_v53 }
 0x345   : > { %9800 = vmatprep.subr.bf16.mxu0 %v9799_v16  ;;  %9836 = vmatprep.subr.bf16.mxu1 %v15144_v0  ;;  %v9805_v24 = vpack.c.bf16 %v17432_v35, %v17431_v33 }
 0x347   : > { %9838 = vmatpush3.bf16.msra.mxu1 %v15163_v57 }
 0x348   : > { %9802 = vmatpush3.bf16.msra.mxu0 %v9801_v21  ;;  %9840 = vmatprep.subr.bf16.mxu1 %v15169_v12 }
 0x349   : > { %9804 = vmatprep.subr.bf16.mxu0 %v9803_v60 }
 0x34b   : > { %9842 = vmatpush3.bf16.msra.mxu1 %v15190_v47  ;;  %v7830_v34 = vpop.f32.mrb[12].mxu1  ;;  %v17439_v47 = vld [vmem:[#allocation19_spill] sm:$0xff] }
 0x34c   : > { %9806 = vmatpush3.bf16.msra.mxu0 %v9805_v24  ;;  %9844 = vmatprep.subr.bf16.mxu1 %v15197_v11  ;;  %v7831_v45 = vpop.f32.mrb[13].mxu1  ;;  %v17440_v11 = vld [vmem:[#allocation36_spill] sm:$0xff] }
 0x34d   : > { %9808 = vmatprep.subr.bf16.mxu0 %v9807_v26  ;;  %v7832_v61 = vadd.f32 %v7831_v45, %v7830_v34 }
 0x34f   : > { %9846 = vmatpush3.bf16.msra.mxu1 %v15216_v62 }
 0x350   : > { %9810 = vmatpush3.bf16.msra.mxu0 %v17435_v25  ;;  %9848 = vmatprep.subr.bf16.mxu1 %v15225_v2  ;;  %v7795_v0 = vpop.f32.mrb[12].mxu0  ;;  %v17441_v2 = vld [vmem:[#allocation67_spill] sm:$0xff] }
 0x351   : > { %9812 = vmatprep.subr.bf16.mxu0 %v17436_v14  ;;  %v7796_v57 = vpop.f32.mrb[13].mxu0 }
 0x352   : > { %v7797_v12 = vadd.f32 %v7796_v57, %v7795_v0 }
 0x353   : > { %9850 = vmatpush3.bf16.msra.mxu1 %v15238_v10  ;;  %v17443_v10 = vld [vmem:[#allocation74_spill] sm:$0xff] }
 0x354   : > { %9814 = vmatpush3.bf16.msra.mxu0 %v17437_v6  ;;  %9852 = vmatprep.subr.bf16.mxu1 %v15248_v9  ;;  %v5291_v62 = vadd.f32 %v7797_v12, %v5153_v55 }
 0x355   : > { %9816 = vmatprep.subr.bf16.mxu0 %v17438_v59 }
 0x356   : > { %v5399_v50 = vadd.f32 %v7832_v61, %v5291_v62 }
 0x357   : > { %9854 = vmatpush3.bf16.msra.mxu1 %v15255_v5 }
 0x358   : > { %9818 = vmatpush3.bf16.msra.mxu0 %v17439_v47  ;;  %9856 = vmatprep.subr.bf16.mxu1 %v15263_v42 }
 0x359   : > { %9820 = vmatprep.subr.bf16.mxu0 %v17440_v11 }
 0x35b   : > { %9858 = vmatpush3.bf16.msra.mxu1 %v15271_v49 }
 0x35c   : > { %9822 = vmatpush3.bf16.msra.mxu0 %v17441_v2 }
 0x35d   : > { %9824 = vmatprep.subr.bf16.mxu0 %v17442_v22 }
 0x35e   : > { %7393 = vmatmul.mubr.f32.vlgmr.msra.gmra.mrb[26].mxu1 %v15218_v63 }
 0x360   : > { %9826 = vmatpush3.bf16.msra.mxu0 %v17443_v10 }
 0x363   : > { %7289 = vmatmul.mubr.f32.vlgmr.msra.gmra.mrb[26].mxu0 %v15218_v63 }
 0x36b   : > { %v7900_v9 = vpop.f32.mrb[14].mxu1 }
 0x36c   : > { %v7901_v18 = vpop.f32.mrb[15].mxu1 }
 0x36d   : > { %v7902_v40 = vadd.f32 %v7901_v18, %v7900_v9 }
 0x370   : > { %v7865_v44 = vpop.f32.mrb[14].mxu0 }
 0x371   : > { %v7866_v5 = vpop.f32.mrb[15].mxu0 }
 0x372   : > { %v7867_v37 = vadd.f32 %v7866_v5, %v7865_v44 }
 0x374   : > { %v5567_v42 = vadd.f32 %v7867_v37, %v5399_v50 }
 0x376   : > { %v5671_v56 = vadd.f32 %v7902_v40, %v5567_v42 }
 0x38d   : > { %v7970_v51 = vpop.f32.mrb[16].mxu1 }
 0x38e   : > { %v7971_v28 = vpop.f32.mrb[17].mxu1 }
 0x38f   : > { %v7972_v7 = vadd.f32 %v7971_v28, %v7970_v51 }
 0x392   : > { %v7935_v1 = vpop.f32.mrb[16].mxu0 }
 0x393   : > { %v7936_v19 = vpop.f32.mrb[17].mxu0 }
 0x394   : > { %v7937_v49 = vadd.f32 %v7936_v19, %v7935_v1 }
 0x396   : > { %v5783_v41 = vadd.f32 %v7937_v49, %v5671_v56 }
 0x398   : > { %v6015_v17 = vadd.f32 %v7972_v7, %v5783_v41 }
 0x3ae   : > { %v8040_v30 = vpop.f32.mrb[18].mxu1 }
 0x3af   : > { %v8041_v48 = vpop.f32.mrb[19].mxu1 }
 0x3b0   : > { %v8042_v23 = vadd.f32 %v8041_v48, %v8040_v30 }
 0x3b2   : > { %v8005_v63 = vpop.f32.mrb[18].mxu0 }
 0x3b3   : > { %v8006_v20 = vpop.f32.mrb[19].mxu0 }
 0x3b4   : > { %v8007_v3 = vadd.f32 %v8006_v20, %v8005_v63 }
 0x3b6   : > { %v6153_v31 = vadd.f32 %v8007_v3, %v6015_v17 }
 0x3b8   : > { %v6261_v52 = vadd.f32 %v8042_v23, %v6153_v31 }
 0x3cf   : > { %v8110_v55 = vpop.f32.mrb[20].mxu1 }
 0x3d0   : > { %v8111_v15 = vpop.f32.mrb[21].mxu1 }
 0x3d1   : > { %v8112_v27 = vadd.f32 %v8111_v15, %v8110_v55 }
 0x3d2   : > { %v8075_v36 = vpop.f32.mrb[20].mxu0 }
 0x3d3   : > { %v8076_v46 = vpop.f32.mrb[21].mxu0 }
 0x3d4   : > { %v8077_v32 = vadd.f32 %v8076_v46, %v8075_v36 }
 0x3d6   : > { %v6429_v43 = vadd.f32 %v8077_v32, %v6261_v52 }
 0x3d8   : > { %v6533_v58 = vadd.f32 %v8112_v27, %v6429_v43 }
 0x3f1   : > { %v8180_v38 = vpop.f32.mrb[22].mxu1 }
 0x3f2   : > { %v8181_v16 = vpop.f32.mrb[23].mxu1 }
 0x3f3   : > { %v8182_v53 = vadd.f32 %v8181_v16, %v8180_v38 }
 0x3f6   : > { %v8145_v54 = vpop.f32.mrb[22].mxu0 }
 0x3f7   : > { %v8146_v8 = vpop.f32.mrb[23].mxu0 }
 0x3f8   : > { %v8147_v21 = vadd.f32 %v8146_v8, %v8145_v54 }
 0x3fa   : > { %v6645_v29 = vadd.f32 %v8147_v21, %v6533_v58 }
 0x3fc   : > { %v6877_v13 = vadd.f32 %v8182_v53, %v6645_v29 }
 0x411   : > { %v8250_v60 = vpop.f32.mrb[24].mxu1 }
 0x412   : > { %v8251_v33 = vpop.f32.mrb[25].mxu1 }
 0x413   : > { %v8252_v35 = vadd.f32 %v8251_v33, %v8250_v60 }
 0x416   : > { %v8215_v24 = vpop.f32.mrb[24].mxu0 }
 0x417   : > { %v8216_v4 = vpop.f32.mrb[25].mxu0 }
 0x418   : > { %v8217_v39 = vadd.f32 %v8216_v4, %v8215_v24 }
 0x41a   : > { %v7015_v26 = vadd.f32 %v8217_v39, %v6877_v13 }
 0x41c   : > { %v7123_v25 = vadd.f32 %v8252_v35, %v7015_v26 }
 0x431   : > { %v8320_v14 = vpop.f32.mrb[26].mxu1 }
 0x432   : > { %v8321_v34 = vpop.f32.mrb[27].mxu1 }
 0x433   : > { %v8322_v6 = vadd.f32 %v8321_v34, %v8320_v14 }
 0x436   : > { %v8285_v45 = vpop.f32.mrb[26].mxu0 }
 0x437   : > { %v8286_v59 = vpop.f32.mrb[27].mxu0 }
 0x438   : > { %v8287_v61 = vadd.f32 %v8286_v59, %v8285_v45 }
 0x43a   : > { %v7291_v0 = vadd.f32 %v8287_v61, %v7123_v25 }
 0x43c   : > { %v7395_v57 = vadd.f32 %v8322_v6, %v7291_v0 }
 0x43e   : > { %7399 = vst.msk [vmem:[%s216_s26] sm:$0xff] %vm7398_vm0, %v7395_v57 }
 0x43f   : > { %9961 = shalt.err (!%p9958_p3)
}
 0x440   : > { %s9962_s13 = scalar_lea.hbm %s15395_s8, 128  ;;  %s9966_s16 = scalar_lea.hbm %s15442_s5, 256 }
 0x441   : > { %p9963_p4 = scmp.ne.s32.totalorder %s15395_s8, %s9962_s13  ;;  %p9967_p9 = scmp.lt.u32.totalorder %s15395_s8, %s15442_s5 }
 0x442   : > { %p9968_p10 = scmp.lt.u32.totalorder %s9966_s16, %s9962_s13  ;;  %p9970_p12 = scmp.lt.u32.totalorder %s9962_s13, %s15395_s8 }
 0x443   : > { %p9964_p7 = pnand %p9963_p4, %p10085_p5 }
 0x444   : > { %p9969_p11 = por %p9968_p10, %p9967_p9 }
 0x445   : > { %p9965_p8 = pneg %p9964_p7 }
 0x446   : > { %p9971_p13 = por %p9970_p12, %p9969_p11 }
 0x448   : > { %p9972_p0 = pnand %p9971_p13, %p9965_p8 }
 0x44a   : > { %9975 = shalt.err (!%p9972_p0)
}
 0x44b   : > { %9907 = dma.vmem_to_hbm [thread:$0]  (%p10085_p5), %s15397_s27, 128, %s15395_s8, %s7401_s9  }
 0x44c PF: > { %p9913_p1 = scmp.ge.s32.totalorder %s10010_s23, 2  ;;  %s7426_s19 = sand.u32 1, %s9998_s20  }
 0x44d   : > { %s7427_s24 = scalar_lea.sflag [#allocation4], %s7426_s19 }
 0x44e   : > { %p9910_p2 = pnand %p9913_p1, %p10089_p6 }
 0x450   : > { %9993 = dma.done.wait (!%p9910_p2), %s7427_s24, 128  }
 0x451   : > { %9995 = vsyncadd (!%p9910_p2), %s7427_s24, 4294967168  ;;  %p16_p3 = scmp.ge.s32.totalorder %s10072_s25, 4   ;;  %s17444_s20 = smov %s10002_s21 }
 0x452   : > { %s17445_s21 = smov %s10006_s22  ;;  %s17446_s22 = smov %s10083_s28 }
 0x453   : > { %s17447_s23 = smov %s10072_s25  ;;  %18 = sbr.rel (!%p16_p3) target bundleno = 5 (0x5), region = 75 }
 0x45a   :  { %7432 = vsyncpa [#allocation4], 1 }
 0x45b   :  { %7434 = vsyncpa [#allocation4 + $0x1], 1 }

</bundles_post_ra>
